<compile_context>
chip_gen: v5e
topology: v5e:2x2
jax: 0.10.0
libtpu: 0.0.40
codegen_flags: <defaults>
</compile_context>

<pallas_src>
import functools

import numpy as np

import jax
import jax.numpy as jnp
from jax.experimental import pallas as pl
from jax.experimental.pallas import tpu as pltpu


# Static layer geometry (24x24 -> 12x12 -> 6x6 -> 3x3, matching fc1 = 3*3*4M).
_H1 = 24                         # conv1 output spatial (= input spatial)
_FLAT1 = _H1 * _H1               # 576 conv1 output rows (im2col, no garbage)
_WP2, _R2, _FLAT2 = 16, 272, 12 * 16   # layer-2 padded flat layout / live rows
_WP3, _R3, _FLAT3 = 16, 176, 6 * 16    # layer-3 padded flat layout / live rows
_FEAT_ROWS = 16                  # pooled 3x3 features scattered into 16 rows
_CPAD = 128                      # every channel dim padded to one lane tile
_K1 = 32                         # conv1 im2col contraction (25 taps -> pad 32)


# ---------------------------------------------------------------------------
# Pallas kernels
# ---------------------------------------------------------------------------
def _conv_trunk_kernel(slab_ref, w1_ref, b1_ref, s1_ref, t1_ref, p1_ref,
                       w2_ref, b2_ref, s2_ref, t2_ref, p2_ref,
                       w3_ref, b3_ref, s3_ref, t3_ref, p3_ref,
                       o_ref, *, btile):
    """One batch tile: conv1..pool3 fully resident in VMEM / registers.

    slab_ref : (btile, 576, 32) bf16   conv1 im2col patch slab (25 taps + pad)
    w1_ref   : (32, 128)        bf16   conv1 taps folded into K
    w2/w3    : (25, 128, 128)   bf16   one (Cin_pad, Cout_pad) matrix per tap
    b/s/t    : (1, 128)         f32    conv bias / folded BN scale / shift
    p1/p2/p3 : 0/0.25 bf16 selection matrices (avg-pool + re-pad/flatten)
    o_ref    : (btile, 16, 128) bf16   pooled conv3 features (rows 9..15 zero)
    """
    f32, bf16 = jnp.float32, jnp.bfloat16

    # ---- conv1: 25 taps folded into K, one matmul for the whole tile -------
    a1 = slab_ref[...].reshape(btile * _FLAT1, _K1)
    y1 = jnp.dot(a1, w1_ref[...], preferred_element_type=f32)       # (B*576,128)
    y1 = jnp.maximum(y1 + b1_ref[...], 0.0) * s1_ref[...] + t1_ref[...]
    y1 = y1.astype(bf16)

    def conv_taps(xs, w_ref, wp, flat_len):
        # xs: 5 dx-shifted, sublane-aligned bf16 copies of the padded input;
        # accumulate all 25 tap matmuls in registers, store once.
        acc = None
        for dy in range(5):
            base = dy * wp
            for dx in range(5):
                a = xs[dx][base:base + flat_len]
                d = jnp.dot(a, w_ref[dy * 5 + dx], preferred_element_type=f32)
                acc = d if acc is None else acc + d
        return acc

    for b in range(btile):
        y1b = y1[b * _FLAT1:(b + 1) * _FLAT1]                        # (576,128)
        # pool1 + scatter into the layer-2 padded flat layout.
        x2 = jnp.dot(p1_ref[...], y1b, preferred_element_type=f32)   # (272,128)
        x2s = [x2[dx:dx + 4 * _WP2 + _FLAT2].astype(bf16) for dx in range(5)]
        y2 = conv_taps(x2s, w2_ref, _WP2, _FLAT2)                    # (192,128)
        y2 = jnp.maximum(y2 + b2_ref[...], 0.0) * s2_ref[...] + t2_ref[...]
        # pool2 + scatter into the layer-3 padded flat layout.
        x3 = jnp.dot(p2_ref[...], y2.astype(bf16), preferred_element_type=f32)
        x3s = [x3[dx:dx + 4 * _WP3 + _FLAT3].astype(bf16) for dx in range(5)]
        y3 = conv_taps(x3s, w3_ref, _WP3, _FLAT3)                    # (96,128)
        y3 = jnp.maximum(y3 + b3_ref[...], 0.0) * s3_ref[...] + t3_ref[...]
        # pool3 -> (16,128) pooled features (rows 9..15 zero).
        feat = jnp.dot(p3_ref[...], y3.astype(bf16), preferred_element_type=f32)
        o_ref[b] = feat.astype(o_ref.dtype)


def _fc_head_kernel(x_ref, w1_ref, b1_ref, w2_ref, b2_ref, o_ref):
    """Fused fc1 + ReLU + (dropout=identity in eval) + fc2 on a batch tile."""
    h = jnp.dot(x_ref[...].astype(jnp.bfloat16), w1_ref[...],
                preferred_element_type=jnp.float32)
    h = jnp.maximum(h + b1_ref[...], 0.0)
    # TODO(synk): Dropout(0.5) is identity in eval mode; training-mode masking
    # (and train-mode BatchNorm batch statistics) are not implemented.
    y = jnp.dot(h.astype(jnp.bfloat16), w2_ref[...],
                preferred_element_type=jnp.float32)
    o_ref[...] = (y + b2_ref[...]).astype(o_ref.dtype)


# ---------------------------------------------------------------------------
# pallas_call wrappers
# ---------------------------------------------------------------------------
def _const_spec(arr):
    """Grid-invariant (weight / pool matrix) BlockSpec: whole array, block 0."""
    return pl.BlockSpec(arr.shape, lambda n, _nd=arr.ndim: (0,) * _nd)


def conv_trunk(slab, consts, *, btile):
    """slab: (N, 576, 32) bf16 -> pooled conv3 features (N, 16, 128) bf16."""
    N = slab.shape[0]
    n_tiles = pl.cdiv(N, btile)
    npad = n_tiles * btile
    if npad != N:
        slab = jnp.pad(slab, ((0, npad - N), (0, 0), (0, 0)))
    kernel = functools.partial(_conv_trunk_kernel, btile=btile)
    out = pl.pallas_call(
        kernel,
        out_shape=jax.ShapeDtypeStruct((npad, _FEAT_ROWS, _CPAD), jnp.bfloat16),
        grid=(n_tiles,),
        in_specs=[pl.BlockSpec((btile, _FLAT1, _K1), lambda n: (n, 0, 0))]
                 + [_const_spec(c) for c in consts],
        out_specs=pl.BlockSpec((btile, _FEAT_ROWS, _CPAD), lambda n: (n, 0, 0)),
        compiler_params=pltpu.CompilerParams(
            dimension_semantics=("parallel",)),
    )(slab, *consts)
    return out[:N]


def fc_head(x2, w1, b1, w2, b2):
    """x2: (N, 2048) bf16 -> logits (N, 10) f32 via fused fc1+relu+fc2."""
    N, K = x2.shape
    TB = N if N <= 128 else 128
    n_tiles = pl.cdiv(N, TB)
    npad = n_tiles * TB
    if npad != N:
        x2 = jnp.pad(x2, ((0, npad - N), (0, 0)))
    out = pl.pallas_call(
        _fc_head_kernel,
        out_shape=jax.ShapeDtypeStruct((npad, w2.shape[1]), jnp.float32),
        grid=(n_tiles,),
        in_specs=[pl.BlockSpec((TB, K), lambda i: (i, 0)),
                  _const_spec(w1), _const_spec(b1),
                  _const_spec(w2), _const_spec(b2)],
        out_specs=pl.BlockSpec((TB, w2.shape[1]), lambda i: (i, 0)),
        compiler_params=pltpu.CompilerParams(
            dimension_semantics=("parallel",)),
    )(x2, w1, b1, w2, b2)
    return out[:N, :10]


# ---------------------------------------------------------------------------
# One-time parameter preparation (layout folding / padding, plain JAX + numpy)
# ---------------------------------------------------------------------------
def _pad_vec(v, n):
    return jnp.pad(v, (0, n - v.shape[0])).reshape(1, n).astype(jnp.float32)


def _make_pool_matrix(h, w, w_in, out_rows, w_out, pad_off):
    """0/0.25 selection matrix: flat conv activations (row stride w_in, real
    (h, w) image) -> 2x2 avg-pooled values scattered at flat output row
    (i + pad_off) * w_out + (j + pad_off).  Zero rows give exact zero padding
    for the next layer's flat shifted-window conv."""
    S = np.zeros((out_rows, h * w_in), np.float32)
    for i in range(h // 2):
        for j in range(w // 2):
            r = (i + pad_off) * w_out + (j + pad_off)
            for py in (0, 1):
                for px in (0, 1):
                    S[r, (2 * i + py) * w_in + (2 * j + px)] = 0.25
    return jnp.asarray(S, dtype=jnp.bfloat16)


def prepare_params(p, M, eps=1e-5):
    """Fold BN (eval) to scale/shift, pad channels to 128 lanes, fold conv1
    taps into K, build pool matrices, permute fc1 for the NHWC flatten."""
    prep = {}
    # conv1: Cin = 1 -> fold the 25 taps into the contraction dim.
    w1 = jnp.transpose(p["conv1_w"][:, 0], (1, 2, 0)).reshape(25, M)
    prep["w1"] = jnp.pad(w1, ((0, _K1 - 25), (0, _CPAD - M))).astype(jnp.bfloat16)
    # conv2 / conv3: one (Cin_pad, Cout_pad) matrix per 5x5 tap.
    for idx, cin, cout in ((2, M, 2 * M), (3, 2 * M, 4 * M)):
        w = jnp.transpose(p[f"conv{idx}_w"], (2, 3, 1, 0))        # (5,5,Cin,Cout)
        w = jnp.pad(w, ((0, 0), (0, 0), (0, _CPAD - cin), (0, _CPAD - cout)))
        prep[f"w{idx}"] = w.reshape(25, _CPAD, _CPAD).astype(jnp.bfloat16)
    for idx, cout in ((1, M), (2, 2 * M), (3, 4 * M)):
        prep[f"b{idx}"] = _pad_vec(p[f"conv{idx}_b"], _CPAD)
        s = p[f"bn{idx}_gamma"] / jnp.sqrt(p[f"bn{idx}_var"] + eps)
        t = p[f"bn{idx}_beta"] - p[f"bn{idx}_mean"] * s
        prep[f"s{idx}"] = _pad_vec(s, _CPAD)
        prep[f"t{idx}"] = _pad_vec(t, _CPAD)
    # pool1: 24x24 conv1 output (576 rows) -> layer-2 padded flat (272 rows).
    prep["pool1"] = _make_pool_matrix(24, 24, 24, _R2, _WP2, 2)
    # pool2: 12x12 conv2 output (Wp=16 flat) -> layer-3 padded flat (176 rows).
    prep["pool2"] = _make_pool_matrix(12, 12, _WP2, _R3, _WP3, 2)
    # pool3: 6x6 conv3 output (Wp=16 flat) -> 3x3 features in 16 rows.
    prep["pool3"] = _make_pool_matrix(6, 6, _WP3, _FEAT_ROWS, 3, 0)

    # fc1: torch flattens NCHW (c*9 + h*3 + w); we feed (h*3+w)*128 + c with
    # 16 feature rows (rows 9..15 zero), so permute + pad fc1's columns once.
    C3 = 4 * M
    w1fc = p["fc1_w"].reshape(64, C3, 3, 3)                       # (o, c, h, w)
    w1fc = jnp.transpose(w1fc, (2, 3, 1, 0))                      # (h, w, c, o)
    w1fc = jnp.pad(w1fc, ((0, 0), (0, 0), (0, _CPAD - C3), (0, 128 - 64)))
    w1fc = w1fc.reshape(9, _CPAD, 128)
    w1fc = jnp.pad(w1fc, ((0, _FEAT_ROWS - 9), (0, 0), (0, 0)))
    prep["fc1_w"] = w1fc.reshape(_FEAT_ROWS * _CPAD, 128).astype(jnp.bfloat16)
    prep["fc1_b"] = _pad_vec(p["fc1_b"], 128)
    w2fc = jnp.pad(jnp.transpose(p["fc2_w"]), ((0, 128 - 64), (0, 128 - 10)))
    prep["fc2_w"] = w2fc.astype(jnp.bfloat16)
    prep["fc2_b"] = _pad_vec(p["fc2_b"], 128)
    return prep


# ---------------------------------------------------------------------------
# Model
# ---------------------------------------------------------------------------
def init_params(key, M):
    """Torch-layout parameters (Conv2d OIHW, Linear (out,in), BN eval stats)."""
    keys = iter(jax.random.split(key, 32))

    def nrm(shape, scale=0.1):
        return (scale * jax.random.normal(next(keys), shape)).astype(jnp.float32)

    p = {}
    for idx, (cin, cout) in enumerate([(1, M), (M, 2 * M), (2 * M, 4 * M)], 1):
        p[f"conv{idx}_w"] = nrm((cout, cin, 5, 5))
        p[f"conv{idx}_b"] = nrm((cout,))
        p[f"bn{idx}_gamma"] = 1.0 + nrm((cout,))
        p[f"bn{idx}_beta"] = nrm((cout,))
        p[f"bn{idx}_mean"] = nrm((cout,))
        p[f"bn{idx}_var"] = 1.0 + jnp.abs(nrm((cout,)))
    p["fc1_w"] = nrm((64, 3 * 3 * 4 * M))
    p["fc1_b"] = nrm((64,))
    p["fc2_w"] = nrm((10, 64))
    p["fc2_b"] = nrm((10,))
    return p


def mnist_cnn_forward(x_nchw, prep):
    """Matches torch: 3 x [conv5x5 -> relu -> bn -> avgpool2x2] -> fc1 -> relu
    -> (dropout, identity in eval) -> fc2.  Input: NCHW (bs, 1, 24, 24)."""
    N, C, H, W = x_nchw.shape
    assert C == 1 and H == 24 and W == 24
    # conv1 im2col patch slab (cheap: one real input channel, 25 taps -> K=32).
    xp = jnp.pad(x_nchw[:, 0].astype(jnp.float32), ((0, 0), (2, 2), (2, 2)))
    slab = jnp.stack([xp[:, dy:dy + H, dx:dx + W]
                      for dy in range(5) for dx in range(5)], axis=-1)
    slab = slab.reshape(N, _FLAT1, 25)
    slab = jnp.pad(slab, ((0, 0), (0, 0), (0, _K1 - 25))).astype(jnp.bfloat16)

    # Batch tile: amortize per-grid-step overhead, keep >= 2 grid steps when
    # possible so both v7x TensorCores get balanced work.
    btile = max(1, min(4, N // 2))
    consts = [prep["w1"], prep["b1"], prep["s1"], prep["t1"], prep["pool1"],
              prep["w2"], prep["b2"], prep["s2"], prep["t2"], prep["pool2"],
              prep["w3"], prep["b3"], prep["s3"], prep["t3"], prep["pool3"]]
    feats = conv_trunk(slab, consts, btile=btile)          # (N, 16, 128) bf16
    feats = feats.reshape(N, _FEAT_ROWS * _CPAD)           # fc1_w pre-permuted
    return fc_head(feats, prep["fc1_w"], prep["fc1_b"],
                   prep["fc2_w"], prep["fc2_b"])


if __name__ == "__main__":
    M = 8                        # small num_features (module default is 32)
    bs, H, W = 2, 24, 24         # 24 -> 12 -> 6 -> 3, matching fc1 in = 3*3*4*M

    key = jax.random.PRNGKey(0)
    k_x, k_p = jax.random.split(key)
    x = jax.random.normal(k_x, (bs, 1, H, W), dtype=jnp.float32)  # NCHW input
    params = init_params(k_p, M)
    prep = prepare_params(params, M)

    fwd = jax.jit(mnist_cnn_forward)
    out = jax.block_until_ready(fwd(x, prep))
    assert out.shape == (bs, 10) and out.dtype == jnp.float32
    print("KERNEL_OK")
</pallas_src>

<mosaic_0001>
module attributes {stable_mosaic.version = 11 : i64} {
  func.func @_conv_trunk_kernel(%arg0: i32, %arg1: memref<1x576x32xbf16, #tpu.memory_space<vmem>>, %arg2: memref<32x128xbf16, #tpu.memory_space<vmem>>, %arg3: memref<1x128xf32, #tpu.memory_space<vmem>>, %arg4: memref<1x128xf32, #tpu.memory_space<vmem>>, %arg5: memref<1x128xf32, #tpu.memory_space<vmem>>, %arg6: memref<272x576xbf16, #tpu.memory_space<vmem>>, %arg7: memref<25x128x128xbf16, #tpu.memory_space<vmem>>, %arg8: memref<1x128xf32, #tpu.memory_space<vmem>>, %arg9: memref<1x128xf32, #tpu.memory_space<vmem>>, %arg10: memref<1x128xf32, #tpu.memory_space<vmem>>, %arg11: memref<176x192xbf16, #tpu.memory_space<vmem>>, %arg12: memref<25x128x128xbf16, #tpu.memory_space<vmem>>, %arg13: memref<1x128xf32, #tpu.memory_space<vmem>>, %arg14: memref<1x128xf32, #tpu.memory_space<vmem>>, %arg15: memref<1x128xf32, #tpu.memory_space<vmem>>, %arg16: memref<16x96xbf16, #tpu.memory_space<vmem>>, %arg17: memref<1x16x128xbf16, #tpu.memory_space<vmem>>) attributes {dimension_semantics = [#tpu.dimension_semantics<parallel>], iteration_bounds = array<i64: 2>, scalar_prefetch = 0 : i64, scratch_operands = 0 : i64, tpu.core_type = #tpu.core_type<tc>, window_params = [{transform_indices = @transform_0, window_bounds = array<i64: 1, 576, 32>}, {pipeline_mode = #tpu.pipeline_mode<synchronous>, transform_indices = @transform_1, window_bounds = array<i64: 32, 128>}, {pipeline_mode = #tpu.pipeline_mode<synchronous>, transform_indices = @transform_2, window_bounds = array<i64: 1, 128>}, {pipeline_mode = #tpu.pipeline_mode<synchronous>, transform_indices = @transform_3, window_bounds = array<i64: 1, 128>}, {pipeline_mode = #tpu.pipeline_mode<synchronous>, transform_indices = @transform_4, window_bounds = array<i64: 1, 128>}, {pipeline_mode = #tpu.pipeline_mode<synchronous>, transform_indices = @transform_5, window_bounds = array<i64: 272, 576>}, {pipeline_mode = #tpu.pipeline_mode<synchronous>, transform_indices = @transform_6, window_bounds = array<i64: 25, 128, 128>}, {pipeline_mode = #tpu.pipeline_mode<synchronous>, transform_indices = @transform_7, window_bounds = array<i64: 1, 128>}, {pipeline_mode = #tpu.pipeline_mode<synchronous>, transform_indices = @transform_8, window_bounds = array<i64: 1, 128>}, {pipeline_mode = #tpu.pipeline_mode<synchronous>, transform_indices = @transform_9, window_bounds = array<i64: 1, 128>}, {pipeline_mode = #tpu.pipeline_mode<synchronous>, transform_indices = @transform_10, window_bounds = array<i64: 176, 192>}, {pipeline_mode = #tpu.pipeline_mode<synchronous>, transform_indices = @transform_11, window_bounds = array<i64: 25, 128, 128>}, {pipeline_mode = #tpu.pipeline_mode<synchronous>, transform_indices = @transform_12, window_bounds = array<i64: 1, 128>}, {pipeline_mode = #tpu.pipeline_mode<synchronous>, transform_indices = @transform_13, window_bounds = array<i64: 1, 128>}, {pipeline_mode = #tpu.pipeline_mode<synchronous>, transform_indices = @transform_14, window_bounds = array<i64: 1, 128>}, {pipeline_mode = #tpu.pipeline_mode<synchronous>, transform_indices = @transform_15, window_bounds = array<i64: 16, 96>}, {transform_indices = @transform_16, window_bounds = array<i64: 1, 16, 128>}]} {
    %c0 = arith.constant 0 : index
    %c0_0 = arith.constant 0 : index
    %c0_1 = arith.constant 0 : index
    %0 = vector.load %arg1[%c0, %c0_0, %c0_1] : memref<1x576x32xbf16, #tpu.memory_space<vmem>>, vector<1x576x32xbf16>
    %1 = vector.shape_cast %0 : vector<1x576x32xbf16> to vector<576x32xbf16>
    %c0_2 = arith.constant 0 : index
    %c0_3 = arith.constant 0 : index
    %2 = vector.load %arg2[%c0_2, %c0_3] : memref<32x128xbf16, #tpu.memory_space<vmem>>, vector<32x128xbf16>
    %cst = arith.constant dense<0.000000e+00> : vector<576x128xf32>
    %3 = tpu.matmul %1, %2, %cst {dimension_numbers = #tpu.dot_dimension_numbers<[1], [0], [0], [1], [0, 0, 1, 1], [], []>} : vector<576x32xbf16>, vector<32x128xbf16>, vector<576x128xf32> -> vector<576x128xf32>
    %c0_4 = arith.constant 0 : index
    %c0_5 = arith.constant 0 : index
    %4 = vector.load %arg3[%c0_4, %c0_5] : memref<1x128xf32, #tpu.memory_space<vmem>>, vector<1x128xf32>
    %5 = vector.broadcast %4 : vector<1x128xf32> to vector<576x128xf32>
    %6 = arith.addf %3, %5 : vector<576x128xf32>
    %cst_6 = arith.constant 0.000000e+00 : f32
    %7 = vector.broadcast %cst_6 : f32 to vector<576x128xf32>
    %8 = arith.maximumf %6, %7 : vector<576x128xf32>
    %c0_7 = arith.constant 0 : index
    %c0_8 = arith.constant 0 : index
    %9 = vector.load %arg4[%c0_7, %c0_8] : memref<1x128xf32, #tpu.memory_space<vmem>>, vector<1x128xf32>
    %10 = vector.broadcast %9 : vector<1x128xf32> to vector<576x128xf32>
    %11 = arith.mulf %8, %10 : vector<576x128xf32>
    %c0_9 = arith.constant 0 : index
    %c0_10 = arith.constant 0 : index
    %12 = vector.load %arg5[%c0_9, %c0_10] : memref<1x128xf32, #tpu.memory_space<vmem>>, vector<1x128xf32>
    %13 = vector.broadcast %12 : vector<1x128xf32> to vector<576x128xf32>
    %14 = arith.addf %11, %13 : vector<576x128xf32>
    %15 = arith.truncf %14 : vector<576x128xf32> to vector<576x128xbf16>
    %c0_11 = arith.constant 0 : index
    %c0_12 = arith.constant 0 : index
    %16 = vector.load %arg6[%c0_11, %c0_12] : memref<272x576xbf16, #tpu.memory_space<vmem>>, vector<272x576xbf16>
    %cst_13 = arith.constant dense<0.000000e+00> : vector<272x128xf32>
    %17 = tpu.matmul %16, %15, %cst_13 {dimension_numbers = #tpu.dot_dimension_numbers<[1], [0], [0], [1], [0, 0, 1, 1], [], []>} : vector<272x576xbf16>, vector<576x128xbf16>, vector<272x128xf32> -> vector<272x128xf32>
    %18 = vector.extract_strided_slice %17 {offsets = [0, 0], sizes = [256, 128], strides = [1, 1]} : vector<272x128xf32> to vector<256x128xf32>
    %19 = arith.truncf %18 : vector<256x128xf32> to vector<256x128xbf16>
    %20 = vector.extract_strided_slice %17 {offsets = [1, 0], sizes = [256, 128], strides = [1, 1]} : vector<272x128xf32> to vector<256x128xf32>
    %21 = arith.truncf %20 : vector<256x128xf32> to vector<256x128xbf16>
    %22 = vector.extract_strided_slice %17 {offsets = [2, 0], sizes = [256, 128], strides = [1, 1]} : vector<272x128xf32> to vector<256x128xf32>
    %23 = arith.truncf %22 : vector<256x128xf32> to vector<256x128xbf16>
    %24 = vector.extract_strided_slice %17 {offsets = [3, 0], sizes = [256, 128], strides = [1, 1]} : vector<272x128xf32> to vector<256x128xf32>
    %25 = arith.truncf %24 : vector<256x128xf32> to vector<256x128xbf16>
    %26 = vector.extract_strided_slice %17 {offsets = [4, 0], sizes = [256, 128], strides = [1, 1]} : vector<272x128xf32> to vector<256x128xf32>
    %27 = arith.truncf %26 : vector<256x128xf32> to vector<256x128xbf16>
    %28 = vector.extract_strided_slice %19 {offsets = [0, 0], sizes = [192, 128], strides = [1, 1]} : vector<256x128xbf16> to vector<192x128xbf16>
    %c0_14 = arith.constant 0 : index
    %c0_15 = arith.constant 0 : index
    %c0_16 = arith.constant 0 : index
    %29 = vector.load %arg7[%c0_14, %c0_15, %c0_16] : memref<25x128x128xbf16, #tpu.memory_space<vmem>>, vector<1x128x128xbf16>
    %30 = vector.shape_cast %29 : vector<1x128x128xbf16> to vector<128x128xbf16>
    %cst_17 = arith.constant dense<0.000000e+00> : vector<192x128xf32>
    %31 = tpu.matmul %28, %30, %cst_17 {dimension_numbers = #tpu.dot_dimension_numbers<[1], [0], [0], [1], [0, 0, 1, 1], [], []>} : vector<192x128xbf16>, vector<128x128xbf16>, vector<192x128xf32> -> vector<192x128xf32>
    %32 = vector.extract_strided_slice %21 {offsets = [0, 0], sizes = [192, 128], strides = [1, 1]} : vector<256x128xbf16> to vector<192x128xbf16>
    %c1 = arith.constant 1 : index
    %c0_18 = arith.constant 0 : index
    %c0_19 = arith.constant 0 : index
    %33 = vector.load %arg7[%c1, %c0_18, %c0_19] : memref<25x128x128xbf16, #tpu.memory_space<vmem>>, vector<1x128x128xbf16>
    %34 = vector.shape_cast %33 : vector<1x128x128xbf16> to vector<128x128xbf16>
    %cst_20 = arith.constant dense<0.000000e+00> : vector<192x128xf32>
    %35 = tpu.matmul %32, %34, %cst_20 {dimension_numbers = #tpu.dot_dimension_numbers<[1], [0], [0], [1], [0, 0, 1, 1], [], []>} : vector<192x128xbf16>, vector<128x128xbf16>, vector<192x128xf32> -> vector<192x128xf32>
    %36 = arith.addf %31, %35 : vector<192x128xf32>
    %37 = vector.extract_strided_slice %23 {offsets = [0, 0], sizes = [192, 128], strides = [1, 1]} : vector<256x128xbf16> to vector<192x128xbf16>
    %c2 = arith.constant 2 : index
    %c0_21 = arith.constant 0 : index
    %c0_22 = arith.constant 0 : index
    %38 = vector.load %arg7[%c2, %c0_21, %c0_22] : memref<25x128x128xbf16, #tpu.memory_space<vmem>>, vector<1x128x128xbf16>
    %39 = vector.shape_cast %38 : vector<1x128x128xbf16> to vector<128x128xbf16>
    %cst_23 = arith.constant dense<0.000000e+00> : vector<192x128xf32>
    %40 = tpu.matmul %37, %39, %cst_23 {dimension_numbers = #tpu.dot_dimension_numbers<[1], [0], [0], [1], [0, 0, 1, 1], [], []>} : vector<192x128xbf16>, vector<128x128xbf16>, vector<192x128xf32> -> vector<192x128xf32>
    %41 = arith.addf %36, %40 : vector<192x128xf32>
    %42 = vector.extract_strided_slice %25 {offsets = [0, 0], sizes = [192, 128], strides = [1, 1]} : vector<256x128xbf16> to vector<192x128xbf16>
    %c3 = arith.constant 3 : index
    %c0_24 = arith.constant 0 : index
    %c0_25 = arith.constant 0 : index
    %43 = vector.load %arg7[%c3, %c0_24, %c0_25] : memref<25x128x128xbf16, #tpu.memory_space<vmem>>, vector<1x128x128xbf16>
    %44 = vector.shape_cast %43 : vector<1x128x128xbf16> to vector<128x128xbf16>
    %cst_26 = arith.constant dense<0.000000e+00> : vector<192x128xf32>
    %45 = tpu.matmul %42, %44, %cst_26 {dimension_numbers = #tpu.dot_dimension_numbers<[1], [0], [0], [1], [0, 0, 1, 1], [], []>} : vector<192x128xbf16>, vector<128x128xbf16>, vector<192x128xf32> -> vector<192x128xf32>
    %46 = arith.addf %41, %45 : vector<192x128xf32>
    %47 = vector.extract_strided_slice %27 {offsets = [0, 0], sizes = [192, 128], strides = [1, 1]} : vector<256x128xbf16> to vector<192x128xbf16>
    %c4 = arith.constant 4 : index
    %c0_27 = arith.constant 0 : index
    %c0_28 = arith.constant 0 : index
    %48 = vector.load %arg7[%c4, %c0_27, %c0_28] : memref<25x128x128xbf16, #tpu.memory_space<vmem>>, vector<1x128x128xbf16>
    %49 = vector.shape_cast %48 : vector<1x128x128xbf16> to vector<128x128xbf16>
    %cst_29 = arith.constant dense<0.000000e+00> : vector<192x128xf32>
    %50 = tpu.matmul %47, %49, %cst_29 {dimension_numbers = #tpu.dot_dimension_numbers<[1], [0], [0], [1], [0, 0, 1, 1], [], []>} : vector<192x128xbf16>, vector<128x128xbf16>, vector<192x128xf32> -> vector<192x128xf32>
    %51 = arith.addf %46, %50 : vector<192x128xf32>
    %52 = vector.extract_strided_slice %19 {offsets = [16, 0], sizes = [192, 128], strides = [1, 1]} : vector<256x128xbf16> to vector<192x128xbf16>
    %c5 = arith.constant 5 : index
    %c0_30 = arith.constant 0 : index
    %c0_31 = arith.constant 0 : index
    %53 = vector.load %arg7[%c5, %c0_30, %c0_31] : memref<25x128x128xbf16, #tpu.memory_space<vmem>>, vector<1x128x128xbf16>
    %54 = vector.shape_cast %53 : vector<1x128x128xbf16> to vector<128x128xbf16>
    %cst_32 = arith.constant dense<0.000000e+00> : vector<192x128xf32>
    %55 = tpu.matmul %52, %54, %cst_32 {dimension_numbers = #tpu.dot_dimension_numbers<[1], [0], [0], [1], [0, 0, 1, 1], [], []>} : vector<192x128xbf16>, vector<128x128xbf16>, vector<192x128xf32> -> vector<192x128xf32>
    %56 = arith.addf %51, %55 : vector<192x128xf32>
    %57 = vector.extract_strided_slice %21 {offsets = [16, 0], sizes = [192, 128], strides = [1, 1]} : vector<256x128xbf16> to vector<192x128xbf16>
    %c6 = arith.constant 6 : index
    %c0_33 = arith.constant 0 : index
    %c0_34 = arith.constant 0 : index
    %58 = vector.load %arg7[%c6, %c0_33, %c0_34] : memref<25x128x128xbf16, #tpu.memory_space<vmem>>, vector<1x128x128xbf16>
    %59 = vector.shape_cast %58 : vector<1x128x128xbf16> to vector<128x128xbf16>
    %cst_35 = arith.constant dense<0.000000e+00> : vector<192x128xf32>
    %60 = tpu.matmul %57, %59, %cst_35 {dimension_numbers = #tpu.dot_dimension_numbers<[1], [0], [0], [1], [0, 0, 1, 1], [], []>} : vector<192x128xbf16>, vector<128x128xbf16>, vector<192x128xf32> -> vector<192x128xf32>
    %61 = arith.addf %56, %60 : vector<192x128xf32>
    %62 = vector.extract_strided_slice %23 {offsets = [16, 0], sizes = [192, 128], strides = [1, 1]} : vector<256x128xbf16> to vector<192x128xbf16>
    %c7 = arith.constant 7 : index
    %c0_36 = arith.constant 0 : index
    %c0_37 = arith.constant 0 : index
    %63 = vector.load %arg7[%c7, %c0_36, %c0_37] : memref<25x128x128xbf16, #tpu.memory_space<vmem>>, vector<1x128x128xbf16>
    %64 = vector.shape_cast %63 : vector<1x128x128xbf16> to vector<128x128xbf16>
    %cst_38 = arith.constant dense<0.000000e+00> : vector<192x128xf32>
    %65 = tpu.matmul %62, %64, %cst_38 {dimension_numbers = #tpu.dot_dimension_numbers<[1], [0], [0], [1], [0, 0, 1, 1], [], []>} : vector<192x128xbf16>, vector<128x128xbf16>, vector<192x128xf32> -> vector<192x128xf32>
    %66 = arith.addf %61, %65 : vector<192x128xf32>
    %67 = vector.extract_strided_slice %25 {offsets = [16, 0], sizes = [192, 128], strides = [1, 1]} : vector<256x128xbf16> to vector<192x128xbf16>
    %c8 = arith.constant 8 : index
    %c0_39 = arith.constant 0 : index
    %c0_40 = arith.constant 0 : index
    %68 = vector.load %arg7[%c8, %c0_39, %c0_40] : memref<25x128x128xbf16, #tpu.memory_space<vmem>>, vector<1x128x128xbf16>
    %69 = vector.shape_cast %68 : vector<1x128x128xbf16> to vector<128x128xbf16>
    %cst_41 = arith.constant dense<0.000000e+00> : vector<192x128xf32>
    %70 = tpu.matmul %67, %69, %cst_41 {dimension_numbers = #tpu.dot_dimension_numbers<[1], [0], [0], [1], [0, 0, 1, 1], [], []>} : vector<192x128xbf16>, vector<128x128xbf16>, vector<192x128xf32> -> vector<192x128xf32>
    %71 = arith.addf %66, %70 : vector<192x128xf32>
    %72 = vector.extract_strided_slice %27 {offsets = [16, 0], sizes = [192, 128], strides = [1, 1]} : vector<256x128xbf16> to vector<192x128xbf16>
    %c9 = arith.constant 9 : index
    %c0_42 = arith.constant 0 : index
    %c0_43 = arith.constant 0 : index
    %73 = vector.load %arg7[%c9, %c0_42, %c0_43] : memref<25x128x128xbf16, #tpu.memory_space<vmem>>, vector<1x128x128xbf16>
    %74 = vector.shape_cast %73 : vector<1x128x128xbf16> to vector<128x128xbf16>
    %cst_44 = arith.constant dense<0.000000e+00> : vector<192x128xf32>
    %75 = tpu.matmul %72, %74, %cst_44 {dimension_numbers = #tpu.dot_dimension_numbers<[1], [0], [0], [1], [0, 0, 1, 1], [], []>} : vector<192x128xbf16>, vector<128x128xbf16>, vector<192x128xf32> -> vector<192x128xf32>
    %76 = arith.addf %71, %75 : vector<192x128xf32>
    %77 = vector.extract_strided_slice %19 {offsets = [32, 0], sizes = [192, 128], strides = [1, 1]} : vector<256x128xbf16> to vector<192x128xbf16>
    %c10 = arith.constant 10 : index
    %c0_45 = arith.constant 0 : index
    %c0_46 = arith.constant 0 : index
    %78 = vector.load %arg7[%c10, %c0_45, %c0_46] : memref<25x128x128xbf16, #tpu.memory_space<vmem>>, vector<1x128x128xbf16>
    %79 = vector.shape_cast %78 : vector<1x128x128xbf16> to vector<128x128xbf16>
    %cst_47 = arith.constant dense<0.000000e+00> : vector<192x128xf32>
    %80 = tpu.matmul %77, %79, %cst_47 {dimension_numbers = #tpu.dot_dimension_numbers<[1], [0], [0], [1], [0, 0, 1, 1], [], []>} : vector<192x128xbf16>, vector<128x128xbf16>, vector<192x128xf32> -> vector<192x128xf32>
    %81 = arith.addf %76, %80 : vector<192x128xf32>
    %82 = vector.extract_strided_slice %21 {offsets = [32, 0], sizes = [192, 128], strides = [1, 1]} : vector<256x128xbf16> to vector<192x128xbf16>
    %c11 = arith.constant 11 : index
    %c0_48 = arith.constant 0 : index
    %c0_49 = arith.constant 0 : index
    %83 = vector.load %arg7[%c11, %c0_48, %c0_49] : memref<25x128x128xbf16, #tpu.memory_space<vmem>>, vector<1x128x128xbf16>
    %84 = vector.shape_cast %83 : vector<1x128x128xbf16> to vector<128x128xbf16>
    %cst_50 = arith.constant dense<0.000000e+00> : vector<192x128xf32>
    %85 = tpu.matmul %82, %84, %cst_50 {dimension_numbers = #tpu.dot_dimension_numbers<[1], [0], [0], [1], [0, 0, 1, 1], [], []>} : vector<192x128xbf16>, vector<128x128xbf16>, vector<192x128xf32> -> vector<192x128xf32>
    %86 = arith.addf %81, %85 : vector<192x128xf32>
    %87 = vector.extract_strided_slice %23 {offsets = [32, 0], sizes = [192, 128], strides = [1, 1]} : vector<256x128xbf16> to vector<192x128xbf16>
    %c12 = arith.constant 12 : index
    %c0_51 = arith.constant 0 : index
    %c0_52 = arith.constant 0 : index
    %88 = vector.load %arg7[%c12, %c0_51, %c0_52] : memref<25x128x128xbf16, #tpu.memory_space<vmem>>, vector<1x128x128xbf16>
    %89 = vector.shape_cast %88 : vector<1x128x128xbf16> to vector<128x128xbf16>
    %cst_53 = arith.constant dense<0.000000e+00> : vector<192x128xf32>
    %90 = tpu.matmul %87, %89, %cst_53 {dimension_numbers = #tpu.dot_dimension_numbers<[1], [0], [0], [1], [0, 0, 1, 1], [], []>} : vector<192x128xbf16>, vector<128x128xbf16>, vector<192x128xf32> -> vector<192x128xf32>
    %91 = arith.addf %86, %90 : vector<192x128xf32>
    %92 = vector.extract_strided_slice %25 {offsets = [32, 0], sizes = [192, 128], strides = [1, 1]} : vector<256x128xbf16> to vector<192x128xbf16>
    %c13 = arith.constant 13 : index
    %c0_54 = arith.constant 0 : index
    %c0_55 = arith.constant 0 : index
    %93 = vector.load %arg7[%c13, %c0_54, %c0_55] : memref<25x128x128xbf16, #tpu.memory_space<vmem>>, vector<1x128x128xbf16>
    %94 = vector.shape_cast %93 : vector<1x128x128xbf16> to vector<128x128xbf16>
    %cst_56 = arith.constant dense<0.000000e+00> : vector<192x128xf32>
    %95 = tpu.matmul %92, %94, %cst_56 {dimension_numbers = #tpu.dot_dimension_numbers<[1], [0], [0], [1], [0, 0, 1, 1], [], []>} : vector<192x128xbf16>, vector<128x128xbf16>, vector<192x128xf32> -> vector<192x128xf32>
    %96 = arith.addf %91, %95 : vector<192x128xf32>
    %97 = vector.extract_strided_slice %27 {offsets = [32, 0], sizes = [192, 128], strides = [1, 1]} : vector<256x128xbf16> to vector<192x128xbf16>
    %c14 = arith.constant 14 : index
    %c0_57 = arith.constant 0 : index
    %c0_58 = arith.constant 0 : index
    %98 = vector.load %arg7[%c14, %c0_57, %c0_58] : memref<25x128x128xbf16, #tpu.memory_space<vmem>>, vector<1x128x128xbf16>
    %99 = vector.shape_cast %98 : vector<1x128x128xbf16> to vector<128x128xbf16>
    %cst_59 = arith.constant dense<0.000000e+00> : vector<192x128xf32>
    %100 = tpu.matmul %97, %99, %cst_59 {dimension_numbers = #tpu.dot_dimension_numbers<[1], [0], [0], [1], [0, 0, 1, 1], [], []>} : vector<192x128xbf16>, vector<128x128xbf16>, vector<192x128xf32> -> vector<192x128xf32>
    %101 = arith.addf %96, %100 : vector<192x128xf32>
    %102 = vector.extract_strided_slice %19 {offsets = [48, 0], sizes = [192, 128], strides = [1, 1]} : vector<256x128xbf16> to vector<192x128xbf16>
    %c15 = arith.constant 15 : index
    %c0_60 = arith.constant 0 : index
    %c0_61 = arith.constant 0 : index
    %103 = vector.load %arg7[%c15, %c0_60, %c0_61] : memref<25x128x128xbf16, #tpu.memory_space<vmem>>, vector<1x128x128xbf16>
    %104 = vector.shape_cast %103 : vector<1x128x128xbf16> to vector<128x128xbf16>
    %cst_62 = arith.constant dense<0.000000e+00> : vector<192x128xf32>
    %105 = tpu.matmul %102, %104, %cst_62 {dimension_numbers = #tpu.dot_dimension_numbers<[1], [0], [0], [1], [0, 0, 1, 1], [], []>} : vector<192x128xbf16>, vector<128x128xbf16>, vector<192x128xf32> -> vector<192x128xf32>
    %106 = arith.addf %101, %105 : vector<192x128xf32>
    %107 = vector.extract_strided_slice %21 {offsets = [48, 0], sizes = [192, 128], strides = [1, 1]} : vector<256x128xbf16> to vector<192x128xbf16>
    %c16 = arith.constant 16 : index
    %c0_63 = arith.constant 0 : index
    %c0_64 = arith.constant 0 : index
    %108 = vector.load %arg7[%c16, %c0_63, %c0_64] : memref<25x128x128xbf16, #tpu.memory_space<vmem>>, vector<1x128x128xbf16>
    %109 = vector.shape_cast %108 : vector<1x128x128xbf16> to vector<128x128xbf16>
    %cst_65 = arith.constant dense<0.000000e+00> : vector<192x128xf32>
    %110 = tpu.matmul %107, %109, %cst_65 {dimension_numbers = #tpu.dot_dimension_numbers<[1], [0], [0], [1], [0, 0, 1, 1], [], []>} : vector<192x128xbf16>, vector<128x128xbf16>, vector<192x128xf32> -> vector<192x128xf32>
    %111 = arith.addf %106, %110 : vector<192x128xf32>
    %112 = vector.extract_strided_slice %23 {offsets = [48, 0], sizes = [192, 128], strides = [1, 1]} : vector<256x128xbf16> to vector<192x128xbf16>
    %c17 = arith.constant 17 : index
    %c0_66 = arith.constant 0 : index
    %c0_67 = arith.constant 0 : index
    %113 = vector.load %arg7[%c17, %c0_66, %c0_67] : memref<25x128x128xbf16, #tpu.memory_space<vmem>>, vector<1x128x128xbf16>
    %114 = vector.shape_cast %113 : vector<1x128x128xbf16> to vector<128x128xbf16>
    %cst_68 = arith.constant dense<0.000000e+00> : vector<192x128xf32>
    %115 = tpu.matmul %112, %114, %cst_68 {dimension_numbers = #tpu.dot_dimension_numbers<[1], [0], [0], [1], [0, 0, 1, 1], [], []>} : vector<192x128xbf16>, vector<128x128xbf16>, vector<192x128xf32> -> vector<192x128xf32>
    %116 = arith.addf %111, %115 : vector<192x128xf32>
    %117 = vector.extract_strided_slice %25 {offsets = [48, 0], sizes = [192, 128], strides = [1, 1]} : vector<256x128xbf16> to vector<192x128xbf16>
    %c18 = arith.constant 18 : index
    %c0_69 = arith.constant 0 : index
    %c0_70 = arith.constant 0 : index
    %118 = vector.load %arg7[%c18, %c0_69, %c0_70] : memref<25x128x128xbf16, #tpu.memory_space<vmem>>, vector<1x128x128xbf16>
    %119 = vector.shape_cast %118 : vector<1x128x128xbf16> to vector<128x128xbf16>
    %cst_71 = arith.constant dense<0.000000e+00> : vector<192x128xf32>
    %120 = tpu.matmul %117, %119, %cst_71 {dimension_numbers = #tpu.dot_dimension_numbers<[1], [0], [0], [1], [0, 0, 1, 1], [], []>} : vector<192x128xbf16>, vector<128x128xbf16>, vector<192x128xf32> -> vector<192x128xf32>
    %121 = arith.addf %116, %120 : vector<192x128xf32>
    %122 = vector.extract_strided_slice %27 {offsets = [48, 0], sizes = [192, 128], strides = [1, 1]} : vector<256x128xbf16> to vector<192x128xbf16>
    %c19 = arith.constant 19 : index
    %c0_72 = arith.constant 0 : index
    %c0_73 = arith.constant 0 : index
    %123 = vector.load %arg7[%c19, %c0_72, %c0_73] : memref<25x128x128xbf16, #tpu.memory_space<vmem>>, vector<1x128x128xbf16>
    %124 = vector.shape_cast %123 : vector<1x128x128xbf16> to vector<128x128xbf16>
    %cst_74 = arith.constant dense<0.000000e+00> : vector<192x128xf32>
    %125 = tpu.matmul %122, %124, %cst_74 {dimension_numbers = #tpu.dot_dimension_numbers<[1], [0], [0], [1], [0, 0, 1, 1], [], []>} : vector<192x128xbf16>, vector<128x128xbf16>, vector<192x128xf32> -> vector<192x128xf32>
    %126 = arith.addf %121, %125 : vector<192x128xf32>
    %127 = vector.extract_strided_slice %19 {offsets = [64, 0], sizes = [192, 128], strides = [1, 1]} : vector<256x128xbf16> to vector<192x128xbf16>
    %c20 = arith.constant 20 : index
    %c0_75 = arith.constant 0 : index
    %c0_76 = arith.constant 0 : index
    %128 = vector.load %arg7[%c20, %c0_75, %c0_76] : memref<25x128x128xbf16, #tpu.memory_space<vmem>>, vector<1x128x128xbf16>
    %129 = vector.shape_cast %128 : vector<1x128x128xbf16> to vector<128x128xbf16>
    %cst_77 = arith.constant dense<0.000000e+00> : vector<192x128xf32>
    %130 = tpu.matmul %127, %129, %cst_77 {dimension_numbers = #tpu.dot_dimension_numbers<[1], [0], [0], [1], [0, 0, 1, 1], [], []>} : vector<192x128xbf16>, vector<128x128xbf16>, vector<192x128xf32> -> vector<192x128xf32>
    %131 = arith.addf %126, %130 : vector<192x128xf32>
    %132 = vector.extract_strided_slice %21 {offsets = [64, 0], sizes = [192, 128], strides = [1, 1]} : vector<256x128xbf16> to vector<192x128xbf16>
    %c21 = arith.constant 21 : index
    %c0_78 = arith.constant 0 : index
    %c0_79 = arith.constant 0 : index
    %133 = vector.load %arg7[%c21, %c0_78, %c0_79] : memref<25x128x128xbf16, #tpu.memory_space<vmem>>, vector<1x128x128xbf16>
    %134 = vector.shape_cast %133 : vector<1x128x128xbf16> to vector<128x128xbf16>
    %cst_80 = arith.constant dense<0.000000e+00> : vector<192x128xf32>
    %135 = tpu.matmul %132, %134, %cst_80 {dimension_numbers = #tpu.dot_dimension_numbers<[1], [0], [0], [1], [0, 0, 1, 1], [], []>} : vector<192x128xbf16>, vector<128x128xbf16>, vector<192x128xf32> -> vector<192x128xf32>
    %136 = arith.addf %131, %135 : vector<192x128xf32>
    %137 = vector.extract_strided_slice %23 {offsets = [64, 0], sizes = [192, 128], strides = [1, 1]} : vector<256x128xbf16> to vector<192x128xbf16>
    %c22 = arith.constant 22 : index
    %c0_81 = arith.constant 0 : index
    %c0_82 = arith.constant 0 : index
    %138 = vector.load %arg7[%c22, %c0_81, %c0_82] : memref<25x128x128xbf16, #tpu.memory_space<vmem>>, vector<1x128x128xbf16>
    %139 = vector.shape_cast %138 : vector<1x128x128xbf16> to vector<128x128xbf16>
    %cst_83 = arith.constant dense<0.000000e+00> : vector<192x128xf32>
    %140 = tpu.matmul %137, %139, %cst_83 {dimension_numbers = #tpu.dot_dimension_numbers<[1], [0], [0], [1], [0, 0, 1, 1], [], []>} : vector<192x128xbf16>, vector<128x128xbf16>, vector<192x128xf32> -> vector<192x128xf32>
    %141 = arith.addf %136, %140 : vector<192x128xf32>
    %142 = vector.extract_strided_slice %25 {offsets = [64, 0], sizes = [192, 128], strides = [1, 1]} : vector<256x128xbf16> to vector<192x128xbf16>
    %c23 = arith.constant 23 : index
    %c0_84 = arith.constant 0 : index
    %c0_85 = arith.constant 0 : index
    %143 = vector.load %arg7[%c23, %c0_84, %c0_85] : memref<25x128x128xbf16, #tpu.memory_space<vmem>>, vector<1x128x128xbf16>
    %144 = vector.shape_cast %143 : vector<1x128x128xbf16> to vector<128x128xbf16>
    %cst_86 = arith.constant dense<0.000000e+00> : vector<192x128xf32>
    %145 = tpu.matmul %142, %144, %cst_86 {dimension_numbers = #tpu.dot_dimension_numbers<[1], [0], [0], [1], [0, 0, 1, 1], [], []>} : vector<192x128xbf16>, vector<128x128xbf16>, vector<192x128xf32> -> vector<192x128xf32>
    %146 = arith.addf %141, %145 : vector<192x128xf32>
    %147 = vector.extract_strided_slice %27 {offsets = [64, 0], sizes = [192, 128], strides = [1, 1]} : vector<256x128xbf16> to vector<192x128xbf16>
    %c24 = arith.constant 24 : index
    %c0_87 = arith.constant 0 : index
    %c0_88 = arith.constant 0 : index
    %148 = vector.load %arg7[%c24, %c0_87, %c0_88] : memref<25x128x128xbf16, #tpu.memory_space<vmem>>, vector<1x128x128xbf16>
    %149 = vector.shape_cast %148 : vector<1x128x128xbf16> to vector<128x128xbf16>
    %cst_89 = arith.constant dense<0.000000e+00> : vector<192x128xf32>
    %150 = tpu.matmul %147, %149, %cst_89 {dimension_numbers = #tpu.dot_dimension_numbers<[1], [0], [0], [1], [0, 0, 1, 1], [], []>} : vector<192x128xbf16>, vector<128x128xbf16>, vector<192x128xf32> -> vector<192x128xf32>
    %151 = arith.addf %146, %150 : vector<192x128xf32>
    %c0_90 = arith.constant 0 : index
    %c0_91 = arith.constant 0 : index
    %152 = vector.load %arg8[%c0_90, %c0_91] : memref<1x128xf32, #tpu.memory_space<vmem>>, vector<1x128xf32>
    %153 = vector.broadcast %152 : vector<1x128xf32> to vector<192x128xf32>
    %154 = arith.addf %151, %153 : vector<192x128xf32>
    %cst_92 = arith.constant 0.000000e+00 : f32
    %155 = vector.broadcast %cst_92 : f32 to vector<192x128xf32>
    %156 = arith.maximumf %154, %155 : vector<192x128xf32>
    %c0_93 = arith.constant 0 : index
    %c0_94 = arith.constant 0 : index
    %157 = vector.load %arg9[%c0_93, %c0_94] : memref<1x128xf32, #tpu.memory_space<vmem>>, vector<1x128xf32>
    %158 = vector.broadcast %157 : vector<1x128xf32> to vector<192x128xf32>
    %159 = arith.mulf %156, %158 : vector<192x128xf32>
    %c0_95 = arith.constant 0 : index
    %c0_96 = arith.constant 0 : index
    %160 = vector.load %arg10[%c0_95, %c0_96] : memref<1x128xf32, #tpu.memory_space<vmem>>, vector<1x128xf32>
    %161 = vector.broadcast %160 : vector<1x128xf32> to vector<192x128xf32>
    %162 = arith.addf %159, %161 : vector<192x128xf32>
    %c0_97 = arith.constant 0 : index
    %c0_98 = arith.constant 0 : index
    %163 = vector.load %arg11[%c0_97, %c0_98] : memref<176x192xbf16, #tpu.memory_space<vmem>>, vector<176x192xbf16>
    %164 = arith.truncf %162 : vector<192x128xf32> to vector<192x128xbf16>
    %cst_99 = arith.constant dense<0.000000e+00> : vector<176x128xf32>
    %165 = tpu.matmul %163, %164, %cst_99 {dimension_numbers = #tpu.dot_dimension_numbers<[1], [0], [0], [1], [0, 0, 1, 1], [], []>} : vector<176x192xbf16>, vector<192x128xbf16>, vector<176x128xf32> -> vector<176x128xf32>
    %166 = vector.extract_strided_slice %165 {offsets = [0, 0], sizes = [160, 128], strides = [1, 1]} : vector<176x128xf32> to vector<160x128xf32>
    %167 = arith.truncf %166 : vector<160x128xf32> to vector<160x128xbf16>
    %168 = vector.extract_strided_slice %165 {offsets = [1, 0], sizes = [160, 128], strides = [1, 1]} : vector<176x128xf32> to vector<160x128xf32>
    %169 = arith.truncf %168 : vector<160x128xf32> to vector<160x128xbf16>
    %170 = vector.extract_strided_slice %165 {offsets = [2, 0], sizes = [160, 128], strides = [1, 1]} : vector<176x128xf32> to vector<160x128xf32>
    %171 = arith.truncf %170 : vector<160x128xf32> to vector<160x128xbf16>
    %172 = vector.extract_strided_slice %165 {offsets = [3, 0], sizes = [160, 128], strides = [1, 1]} : vector<176x128xf32> to vector<160x128xf32>
    %173 = arith.truncf %172 : vector<160x128xf32> to vector<160x128xbf16>
    %174 = vector.extract_strided_slice %165 {offsets = [4, 0], sizes = [160, 128], strides = [1, 1]} : vector<176x128xf32> to vector<160x128xf32>
    %175 = arith.truncf %174 : vector<160x128xf32> to vector<160x128xbf16>
    %176 = vector.extract_strided_slice %167 {offsets = [0, 0], sizes = [96, 128], strides = [1, 1]} : vector<160x128xbf16> to vector<96x128xbf16>
    %c0_100 = arith.constant 0 : index
    %c0_101 = arith.constant 0 : index
    %c0_102 = arith.constant 0 : index
    %177 = vector.load %arg12[%c0_100, %c0_101, %c0_102] : memref<25x128x128xbf16, #tpu.memory_space<vmem>>, vector<1x128x128xbf16>
    %178 = vector.shape_cast %177 : vector<1x128x128xbf16> to vector<128x128xbf16>
    %cst_103 = arith.constant dense<0.000000e+00> : vector<96x128xf32>
    %179 = tpu.matmul %176, %178, %cst_103 {dimension_numbers = #tpu.dot_dimension_numbers<[1], [0], [0], [1], [0, 0, 1, 1], [], []>} : vector<96x128xbf16>, vector<128x128xbf16>, vector<96x128xf32> -> vector<96x128xf32>
    %180 = vector.extract_strided_slice %169 {offsets = [0, 0], sizes = [96, 128], strides = [1, 1]} : vector<160x128xbf16> to vector<96x128xbf16>
    %c1_104 = arith.constant 1 : index
    %c0_105 = arith.constant 0 : index
    %c0_106 = arith.constant 0 : index
    %181 = vector.load %arg12[%c1_104, %c0_105, %c0_106] : memref<25x128x128xbf16, #tpu.memory_space<vmem>>, vector<1x128x128xbf16>
    %182 = vector.shape_cast %181 : vector<1x128x128xbf16> to vector<128x128xbf16>
    %cst_107 = arith.constant dense<0.000000e+00> : vector<96x128xf32>
    %183 = tpu.matmul %180, %182, %cst_107 {dimension_numbers = #tpu.dot_dimension_numbers<[1], [0], [0], [1], [0, 0, 1, 1], [], []>} : vector<96x128xbf16>, vector<128x128xbf16>, vector<96x128xf32> -> vector<96x128xf32>
    %184 = arith.addf %179, %183 : vector<96x128xf32>
    %185 = vector.extract_strided_slice %171 {offsets = [0, 0], sizes = [96, 128], strides = [1, 1]} : vector<160x128xbf16> to vector<96x128xbf16>
    %c2_108 = arith.constant 2 : index
    %c0_109 = arith.constant 0 : index
    %c0_110 = arith.constant 0 : index
    %186 = vector.load %arg12[%c2_108, %c0_109, %c0_110] : memref<25x128x128xbf16, #tpu.memory_space<vmem>>, vector<1x128x128xbf16>
    %187 = vector.shape_cast %186 : vector<1x128x128xbf16> to vector<128x128xbf16>
    %cst_111 = arith.constant dense<0.000000e+00> : vector<96x128xf32>
    %188 = tpu.matmul %185, %187, %cst_111 {dimension_numbers = #tpu.dot_dimension_numbers<[1], [0], [0], [1], [0, 0, 1, 1], [], []>} : vector<96x128xbf16>, vector<128x128xbf16>, vector<96x128xf32> -> vector<96x128xf32>
    %189 = arith.addf %184, %188 : vector<96x128xf32>
    %190 = vector.extract_strided_slice %173 {offsets = [0, 0], sizes = [96, 128], strides = [1, 1]} : vector<160x128xbf16> to vector<96x128xbf16>
    %c3_112 = arith.constant 3 : index
    %c0_113 = arith.constant 0 : index
    %c0_114 = arith.constant 0 : index
    %191 = vector.load %arg12[%c3_112, %c0_113, %c0_114] : memref<25x128x128xbf16, #tpu.memory_space<vmem>>, vector<1x128x128xbf16>
    %192 = vector.shape_cast %191 : vector<1x128x128xbf16> to vector<128x128xbf16>
    %cst_115 = arith.constant dense<0.000000e+00> : vector<96x128xf32>
    %193 = tpu.matmul %190, %192, %cst_115 {dimension_numbers = #tpu.dot_dimension_numbers<[1], [0], [0], [1], [0, 0, 1, 1], [], []>} : vector<96x128xbf16>, vector<128x128xbf16>, vector<96x128xf32> -> vector<96x128xf32>
    %194 = arith.addf %189, %193 : vector<96x128xf32>
    %195 = vector.extract_strided_slice %175 {offsets = [0, 0], sizes = [96, 128], strides = [1, 1]} : vector<160x128xbf16> to vector<96x128xbf16>
    %c4_116 = arith.constant 4 : index
    %c0_117 = arith.constant 0 : index
    %c0_118 = arith.constant 0 : index
    %196 = vector.load %arg12[%c4_116, %c0_117, %c0_118] : memref<25x128x128xbf16, #tpu.memory_space<vmem>>, vector<1x128x128xbf16>
    %197 = vector.shape_cast %196 : vector<1x128x128xbf16> to vector<128x128xbf16>
    %cst_119 = arith.constant dense<0.000000e+00> : vector<96x128xf32>
    %198 = tpu.matmul %195, %197, %cst_119 {dimension_numbers = #tpu.dot_dimension_numbers<[1], [0], [0], [1], [0, 0, 1, 1], [], []>} : vector<96x128xbf16>, vector<128x128xbf16>, vector<96x128xf32> -> vector<96x128xf32>
    %199 = arith.addf %194, %198 : vector<96x128xf32>
    %200 = vector.extract_strided_slice %167 {offsets = [16, 0], sizes = [96, 128], strides = [1, 1]} : vector<160x128xbf16> to vector<96x128xbf16>
    %c5_120 = arith.constant 5 : index
    %c0_121 = arith.constant 0 : index
    %c0_122 = arith.constant 0 : index
    %201 = vector.load %arg12[%c5_120, %c0_121, %c0_122] : memref<25x128x128xbf16, #tpu.memory_space<vmem>>, vector<1x128x128xbf16>
    %202 = vector.shape_cast %201 : vector<1x128x128xbf16> to vector<128x128xbf16>
    %cst_123 = arith.constant dense<0.000000e+00> : vector<96x128xf32>
    %203 = tpu.matmul %200, %202, %cst_123 {dimension_numbers = #tpu.dot_dimension_numbers<[1], [0], [0], [1], [0, 0, 1, 1], [], []>} : vector<96x128xbf16>, vector<128x128xbf16>, vector<96x128xf32> -> vector<96x128xf32>
    %204 = arith.addf %199, %203 : vector<96x128xf32>
    %205 = vector.extract_strided_slice %169 {offsets = [16, 0], sizes = [96, 128], strides = [1, 1]} : vector<160x128xbf16> to vector<96x128xbf16>
    %c6_124 = arith.constant 6 : index
    %c0_125 = arith.constant 0 : index
    %c0_126 = arith.constant 0 : index
    %206 = vector.load %arg12[%c6_124, %c0_125, %c0_126] : memref<25x128x128xbf16, #tpu.memory_space<vmem>>, vector<1x128x128xbf16>
    %207 = vector.shape_cast %206 : vector<1x128x128xbf16> to vector<128x128xbf16>
    %cst_127 = arith.constant dense<0.000000e+00> : vector<96x128xf32>
    %208 = tpu.matmul %205, %207, %cst_127 {dimension_numbers = #tpu.dot_dimension_numbers<[1], [0], [0], [1], [0, 0, 1, 1], [], []>} : vector<96x128xbf16>, vector<128x128xbf16>, vector<96x128xf32> -> vector<96x128xf32>
    %209 = arith.addf %204, %208 : vector<96x128xf32>
    %210 = vector.extract_strided_slice %171 {offsets = [16, 0], sizes = [96, 128], strides = [1, 1]} : vector<160x128xbf16> to vector<96x128xbf16>
    %c7_128 = arith.constant 7 : index
    %c0_129 = arith.constant 0 : index
    %c0_130 = arith.constant 0 : index
    %211 = vector.load %arg12[%c7_128, %c0_129, %c0_130] : memref<25x128x128xbf16, #tpu.memory_space<vmem>>, vector<1x128x128xbf16>
    %212 = vector.shape_cast %211 : vector<1x128x128xbf16> to vector<128x128xbf16>
    %cst_131 = arith.constant dense<0.000000e+00> : vector<96x128xf32>
    %213 = tpu.matmul %210, %212, %cst_131 {dimension_numbers = #tpu.dot_dimension_numbers<[1], [0], [0], [1], [0, 0, 1, 1], [], []>} : vector<96x128xbf16>, vector<128x128xbf16>, vector<96x128xf32> -> vector<96x128xf32>
    %214 = arith.addf %209, %213 : vector<96x128xf32>
    %215 = vector.extract_strided_slice %173 {offsets = [16, 0], sizes = [96, 128], strides = [1, 1]} : vector<160x128xbf16> to vector<96x128xbf16>
    %c8_132 = arith.constant 8 : index
    %c0_133 = arith.constant 0 : index
    %c0_134 = arith.constant 0 : index
    %216 = vector.load %arg12[%c8_132, %c0_133, %c0_134] : memref<25x128x128xbf16, #tpu.memory_space<vmem>>, vector<1x128x128xbf16>
    %217 = vector.shape_cast %216 : vector<1x128x128xbf16> to vector<128x128xbf16>
    %cst_135 = arith.constant dense<0.000000e+00> : vector<96x128xf32>
    %218 = tpu.matmul %215, %217, %cst_135 {dimension_numbers = #tpu.dot_dimension_numbers<[1], [0], [0], [1], [0, 0, 1, 1], [], []>} : vector<96x128xbf16>, vector<128x128xbf16>, vector<96x128xf32> -> vector<96x128xf32>
    %219 = arith.addf %214, %218 : vector<96x128xf32>
    %220 = vector.extract_strided_slice %175 {offsets = [16, 0], sizes = [96, 128], strides = [1, 1]} : vector<160x128xbf16> to vector<96x128xbf16>
    %c9_136 = arith.constant 9 : index
    %c0_137 = arith.constant 0 : index
    %c0_138 = arith.constant 0 : index
    %221 = vector.load %arg12[%c9_136, %c0_137, %c0_138] : memref<25x128x128xbf16, #tpu.memory_space<vmem>>, vector<1x128x128xbf16>
    %222 = vector.shape_cast %221 : vector<1x128x128xbf16> to vector<128x128xbf16>
    %cst_139 = arith.constant dense<0.000000e+00> : vector<96x128xf32>
    %223 = tpu.matmul %220, %222, %cst_139 {dimension_numbers = #tpu.dot_dimension_numbers<[1], [0], [0], [1], [0, 0, 1, 1], [], []>} : vector<96x128xbf16>, vector<128x128xbf16>, vector<96x128xf32> -> vector<96x128xf32>
    %224 = arith.addf %219, %223 : vector<96x128xf32>
    %225 = vector.extract_strided_slice %167 {offsets = [32, 0], sizes = [96, 128], strides = [1, 1]} : vector<160x128xbf16> to vector<96x128xbf16>
    %c10_140 = arith.constant 10 : index
    %c0_141 = arith.constant 0 : index
    %c0_142 = arith.constant 0 : index
    %226 = vector.load %arg12[%c10_140, %c0_141, %c0_142] : memref<25x128x128xbf16, #tpu.memory_space<vmem>>, vector<1x128x128xbf16>
    %227 = vector.shape_cast %226 : vector<1x128x128xbf16> to vector<128x128xbf16>
    %cst_143 = arith.constant dense<0.000000e+00> : vector<96x128xf32>
    %228 = tpu.matmul %225, %227, %cst_143 {dimension_numbers = #tpu.dot_dimension_numbers<[1], [0], [0], [1], [0, 0, 1, 1], [], []>} : vector<96x128xbf16>, vector<128x128xbf16>, vector<96x128xf32> -> vector<96x128xf32>
    %229 = arith.addf %224, %228 : vector<96x128xf32>
    %230 = vector.extract_strided_slice %169 {offsets = [32, 0], sizes = [96, 128], strides = [1, 1]} : vector<160x128xbf16> to vector<96x128xbf16>
    %c11_144 = arith.constant 11 : index
    %c0_145 = arith.constant 0 : index
    %c0_146 = arith.constant 0 : index
    %231 = vector.load %arg12[%c11_144, %c0_145, %c0_146] : memref<25x128x128xbf16, #tpu.memory_space<vmem>>, vector<1x128x128xbf16>
    %232 = vector.shape_cast %231 : vector<1x128x128xbf16> to vector<128x128xbf16>
    %cst_147 = arith.constant dense<0.000000e+00> : vector<96x128xf32>
    %233 = tpu.matmul %230, %232, %cst_147 {dimension_numbers = #tpu.dot_dimension_numbers<[1], [0], [0], [1], [0, 0, 1, 1], [], []>} : vector<96x128xbf16>, vector<128x128xbf16>, vector<96x128xf32> -> vector<96x128xf32>
    %234 = arith.addf %229, %233 : vector<96x128xf32>
    %235 = vector.extract_strided_slice %171 {offsets = [32, 0], sizes = [96, 128], strides = [1, 1]} : vector<160x128xbf16> to vector<96x128xbf16>
    %c12_148 = arith.constant 12 : index
    %c0_149 = arith.constant 0 : index
    %c0_150 = arith.constant 0 : index
    %236 = vector.load %arg12[%c12_148, %c0_149, %c0_150] : memref<25x128x128xbf16, #tpu.memory_space<vmem>>, vector<1x128x128xbf16>
    %237 = vector.shape_cast %236 : vector<1x128x128xbf16> to vector<128x128xbf16>
    %cst_151 = arith.constant dense<0.000000e+00> : vector<96x128xf32>
    %238 = tpu.matmul %235, %237, %cst_151 {dimension_numbers = #tpu.dot_dimension_numbers<[1], [0], [0], [1], [0, 0, 1, 1], [], []>} : vector<96x128xbf16>, vector<128x128xbf16>, vector<96x128xf32> -> vector<96x128xf32>
    %239 = arith.addf %234, %238 : vector<96x128xf32>
    %240 = vector.extract_strided_slice %173 {offsets = [32, 0], sizes = [96, 128], strides = [1, 1]} : vector<160x128xbf16> to vector<96x128xbf16>
    %c13_152 = arith.constant 13 : index
    %c0_153 = arith.constant 0 : index
    %c0_154 = arith.constant 0 : index
    %241 = vector.load %arg12[%c13_152, %c0_153, %c0_154] : memref<25x128x128xbf16, #tpu.memory_space<vmem>>, vector<1x128x128xbf16>
    %242 = vector.shape_cast %241 : vector<1x128x128xbf16> to vector<128x128xbf16>
    %cst_155 = arith.constant dense<0.000000e+00> : vector<96x128xf32>
    %243 = tpu.matmul %240, %242, %cst_155 {dimension_numbers = #tpu.dot_dimension_numbers<[1], [0], [0], [1], [0, 0, 1, 1], [], []>} : vector<96x128xbf16>, vector<128x128xbf16>, vector<96x128xf32> -> vector<96x128xf32>
    %244 = arith.addf %239, %243 : vector<96x128xf32>
    %245 = vector.extract_strided_slice %175 {offsets = [32, 0], sizes = [96, 128], strides = [1, 1]} : vector<160x128xbf16> to vector<96x128xbf16>
    %c14_156 = arith.constant 14 : index
    %c0_157 = arith.constant 0 : index
    %c0_158 = arith.constant 0 : index
    %246 = vector.load %arg12[%c14_156, %c0_157, %c0_158] : memref<25x128x128xbf16, #tpu.memory_space<vmem>>, vector<1x128x128xbf16>
    %247 = vector.shape_cast %246 : vector<1x128x128xbf16> to vector<128x128xbf16>
    %cst_159 = arith.constant dense<0.000000e+00> : vector<96x128xf32>
    %248 = tpu.matmul %245, %247, %cst_159 {dimension_numbers = #tpu.dot_dimension_numbers<[1], [0], [0], [1], [0, 0, 1, 1], [], []>} : vector<96x128xbf16>, vector<128x128xbf16>, vector<96x128xf32> -> vector<96x128xf32>
    %249 = arith.addf %244, %248 : vector<96x128xf32>
    %250 = vector.extract_strided_slice %167 {offsets = [48, 0], sizes = [96, 128], strides = [1, 1]} : vector<160x128xbf16> to vector<96x128xbf16>
    %c15_160 = arith.constant 15 : index
    %c0_161 = arith.constant 0 : index
    %c0_162 = arith.constant 0 : index
    %251 = vector.load %arg12[%c15_160, %c0_161, %c0_162] : memref<25x128x128xbf16, #tpu.memory_space<vmem>>, vector<1x128x128xbf16>
    %252 = vector.shape_cast %251 : vector<1x128x128xbf16> to vector<128x128xbf16>
    %cst_163 = arith.constant dense<0.000000e+00> : vector<96x128xf32>
    %253 = tpu.matmul %250, %252, %cst_163 {dimension_numbers = #tpu.dot_dimension_numbers<[1], [0], [0], [1], [0, 0, 1, 1], [], []>} : vector<96x128xbf16>, vector<128x128xbf16>, vector<96x128xf32> -> vector<96x128xf32>
    %254 = arith.addf %249, %253 : vector<96x128xf32>
    %255 = vector.extract_strided_slice %169 {offsets = [48, 0], sizes = [96, 128], strides = [1, 1]} : vector<160x128xbf16> to vector<96x128xbf16>
    %c16_164 = arith.constant 16 : index
    %c0_165 = arith.constant 0 : index
    %c0_166 = arith.constant 0 : index
    %256 = vector.load %arg12[%c16_164, %c0_165, %c0_166] : memref<25x128x128xbf16, #tpu.memory_space<vmem>>, vector<1x128x128xbf16>
    %257 = vector.shape_cast %256 : vector<1x128x128xbf16> to vector<128x128xbf16>
    %cst_167 = arith.constant dense<0.000000e+00> : vector<96x128xf32>
    %258 = tpu.matmul %255, %257, %cst_167 {dimension_numbers = #tpu.dot_dimension_numbers<[1], [0], [0], [1], [0, 0, 1, 1], [], []>} : vector<96x128xbf16>, vector<128x128xbf16>, vector<96x128xf32> -> vector<96x128xf32>
    %259 = arith.addf %254, %258 : vector<96x128xf32>
    %260 = vector.extract_strided_slice %171 {offsets = [48, 0], sizes = [96, 128], strides = [1, 1]} : vector<160x128xbf16> to vector<96x128xbf16>
    %c17_168 = arith.constant 17 : index
    %c0_169 = arith.constant 0 : index
    %c0_170 = arith.constant 0 : index
    %261 = vector.load %arg12[%c17_168, %c0_169, %c0_170] : memref<25x128x128xbf16, #tpu.memory_space<vmem>>, vector<1x128x128xbf16>
    %262 = vector.shape_cast %261 : vector<1x128x128xbf16> to vector<128x128xbf16>
    %cst_171 = arith.constant dense<0.000000e+00> : vector<96x128xf32>
    %263 = tpu.matmul %260, %262, %cst_171 {dimension_numbers = #tpu.dot_dimension_numbers<[1], [0], [0], [1], [0, 0, 1, 1], [], []>} : vector<96x128xbf16>, vector<128x128xbf16>, vector<96x128xf32> -> vector<96x128xf32>
    %264 = arith.addf %259, %263 : vector<96x128xf32>
    %265 = vector.extract_strided_slice %173 {offsets = [48, 0], sizes = [96, 128], strides = [1, 1]} : vector<160x128xbf16> to vector<96x128xbf16>
    %c18_172 = arith.constant 18 : index
    %c0_173 = arith.constant 0 : index
    %c0_174 = arith.constant 0 : index
    %266 = vector.load %arg12[%c18_172, %c0_173, %c0_174] : memref<25x128x128xbf16, #tpu.memory_space<vmem>>, vector<1x128x128xbf16>
    %267 = vector.shape_cast %266 : vector<1x128x128xbf16> to vector<128x128xbf16>
    %cst_175 = arith.constant dense<0.000000e+00> : vector<96x128xf32>
    %268 = tpu.matmul %265, %267, %cst_175 {dimension_numbers = #tpu.dot_dimension_numbers<[1], [0], [0], [1], [0, 0, 1, 1], [], []>} : vector<96x128xbf16>, vector<128x128xbf16>, vector<96x128xf32> -> vector<96x128xf32>
    %269 = arith.addf %264, %268 : vector<96x128xf32>
    %270 = vector.extract_strided_slice %175 {offsets = [48, 0], sizes = [96, 128], strides = [1, 1]} : vector<160x128xbf16> to vector<96x128xbf16>
    %c19_176 = arith.constant 19 : index
    %c0_177 = arith.constant 0 : index
    %c0_178 = arith.constant 0 : index
    %271 = vector.load %arg12[%c19_176, %c0_177, %c0_178] : memref<25x128x128xbf16, #tpu.memory_space<vmem>>, vector<1x128x128xbf16>
    %272 = vector.shape_cast %271 : vector<1x128x128xbf16> to vector<128x128xbf16>
    %cst_179 = arith.constant dense<0.000000e+00> : vector<96x128xf32>
    %273 = tpu.matmul %270, %272, %cst_179 {dimension_numbers = #tpu.dot_dimension_numbers<[1], [0], [0], [1], [0, 0, 1, 1], [], []>} : vector<96x128xbf16>, vector<128x128xbf16>, vector<96x128xf32> -> vector<96x128xf32>
    %274 = arith.addf %269, %273 : vector<96x128xf32>
    %275 = vector.extract_strided_slice %167 {offsets = [64, 0], sizes = [96, 128], strides = [1, 1]} : vector<160x128xbf16> to vector<96x128xbf16>
    %c20_180 = arith.constant 20 : index
    %c0_181 = arith.constant 0 : index
    %c0_182 = arith.constant 0 : index
    %276 = vector.load %arg12[%c20_180, %c0_181, %c0_182] : memref<25x128x128xbf16, #tpu.memory_space<vmem>>, vector<1x128x128xbf16>
    %277 = vector.shape_cast %276 : vector<1x128x128xbf16> to vector<128x128xbf16>
    %cst_183 = arith.constant dense<0.000000e+00> : vector<96x128xf32>
    %278 = tpu.matmul %275, %277, %cst_183 {dimension_numbers = #tpu.dot_dimension_numbers<[1], [0], [0], [1], [0, 0, 1, 1], [], []>} : vector<96x128xbf16>, vector<128x128xbf16>, vector<96x128xf32> -> vector<96x128xf32>
    %279 = arith.addf %274, %278 : vector<96x128xf32>
    %280 = vector.extract_strided_slice %169 {offsets = [64, 0], sizes = [96, 128], strides = [1, 1]} : vector<160x128xbf16> to vector<96x128xbf16>
    %c21_184 = arith.constant 21 : index
    %c0_185 = arith.constant 0 : index
    %c0_186 = arith.constant 0 : index
    %281 = vector.load %arg12[%c21_184, %c0_185, %c0_186] : memref<25x128x128xbf16, #tpu.memory_space<vmem>>, vector<1x128x128xbf16>
    %282 = vector.shape_cast %281 : vector<1x128x128xbf16> to vector<128x128xbf16>
    %cst_187 = arith.constant dense<0.000000e+00> : vector<96x128xf32>
    %283 = tpu.matmul %280, %282, %cst_187 {dimension_numbers = #tpu.dot_dimension_numbers<[1], [0], [0], [1], [0, 0, 1, 1], [], []>} : vector<96x128xbf16>, vector<128x128xbf16>, vector<96x128xf32> -> vector<96x128xf32>
    %284 = arith.addf %279, %283 : vector<96x128xf32>
    %285 = vector.extract_strided_slice %171 {offsets = [64, 0], sizes = [96, 128], strides = [1, 1]} : vector<160x128xbf16> to vector<96x128xbf16>
    %c22_188 = arith.constant 22 : index
    %c0_189 = arith.constant 0 : index
    %c0_190 = arith.constant 0 : index
    %286 = vector.load %arg12[%c22_188, %c0_189, %c0_190] : memref<25x128x128xbf16, #tpu.memory_space<vmem>>, vector<1x128x128xbf16>
    %287 = vector.shape_cast %286 : vector<1x128x128xbf16> to vector<128x128xbf16>
    %cst_191 = arith.constant dense<0.000000e+00> : vector<96x128xf32>
    %288 = tpu.matmul %285, %287, %cst_191 {dimension_numbers = #tpu.dot_dimension_numbers<[1], [0], [0], [1], [0, 0, 1, 1], [], []>} : vector<96x128xbf16>, vector<128x128xbf16>, vector<96x128xf32> -> vector<96x128xf32>
    %289 = arith.addf %284, %288 : vector<96x128xf32>
    %290 = vector.extract_strided_slice %173 {offsets = [64, 0], sizes = [96, 128], strides = [1, 1]} : vector<160x128xbf16> to vector<96x128xbf16>
    %c23_192 = arith.constant 23 : index
    %c0_193 = arith.constant 0 : index
    %c0_194 = arith.constant 0 : index
    %291 = vector.load %arg12[%c23_192, %c0_193, %c0_194] : memref<25x128x128xbf16, #tpu.memory_space<vmem>>, vector<1x128x128xbf16>
    %292 = vector.shape_cast %291 : vector<1x128x128xbf16> to vector<128x128xbf16>
    %cst_195 = arith.constant dense<0.000000e+00> : vector<96x128xf32>
    %293 = tpu.matmul %290, %292, %cst_195 {dimension_numbers = #tpu.dot_dimension_numbers<[1], [0], [0], [1], [0, 0, 1, 1], [], []>} : vector<96x128xbf16>, vector<128x128xbf16>, vector<96x128xf32> -> vector<96x128xf32>
    %294 = arith.addf %289, %293 : vector<96x128xf32>
    %295 = vector.extract_strided_slice %175 {offsets = [64, 0], sizes = [96, 128], strides = [1, 1]} : vector<160x128xbf16> to vector<96x128xbf16>
    %c24_196 = arith.constant 24 : index
    %c0_197 = arith.constant 0 : index
    %c0_198 = arith.constant 0 : index
    %296 = vector.load %arg12[%c24_196, %c0_197, %c0_198] : memref<25x128x128xbf16, #tpu.memory_space<vmem>>, vector<1x128x128xbf16>
    %297 = vector.shape_cast %296 : vector<1x128x128xbf16> to vector<128x128xbf16>
    %cst_199 = arith.constant dense<0.000000e+00> : vector<96x128xf32>
    %298 = tpu.matmul %295, %297, %cst_199 {dimension_numbers = #tpu.dot_dimension_numbers<[1], [0], [0], [1], [0, 0, 1, 1], [], []>} : vector<96x128xbf16>, vector<128x128xbf16>, vector<96x128xf32> -> vector<96x128xf32>
    %299 = arith.addf %294, %298 : vector<96x128xf32>
    %c0_200 = arith.constant 0 : index
    %c0_201 = arith.constant 0 : index
    %300 = vector.load %arg13[%c0_200, %c0_201] : memref<1x128xf32, #tpu.memory_space<vmem>>, vector<1x128xf32>
    %301 = vector.broadcast %300 : vector<1x128xf32> to vector<96x128xf32>
    %302 = arith.addf %299, %301 : vector<96x128xf32>
    %cst_202 = arith.constant 0.000000e+00 : f32
    %303 = vector.broadcast %cst_202 : f32 to vector<96x128xf32>
    %304 = arith.maximumf %302, %303 : vector<96x128xf32>
    %c0_203 = arith.constant 0 : index
    %c0_204 = arith.constant 0 : index
    %305 = vector.load %arg14[%c0_203, %c0_204] : memref<1x128xf32, #tpu.memory_space<vmem>>, vector<1x128xf32>
    %306 = vector.broadcast %305 : vector<1x128xf32> to vector<96x128xf32>
    %307 = arith.mulf %304, %306 : vector<96x128xf32>
    %c0_205 = arith.constant 0 : index
    %c0_206 = arith.constant 0 : index
    %308 = vector.load %arg15[%c0_205, %c0_206] : memref<1x128xf32, #tpu.memory_space<vmem>>, vector<1x128xf32>
    %309 = vector.broadcast %308 : vector<1x128xf32> to vector<96x128xf32>
    %310 = arith.addf %307, %309 : vector<96x128xf32>
    %c0_207 = arith.constant 0 : index
    %c0_208 = arith.constant 0 : index
    %311 = vector.load %arg16[%c0_207, %c0_208] : memref<16x96xbf16, #tpu.memory_space<vmem>>, vector<16x96xbf16>
    %312 = arith.truncf %310 : vector<96x128xf32> to vector<96x128xbf16>
    %cst_209 = arith.constant dense<0.000000e+00> : vector<16x128xf32>
    %313 = tpu.matmul %311, %312, %cst_209 {dimension_numbers = #tpu.dot_dimension_numbers<[1], [0], [0], [1], [0, 0, 1, 1], [], []>} : vector<16x96xbf16>, vector<96x128xbf16>, vector<16x128xf32> -> vector<16x128xf32>
    %314 = arith.truncf %313 : vector<16x128xf32> to vector<16x128xbf16>
    %c0_210 = arith.constant 0 : index
    %c0_211 = arith.constant 0 : index
    %c0_212 = arith.constant 0 : index
    %315 = vector.load %arg17[%c0_210, %c0_211, %c0_212] : memref<1x16x128xbf16, #tpu.memory_space<vmem>>, vector<1x16x128xbf16>
    %316 = vector.shape_cast %315 : vector<1x16x128xbf16> to vector<16x128xbf16>
    %317 = vector.shape_cast %314 : vector<16x128xbf16> to vector<1x16x128xbf16>
    tpu.vector_store %arg17[%c0_210, %c0_211, %c0_212], %317 {strides = array<i32>} : memref<1x16x128xbf16, #tpu.memory_space<vmem>>, vector<1x16x128xbf16>,
    return
  }
  func.func @transform_0(%arg0: i32) -> (i32, i32, i32) {
    %c0_i32 = arith.constant 0 : i32
    %c0_i32_0 = arith.constant 0 : i32
    %c0_i32_1 = arith.constant 0 : i32
    return %arg0, %c0_i32, %c0_i32_0 : i32, i32, i32
  }
  func.func @transform_1(%arg0: i32) -> (i32, i32) {
    %c0_i32 = arith.constant 0 : i32
    %c0_i32_0 = arith.constant 0 : i32
    %c0_i32_1 = arith.constant 0 : i32
    return %c0_i32, %c0_i32_0 : i32, i32
  }
  func.func @transform_2(%arg0: i32) -> (i32, i32) {
    %c0_i32 = arith.constant 0 : i32
    %c0_i32_0 = arith.constant 0 : i32
    %c0_i32_1 = arith.constant 0 : i32
    return %c0_i32, %c0_i32_0 : i32, i32
  }
  func.func @transform_3(%arg0: i32) -> (i32, i32) {
    %c0_i32 = arith.constant 0 : i32
    %c0_i32_0 = arith.constant 0 : i32
    %c0_i32_1 = arith.constant 0 : i32
    return %c0_i32, %c0_i32_0 : i32, i32
  }
  func.func @transform_4(%arg0: i32) -> (i32, i32) {
    %c0_i32 = arith.constant 0 : i32
    %c0_i32_0 = arith.constant 0 : i32
    %c0_i32_1 = arith.constant 0 : i32
    return %c0_i32, %c0_i32_0 : i32, i32
  }
  func.func @transform_5(%arg0: i32) -> (i32, i32) {
    %c0_i32 = arith.constant 0 : i32
    %c0_i32_0 = arith.constant 0 : i32
    %c0_i32_1 = arith.constant 0 : i32
    return %c0_i32, %c0_i32_0 : i32, i32
  }
  func.func @transform_6(%arg0: i32) -> (i32, i32, i32) {
    %c0_i32 = arith.constant 0 : i32
    %c0_i32_0 = arith.constant 0 : i32
    %c0_i32_1 = arith.constant 0 : i32
    %c0_i32_2 = arith.constant 0 : i32
    return %c0_i32, %c0_i32_0, %c0_i32_1 : i32, i32, i32
  }
  func.func @transform_7(%arg0: i32) -> (i32, i32) {
    %c0_i32 = arith.constant 0 : i32
    %c0_i32_0 = arith.constant 0 : i32
    %c0_i32_1 = arith.constant 0 : i32
    return %c0_i32, %c0_i32_0 : i32, i32
  }
  func.func @transform_8(%arg0: i32) -> (i32, i32) {
    %c0_i32 = arith.constant 0 : i32
    %c0_i32_0 = arith.constant 0 : i32
    %c0_i32_1 = arith.constant 0 : i32
    return %c0_i32, %c0_i32_0 : i32, i32
  }
  func.func @transform_9(%arg0: i32) -> (i32, i32) {
    %c0_i32 = arith.constant 0 : i32
    %c0_i32_0 = arith.constant 0 : i32
    %c0_i32_1 = arith.constant 0 : i32
    return %c0_i32, %c0_i32_0 : i32, i32
  }
  func.func @transform_10(%arg0: i32) -> (i32, i32) {
    %c0_i32 = arith.constant 0 : i32
    %c0_i32_0 = arith.constant 0 : i32
    %c0_i32_1 = arith.constant 0 : i32
    return %c0_i32, %c0_i32_0 : i32, i32
  }
  func.func @transform_11(%arg0: i32) -> (i32, i32, i32) {
    %c0_i32 = arith.constant 0 : i32
    %c0_i32_0 = arith.constant 0 : i32
    %c0_i32_1 = arith.constant 0 : i32
    %c0_i32_2 = arith.constant 0 : i32
    return %c0_i32, %c0_i32_0, %c0_i32_1 : i32, i32, i32
  }
  func.func @transform_12(%arg0: i32) -> (i32, i32) {
    %c0_i32 = arith.constant 0 : i32
    %c0_i32_0 = arith.constant 0 : i32
    %c0_i32_1 = arith.constant 0 : i32
    return %c0_i32, %c0_i32_0 : i32, i32
  }
  func.func @transform_13(%arg0: i32) -> (i32, i32) {
    %c0_i32 = arith.constant 0 : i32
    %c0_i32_0 = arith.constant 0 : i32
    %c0_i32_1 = arith.constant 0 : i32
    return %c0_i32, %c0_i32_0 : i32, i32
  }
  func.func @transform_14(%arg0: i32) -> (i32, i32) {
    %c0_i32 = arith.constant 0 : i32
    %c0_i32_0 = arith.constant 0 : i32
    %c0_i32_1 = arith.constant 0 : i32
    return %c0_i32, %c0_i32_0 : i32, i32
  }
  func.func @transform_15(%arg0: i32) -> (i32, i32) {
    %c0_i32 = arith.constant 0 : i32
    %c0_i32_0 = arith.constant 0 : i32
    %c0_i32_1 = arith.constant 0 : i32
    return %c0_i32, %c0_i32_0 : i32, i32
  }
  func.func @transform_16(%arg0: i32) -> (i32, i32, i32) {
    %c0_i32 = arith.constant 0 : i32
    %c0_i32_0 = arith.constant 0 : i32
    %c0_i32_1 = arith.constant 0 : i32
    return %arg0, %c0_i32, %c0_i32_0 : i32, i32, i32
  }
}

module attributes {stable_mosaic.version = 11 : i64} {
  func.func @_fc_head_kernel(%arg0: i32, %arg1: memref<2x2048xbf16, #tpu.memory_space<vmem>>, %arg2: memref<2048x128xbf16, #tpu.memory_space<vmem>>, %arg3: memref<1x128xf32, #tpu.memory_space<vmem>>, %arg4: memref<128x128xbf16, #tpu.memory_space<vmem>>, %arg5: memref<1x128xf32, #tpu.memory_space<vmem>>, %arg6: memref<2x128xf32, #tpu.memory_space<vmem>>) attributes {dimension_semantics = [#tpu.dimension_semantics<parallel>], iteration_bounds = array<i64: 1>, scalar_prefetch = 0 : i64, scratch_operands = 0 : i64, tpu.core_type = #tpu.core_type<tc>, window_params = [{transform_indices = @transform_0, window_bounds = array<i64: 2, 2048>}, {pipeline_mode = #tpu.pipeline_mode<synchronous>, transform_indices = @transform_1, window_bounds = array<i64: 2048, 128>}, {pipeline_mode = #tpu.pipeline_mode<synchronous>, transform_indices = @transform_2, window_bounds = array<i64: 1, 128>}, {pipeline_mode = #tpu.pipeline_mode<synchronous>, transform_indices = @transform_3, window_bounds = array<i64: 128, 128>}, {pipeline_mode = #tpu.pipeline_mode<synchronous>, transform_indices = @transform_4, window_bounds = array<i64: 1, 128>}, {transform_indices = @transform_5, window_bounds = array<i64: 2, 128>}]} {
    %c0 = arith.constant 0 : index
    %c0_0 = arith.constant 0 : index
    %0 = vector.load %arg1[%c0, %c0_0] : memref<2x2048xbf16, #tpu.memory_space<vmem>>, vector<2x2048xbf16>
    %c0_1 = arith.constant 0 : index
    %c0_2 = arith.constant 0 : index
    %1 = vector.load %arg2[%c0_1, %c0_2] : memref<2048x128xbf16, #tpu.memory_space<vmem>>, vector<2048x128xbf16>
    %cst = arith.constant dense<0.000000e+00> : vector<2x128xf32>
    %2 = tpu.matmul %0, %1, %cst {dimension_numbers = #tpu.dot_dimension_numbers<[1], [0], [0], [1], [0, 0, 1, 1], [], []>} : vector<2x2048xbf16>, vector<2048x128xbf16>, vector<2x128xf32> -> vector<2x128xf32>
    %c0_3 = arith.constant 0 : index
    %c0_4 = arith.constant 0 : index
    %3 = vector.load %arg3[%c0_3, %c0_4] : memref<1x128xf32, #tpu.memory_space<vmem>>, vector<1x128xf32>
    %4 = vector.broadcast %3 : vector<1x128xf32> to vector<2x128xf32>
    %5 = arith.addf %2, %4 : vector<2x128xf32>
    %cst_5 = arith.constant 0.000000e+00 : f32
    %6 = vector.broadcast %cst_5 : f32 to vector<2x128xf32>
    %7 = arith.maximumf %5, %6 : vector<2x128xf32>
    %8 = arith.truncf %7 : vector<2x128xf32> to vector<2x128xbf16>
    %c0_6 = arith.constant 0 : index
    %c0_7 = arith.constant 0 : index
    %9 = vector.load %arg4[%c0_6, %c0_7] : memref<128x128xbf16, #tpu.memory_space<vmem>>, vector<128x128xbf16>
    %cst_8 = arith.constant dense<0.000000e+00> : vector<2x128xf32>
    %10 = tpu.matmul %8, %9, %cst_8 {dimension_numbers = #tpu.dot_dimension_numbers<[1], [0], [0], [1], [0, 0, 1, 1], [], []>} : vector<2x128xbf16>, vector<128x128xbf16>, vector<2x128xf32> -> vector<2x128xf32>
    %c0_9 = arith.constant 0 : index
    %c0_10 = arith.constant 0 : index
    %11 = vector.load %arg5[%c0_9, %c0_10] : memref<1x128xf32, #tpu.memory_space<vmem>>, vector<1x128xf32>
    %12 = vector.broadcast %11 : vector<1x128xf32> to vector<2x128xf32>
    %13 = arith.addf %10, %12 : vector<2x128xf32>
    %c0_11 = arith.constant 0 : index
    %c0_12 = arith.constant 0 : index
    %14 = vector.load %arg6[%c0_11, %c0_12] : memref<2x128xf32, #tpu.memory_space<vmem>>, vector<2x128xf32>
    tpu.vector_store %arg6[%c0_11, %c0_12], %13 {strides = array<i32>} : memref<2x128xf32, #tpu.memory_space<vmem>>, vector<2x128xf32>,
    return
  }
  func.func @transform_0(%arg0: i32) -> (i32, i32) {
    %c0_i32 = arith.constant 0 : i32
    %c0_i32_0 = arith.constant 0 : i32
    return %arg0, %c0_i32 : i32, i32
  }
  func.func @transform_1(%arg0: i32) -> (i32, i32) {
    %c0_i32 = arith.constant 0 : i32
    %c0_i32_0 = arith.constant 0 : i32
    %c0_i32_1 = arith.constant 0 : i32
    return %c0_i32, %c0_i32_0 : i32, i32
  }
  func.func @transform_2(%arg0: i32) -> (i32, i32) {
    %c0_i32 = arith.constant 0 : i32
    %c0_i32_0 = arith.constant 0 : i32
    %c0_i32_1 = arith.constant 0 : i32
    return %c0_i32, %c0_i32_0 : i32, i32
  }
  func.func @transform_3(%arg0: i32) -> (i32, i32) {
    %c0_i32 = arith.constant 0 : i32
    %c0_i32_0 = arith.constant 0 : i32
    %c0_i32_1 = arith.constant 0 : i32
    return %c0_i32, %c0_i32_0 : i32, i32
  }
  func.func @transform_4(%arg0: i32) -> (i32, i32) {
    %c0_i32 = arith.constant 0 : i32
    %c0_i32_0 = arith.constant 0 : i32
    %c0_i32_1 = arith.constant 0 : i32
    return %c0_i32, %c0_i32_0 : i32, i32
  }
  func.func @transform_5(%arg0: i32) -> (i32, i32) {
    %c0_i32 = arith.constant 0 : i32
    %c0_i32_0 = arith.constant 0 : i32
    return %arg0, %c0_i32 : i32, i32
  }
}

</mosaic_0001>

<bundles_post_ra>
// kernel: mnist_cnn_forward.3
= control target key start
LH: loop header
LB: loop body
LE: loop exit
PB: predicated region body
PF: predicated region fallthrough
CT: control target
= control target key end

     0   :  { %10 = vsyncpa [#allocation3], 0  ;;  %s2308_s0 = inlined_call_operand.vmem [shape: bf16[2,2048], index: 0, kind: input, shape index: {}]   ;;  %s2309_s1 = inlined_call_operand.hbm [shape: bf16[2048,128], index: 1, kind: input, shape index: {}]   ;;  %s2310_s2 = inlined_call_operand.hbm [shape: f32[1,128], index: 2, kind: input, shape index: {}]   ;;  %s2311_s3 = inlined_call_operand.vmem [shape: bf16[128,128], index: 3, kind: input, shape index: {}]   ;;  %s2312_s4 = inlined_call_operand.hbm [shape: f32[1,128], index: 4, kind: input, shape index: {}]   ;;  %s2313_s5 = inlined_call_operand.hbm [shape: f32[2,128], index: 5, kind: output, shape index: {}]  }
   0x1   :  { %11 = vsyncpa [#allocation6], 0  ;;  %s33_s20 = sshll.u32 %s2310_s2, 4  ;;  %s34_s20 = int_to_ptr.hbm [resolvable:$true] %s33_s20 }
   0x2   :  { %12 = vsyncpa [#allocation4], 0  ;;  %s2230_s21 = smov [#allocation5]   ;;  %s19_s25 = sshll.u32 %s2309_s1, 4  ;;  %s20_s25 = int_to_ptr.hbm [resolvable:$true] %s19_s25 }
   0x3   :  { %s35_s22 = sshll.u32 %s2230_s21, 4  ;;  %s2231_s26 = smov [#allocation2]   ;;  %s36_s22 = int_to_ptr.vmem [resolvable:$true] %s35_s22 }
   0x4   :  { %38 = dma.hbm_to_vmem [thread:$0]  %s34_s20, 16, %s36_s22, [#allocation6]  }
   0x5   :  { %s21_s27 = sshll.u32 %s2231_s26, 4  ;;  %s2232_s28 = smov 64   ;;  %s22_s27 = int_to_ptr.vmem [resolvable:$true] %s21_s27 }
   0x6   :  { %s2233_s29 = smov 4   ;;  %s46_s2 = sshll.u32 %s2312_s4, 4  ;;  %s47_s2 = int_to_ptr.hbm [resolvable:$true] %s46_s2 }
   0x7   :  { %27 = dma.hbm_to_vmem [thread:$0]  %s20_s25, 16384, %s22_s27, [#allocation3], %s2232_s28, %s2232_s28, %s2233_s29  }
   0x8   :  { %s2234_s7 = smov [#allocation7]  }
   0x9   :  { %s48_s8 = sshll.u32 %s2234_s7, 4  ;;  %s49_s8 = int_to_ptr.vmem [resolvable:$true] %s48_s8 }
   0xa   :  { %51 = dma.hbm_to_vmem [thread:$0]  %s47_s2, 16, %s49_s8, [#allocation6]  }
   0xb   :  { %2224 = dma.done.wait [#allocation3], 16384  }
   0xc   :  { %2225 = vsyncadd [#allocation3], 4294950912 }
   0xd   :  { %2226 = dma.done.wait [#allocation6], 32  }
   0xe   :  { %2227 = vsyncadd [#allocation6], 4294967264  ;;  %v1991_v0 = vld [vmem:[#allocation2 + $0x38] sm:$0xff]  ;;  %v1990_v4 = vld [vmem:[#allocation2 + $0x30] sm:$0xff]  ;;  %s1429_s29 = sshll.u32 %s2313_s5, 4  ;;  %s1430_s29 = int_to_ptr.hbm [resolvable:$true] %s1429_s29 }
   0xf   :  { %v1999_v1 = vld [vmem:[#allocation2 + $0x78] sm:$0xff]  ;;  %1130 = vmatpush.bf16.msra.mxu0 %v1991_v0  ;;  %v1998_v5 = vld [vmem:[#allocation2 + $0x70] sm:$0xff]  ;;  %v1989_v8 = vld [vmem:[#allocation2 + $0x28] sm:$0xff] }
  0x10   :  { %v2007_v2 = vld [vmem:[#allocation2 + $0xb8] sm:$0xff]  ;;  %1143 = vmatpush.bf16.msra.mxu1 %v1999_v1  ;;  %v2006_v6 = vld [vmem:[#allocation2 + $0xb0] sm:$0xff]  ;;  %v1997_v9 = vld [vmem:[#allocation2 + $0x68] sm:$0xff] }
  0x11   :  { %v2015_v3 = vld [vmem:[#allocation2 + $0xf8] sm:$0xff]  ;;  %1156 = vmatpush.bf16.msra.mxu2 %v2007_v2  ;;  %v2014_v7 = vld [vmem:[#allocation2 + $0xf0] sm:$0xff]  ;;  %v2005_v10 = vld [vmem:[#allocation2 + $0xa8] sm:$0xff] }
  0x12   :  { %1169 = vmatpush.bf16.msra.mxu3 %v2015_v3  ;;  %v2013_v11 = vld [vmem:[#allocation2 + $0xe8] sm:$0xff]  ;;  %v1988_v12 = vld [vmem:[#allocation2 + $0x20] sm:$0xff]  ;;  %v1987_v16 = vld [vmem:[#allocation2 + $0x18] sm:$0xff] }
  0x13   :  { %1131 = vmatpush.bf16.msra.mxu0 %v1990_v4  ;;  %v1996_v13 = vld [vmem:[#allocation2 + $0x60] sm:$0xff]  ;;  %v1995_v17 = vld [vmem:[#allocation2 + $0x58] sm:$0xff]  ;;  %v1986_v20 = vld [vmem:[#allocation2 + $0x10] sm:$0xff] }
  0x14   :  { %1144 = vmatpush.bf16.msra.mxu1 %v1998_v5  ;;  %v2004_v14 = vld [vmem:[#allocation2 + $0xa0] sm:$0xff]  ;;  %v2003_v18 = vld [vmem:[#allocation2 + $0x98] sm:$0xff]  ;;  %v1994_v21 = vld [vmem:[#allocation2 + $0x50] sm:$0xff] }
  0x15   :  { %1157 = vmatpush.bf16.msra.mxu2 %v2006_v6  ;;  %v2012_v15 = vld [vmem:[#allocation2 + $0xe0] sm:$0xff]  ;;  %v2011_v19 = vld [vmem:[#allocation2 + $0xd8] sm:$0xff]  ;;  %v2002_v23 = vld [vmem:[#allocation2 + $0x90] sm:$0xff] }
  0x16   :  { %1170 = vmatpush.bf16.msra.mxu3 %v2014_v7  ;;  %v64_v22 = vld [vmem:[%s2308_s0] sm:$0xff]  ;;  %v2010_v24 = vld [vmem:[#allocation2 + $0xd0] sm:$0xff]  ;;  %v1985_v25 = vld [vmem:[#allocation2 + $0x8] sm:$0xff] }
  0x17   :  { %1132 = vmatpush.bf16.msra.mxu0 %v1989_v8  ;;  %327 = vst [vmem:[#allocation1] ss:$9 sm:$0xff] %v64_v22  ;;  %v1993_v26 = vld [vmem:[#allocation2 + $0x48] sm:$0xff]  ;;  %v1984_v29 = vld [vmem:[#allocation2] sm:$0xff]  ;;  %v2023_v33 = vld [vmem:[#allocation2 + $0x138] sm:$0xff] }
  0x18   :  { %1145 = vmatpush.bf16.msra.mxu1 %v1997_v9  ;;  %v2001_v27 = vld [vmem:[#allocation2 + $0x88] sm:$0xff]  ;;  %v1992_v30 = vld [vmem:[#allocation2 + $0x40] sm:$0xff]  ;;  %v2031_v34 = vld [vmem:[#allocation2 + $0x178] sm:$0xff] }
  0x19   :  { %1158 = vmatpush.bf16.msra.mxu2 %v2005_v10  ;;  %v2009_v28 = vld [vmem:[#allocation2 + $0xc8] sm:$0xff]  ;;  %v2000_v31 = vld [vmem:[#allocation2 + $0x80] sm:$0xff]  ;;  %v2039_v35 = vld [vmem:[#allocation2 + $0x1b8] sm:$0xff] }
  0x1a   :  { %1171 = vmatpush.bf16.msra.mxu3 %v2013_v11  ;;  %v2008_v32 = vld [vmem:[#allocation2 + $0xc0] sm:$0xff]  ;;  %v2047_v36 = vld [vmem:[#allocation2 + $0x1f8] sm:$0xff]  ;;  %v2022_v37 = vld [vmem:[#allocation2 + $0x130] sm:$0xff] }
  0x1b   :  { %1133 = vmatpush.bf16.msra.mxu0 %v1988_v12  ;;  %v2030_v40 = vld [vmem:[#allocation2 + $0x170] sm:$0xff]  ;;  %v2021_v45 = vld [vmem:[#allocation2 + $0x128] sm:$0xff]  ;;  %v2020_v49 = vld [vmem:[#allocation2 + $0x120] sm:$0xff] }
  0x1c   :  { %1146 = vmatpush.bf16.msra.mxu1 %v1996_v13  ;;  %v2038_v43 = vld [vmem:[#allocation2 + $0x1b0] sm:$0xff]  ;;  %v2029_v46 = vld [vmem:[#allocation2 + $0x168] sm:$0xff]  ;;  %v2028_v50 = vld [vmem:[#allocation2 + $0x160] sm:$0xff] }
  0x1d   :  { %1159 = vmatpush.bf16.msra.mxu2 %v2004_v14  ;;  %v2046_v44 = vld [vmem:[#allocation2 + $0x1f0] sm:$0xff]  ;;  %v2037_v47 = vld [vmem:[#allocation2 + $0x1a8] sm:$0xff]  ;;  %v65_v52 = vld [vmem:[%s2308_s0 + $0x8] sm:$0xff] }
  0x1e   :  { %1172 = vmatpush.bf16.msra.mxu3 %v2012_v15  ;;  %v330_v38 = vld [vmem:[#allocation1 + $0x12] sm:$0xff]  ;;  %v328_v39 = vld [vmem:[#allocation1] sm:$0xff]  ;;  %v329_v42 = vld [vmem:[#allocation1 + $0x9] sm:$0xff] }
  0x1f   :  { %1134 = vmatpush.bf16.msra.mxu0 %v1987_v16  ;;  %v331_v41 = vld [vmem:[#allocation1 + $0x1b] sm:$0xff]  ;;  %v2045_v48 = vld [vmem:[#allocation2 + $0x1e8] sm:$0xff]  ;;  %v332_v53 = vld [vmem:[#allocation1 + $0x24] sm:$0xff] }
  0x20   :  { %1147 = vmatpush.bf16.msra.mxu1 %v1995_v17  ;;  %v334_v51 = vld [vmem:[#allocation1 + $0x36] sm:$0xff]  ;;  %v335_v54 = vld [vmem:[#allocation1 + $0x3f] sm:$0xff]  ;;  %v333_v55 = vld [vmem:[#allocation1 + $0x2d] sm:$0xff] }
  0x21   :  { %1160 = vmatpush.bf16.msra.mxu2 %v2003_v18  ;;  %v2036_v56 = vld [vmem:[#allocation2 + $0x1a0] sm:$0xff]  ;;  %337 = vst [vmem:[#allocation1] ss:$9 sm:$0xff] %v65_v52  ;;  %v2019_v58 = vld [vmem:[#allocation2 + $0x118] sm:$0xff]  ;;  %v2018_v62 = vld [vmem:[#allocation2 + $0x110] sm:$0xff] }
  0x22   :  { %1173 = vmatpush.bf16.msra.mxu3 %v2011_v19  ;;  %v2044_v57 = vld [vmem:[#allocation2 + $0x1e0] sm:$0xff]  ;;  %v2027_v59 = vld [vmem:[#allocation2 + $0x158] sm:$0xff]  ;;  %v2026_v63 = vld [vmem:[#allocation2 + $0x150] sm:$0xff] }
  0x23   :  { %1135 = vmatpush.bf16.msra.mxu0 %v1986_v20  ;;  %v2035_v60 = vld [vmem:[#allocation2 + $0x198] sm:$0xff]  ;;  %v2034_v0 = vld [vmem:[#allocation2 + $0x190] sm:$0xff]  ;;  %v2017_v2 = vld [vmem:[#allocation2 + $0x108] sm:$0xff] }
  0x24   :  { %1148 = vmatpush.bf16.msra.mxu1 %v1994_v21  ;;  %v2043_v61 = vld [vmem:[#allocation2 + $0x1d8] sm:$0xff]  ;;  %v2042_v1 = vld [vmem:[#allocation2 + $0x1d0] sm:$0xff]  ;;  %v2025_v3 = vld [vmem:[#allocation2 + $0x148] sm:$0xff] }
  0x25   :  { %1161 = vmatpush.bf16.msra.mxu2 %v2002_v23  ;;  %v2033_v4 = vld [vmem:[#allocation2 + $0x188] sm:$0xff]  ;;  %v2016_v6 = vld [vmem:[#allocation2 + $0x100] sm:$0xff]  ;;  %v2055_v10 = vld [vmem:[#allocation2 + $0x238] sm:$0xff] }
  0x26   :  { %1174 = vmatpush.bf16.msra.mxu3 %v2010_v24  ;;  %v2041_v5 = vld [vmem:[#allocation2 + $0x1c8] sm:$0xff]  ;;  %v2024_v7 = vld [vmem:[#allocation2 + $0x140] sm:$0xff]  ;;  %v2063_v11 = vld [vmem:[#allocation2 + $0x278] sm:$0xff] }
  0x27   :  { %1136 = vmatpush.bf16.msra.mxu0 %v1985_v25  ;;  %v2032_v8 = vld [vmem:[#allocation2 + $0x180] sm:$0xff]  ;;  %v2071_v12 = vld [vmem:[#allocation2 + $0x2b8] sm:$0xff]  ;;  %v2054_v14 = vld [vmem:[#allocation2 + $0x230] sm:$0xff] }
  0x28   :  { %1149 = vmatpush.bf16.msra.mxu1 %v1993_v26  ;;  %v2040_v9 = vld [vmem:[#allocation2 + $0x1c0] sm:$0xff]  ;;  %v2079_v13 = vld [vmem:[#allocation2 + $0x2f8] sm:$0xff]  ;;  %v2062_v15 = vld [vmem:[#allocation2 + $0x270] sm:$0xff] }
  0x29   :  { %1162 = vmatpush.bf16.msra.mxu2 %v2001_v27  ;;  %v2070_v16 = vld [vmem:[#allocation2 + $0x2b0] sm:$0xff]  ;;  %v2053_v18 = vld [vmem:[#allocation2 + $0x228] sm:$0xff]  ;;  %v2052_v22 = vld [vmem:[#allocation2 + $0x220] sm:$0xff] }
  0x2a   :  { %1175 = vmatpush.bf16.msra.mxu3 %v2009_v28  ;;  %v2078_v17 = vld [vmem:[#allocation2 + $0x2f0] sm:$0xff]  ;;  %v2061_v19 = vld [vmem:[#allocation2 + $0x268] sm:$0xff]  ;;  %v2060_v23 = vld [vmem:[#allocation2 + $0x260] sm:$0xff] }
  0x2b   :  { %1137 = vmatpush.bf16.msra.mxu0 %v1984_v29  ;;  %v2069_v20 = vld [vmem:[#allocation2 + $0x2a8] sm:$0xff]  ;;  %v2068_v24 = vld [vmem:[#allocation2 + $0x2a0] sm:$0xff]  ;;  %v2051_v26 = vld [vmem:[#allocation2 + $0x218] sm:$0xff] }
  0x2c   :  { %1150 = vmatpush.bf16.msra.mxu1 %v1992_v30  ;;  %v2077_v21 = vld [vmem:[#allocation2 + $0x2e8] sm:$0xff]  ;;  %v2076_v25 = vld [vmem:[#allocation2 + $0x2e0] sm:$0xff]  ;;  %v2059_v27 = vld [vmem:[#allocation2 + $0x258] sm:$0xff] }
  0x2d   :  { %1163 = vmatpush.bf16.msra.mxu2 %v2000_v31  ;;  %v2067_v28 = vld [vmem:[#allocation2 + $0x298] sm:$0xff]  ;;  %v2050_v30 = vld [vmem:[#allocation2 + $0x210] sm:$0xff] }
  0x2e   :  { %1176 = vmatpush.bf16.msra.mxu3 %v2008_v32  ;;  %1138 = vmatmul.bf16.vlgmr.msra.gmra.mxu0 %v328_v39  ;;  %v2075_v29 = vld [vmem:[#allocation2 + $0x2d8] sm:$0xff]  ;;  %v2058_v31 = vld [vmem:[#allocation2 + $0x250] sm:$0xff]  ;;  %v2056_v39 = vld [vmem:[#allocation2 + $0x240] sm:$0xff] }
  0x2f   :  { %1182 = vmatpush.bf16.msrb.mxu0 %v2023_v33  ;;  %1151 = vmatmul.bf16.vlgmr.msra.gmra.mxu1 %v329_v42  ;;  %v2066_v32 = vld [vmem:[#allocation2 + $0x290] sm:$0xff]  ;;  %v2087_v42 = vld [vmem:[#allocation2 + $0x338] sm:$0xff] }
  0x30   :  { %1195 = vmatpush.bf16.msrb.mxu1 %v2031_v34  ;;  %1164 = vmatmul.bf16.vlgmr.msra.gmra.mxu2 %v330_v38  ;;  %v2074_v33 = vld [vmem:[#allocation2 + $0x2d0] sm:$0xff]  ;;  %v2049_v34 = vld [vmem:[#allocation2 + $0x208] sm:$0xff]  ;;  %v2048_v38 = vld [vmem:[#allocation2 + $0x200] sm:$0xff] }
  0x31   :  { %1208 = vmatpush.bf16.msrb.mxu2 %v2039_v35  ;;  %1177 = vmatmul.bf16.vlgmr.msra.gmra.mxu3 %v331_v41  ;;  %v2057_v35 = vld [vmem:[#allocation2 + $0x248] sm:$0xff]  ;;  %v2072_v41 = vld [vmem:[#allocation2 + $0x2c0] sm:$0xff]  ;;  %v2102_v52 = vld [vmem:[#allocation2 + $0x3b0] sm:$0xff] }
  0x32   :  { %1221 = vmatpush.bf16.msrb.mxu3 %v2047_v36  ;;  %v2065_v36 = vld [vmem:[#allocation2 + $0x288] sm:$0xff] }
  0x33   :  { %1183 = vmatpush.bf16.msrb.mxu0 %v2022_v37  ;;  %v2073_v37 = vld [vmem:[#allocation2 + $0x2c8] sm:$0xff] }
  0x34   :  { %1196 = vmatpush.bf16.msrb.mxu1 %v2030_v40  ;;  %v2064_v40 = vld [vmem:[#allocation2 + $0x280] sm:$0xff] }
  0x35   :  { %1209 = vmatpush.bf16.msrb.mxu2 %v2038_v43  ;;  %v2095_v43 = vld [vmem:[#allocation2 + $0x378] sm:$0xff] }
  0x36   :  { %1222 = vmatpush.bf16.msrb.mxu3 %v2046_v44  ;;  %v2103_v44 = vld [vmem:[#allocation2 + $0x3b8] sm:$0xff] }
  0x37   :  { %1184 = vmatpush.bf16.msrb.mxu0 %v2021_v45  ;;  %v2111_v45 = vld [vmem:[#allocation2 + $0x3f8] sm:$0xff] }
  0x38   :  { %1197 = vmatpush.bf16.msrb.mxu1 %v2029_v46  ;;  %v338_v46 = vld [vmem:[#allocation1] sm:$0xff] }
  0x39   :  { %1210 = vmatpush.bf16.msrb.mxu2 %v2037_v47  ;;  %v340_v47 = vld [vmem:[#allocation1 + $0x12] sm:$0xff] }
  0x3a   :  { %1223 = vmatpush.bf16.msrb.mxu3 %v2045_v48  ;;  %v339_v48 = vld [vmem:[#allocation1 + $0x9] sm:$0xff] }
  0x3b   :  { %1185 = vmatpush.bf16.msrb.mxu0 %v2020_v49  ;;  %v341_v49 = vld [vmem:[#allocation1 + $0x1b] sm:$0xff] }
  0x3c   :  { %1198 = vmatpush.bf16.msrb.mxu1 %v2028_v50  ;;  %v2086_v50 = vld [vmem:[#allocation2 + $0x330] sm:$0xff] }
  0x3d   :  { %1211 = vmatpush.bf16.msrb.mxu2 %v2036_v56  ;;  %v2101_v56 = vld [vmem:[#allocation2 + $0x3a8] sm:$0xff] }
  0x3e   :  { %1224 = vmatpush.bf16.msrb.mxu3 %v2044_v57  ;;  %v2109_v57 = vld [vmem:[#allocation2 + $0x3e8] sm:$0xff] }
  0x3f   :  { %1186 = vmatpush.bf16.msrb.mxu0 %v2019_v58  ;;  %v2084_v58 = vld [vmem:[#allocation2 + $0x320] sm:$0xff] }
  0x40   :  { %1199 = vmatpush.bf16.msrb.mxu1 %v2027_v59  ;;  %v2092_v59 = vld [vmem:[#allocation2 + $0x360] sm:$0xff] }
  0x41   :  { %1212 = vmatpush.bf16.msrb.mxu2 %v2035_v60  ;;  %v2100_v60 = vld [vmem:[#allocation2 + $0x3a0] sm:$0xff] }
  0x42   :  { %1225 = vmatpush.bf16.msrb.mxu3 %v2043_v61  ;;  %v2108_v61 = vld [vmem:[#allocation2 + $0x3e0] sm:$0xff] }
  0x43   :  { %1187 = vmatpush.bf16.msrb.mxu0 %v2018_v62  ;;  %v2083_v62 = vld [vmem:[#allocation2 + $0x318] sm:$0xff] }
  0x44   :  { %1200 = vmatpush.bf16.msrb.mxu1 %v2026_v63  ;;  %v2091_v63 = vld [vmem:[#allocation2 + $0x358] sm:$0xff] }
  0x45   :  { %1213 = vmatpush.bf16.msrb.mxu2 %v2034_v0  ;;  %v2099_v0 = vld [vmem:[#allocation2 + $0x398] sm:$0xff] }
  0x46   :  { %1226 = vmatpush.bf16.msrb.mxu3 %v2042_v1  ;;  %v2107_v1 = vld [vmem:[#allocation2 + $0x3d8] sm:$0xff] }
  0x47   :  { %1188 = vmatpush.bf16.msrb.mxu0 %v2017_v2  ;;  %v2082_v2 = vld [vmem:[#allocation2 + $0x310] sm:$0xff] }
  0x48   :  { %1201 = vmatpush.bf16.msrb.mxu1 %v2025_v3  ;;  %v2090_v3 = vld [vmem:[#allocation2 + $0x350] sm:$0xff] }
  0x49   :  { %1214 = vmatpush.bf16.msrb.mxu2 %v2033_v4  ;;  %v2098_v4 = vld [vmem:[#allocation2 + $0x390] sm:$0xff] }
  0x4a   :  { %1227 = vmatpush.bf16.msrb.mxu3 %v2041_v5  ;;  %v2106_v5 = vld [vmem:[#allocation2 + $0x3d0] sm:$0xff] }
  0x4b   :  { %1189 = vmatpush.bf16.msrb.mxu0 %v2016_v6  ;;  %v2081_v6 = vld [vmem:[#allocation2 + $0x308] sm:$0xff] }
  0x4c   :  { %1202 = vmatpush.bf16.msrb.mxu1 %v2024_v7  ;;  %v2089_v7 = vld [vmem:[#allocation2 + $0x348] sm:$0xff] }
  0x4d   :  { %1215 = vmatpush.bf16.msrb.mxu2 %v2032_v8  ;;  %v2097_v8 = vld [vmem:[#allocation2 + $0x388] sm:$0xff] }
  0x4e   :  { %1228 = vmatpush.bf16.msrb.mxu3 %v2040_v9  ;;  %1190 = vmatmul.bf16.vlgmr.msrb.gmra.mxu0 %v332_v53  ;;  %v2110_v53 = vld [vmem:[#allocation2 + $0x3f0] sm:$0xff]  ;;  %v2105_v9 = vld [vmem:[#allocation2 + $0x3c8] sm:$0xff] }
  0x4f   :  { %1234 = vmatpush.bf16.msra.mxu0 %v2055_v10  ;;  %1203 = vmatmul.bf16.vlgmr.msrb.gmra.mxu1 %v333_v55  ;;  %v2093_v55 = vld [vmem:[#allocation2 + $0x368] sm:$0xff]  ;;  %v2080_v10 = vld [vmem:[#allocation2 + $0x300] sm:$0xff] }
  0x50   :  { %1247 = vmatpush.bf16.msra.mxu1 %v2063_v11  ;;  %1216 = vmatmul.bf16.vlgmr.msrb.gmra.mxu2 %v334_v51  ;;  %v2094_v51 = vld [vmem:[#allocation2 + $0x370] sm:$0xff]  ;;  %v2088_v11 = vld [vmem:[#allocation2 + $0x340] sm:$0xff] }
  0x51   :  { %1260 = vmatpush.bf16.msra.mxu2 %v2071_v12  ;;  %1229 = vmatmul.bf16.vlgmr.msrb.gmra.mxu3 %v335_v54  ;;  %v2085_v54 = vld [vmem:[#allocation2 + $0x328] sm:$0xff]  ;;  %v2096_v12 = vld [vmem:[#allocation2 + $0x380] sm:$0xff] }
  0x52   :  { %1273 = vmatpush.bf16.msra.mxu3 %v2079_v13  ;;  %v2104_v13 = vld [vmem:[#allocation2 + $0x3c0] sm:$0xff] }
  0x53   :  { %1235 = vmatpush.bf16.msra.mxu0 %v2054_v14  ;;  %v342_v14 = vld [vmem:[#allocation1 + $0x24] sm:$0xff] }
  0x54   :  { %1248 = vmatpush.bf16.msra.mxu1 %v2062_v15  ;;  %v343_v15 = vld [vmem:[#allocation1 + $0x2d] sm:$0xff] }
  0x55   :  { %1261 = vmatpush.bf16.msra.mxu2 %v2070_v16  ;;  %v344_v16 = vld [vmem:[#allocation1 + $0x36] sm:$0xff] }
  0x56   :  { %1274 = vmatpush.bf16.msra.mxu3 %v2078_v17  ;;  %v345_v17 = vld [vmem:[#allocation1 + $0x3f] sm:$0xff] }
  0x57   :  { %1236 = vmatpush.bf16.msra.mxu0 %v2053_v18  ;;  %v2126_v18 = vld [vmem:[#allocation5] ss:$0 sm:$0xff] }
  0x58   :  { %1249 = vmatpush.bf16.msra.mxu1 %v2061_v19 }
  0x59   :  { %1262 = vmatpush.bf16.msra.mxu2 %v2069_v20 }
  0x5a   :  { %1275 = vmatpush.bf16.msra.mxu3 %v2077_v21 }
  0x5b   :  { %1237 = vmatpush.bf16.msra.mxu0 %v2052_v22 }
  0x5c   :  { %1250 = vmatpush.bf16.msra.mxu1 %v2060_v23 }
  0x5d   :  { %1263 = vmatpush.bf16.msra.mxu2 %v2068_v24 }
  0x5e   :  { %1276 = vmatpush.bf16.msra.mxu3 %v2076_v25 }
  0x5f   :  { %1238 = vmatpush.bf16.msra.mxu0 %v2051_v26 }
  0x60   :  { %1251 = vmatpush.bf16.msra.mxu1 %v2059_v27 }
  0x61   :  { %1264 = vmatpush.bf16.msra.mxu2 %v2067_v28 }
  0x62   :  { %1277 = vmatpush.bf16.msra.mxu3 %v2075_v29 }
  0x63   :  { %1239 = vmatpush.bf16.msra.mxu0 %v2050_v30 }
  0x64   :  { %1252 = vmatpush.bf16.msra.mxu1 %v2058_v31 }
  0x65   :  { %1265 = vmatpush.bf16.msra.mxu2 %v2066_v32 }
  0x66   :  { %1278 = vmatpush.bf16.msra.mxu3 %v2074_v33 }
  0x67   :  { %1240 = vmatpush.bf16.msra.mxu0 %v2049_v34 }
  0x68   :  { %1253 = vmatpush.bf16.msra.mxu1 %v2057_v35  ;;  %v2119_v35 = vld [vmem:[%s2311_s3 + $0x38] sm:$0xff] }
  0x69   :  { %1266 = vmatpush.bf16.msra.mxu2 %v2065_v36 }
  0x6a   :  { %1279 = vmatpush.bf16.msra.mxu3 %v2073_v37 }
  0x6b   :  { %1241 = vmatpush.bf16.msra.mxu0 %v2048_v38  ;;  %v2118_v38 = vld [vmem:[%s2311_s3 + $0x30] sm:$0xff] }
  0x6c   :  { %1254 = vmatpush.bf16.msra.mxu1 %v2056_v39  ;;  %v2117_v39 = vld [vmem:[%s2311_s3 + $0x28] sm:$0xff] }
  0x6d   :  { %1267 = vmatpush.bf16.msra.mxu2 %v2064_v40 }
  0x6e   :  { %1280 = vmatpush.bf16.msra.mxu3 %v2072_v41  ;;  %1242 = vmatmul.bf16.vlgmr.msra.gmra.mxu0 %v338_v46 }
  0x6f   :  { %1286 = vmatpush.bf16.msrb.mxu0 %v2087_v42  ;;  %1255 = vmatmul.bf16.vlgmr.msra.gmra.mxu1 %v339_v48  ;;  %v2116_v42 = vld [vmem:[%s2311_s3 + $0x20] sm:$0xff] }
  0x70   :  { %1299 = vmatpush.bf16.msrb.mxu1 %v2095_v43  ;;  %1268 = vmatmul.bf16.vlgmr.msra.gmra.mxu2 %v340_v47  ;;  %v2115_v43 = vld [vmem:[%s2311_s3 + $0x18] sm:$0xff]  ;;  %v2113_v47 = vld [vmem:[%s2311_s3 + $0x8] sm:$0xff] }
  0x71   :  { %1312 = vmatpush.bf16.msrb.mxu2 %v2103_v44  ;;  %1281 = vmatmul.bf16.vlgmr.msra.gmra.mxu3 %v341_v49 }
  0x72   :  { %1325 = vmatpush.bf16.msrb.mxu3 %v2111_v45  ;;  %v2114_v45 = vld [vmem:[%s2311_s3 + $0x10] sm:$0xff] }
  0x73   :  { %1287 = vmatpush.bf16.msrb.mxu0 %v2086_v50 }
  0x74   :  { %1300 = vmatpush.bf16.msrb.mxu1 %v2094_v51 }
  0x75   :  { %1313 = vmatpush.bf16.msrb.mxu2 %v2102_v52  ;;  %v2112_v52 = vld [vmem:[%s2311_s3] sm:$0xff]  ;;  %s2235_s3 = smov [#allocation8]  }
  0x76   :  { %1326 = vmatpush.bf16.msrb.mxu3 %v2110_v53  ;;  %s1427_s26 = sshll.u32 %s2235_s3, 4  ;;  %s1428_s26 = int_to_ptr.vmem [resolvable:$true] %s1427_s26 }
  0x77   :  { %1288 = vmatpush.bf16.msrb.mxu0 %v2085_v54 }
  0x78   :  { %1301 = vmatpush.bf16.msrb.mxu1 %v2093_v55 }
  0x79   :  { %1314 = vmatpush.bf16.msrb.mxu2 %v2101_v56 }
  0x7a   :  { %1327 = vmatpush.bf16.msrb.mxu3 %v2109_v57 }
  0x7b   :  { %1289 = vmatpush.bf16.msrb.mxu0 %v2084_v58 }
  0x7c   :  { %1302 = vmatpush.bf16.msrb.mxu1 %v2092_v59 }
  0x7d   :  { %1315 = vmatpush.bf16.msrb.mxu2 %v2100_v60 }
  0x7e   :  { %1328 = vmatpush.bf16.msrb.mxu3 %v2108_v61 }
  0x7f   :  { %1290 = vmatpush.bf16.msrb.mxu0 %v2083_v62 }
  0x80   :  { %1303 = vmatpush.bf16.msrb.mxu1 %v2091_v63 }
  0x81   :  { %1316 = vmatpush.bf16.msrb.mxu2 %v2099_v0 }
  0x82   :  { %1329 = vmatpush.bf16.msrb.mxu3 %v2107_v1 }
  0x83   :  { %1291 = vmatpush.bf16.msrb.mxu0 %v2082_v2 }
  0x84   :  { %1304 = vmatpush.bf16.msrb.mxu1 %v2090_v3 }
  0x85   :  { %1317 = vmatpush.bf16.msrb.mxu2 %v2098_v4 }
  0x86   :  { %1330 = vmatpush.bf16.msrb.mxu3 %v2106_v5 }
  0x87   :  { %1292 = vmatpush.bf16.msrb.mxu0 %v2081_v6 }
  0x88   :  { %1305 = vmatpush.bf16.msrb.mxu1 %v2089_v7 }
  0x89   :  { %1318 = vmatpush.bf16.msrb.mxu2 %v2097_v8 }
  0x8a   :  { %1331 = vmatpush.bf16.msrb.mxu3 %v2105_v9 }
  0x8b   :  { %1293 = vmatpush.bf16.msrb.mxu0 %v2080_v10 }
  0x8c   :  { %1306 = vmatpush.bf16.msrb.mxu1 %v2088_v11 }
  0x8d   :  { %1319 = vmatpush.bf16.msrb.mxu2 %v2096_v12 }
  0x8e   :  { %1332 = vmatpush.bf16.msrb.mxu3 %v2104_v13  ;;  %1294 = vmatmul.bf16.vlgmr.msrb.gmra.mxu0 %v342_v14  ;;  %v2127_v13 = vld [vmem:[#allocation7] ss:$0 sm:$0xff] }
  0x8f   :  { %1307 = vmatmul.bf16.vlgmr.msrb.gmra.mxu1 %v343_v15  ;;  %1408 = vmatpush.bf16.msra.mxu0 %v2119_v35 }
  0x90   :  { %1320 = vmatmul.bf16.vlgmr.msrb.gmra.mxu2 %v344_v16 }
  0x91   :  { %1333 = vmatmul.bf16.vlgmr.msrb.gmra.mxu3 %v345_v17 }
  0x93   :  { %1409 = vmatpush.bf16.msra.mxu0 %v2118_v38 }
  0x97   :  { %1410 = vmatpush.bf16.msra.mxu0 %v2117_v39 }
  0x9b   :  { %1411 = vmatpush.bf16.msra.mxu0 %v2116_v42 }
  0x9f   :  { %1412 = vmatpush.bf16.msra.mxu0 %v2115_v43 }
  0xa3   :  { %1413 = vmatpush.bf16.msra.mxu0 %v2114_v45 }
  0xa7   :  { %1414 = vmatpush.bf16.msra.mxu0 %v2113_v47 }
  0xab   :  { %v1139_v19 = vpop.f32.mrf.mxu0  ;;  %1415 = vmatpush.bf16.msra.mxu0 %v2112_v52 }
  0xac   :  { %v1140_v20 = vadd.f32 %v2126_v18, %v1139_v19  ;;  %v1152_v21 = vpop.f32.mrf.mxu1 }
  0xae   :  { %v1153_v22 = vadd.f32 %v1152_v21, %v1140_v20 }
  0xb3   :  { %v1165_v23 = vpop.f32.mrf.mxu2  ;;  %v1141_v26 = vpop.f32.mrf.mxu0 }
  0xb4   :  { %v1166_v24 = vadd.f32 %v1165_v23, %v1153_v22  ;;  %v1178_v25 = vpop.f32.mrf.mxu3  ;;  %v1154_v28 = vpop.f32.mrf.mxu1 }
  0xb6   :  { %v1179_v27 = vadd.f32 %v1178_v25, %v1166_v24 }
  0xbb   :  { %v1167_v29 = vpop.f32.mrf.mxu2 }
  0xbc   :  { %v1180_v30 = vpop.f32.mrf.mxu3 }
  0xcb   :  { %v1191_v31 = vpop.f32.mrf.mxu0 }
  0xcc   :  { %v1204_v32 = vpop.f32.mrf.mxu1  ;;  %v1192_v48 = vadd.f32 %v1191_v31, %v1179_v27 }
  0xce   :  { %v1205_v53 = vadd.f32 %v1204_v32, %v1192_v48 }
  0xd3   :  { %v1217_v33 = vpop.f32.mrf.mxu2  ;;  %v1193_v36 = vpop.f32.mrf.mxu0 }
  0xd4   :  { %v1230_v34 = vpop.f32.mrf.mxu3  ;;  %v1206_v37 = vpop.f32.mrf.mxu1  ;;  %v1218_v55 = vadd.f32 %v1217_v33, %v1205_v53 }
  0xd6   :  { %v1231_v58 = vadd.f32 %v1230_v34, %v1218_v55 }
  0xdb   :  { %v1219_v40 = vpop.f32.mrf.mxu2 }
  0xdc   :  { %v1232_v41 = vpop.f32.mrf.mxu3 }
  0xeb   :  { %v1243_v44 = vpop.f32.mrf.mxu0 }
  0xec   :  { %v1256_v46 = vpop.f32.mrf.mxu1  ;;  %v1244_v59 = vadd.f32 %v1243_v44, %v1231_v58 }
  0xee   :  { %v1257_v60 = vadd.f32 %v1256_v46, %v1244_v59 }
  0xf3   :  { %v1269_v49 = vpop.f32.mrf.mxu2  ;;  %v1245_v51 = vpop.f32.mrf.mxu0 }
  0xf4   :  { %v1282_v50 = vpop.f32.mrf.mxu3  ;;  %v1258_v54 = vpop.f32.mrf.mxu1  ;;  %v1270_v61 = vadd.f32 %v1269_v49, %v1257_v60 }
  0xf6   :  { %v1283_v62 = vadd.f32 %v1282_v50, %v1270_v61 }
  0xfb   :  { %v1271_v56 = vpop.f32.mrf.mxu2 }
  0xfc   :  { %v1284_v57 = vpop.f32.mrf.mxu3 }
 0x10b   :  { %v1295_v63 = vpop.f32.mrf.mxu0 }
 0x10c   :  { %v1308_v0 = vpop.f32.mrf.mxu1  ;;  %v1296_v1 = vadd.f32 %v1295_v63, %v1283_v62 }
 0x10e   :  { %v1309_v2 = vadd.f32 %v1308_v0, %v1296_v1 }
 0x113   :  { %v1321_v3 = vpop.f32.mrf.mxu2  ;;  %v1297_v6 = vpop.f32.mrf.mxu0 }
 0x114   :  { %v1334_v4 = vpop.f32.mrf.mxu3  ;;  %v1322_v5 = vadd.f32 %v1321_v3, %v1309_v2  ;;  %v1310_v7 = vpop.f32.mrf.mxu1 }
 0x116   :  { %v1335_v8 = vadd.f32 %v1334_v4, %v1322_v5 }
 0x118   :  { %v1338_v9 = vmax.f32 %v1335_v8, 0.0 }
 0x11a   :  { %v1339_v10 = vpack.c.bf16 %v1338_v9, %v1338_v9 }
 0x11b   :  { %v1323_v11 = vpop.f32.mrf.mxu2 }
 0x11c   :  { %v1336_v12 = vpop.f32.mrf.mxu3  ;;  %1416 = vmatmul.bf16.vlgmr.msra.gmra.mxu0 %v1339_v10 }
 0x199   :  { %v1417_v14 = vpop.f32.mrf.mxu0 }
 0x19a   :  { %v1418_v15 = vadd.f32 %v2127_v13, %v1417_v14 }
 0x19c   :  { %1421 = vst [vmem:[#allocation8] sm:$0x3] %v1418_v15 }
 0x19d   :  { %1432 = dma.vmem_to_hbm [thread:$0]  %s1428_s26, 32, %s1430_s29, [#allocation4]  }
 0x1a1   :  { %v1419_v16 = vpop.f32.mrf.mxu0 }
 0x1a2   :  { %2228 = dma.done.wait [#allocation4], 32  }
 0x1a3   :  { %2229 = vsyncadd [#allocation4], 4294967264 }
 0x1a4   :  { %1437 = vsyncpa [#allocation3], 1 }
 0x1a5   :  { %1438 = vsyncpa [#allocation6], 1 }
 0x1a6   :  { %1439 = vsyncpa [#allocation4], 1 }

// kernel: mnist_cnn_forward.2
= control target key start
LH: loop header
LB: loop body
LE: loop exit
PB: predicated region body
PF: predicated region fallthrough
CT: control target
= control target key end

     0   :  { %s21087_s0 = inlined_call_operand.vmem [shape: bf16[2,576,32], index: 0, kind: input, shape index: {}]   ;;  %s21088_s1 = inlined_call_operand.vmem [shape: bf16[32,128], index: 1, kind: input, shape index: {}]   ;;  %s21089_s2 = inlined_call_operand.vmem [shape: f32[1,128], index: 2, kind: input, shape index: {}]   ;;  %s21090_s3 = inlined_call_operand.vmem [shape: f32[1,128], index: 3, kind: input, shape index: {}]   ;;  %s21091_s4 = inlined_call_operand.vmem [shape: f32[1,128], index: 4, kind: input, shape index: {}]   ;;  %s21092_s5 = inlined_call_operand.vmem [shape: bf16[272,576], index: 5, kind: input, shape index: {}]   ;;  %s21093_s6 = inlined_call_operand.vmem [shape: bf16[25,128,128], index: 6, kind: input, shape index: {}]   ;;  %s21094_s7 = inlined_call_operand.vmem [shape: f32[1,128], index: 7, kind: input, shape index: {}]   ;;  %s21095_s8 = inlined_call_operand.vmem [shape: f32[1,128], index: 8, kind: input, shape index: {}]   ;;  %s21096_s9 = inlined_call_operand.hbm [shape: f32[1,128], index: 9, kind: input, shape index: {}]   ;;  %s21097_s10 = inlined_call_operand.vmem [shape: bf16[176,192], index: 10, kind: input, shape index: {}]   ;;  %s21098_s11 = inlined_call_operand.vmem [shape: bf16[25,128,128], index: 11, kind: input, shape index: {}]   ;;  %s21099_s12 = inlined_call_operand.hbm [shape: f32[1,128], index: 12, kind: input, shape index: {}]   ;;  %s21100_s13 = inlined_call_operand.hbm [shape: f32[1,128], index: 13, kind: input, shape index: {}]   ;;  %s21101_s14 = inlined_call_operand.hbm [shape: f32[1,128], index: 14, kind: input, shape index: {}]   ;;  %s21102_s15 = inlined_call_operand.hbm [shape: bf16[16,96], index: 15, kind: input, shape index: {}]   ;;  %s21103_s16 = inlined_call_operand.vmem [shape: bf16[2,16,128], index: 16, kind: output, shape index: {}]  }
   0x1   :  { %21270 = sst [smem:[#allocation207_spill]] %s21087_s0 }
   0x2   :  { %21271 = sst [smem:[#allocation208_spill]] %s21096_s9 }
   0x3   :  { %21272 = sst [smem:[#allocation209_spill]] %s21099_s12 }
   0x4   :  { %21273 = sst [smem:[#allocation210_spill]] %s21101_s14 }
   0x5   :  { %21 = vsyncpa [#allocation3], 0 }
   0x6   :  { %22 = vsyncpa [#allocation5], 0 }
   0x7   :  { %23 = vsyncpa [#allocation8], 0  ;;  %s14695_s21 = smov 0  }
   0x8 LB: > { %21274 = sst [smem:[#allocation13_spill]] %s14601_s21  ;;  %s14704_s25 = sadd.s32 4294967295, %s14601_s21   ;;  %s14601_s21 = sphi %s14695_s21, %s29_s21  }
   0x9   : > { %s21275_s12 = sld [smem:[#allocation209_spill]]  ;;  %p10772_p0 = scmp.ge.s32.totalorder %s14601_s21, 1 }
   0xa   : > { %p401_p1 = scmp.lt.s32.totalorder %s14601_s21, 3  ;;  %p14396_p2 = scmp.eq.s32.totalorder %s14704_s25, 0 }
   0xb   : > { %s14603_s27 = smov [#allocation4]   ;;  %s21277_s14 = sld [smem:[#allocation210_spill]] }
   0xc   : > { %p14709_p3 = pnand %p10772_p0, %p401_p1  ;;  %s457_s28 = sshll.u32 %s14603_s27, 4  ;;  %s458_s28 = int_to_ptr.vmem [resolvable:$true] %s457_s28 }
   0xd   : > { %s21278_s9 = sld [smem:[#allocation208_spill]]  ;;  %s14604_s22 = smov [#allocation7]  }
   0xe   : > { %p14380_p4 = pneg %p14709_p3  ;;  %s481_s23 = sshll.u32 %s14604_s22, 4  ;;  %s482_s23 = int_to_ptr.vmem [resolvable:$true] %s481_s23 }
   0xf   : > { %s455_s24 = sshll.u32 %s21275_s12, 4  ;;  %s14605_s27 = smov [#allocation2]   ;;  %s456_s24 = int_to_ptr.hbm [resolvable:$true] %s455_s24 }
  0x10   : > { %p14723_p5 = pnand %p14396_p2, %p14380_p4  ;;  %s439_s29 = sshll.u32 %s14605_s27, 4  ;;  %s440_s29 = int_to_ptr.vmem [resolvable:$true] %s439_s29 }
  0x11   : > { %s479_s0 = sshll.u32 %s21277_s14, 4  ;;  %s467_s18 = sshll.u32 %s21100_s13, 4  ;;  %s480_s0 = int_to_ptr.hbm [resolvable:$true] %s479_s0  ;;  %s468_s18 = int_to_ptr.hbm [resolvable:$true] %s467_s18 }
  0x12   : > { %14386 = dma.hbm_to_vmem [thread:$0]  (!%p14723_p5), %s456_s24, 16, %s458_s28, [#allocation5]  }
  0x13   : > { %s437_s19 = sshll.u32 %s21278_s9, 4  ;;  %s490_s12 = sshll.u32 %s21102_s15, 4  ;;  %s438_s19 = int_to_ptr.hbm [resolvable:$true] %s437_s19  ;;  %s491_s12 = int_to_ptr.hbm [resolvable:$true] %s490_s12 }
  0x14   : > { %14392 = dma.hbm_to_vmem [thread:$0]  (!%p14723_p5), %s480_s0, 16, %s482_s23, [#allocation8]  }
  0x15   : > { %14383 = dma.hbm_to_vmem [thread:$0]  (!%p14723_p5), %s438_s19, 16, %s440_s29, [#allocation3]  }
  0x16   : > { %s14606_s14 = smov [#allocation6]   ;;  %s14607_s24 = smov [#allocation9]  }
  0x17   : > { %s469_s21 = sshll.u32 %s14606_s14, 4  ;;  %s492_s28 = sshll.u32 %s14607_s24, 4  ;;  %s470_s21 = int_to_ptr.vmem [resolvable:$true] %s469_s21  ;;  %s493_s28 = int_to_ptr.vmem [resolvable:$true] %s492_s28 }
  0x18   : > { %14389 = dma.hbm_to_vmem [thread:$0]  (!%p14723_p5), %s468_s18, 16, %s470_s21, [#allocation5]  }
  0x19   : > { %s14608_s0 = smov 64   ;;  %s14609_s23 = smov 4  }
  0x1a   : > { %14395 = dma.hbm_to_vmem [thread:$0]  (!%p14723_p5), %s491_s12, 128, %s493_s28, [#allocation8], %s14608_s0, %s14608_s0, %s14609_s23  }
  0x1b   : > { %516 = sbr.rel (%p14709_p3) target bundleno = 3570 (0xdf2), region = 84 }
  0x20   : > { %14588 = dma.done.wait (%p14396_p2), [#allocation3], 16  }
  0x21   : > { %14590 = vsyncadd (%p14396_p2), [#allocation3], 4294967280 }
  0x22   : > { %14592 = dma.done.wait (%p14396_p2), [#allocation5], 32  }
  0x23   : > { %14594 = vsyncadd (%p14396_p2), [#allocation5], 4294967264 }
  0x24   : > { %14596 = dma.done.wait (%p14396_p2), [#allocation8], 144  }
  0x25   : > { %14598 = vsyncadd (%p14396_p2), [#allocation8], 4294967152  ;;  %p587_p6 = scmp.lt.s32.totalorder %s14704_s25, 1  ;;  %v13845_v0 = vld [vmem:[%s21088_s1 + $0x8] sm:$0xff]  ;;  %v13844_v1 = vld [vmem:[%s21088_s1] sm:$0xff]  ;;  %s21280_s27 = sld [smem:[#allocation207_spill]] }
  0x26   : > { %985 = vmatpush.bf16.msra.mxu0 %v13845_v0  ;;  %vm870_vm0 = vcmask 261120   ;;  %v14792_v10 = vld [vmem:[%s21089_s2] ss:$0 sm:$0xff]  ;;  %vm1955_vm1 = vcmask 523264   ;;  %vm3397_vm2 = vcmask 1045504   ;;  %vm2977_vm5 = vcmask 1046528  }
  0x27   : > { %s22245_s25 = smov (!%p587_p6, %s14704_s25), 1  ;;  %v14800_v15 = vld [vmem:[%s21090_s3] ss:$0 sm:$0xff]  ;;  %vm2601_vm3 = vsmask.f32 7424  ;;  %vm10643_vm6 = vcmask 785408  }
  0x28   : > { %s14359_s9 = smul.u32 288, %s22245_s25  ;;  %v14807_v20 = vld [vmem:[%s21091_s4] ss:$0 sm:$0xff]  ;;  %vm3173_vm4 = vsmask.f32 6400  ;;  %s13807_s12 = sshll.u32 %s22245_s25, 3 }
  0x29   : > { %s596_s21 = scalar_lea.vmem %s21103_s16, %s13807_s12 }
  0x2a   : > { %986 = vmatpush.bf16.msra.mxu0 %v13844_v1 }
  0x2b   : > { %s14771_s29 = scalar_lea.vmem %s21280_s27, %s14359_s9 }
  0x2c   : > { %v13808_v2 = vld [vmem:[%s14771_s29] sm:$0xff]  ;;  %v13809_v3 = vld [vmem:[%s14771_s29 + $0x8] sm:$0xff]  ;;  %v13810_v4 = vld [vmem:[%s14771_s29 + $0x10] sm:$0xff] }
  0x2d   : > { %10940 = vmatmul.msk.bf16.vlgmr.msra.gmra.mxu0 %vm870_vm0, %v13808_v2  ;;  %v13811_v5 = vld [vmem:[%s14771_s29 + $0x18] sm:$0xff]  ;;  %v13812_v6 = vld [vmem:[%s14771_s29 + $0x20] sm:$0xff]  ;;  %v13813_v7 = vld [vmem:[%s14771_s29 + $0x28] sm:$0xff] }
  0x2e   : > { %v13814_v8 = vld [vmem:[%s14771_s29 + $0x30] sm:$0xff]  ;;  %v13815_v9 = vld [vmem:[%s14771_s29 + $0x38] sm:$0xff]  ;;  %v13816_v11 = vld [vmem:[%s14771_s29 + $0x40] sm:$0xff] }
  0x2f   : > { %v13817_v22 = vld [vmem:[%s14771_s29 + $0x48] sm:$0xff]  ;;  %v13818_v34 = vld [vmem:[%s14771_s29 + $0x50] sm:$0xff]  ;;  %v13819_v46 = vld [vmem:[%s14771_s29 + $0x58] sm:$0xff] }
  0x30   : > { %v13820_v58 = vld [vmem:[%s14771_s29 + $0x60] sm:$0xff]  ;;  %v13821_v0 = vld [vmem:[%s14771_s29 + $0x68] sm:$0xff] }
  0x3d   : > { %10941 = vmatmul.msk.bf16.gmra.mxu0 %vm870_vm0, %v13809_v3  ;;  %v13822_v3 = vld [vmem:[%s14771_s29 + $0x70] sm:$0xff] }
  0x4d   : > { %10942 = vmatmul.msk.bf16.gmra.mxu0 %vm870_vm0, %v13810_v4 }
  0x5d   : > { %10943 = vmatmul.msk.bf16.gmra.mxu0 %vm870_vm0, %v13811_v5 }
  0x6d   : > { %10944 = vmatmul.msk.bf16.gmra.mxu0 %vm870_vm0, %v13812_v6  ;;  %v13823_v6 = vld [vmem:[%s14771_s29 + $0x78] sm:$0xff] }
  0x7d   : > { %10945 = vmatmul.msk.bf16.gmra.mxu0 %vm870_vm0, %v13813_v7 }
  0x8d   : > { %10946 = vmatmul.msk.bf16.gmra.mxu0 %vm870_vm0, %v13814_v8 }
  0x9d   : > { %10947 = vmatmul.msk.bf16.gmra.mxu0 %vm870_vm0, %v13815_v9 }
  0xaa   : > { %v988_v12 = vpop.f32.mrf.mxu0 }
  0xab   : > { %v989_v13 = vadd.f32 %v14792_v10, %v988_v12 }
  0xad   : > { %10948 = vmatmul.msk.bf16.gmra.mxu0 %vm870_vm0, %v13816_v11  ;;  %v1168_v14 = vmax.f32 %v989_v13, 0.0 }
  0xaf   : > { %v1244_v18 = vmul.f32 %v14800_v15, %v1168_v14 }
  0xb1   : > { %v14812_v23 = vadd.f32 %v14807_v20, %v1244_v18 }
  0xb2   : > { %v990_v16 = vpop.f32.mrf.mxu0 }
  0xb3   : > { %v991_v17 = vadd.f32 %v14792_v10, %v990_v16 }
  0xb5   : > { %v1169_v19 = vmax.f32 %v991_v17, 0.0 }
  0xb7   : > { %v1245_v21 = vmul.f32 %v14800_v15, %v1169_v19 }
  0xb9   : > { %v14815_v24 = vadd.f32 %v14807_v20, %v1245_v21 }
  0xba   : > { %v993_v25 = vpop.f32.mrf.mxu0 }
  0xbb   : > { %v1392_v26 = vpack.c.bf16 %v14815_v24, %v14812_v23  ;;  %v994_v27 = vadd.f32 %v14792_v10, %v993_v25 }
  0xbd   : > { %10949 = vmatmul.msk.bf16.gmra.mxu0 %vm870_vm0, %v13817_v22  ;;  %v1170_v28 = vmax.f32 %v994_v27, 0.0 }
  0xbf   : > { %v1246_v31 = vmul.f32 %v14800_v15, %v1170_v28 }
  0xc1   : > { %v14826_v35 = vadd.f32 %v14807_v20, %v1246_v31 }
  0xc2   : > { %v995_v29 = vpop.f32.mrf.mxu0 }
  0xc3   : > { %v996_v30 = vadd.f32 %v14792_v10, %v995_v29 }
  0xc5   : > { %v1171_v32 = vmax.f32 %v996_v30, 0.0 }
  0xc7   : > { %v1247_v33 = vmul.f32 %v14800_v15, %v1171_v32 }
  0xc9   : > { %v14829_v36 = vadd.f32 %v14807_v20, %v1247_v33  ;;  %v13824_v33 = vld [vmem:[%s14771_s29 + $0x80] sm:$0xff] }
  0xca   : > { %v998_v37 = vpop.f32.mrf.mxu0 }
  0xcb   : > { %v1393_v38 = vpack.c.bf16 %v14829_v36, %v14826_v35  ;;  %v999_v39 = vadd.f32 %v14792_v10, %v998_v37 }
  0xcd   : > { %10950 = vmatmul.msk.bf16.gmra.mxu0 %vm870_vm0, %v13818_v34  ;;  %v1172_v40 = vmax.f32 %v999_v39, 0.0 }
  0xcf   : > { %v1248_v43 = vmul.f32 %v14800_v15, %v1172_v40 }
  0xd1   : > { %v14840_v47 = vadd.f32 %v14807_v20, %v1248_v43 }
  0xd2   : > { %v1000_v41 = vpop.f32.mrf.mxu0 }
  0xd3   : > { %v1001_v42 = vadd.f32 %v14792_v10, %v1000_v41 }
  0xd5   : > { %v1173_v44 = vmax.f32 %v1001_v42, 0.0 }
  0xd7   : > { %v1249_v45 = vmul.f32 %v14800_v15, %v1173_v44 }
  0xd9   : > { %v14843_v48 = vadd.f32 %v14807_v20, %v1249_v45 }
  0xda   : > { %v1003_v49 = vpop.f32.mrf.mxu0 }
  0xdb   : > { %v1394_v50 = vpack.c.bf16 %v14843_v48, %v14840_v47  ;;  %v1004_v51 = vadd.f32 %v14792_v10, %v1003_v49 }
  0xdd   : > { %10951 = vmatmul.msk.bf16.gmra.mxu0 %vm870_vm0, %v13819_v46  ;;  %v1174_v52 = vmax.f32 %v1004_v51, 0.0 }
  0xdf   : > { %v1250_v55 = vmul.f32 %v14800_v15, %v1174_v52 }
  0xe1   : > { %v14854_v59 = vadd.f32 %v14807_v20, %v1250_v55 }
  0xe2   : > { %v1005_v53 = vpop.f32.mrf.mxu0 }
  0xe3   : > { %v1006_v54 = vadd.f32 %v14792_v10, %v1005_v53 }
  0xe5   : > { %v1175_v56 = vmax.f32 %v1006_v54, 0.0 }
  0xe7   : > { %v1251_v57 = vmul.f32 %v14800_v15, %v1175_v56 }
  0xe9   : > { %v14857_v60 = vadd.f32 %v14807_v20, %v1251_v57 }
  0xea   : > { %v1008_v61 = vpop.f32.mrf.mxu0 }
  0xeb   : > { %v1395_v62 = vpack.c.bf16 %v14857_v60, %v14854_v59  ;;  %v1009_v30 = vadd.f32 %v14792_v10, %v1008_v61  ;;  %v13826_v59 = vld [vmem:[%s14771_s29 + $0x90] sm:$0xff] }
  0xed   : > { %10952 = vmatmul.msk.bf16.gmra.mxu0 %vm870_vm0, %v13820_v58  ;;  %v1176_v44 = vmax.f32 %v1009_v30, 0.0 }
  0xef   : > { %v1252_v54 = vmul.f32 %v14800_v15, %v1176_v44  ;;  %v13829_v44 = vld [vmem:[%s14771_s29 + $0xa8] sm:$0xff] }
  0xf2   : > { %v1010_v63 = vpop.f32.mrf.mxu0 }
  0xf3   : > { %v1011_v25 = vadd.f32 %v14792_v10, %v1010_v63 }
  0xf5   : > { %v1177_v40 = vmax.f32 %v1011_v25, 0.0 }
  0xf7   : > { %v1253_v51 = vmul.f32 %v14800_v15, %v1177_v40 }
  0xf9   : > { %v1329_v63 = vadd.f32 %v14807_v20, %v1253_v51 }
  0xfa   : > { %v1013_v1 = vpop.f32.mrf.mxu0 }
  0xfb   : > { %v1014_v18 = vadd.f32 %v14792_v10, %v1013_v1 }
  0xfd   : > { %10953 = vmatmul.msk.bf16.gmra.mxu0 %vm870_vm0, %v13821_v0  ;;  %v1178_v31 = vmax.f32 %v1014_v18, 0.0 }
  0xff   : > { %v1254_v45 = vmul.f32 %v14800_v15, %v1178_v31 }
 0x101   : > { %v1330_v56 = vadd.f32 %v14807_v20, %v1254_v45 }
 0x102   : > { %v1015_v2 = vpop.f32.mrf.mxu0 }
 0x103   : > { %v1016_v14 = vadd.f32 %v14792_v10, %v1015_v2  ;;  %v1328_v2 = vadd.f32 %v14807_v20, %v1252_v54  ;;  %v10978_v54 = vld [vmem:[%s21092_s5] sm:$0xf] }
 0x105   : > { %v1179_v27 = vmax.f32 %v1016_v14, 0.0 }
 0x107   : > { %v1255_v41 = vmul.f32 %v14800_v15, %v1179_v27 }
 0x109   : > { %v1331_v53 = vadd.f32 %v14807_v20, %v1255_v41 }
 0x10a   : > { %v1018_v4 = vpop.f32.mrf.mxu0 }
 0x10b   : > { %v1019_v11 = vadd.f32 %v14792_v10, %v1018_v4  ;;  %v1397_v61 = vpack.c.bf16 %v1331_v53, %v1330_v56  ;;  %v1396_v4 = vpack.c.bf16 %v1329_v63, %v1328_v2  ;;  %v13831_v53 = vld [vmem:[%s14771_s29 + $0xb8] sm:$0xff] }
 0x10d   : > { %10954 = vmatmul.msk.bf16.gmra.mxu0 %vm870_vm0, %v13822_v3  ;;  %v1180_v19 = vmax.f32 %v1019_v11, 0.0 }
 0x10f   : > { %v1256_v32 = vmul.f32 %v14800_v15, %v1180_v19  ;;  %v13827_v19 = vld [vmem:[%s14771_s29 + $0x98] sm:$0xff] }
 0x111   : > { %v1332_v49 = vadd.f32 %v14807_v20, %v1256_v32 }
 0x112   : > { %v1020_v5 = vpop.f32.mrf.mxu0 }
 0x113   : > { %v1021_v9 = vadd.f32 %v14792_v10, %v1020_v5  ;;  %v13825_v5 = vld [vmem:[%s14771_s29 + $0x88] sm:$0xff] }
 0x115   : > { %v1181_v16 = vmax.f32 %v1021_v9, 0.0 }
 0x117   : > { %v1257_v28 = vmul.f32 %v14800_v15, %v1181_v16 }
 0x119   : > { %v1333_v43 = vadd.f32 %v14807_v20, %v1257_v28 }
 0x11a   : > { %v1023_v7 = vpop.f32.mrf.mxu0 }
 0x11b   : > { %v1024_v8 = vadd.f32 %v14792_v10, %v1023_v7  ;;  %v1398_v52 = vpack.c.bf16 %v1333_v43, %v1332_v49  ;;  %v13830_v49 = vld [vmem:[%s14771_s29 + $0xb0] sm:$0xff] }
 0x11d   : > { %10955 = vmatmul.msk.bf16.gmra.mxu0 %vm870_vm0, %v13823_v6  ;;  %v1182_v12 = vmax.f32 %v1024_v8, 0.0 }
 0x11f   : > { %v1258_v21 = vmul.f32 %v14800_v15, %v1182_v12 }
 0x121   : > { %v1334_v34 = vadd.f32 %v14807_v20, %v1258_v21 }
 0x122   : > { %v1025_v13 = vpop.f32.mrf.mxu0 }
 0x123   : > { %v1026_v17 = vadd.f32 %v14792_v10, %v1025_v13 }
 0x125   : > { %v1183_v22 = vmax.f32 %v1026_v17, 0.0 }
 0x127   : > { %v1259_v29 = vmul.f32 %v14800_v15, %v1183_v22 }
 0x129   : > { %v1335_v37 = vadd.f32 %v14807_v20, %v1259_v29 }
 0x12a   : > { %v1028_v39 = vpop.f32.mrf.mxu0 }
 0x12b   : > { %v1399_v42 = vpack.c.bf16 %v1335_v37, %v1334_v34  ;;  %v1029_v46 = vadd.f32 %v14792_v10, %v1028_v39  ;;  %v13828_v37 = vld [vmem:[%s14771_s29 + $0xa0] sm:$0xff] }
 0x12d   : > { %10956 = vmatmul.msk.bf16.gmra.mxu0 %vm870_vm0, %v13824_v33  ;;  %2007 = vmatpush.bf16.msra.mxu1 %v1399_v42  ;;  %v1184_v55 = vmax.f32 %v1029_v46, 0.0 }
 0x12f   : > { %v1260_v0 = vmul.f32 %v14800_v15, %v1184_v55  ;;  %v13848_v55 = vld [vmem:[%s21092_s5 + $0x10] sm:$0xf0] }
 0x131   : > { %2008 = vmatpush.bf16.msra.mxu1 %v1398_v52  ;;  %v14900_v6 = vadd.f32 %v14807_v20, %v1260_v0 }
 0x132   : > { %v1030_v57 = vpop.f32.mrf.mxu0 }
 0x133   : > { %v1031_v58 = vadd.f32 %v14792_v10, %v1030_v57  ;;  %v10979_v57 = vor.u32 %v13848_v55, %v10978_v54 }
 0x135   : > { %v1185_v1 = vmax.f32 %v1031_v58, 0.0  ;;  %2009 = vmatpush.bf16.msra.mxu1 %v1397_v61 }
 0x137   : > { %v1261_v3 = vmul.f32 %v14800_v15, %v1185_v1 }
 0x139   : > { %2010 = vmatpush.bf16.msra.mxu1 %v1396_v4  ;;  %v14903_v7 = vadd.f32 %v14807_v20, %v1261_v3 }
 0x13a   : > { %v1033_v8 = vpop.f32.mrf.mxu0 }
 0x13b   : > { %v1400_v9 = vpack.c.bf16 %v14903_v7, %v14900_v6  ;;  %v1034_v11 = vadd.f32 %v14792_v10, %v1033_v8 }
 0x13d   : > { %10957 = vmatmul.msk.bf16.gmra.mxu0 %vm870_vm0, %v13825_v5  ;;  %2011 = vmatpush.bf16.msra.mxu1 %v1395_v62  ;;  %v1186_v12 = vmax.f32 %v1034_v11, 0.0 }
 0x13f   : > { %v1262_v16 = vmul.f32 %v14800_v15, %v1186_v12 }
 0x141   : > { %2012 = vmatpush.bf16.msra.mxu1 %v1394_v50  ;;  %v14926_v47 = vadd.f32 %v14807_v20, %v1262_v16 }
 0x142   : > { %v1035_v13 = vpop.f32.mrf.mxu0 }
 0x143   : > { %v1036_v14 = vadd.f32 %v14792_v10, %v1035_v13 }
 0x145   : > { %v1187_v17 = vmax.f32 %v1036_v14, 0.0  ;;  %2013 = vmatpush.bf16.msra.mxu1 %v1393_v38 }
 0x147   : > { %v1263_v18 = vmul.f32 %v14800_v15, %v1187_v17 }
 0x149   : > { %2014 = vmatpush.bf16.msra.mxu1 %v1392_v26  ;;  %v14929_v48 = vadd.f32 %v14807_v20, %v1263_v18 }
 0x14a   : > { %v1038_v50 = vpop.f32.mrf.mxu0 }
 0x14b   : > { %v1401_v60 = vpack.c.bf16 %v14929_v48, %v14926_v47  ;;  %v1039_v35 = vadd.f32 %v14792_v10, %v1038_v50  ;;  %v11038_v47 = vld [vmem:[%s21092_s5 + $0x78] sm:$0xf]  ;;  %v13863_v48 = vld [vmem:[%s21092_s5 + $0x88] sm:$0xf0] }
 0x14c   : > { %2015 = vmatmul.bf16.vlgmr.msra.gmra.mxu1 %v10979_v57 }
 0x14d   : > { %10958 = vmatmul.msk.bf16.gmra.mxu0 %vm870_vm0, %v13826_v59  ;;  %v1188_v36 = vmax.f32 %v1039_v35, 0.0  ;;  %v13832_v35 = vld [vmem:[%s14771_s29 + $0xc0] sm:$0xff] }
 0x14f   : > { %v1264_v24 = vmul.f32 %v14800_v15, %v1188_v36 }
 0x151   : > { %v14940_v21 = vadd.f32 %v14807_v20, %v1264_v24  ;;  %v13853_v24 = vld [vmem:[%s21092_s5 + $0x38] sm:$0xf0] }
 0x152   : > { %v1040_v38 = vpop.f32.mrf.mxu0 }
 0x153   : > { %v1041_v23 = vadd.f32 %v14792_v10, %v1040_v38 }
 0x155   : > { %v1189_v26 = vmax.f32 %v1041_v23, 0.0  ;;  %v10998_v23 = vld [vmem:[%s21092_s5 + $0x28] sm:$0xf] }
 0x157   : > { %v1265_v62 = vmul.f32 %v14800_v15, %v1189_v26 }
 0x159   : > { %v14943_v22 = vadd.f32 %v14807_v20, %v1265_v62  ;;  %v10999_v62 = vor.u32 %v13853_v24, %v10998_v23 }
 0x15a   : > { %v1043_v25 = vpop.f32.mrf.mxu0 }
 0x15b   : > { %v1402_v27 = vpack.c.bf16 %v14943_v22, %v14940_v21  ;;  %v1044_v28 = vadd.f32 %v14792_v10, %v1043_v25 }
 0x15c   : > { %2020 = vmatmul.bf16.gmra.mxu1 %v10999_v62  ;;  %v11058_v62 = vld [vmem:[%s21092_s5 + $0xa0] sm:$0xf] }
 0x15d   : > { %10959 = vmatmul.msk.bf16.gmra.mxu0 %vm870_vm0, %v13827_v19  ;;  %v1190_v29 = vmax.f32 %v1044_v28, 0.0 }
 0x15f   : > { %v1266_v32 = vmul.f32 %v14800_v15, %v1190_v29 }
 0x161   : > { %v14954_v39 = vadd.f32 %v14807_v20, %v1266_v32 }
 0x162   : > { %v1045_v30 = vpop.f32.mrf.mxu0 }
 0x163   : > { %v1046_v31 = vadd.f32 %v14792_v10, %v1045_v30 }
 0x165   : > { %v1191_v33 = vmax.f32 %v1046_v31, 0.0 }
 0x167   : > { %v1267_v34 = vmul.f32 %v14800_v15, %v1191_v33 }
 0x169   : > { %v14957_v40 = vadd.f32 %v14807_v20, %v1267_v34 }
 0x16a   : > { %v1048_v41 = vpop.f32.mrf.mxu0 }
 0x16b   : > { %v1403_v42 = vpack.c.bf16 %v14957_v40, %v14954_v39  ;;  %v1049_v18 = vadd.f32 %v14792_v10, %v1048_v41  ;;  %v13846_v39 = vld [vmem:[%s21092_s5 + $0x4] sm:$0xf]  ;;  %v10980_v40 = vld [vmem:[%s21092_s5 + $0x14] sm:$0xf0] }
 0x16c   : > { %v10983_v22 = vor.u32 %v13846_v39, %v10980_v40  ;;  %v13866_v39 = vld [vmem:[%s21092_s5 + $0xa4] sm:$0xf]  ;;  %v11060_v40 = vld [vmem:[%s21092_s5 + $0xb4] sm:$0xf0] }
 0x16d   : > { %10960 = vmatmul.msk.bf16.gmra.mxu0 %vm870_vm0, %v13828_v37  ;;  %v1192_v30 = vmax.f32 %v1049_v18, 0.0 }
 0x172   : > { %v1050_v43 = vpop.f32.mrf.mxu0 }
 0x173   : > { %v1051_v13 = vadd.f32 %v14792_v10, %v1050_v43  ;;  %v1268_v43 = vmul.f32 %v14800_v15, %v1192_v30 }
 0x175   : > { %v1193_v19 = vmax.f32 %v1051_v13, 0.0  ;;  %v1344_v55 = vadd.f32 %v14807_v20, %v1268_v43 }
 0x177   : > { %v1269_v34 = vmul.f32 %v14800_v15, %v1193_v19  ;;  %v13868_v19 = vld [vmem:[%s21092_s5 + $0xb0] sm:$0xf0] }
 0x178   : > { %v11059_v30 = vor.u32 %v13868_v19, %v11058_v62 }
 0x17a   : > { %v1053_v45 = vpop.f32.mrf.mxu0 }
 0x17b   : > { %v1054_v5 = vadd.f32 %v14792_v10, %v1053_v45 }
 0x17d   : > { %10961 = vmatmul.msk.bf16.gmra.mxu0 %vm870_vm0, %v13829_v44  ;;  %v1194_v59 = vmax.f32 %v1054_v5, 0.0 }
 0x17f   : > { %v1270_v31 = vmul.f32 %v14800_v15, %v1194_v59 }
 0x181   : > { %v1346_v45 = vadd.f32 %v14807_v20, %v1270_v31 }
 0x182   : > { %v1055_v46 = vpop.f32.mrf.mxu0 }
 0x183   : > { %v1056_v2 = vadd.f32 %v14792_v10, %v1055_v46 }
 0x185   : > { %v1195_v14 = vmax.f32 %v1056_v2, 0.0 }
 0x187   : > { %v1271_v25 = vmul.f32 %v14800_v15, %v1195_v14 }
 0x189   : > { %v1347_v41 = vadd.f32 %v14807_v20, %v1271_v25 }
 0x18a   : > { %v1058_v51 = vpop.f32.mrf.mxu0 }
 0x18b   : > { %v1059_v63 = vadd.f32 %v14792_v10, %v1058_v51  ;;  %v1405_v51 = vpack.c.bf16 %v1347_v41, %v1346_v45  ;;  %v11020_v45 = vld [vmem:[%s21092_s5 + $0x64] sm:$0xf0] }
 0x18d   : > { %10962 = vmatmul.msk.bf16.gmra.mxu0 %vm870_vm0, %v13830_v49  ;;  %v1196_v8 = vmax.f32 %v1059_v63, 0.0  ;;  %v13858_v63 = vld [vmem:[%s21092_s5 + $0x60] sm:$0xf0] }
 0x18f   : > { %v1272_v50 = vmul.f32 %v14800_v15, %v1196_v8 }
 0x191   : > { %v1348_v33 = vadd.f32 %v14807_v20, %v1272_v50 }
 0x192   : > { %v1060_v52 = vpop.f32.mrf.mxu0 }
 0x193   : > { %v1061_v61 = vadd.f32 %v14792_v10, %v1060_v52  ;;  %v1345_v52 = vadd.f32 %v14807_v20, %v1269_v34 }
 0x195   : > { %v1197_v3 = vmax.f32 %v1061_v61, 0.0  ;;  %v1404_v57 = vpack.c.bf16 %v1345_v52, %v1344_v55  ;;  %v11018_v61 = vld [vmem:[%s21092_s5 + $0x50] sm:$0xf]  ;;  %v11078_v52 = vld [vmem:[%s21092_s5 + $0xc8] sm:$0xf] }
 0x197   : > { %v1273_v16 = vmul.f32 %v14800_v15, %v1197_v3  ;;  %v11019_v3 = vor.u32 %v13858_v63, %v11018_v61  ;;  %v13861_v63 = vld [vmem:[%s21092_s5 + $0x7c] sm:$0xf] }
 0x199   : > { %v1349_v29 = vadd.f32 %v14807_v20, %v1273_v16  ;;  %2025 = vmatmul.bf16.gmra.mxu1 %v11019_v3 }
 0x19a   : > { %v1063_v56 = vpop.f32.mrf.mxu0 }
 0x19b   : > { %v1064_v58 = vadd.f32 %v14792_v10, %v1063_v56  ;;  %v1406_v37 = vpack.c.bf16 %v1349_v29, %v1348_v33 }
 0x19d   : > { %10963 = vmatmul.msk.bf16.gmra.mxu0 %vm870_vm0, %v13831_v53  ;;  %v1198_v0 = vmax.f32 %v1064_v58, 0.0  ;;  %v13833_v58 = vld [vmem:[%s14771_s29 + $0xc8] sm:$0xff] }
 0x19f   : > { %v1274_v11 = vmul.f32 %v14800_v15, %v1198_v0 }
 0x1a1   : > { %v1350_v36 = vadd.f32 %v14807_v20, %v1274_v11 }
 0x1a2   : > { %v1065_v1 = vpop.f32.mrf.mxu0 }
 0x1a3   : > { %v1066_v4 = vadd.f32 %v14792_v10, %v1065_v1 }
 0x1a5   : > { %v1199_v12 = vmax.f32 %v1066_v4, 0.0 }
 0x1a7   : > { %v1275_v17 = vmul.f32 %v14800_v15, %v1199_v12 }
 0x1a9   : > { %v1351_v38 = vadd.f32 %v14807_v20, %v1275_v17  ;;  %v11039_v17 = vor.u32 %v13863_v48, %v11038_v47  ;;  %v13883_v47 = vld [vmem:[%s21092_s5 + $0x128] sm:$0xf0] }
 0x1aa   : > { %v1068_v26 = vpop.f32.mrf.mxu0 }
 0x1ab   : > { %v1407_v28 = vpack.c.bf16 %v1351_v38, %v1350_v36  ;;  %v1069_v32 = vadd.f32 %v14792_v10, %v1068_v26  ;;  %2030 = vmatmul.bf16.gmra.mxu1 %v11039_v17  ;;  %v13851_v36 = vld [vmem:[%s21092_s5 + $0x2c] sm:$0xf]  ;;  %v11000_v38 = vld [vmem:[%s21092_s5 + $0x3c] sm:$0xf0]  ;;  %v13835_v26 = vld [vmem:[%s14771_s29 + $0xd8] sm:$0xff] }
 0x1ac   : > { %v11003_v24 = vor.u32 %v13851_v36, %v11000_v38  ;;  %v13888_v36 = vld [vmem:[%s21092_s5 + $0x150] sm:$0xf0] }
 0x1ad   : > { %10964 = vmatmul.msk.bf16.gmra.mxu0 %vm870_vm0, %v13832_v35  ;;  %2100 = vmatpush.bf16.msra.mxu2 %v1407_v28  ;;  %v1200_v44 = vmax.f32 %v1069_v32, 0.0 }
 0x1af   : > { %v1276_v53 = vmul.f32 %v14800_v15, %v1200_v44  ;;  %v13856_v44 = vld [vmem:[%s21092_s5 + $0x54] sm:$0xf] }
 0x1b1   : > { %2101 = vmatpush.bf16.msra.mxu2 %v1406_v37  ;;  %v15018_v0 = vadd.f32 %v14807_v20, %v1276_v53  ;;  %v13873_v53 = vld [vmem:[%s21092_s5 + $0xd8] sm:$0xf0] }
 0x1b2   : > { %v1070_v46 = vpop.f32.mrf.mxu0 }
 0x1b3   : > { %v1071_v49 = vadd.f32 %v14792_v10, %v1070_v46 }
 0x1b5   : > { %v1201_v54 = vmax.f32 %v1071_v49, 0.0  ;;  %2102 = vmatpush.bf16.msra.mxu2 %v1405_v51  ;;  %v11023_v49 = vor.u32 %v13856_v44, %v11020_v45  ;;  %v13836_v51 = vld [vmem:[%s14771_s29 + $0xe0] sm:$0xff]  ;;  %v13876_v45 = vld [vmem:[%s21092_s5 + $0xf4] sm:$0xf] }
 0x1b7   : > { %v1277_v56 = vmul.f32 %v14800_v15, %v1201_v54 }
 0x1b9   : > { %2103 = vmatpush.bf16.msra.mxu2 %v1404_v57  ;;  %v15021_v1 = vadd.f32 %v14807_v20, %v1277_v56  ;;  %v11079_v57 = vor.u32 %v13873_v53, %v11078_v52 }
 0x1ba   : > { %v1073_v2 = vpop.f32.mrf.mxu0 }
 0x1bb   : > { %v1408_v4 = vpack.c.bf16 %v15021_v1, %v15018_v0  ;;  %v1074_v5 = vadd.f32 %v14792_v10, %v1073_v2  ;;  %2035 = vmatmul.bf16.gmra.mxu1 %v11059_v30  ;;  %v11040_v2 = vld [vmem:[%s21092_s5 + $0x8c] sm:$0xf0] }
 0x1bc   : > { %v11043_v3 = vor.u32 %v13861_v63, %v11040_v2 }
 0x1bd   : > { %10965 = vmatmul.msk.bf16.gmra.mxu0 %vm870_vm0, %v13833_v58  ;;  %2104 = vmatpush.bf16.msra.mxu2 %v1403_v42  ;;  %v1202_v8 = vmax.f32 %v1074_v5, 0.0  ;;  %v13837_v5 = vld [vmem:[%s14771_s29 + $0xe8] sm:$0xff] }
 0x1bf   : > { %v1278_v13 = vmul.f32 %v14800_v15, %v1202_v8  ;;  %v11098_v8 = vld [vmem:[%s21092_s5 + $0xf0] sm:$0xf] }
 0x1c1   : > { %2105 = vmatpush.bf16.msra.mxu2 %v1402_v27  ;;  %v13834_v27 = vld [vmem:[%s14771_s29 + $0xd0] sm:$0xff] }
 0x1c2   : > { %v1075_v11 = vpop.f32.mrf.mxu0 }
 0x1c3   : > { %v1076_v12 = vadd.f32 %v14792_v10, %v1075_v11  ;;  %v13878_v11 = vld [vmem:[%s21092_s5 + $0x100] sm:$0xf0] }
 0x1c5   : > { %v1203_v14 = vmax.f32 %v1076_v12, 0.0  ;;  %2106 = vmatpush.bf16.msra.mxu2 %v1401_v60  ;;  %v15056_v60 = vadd.f32 %v14807_v20, %v1278_v13  ;;  %v11099_v13 = vor.u32 %v13878_v11, %v11098_v8 }
 0x1c7   : > { %v1279_v21 = vmul.f32 %v14800_v15, %v1203_v14 }
 0x1c9   : > { %2107 = vmatpush.bf16.msra.mxu2 %v1400_v9  ;;  %v15059_v42 = vadd.f32 %v14807_v20, %v1279_v21  ;;  %v11063_v21 = vor.u32 %v13866_v39, %v11060_v40 }
 0x1ca   : > { %v1078_v16 = vpop.f32.mrf.mxu0 }
 0x1cb   : > { %v1409_v6 = vpack.c.bf16 %v15059_v42, %v15056_v60  ;;  %v1079_v7 = vadd.f32 %v14792_v10, %v1078_v16  ;;  %2040 = vmatmul.bf16.gmra.mxu1 %v11079_v57  ;;  %v13842_v60 = vld [vmem:[%s14771_s29 + $0x110] sm:$0xff] }
 0x1cc   : > { %2108 = vmatmul.bf16.vlgmr.msra.gmra.mxu2 %v10983_v22  ;;  %v13838_v22 = vld [vmem:[%s14771_s29 + $0xf0] sm:$0xff] }
 0x1cd   : > { %10966 = vmatmul.msk.bf16.gmra.mxu0 %vm870_vm0, %v13834_v27  ;;  %v1204_v9 = vmax.f32 %v1079_v7, 0.0  ;;  %v11118_v27 = vld [vmem:[%s21092_s5 + $0x118] sm:$0xf]  ;;  %v13871_v7 = vld [vmem:[%s21092_s5 + $0xcc] sm:$0xf] }
 0x1ce   : > { %v11119_v16 = vor.u32 %v13883_v47, %v11118_v27 }
 0x1cf   : > { %v1280_v50 = vmul.f32 %v14800_v15, %v1204_v9  ;;  %v11080_v9 = vld [vmem:[%s21092_s5 + $0xdc] sm:$0xf0] }
 0x1d1   : > { %v15082_v25 = vadd.f32 %v14807_v20, %v1280_v50  ;;  %v15151_v50 = vpop.f32.mrf.mxu1 }
 0x1d2   : > { %v1080_v18 = vpop.f32.mrf.mxu0 }
 0x1d3   : > { %v1081_v59 = vadd.f32 %v14792_v10, %v1080_v18  ;;  %v11083_v18 = vor.u32 %v13871_v7, %v11080_v9 }
 0x1d5   : > { %v1205_v35 = vmax.f32 %v1081_v59, 0.0  ;;  %v13839_v59 = vld [vmem:[%s14771_s29 + $0xf8] sm:$0xff] }
 0x1d7   : > { %v1281_v23 = vmul.f32 %v14800_v15, %v1205_v35  ;;  %v11138_v35 = vld [vmem:[%s21092_s5 + $0x140] sm:$0xf] }
 0x1d9   : > { %v15085_v28 = vadd.f32 %v14807_v20, %v1281_v23  ;;  %v11139_v23 = vor.u32 %v13888_v36, %v11138_v35 }
 0x1da   : > { %v1083_v29 = vpop.f32.mrf.mxu0 }
 0x1db   : > { %v1410_v31 = vpack.c.bf16 %v15085_v28, %v15082_v25  ;;  %v1084_v32 = vadd.f32 %v14792_v10, %v1083_v29  ;;  %2045 = vmatmul.bf16.gmra.mxu1 %v11099_v13  ;;  %v15163_v29 = vpop.f32.mrf.mxu1  ;;  %v13893_v13 = vld [vmem:[%s21092_s5 + $0x178] sm:$0xf0]  ;;  %v13886_v25 = vld [vmem:[%s21092_s5 + $0x144] sm:$0xf]  ;;  %v11140_v28 = vld [vmem:[%s21092_s5 + $0x154] sm:$0xf0] }
 0x1dc   : > { %2113 = vmatmul.bf16.gmra.mxu2 %v11003_v24 }
 0x1dd   : > { %10967 = vmatmul.msk.bf16.gmra.mxu0 %vm870_vm0, %v13835_v26  ;;  %v1206_v33 = vmax.f32 %v1084_v32, 0.0 }
 0x1df   : > { %v1282_v41 = vmul.f32 %v14800_v15, %v1206_v33 }
 0x1e1   : > { %v15108_v54 = vadd.f32 %v14807_v20, %v1282_v41 }
 0x1e2   : > { %v1085_v34 = vpop.f32.mrf.mxu0 }
 0x1e3   : > { %v1086_v37 = vadd.f32 %v14792_v10, %v1085_v34 }
 0x1e5   : > { %v1207_v43 = vmax.f32 %v1086_v37, 0.0 }
 0x1e7   : > { %v1283_v46 = vmul.f32 %v14800_v15, %v1207_v43 }
 0x1e9   : > { %v15111_v55 = vadd.f32 %v14807_v20, %v1283_v46  ;;  %v11100_v46 = vld [vmem:[%s21092_s5 + $0x104] sm:$0xf0] }
 0x1ea   : > { %v1088_v56 = vpop.f32.mrf.mxu0  ;;  %v11103_v63 = vor.u32 %v13876_v45, %v11100_v46  ;;  %v11006_v46 = vld [vmem:[%s21092_s5 + $0x30] sm:$0xf] }
 0x1eb   : > { %v1411_v58 = vpack.c.bf16 %v15111_v55, %v15108_v54  ;;  %2050 = vmatmul.bf16.gmra.mxu1 %v11119_v16  ;;  %v1089_v57 = vadd.f32 %v14792_v10, %v1088_v56  ;;  %v13849_v54 = vld [vmem:[%s21092_s5 + $0x18] sm:$0xf0]  ;;  %v13903_v55 = vld [vmem:[%s21092_s5 + $0x1c8] sm:$0xf0] }
 0x1ec   : > { %2118 = vmatmul.bf16.gmra.mxu2 %v11023_v49 }
 0x1ed   : > { %10968 = vmatmul.msk.bf16.gmra.mxu0 %vm870_vm0, %v13836_v51 }
 0x1f2   : > { %v1090_v61 = vpop.f32.mrf.mxu0 }
 0x1f3   : > { %v1091_v49 = vadd.f32 %v14792_v10, %v1090_v61  ;;  %v11158_v61 = vld [vmem:[%s21092_s5 + $0x168] sm:$0xf] }
 0x1f4   : > { %v11159_v56 = vor.u32 %v13893_v13, %v11158_v61 }
 0x1fa   : > { %v1093_v12 = vpop.f32.mrf.mxu0 }
 0x1fb   : > { %2055 = vmatmul.bf16.gmra.mxu1 %v11139_v23  ;;  %v1094_v37 = vadd.f32 %v14792_v10, %v1093_v12  ;;  %v15183_v12 = vpop.f32.mrf.mxu1  ;;  %v13881_v23 = vld [vmem:[%s21092_s5 + $0x11c] sm:$0xf] }
 0x1fc   : > { %2123 = vmatmul.bf16.gmra.mxu2 %v11043_v3 }
 0x1fd   : > { %10969 = vmatmul.msk.bf16.gmra.mxu0 %vm870_vm0, %v13837_v5  ;;  %v1210_v2 = vmax.f32 %v1094_v37, 0.0  ;;  %v13840_v5 = vld [vmem:[%s14771_s29 + $0x100] sm:$0xff] }
 0x1ff   : > { %v1286_v27 = vmul.f32 %v14800_v15, %v1210_v2 }
 0x201   : > { %v1362_v9 = vadd.f32 %v14807_v20, %v1286_v27 }
 0x202   : > { %v1095_v14 = vpop.f32.mrf.mxu0 }
 0x203   : > { %v1096_v32 = vadd.f32 %v14792_v10, %v1095_v14  ;;  %v1209_v14 = vmax.f32 %v1091_v49, 0.0  ;;  %v13854_v49 = vld [vmem:[%s21092_s5 + $0x40] sm:$0xf0] }
 0x205   : > { %v1211_v51 = vmax.f32 %v1096_v32, 0.0 }
 0x207   : > { %v1287_v39 = vmul.f32 %v14800_v15, %v1211_v51  ;;  %v13891_v51 = vld [vmem:[%s21092_s5 + $0x16c] sm:$0xf] }
 0x20a   : > { %v1098_v48 = vpop.f32.mrf.mxu0 }
 0x20b   : > { %v1099_v62 = vadd.f32 %v14792_v10, %v1098_v48  ;;  %2060 = vmatmul.bf16.gmra.mxu1 %v11159_v56  ;;  %v1285_v48 = vmul.f32 %v14800_v15, %v1209_v14 }
 0x20c   : > { %2128 = vmatmul.bf16.gmra.mxu2 %v11063_v21 }
 0x20d   : > { %10970 = vmatmul.msk.bf16.gmra.mxu0 %vm870_vm0, %v13838_v22  ;;  %v1212_v41 = vmax.f32 %v1099_v62, 0.0  ;;  %v1208_v22 = vmax.f32 %v1089_v57, 0.0  ;;  %v1361_v36 = vadd.f32 %v14807_v20, %v1285_v48  ;;  %v13841_v62 = vld [vmem:[%s14771_s29 + $0x108] sm:$0xff] }
 0x20f   : > { %v1288_v3 = vmul.f32 %v14800_v15, %v1212_v41  ;;  %v1284_v7 = vmul.f32 %v14800_v15, %v1208_v22  ;;  %v10986_v41 = vld [vmem:[%s21092_s5 + $0x8] sm:$0xf] }
 0x211   : > { %v1364_v47 = vadd.f32 %v14807_v20, %v1288_v3  ;;  %v11218_v3 = vld [vmem:[%s21092_s5 + $0x1e0] sm:$0xf] }
 0x212   : > { %v1100_v17 = vpop.f32.mrf.mxu0 }
 0x213   : > { %v1101_v26 = vadd.f32 %v14792_v10, %v1100_v17  ;;  %v1363_v17 = vadd.f32 %v14807_v20, %v1287_v39  ;;  %v11026_v39 = vld [vmem:[%s21092_s5 + $0x58] sm:$0xf] }
 0x215   : > { %v1213_v33 = vmax.f32 %v1101_v26, 0.0  ;;  %v1413_v35 = vpack.c.bf16 %v1363_v17, %v1362_v9  ;;  %v13913_v17 = vld [vmem:[%s21092_s5 + $0x218] sm:$0xf0] }
 0x217   : > { %v1289_v52 = vmul.f32 %v14800_v15, %v1213_v33 }
 0x219   : > { %v1365_v21 = vadd.f32 %v14807_v20, %v1289_v52 }
 0x21a   : > { %v1103_v38 = vpop.f32.mrf.mxu0 }
 0x21b   : > { %v1104_v24 = vadd.f32 %v14792_v10, %v1103_v38  ;;  %v1414_v16 = vpack.c.bf16 %v1365_v21, %v1364_v47  ;;  %v1360_v38 = vadd.f32 %v14807_v20, %v1284_v7  ;;  %v13896_v21 = vld [vmem:[%s21092_s5 + $0x194] sm:$0xf] }
 0x21c   : > { %2133 = vmatmul.bf16.gmra.mxu2 %v11083_v18  ;;  %v15202_v18 = vpop.f32.mrf.mxu1 }
 0x21d   : > { %10971 = vmatmul.msk.bf16.gmra.mxu0 %vm870_vm0, %v13839_v59  ;;  %v1214_v19 = vmax.f32 %v1104_v24, 0.0  ;;  %v1412_v24 = vpack.c.bf16 %v1361_v36, %v1360_v38 }
 0x21f   : > { %v1290_v43 = vmul.f32 %v14800_v15, %v1214_v19 }
 0x221   : > { %v1366_v8 = vadd.f32 %v14807_v20, %v1290_v43 }
 0x222   : > { %v1105_v30 = vpop.f32.mrf.mxu0 }
 0x223   : > { %v1106_v34 = vadd.f32 %v14792_v10, %v1105_v30  ;;  %v11178_v30 = vld [vmem:[%s21092_s5 + $0x190] sm:$0xf] }
 0x224   : > { %v15215_v19 = vpop.f32.mrf.mxu1 }
 0x225   : > { %v1215_v44 = vmax.f32 %v1106_v34, 0.0 }
 0x227   : > { %v1291_v53 = vmul.f32 %v14800_v15, %v1215_v44  ;;  %v11120_v15 = vld [vmem:[%s21092_s5 + $0x12c] sm:$0xf0] }
 0x228   : > { %v11123_v26 = vor.u32 %v13881_v23, %v11120_v15  ;;  %v11046_v15 = vld [vmem:[%s21092_s5 + $0x80] sm:$0xf] }
 0x229   : > { %v1367_v11 = vadd.f32 %v14807_v20, %v1291_v53  ;;  %v13898_v20 = vld [vmem:[%s21092_s5 + $0x1a0] sm:$0xf0]  ;;  %v11007_v53 = vor.u32 %v13854_v49, %v11006_v46 }
 0x22a   : > { %v15191_v10 = vpop.f32.mrf.mxu0  ;;  %v11179_v33 = vor.u32 %v13898_v20, %v11178_v30 }
 0x22b   : > { %v1415_v40 = vpack.c.bf16 %v1367_v11, %v1366_v8 }
 0x22c   : > { %2138 = vmatmul.bf16.gmra.mxu2 %v11103_v63  ;;  %2065 = vmatmul.bf16.gmra.mxu1 %v11179_v33  ;;  %v15232_v34 = vpop.f32.mrf.mxu1  ;;  %v13843_v63 = vld [vmem:[%s14771_s29 + $0x118] sm:$0xff] }
 0x22d   : > { %10972 = vmatmul.msk.bf16.gmra.mxu0 %vm870_vm0, %v13840_v5  ;;  %2193 = vmatpush.bf16.msra.mxu3 %v1415_v40  ;;  %v13908_v5 = vld [vmem:[%s21092_s5 + $0x1f0] sm:$0xf0]  ;;  %v13859_v40 = vld [vmem:[%s21092_s5 + $0x68] sm:$0xf0] }
 0x22e   : > { %v11219_v61 = vor.u32 %v13908_v5, %v11218_v3  ;;  %v11027_v27 = vor.u32 %v13859_v40, %v11026_v39  ;;  %v11086_v39 = vld [vmem:[%s21092_s5 + $0xd0] sm:$0xf]  ;;  %v13874_v40 = vld [vmem:[%s21092_s5 + $0xe0] sm:$0xf0] }
 0x231   : > { %2194 = vmatpush.bf16.msra.mxu3 %v1414_v16  ;;  %v11238_v16 = vld [vmem:[%s21092_s5 + $0x208] sm:$0xf] }
 0x232   : > { %v15204_v59 = vpop.f32.mrf.mxu0 }
 0x234   : > { %v15255_v42 = vpop.f32.mrf.mxu1 }
 0x235   : > { %2195 = vmatpush.bf16.msra.mxu3 %v1413_v35  ;;  %v11239_v35 = vor.u32 %v13913_v17, %v11238_v16  ;;  %v11298_v17 = vld [vmem:[%s21092_s5 + $0x280] sm:$0xf] }
 0x239   : > { %2196 = vmatpush.bf16.msra.mxu3 %v1412_v24  ;;  %v13864_v24 = vld [vmem:[%s21092_s5 + $0x90] sm:$0xf0] }
 0x23a   : > { %v15223_v32 = vpop.f32.mrf.mxu0  ;;  %v11047_v30 = vor.u32 %v13864_v24, %v11046_v15 }
 0x23c   : > { %2143 = vmatmul.bf16.gmra.mxu2 %v11123_v26  ;;  %v13901_v26 = vld [vmem:[%s21092_s5 + $0x1bc] sm:$0xf] }
 0x23d   : > { %10973 = vmatmul.msk.bf16.gmra.mxu0 %vm870_vm0, %v13841_v62  ;;  %2197 = vmatpush.bf16.msra.mxu3 %v1411_v58  ;;  %v11143_v58 = vor.u32 %v13886_v25, %v11140_v28  ;;  %v11200_v62 = vld [vmem:[%s21092_s5 + $0x1cc] sm:$0xf0] }
 0x23e   : > { %v11203_v25 = vor.u32 %v13901_v26, %v11200_v62 }
 0x241   : > { %2198 = vmatpush.bf16.msra.mxu3 %v1410_v31  ;;  %v10987_v31 = vor.u32 %v13849_v54, %v10986_v41  ;;  %v11258_v41 = vld [vmem:[%s21092_s5 + $0x230] sm:$0xf]  ;;  %v13918_v54 = vld [vmem:[%s21092_s5 + $0x240] sm:$0xf0] }
 0x242   : > { %v15234_v37 = vpop.f32.mrf.mxu0 }
 0x245   : > { %2199 = vmatpush.bf16.msra.mxu3 %v1409_v6  ;;  %v11198_v6 = vld [vmem:[%s21092_s5 + $0x1b8] sm:$0xf] }
 0x246   : > { %v11199_v44 = vor.u32 %v13903_v55, %v11198_v6 }
 0x248   : > { %2070 = vmatmul.bf16.gmra.mxu1 %v11199_v44  ;;  %v13869_v44 = vld [vmem:[%s21092_s5 + $0xb8] sm:$0xf0] }
 0x249   : > { %2200 = vmatpush.bf16.msra.mxu3 %v1408_v4  ;;  %v15269_v4 = vpop.f32.mrf.mxu1 }
 0x24a   : > { %v15263_v43 = vpop.f32.mrf.mxu0 }
 0x24c   : > { %2201 = vmatmul.bf16.vlgmr.msra.gmra.mxu3 %v10987_v31  ;;  %2148 = vmatmul.bf16.gmra.mxu2 %v11143_v58  ;;  %v11259_v31 = vor.u32 %v13918_v54, %v11258_v41  ;;  %v11066_v58 = vld [vmem:[%s21092_s5 + $0xa8] sm:$0xf] }
 0x24d   : > { %10974 = vmatmul.msk.bf16.gmra.mxu0 %vm870_vm0, %v13842_v60  ;;  %v11067_v49 = vor.u32 %v13869_v44, %v11066_v58 }
 0x24f   : > { %v2109_v0 = vpop.f32.mrf.mxu2 }
 0x250   : > { %v15267_v1 = vadd.f32 %v2109_v0, %v15151_v50  ;;  %v11160_v50 = vld [vmem:[%s21092_s5 + $0x17c] sm:$0xf0]  ;;  %v13906_v0 = vld [vmem:[%s21092_s5 + $0x1e4] sm:$0xf] }
 0x251   : > { %v15289_v2 = vpop.f32.mrf.mxu1  ;;  %v11163_v8 = vor.u32 %v13891_v51, %v11160_v50 }
 0x252   : > { %v15271_v45 = vpop.f32.mrf.mxu0 }
 0x257   : > { %v2111_v52 = vpop.f32.mrf.mxu2 }
 0x258   : > { %v15286_v57 = vadd.f32 %v2111_v52, %v15163_v29  ;;  %2075 = vmatmul.bf16.gmra.mxu1 %v11219_v61  ;;  %v11278_v52 = vld [vmem:[%s21092_s5 + $0x258] sm:$0xf] }
 0x259   : > { %v15303_v56 = vpop.f32.mrf.mxu1 }
 0x25a   : > { %v15297_v11 = vpop.f32.mrf.mxu0 }
 0x25c   : > { %2206 = vmatmul.bf16.gmra.mxu3 %v11007_v53  ;;  %2153 = vmatmul.bf16.gmra.mxu2 %v11163_v8  ;;  %v13923_v53 = vld [vmem:[%s21092_s5 + $0x268] sm:$0xf0] }
 0x25d   : > { %10975 = vmatmul.msk.bf16.gmra.mxu0 %vm870_vm0, %v13843_v63  ;;  %v11279_v5 = vor.u32 %v13923_v53, %v11278_v52  ;;  %v11260_v52 = vld [vmem:[%s21092_s5 + $0x244] sm:$0xf0] }
 0x25f   : > { %v2114_v29 = vpop.f32.mrf.mxu2 }
 0x260   : > { %v15301_v13 = vadd.f32 %v2114_v29, %v15183_v12  ;;  %v11180_v12 = vld [vmem:[%s21092_s5 + $0x1a4] sm:$0xf0] }
 0x261   : > { %v15322_v48 = vpop.f32.mrf.mxu1  ;;  %v11183_v7 = vor.u32 %v13896_v21, %v11180_v12  ;;  %v13911_v21 = vld [vmem:[%s21092_s5 + $0x20c] sm:$0xf] }
 0x262   : > { %v15305_v14 = vpop.f32.mrf.mxu0 }
 0x267   : > { %v2116_v22 = vpop.f32.mrf.mxu2 }
 0x268   : > { %v15320_v47 = vadd.f32 %v2116_v22, %v15202_v18  ;;  %2080 = vmatmul.bf16.gmra.mxu1 %v11239_v35  ;;  %v11087_v22 = vor.u32 %v13874_v40, %v11086_v39 }
 0x269   : > { %v15335_v38 = vpop.f32.mrf.mxu1 }
 0x26a   : > { %v15330_v9 = vpop.f32.mrf.mxu0 }
 0x26c   : > { %2211 = vmatmul.bf16.gmra.mxu3 %v11027_v27  ;;  %2158 = vmatmul.bf16.gmra.mxu2 %v11183_v7  ;;  %v13928_v7 = vld [vmem:[%s21092_s5 + $0x290] sm:$0xf0] }
 0x26d   : > { %v11299_v15 = vor.u32 %v13928_v7, %v11298_v17 }
 0x26f   : > { %v2119_v36 = vpop.f32.mrf.mxu2 }
 0x270   : > { %v15333_v18 = vadd.f32 %v2119_v36, %v15215_v19 }
 0x271   : > { %v15354_v33 = vpop.f32.mrf.mxu1 }
 0x272   : > { %v15337_v23 = vpop.f32.mrf.mxu0 }
 0x277   : > { %v2121_v19 = vpop.f32.mrf.mxu2 }
 0x278   : > { %v15352_v20 = vadd.f32 %v2121_v19, %v15232_v34  ;;  %2085 = vmatmul.bf16.gmra.mxu1 %v11259_v31 }
 0x279   : > { %v15365_v6 = vpop.f32.mrf.mxu1 }
 0x27a   : > { %v1133_v28 = vpop.f32.mrf.mxu0 }
 0x27c   : > { %2216 = vmatmul.bf16.gmra.mxu3 %v11047_v30  ;;  %2163 = vmatmul.bf16.gmra.mxu2 %v11203_v25 }
 0x27f   : > { %v2124_v60 = vpop.f32.mrf.mxu2 }
 0x280   : > { %v15363_v34 = vadd.f32 %v2124_v60, %v15255_v42  ;;  %v11220_v42 = vld [vmem:[%s21092_s5 + $0x1f4] sm:$0xf0] }
 0x281   : > { %v15382_v50 = vpop.f32.mrf.mxu1  ;;  %v11223_v63 = vor.u32 %v13906_v0, %v11220_v42  ;;  %v15437_v42 = vld [vmem:[%s21090_s3] ss:$0 sm:$0xff] }
 0x282   : > { %v1135_v55 = vpop.f32.mrf.mxu0 }
 0x287   : > { %v2126_v46 = vpop.f32.mrf.mxu2 }
 0x288   : > { %v15380_v51 = vadd.f32 %v2126_v46, %v15269_v4  ;;  %2090 = vmatmul.bf16.gmra.mxu1 %v11279_v5 }
 0x289   : > { %v15393_v61 = vpop.f32.mrf.mxu1 }
 0x28a   : > { %v1138_v3 = vpop.f32.mrf.mxu0 }
 0x28c   : > { %2221 = vmatmul.bf16.gmra.mxu3 %v11067_v49  ;;  %2168 = vmatmul.bf16.gmra.mxu2 %v11223_v63  ;;  %v11106_v49 = vld [vmem:[%s21092_s5 + $0xf8] sm:$0xf] }
 0x28f   : > { %v2129_v8 = vpop.f32.mrf.mxu2 }
 0x290   : > { %v15391_v4 = vadd.f32 %v2129_v8, %v15289_v2  ;;  %v11240_v2 = vld [vmem:[%s21092_s5 + $0x21c] sm:$0xf0] }
 0x291   : > { %v15410_v16 = vpop.f32.mrf.mxu1  ;;  %v11243_v35 = vor.u32 %v13911_v21, %v11240_v2  ;;  %v15464_v2 = vld [vmem:[%s21091_s4] ss:$0 sm:$0xff] }
 0x292   : > { %v1140_v29 = vpop.f32.mrf.mxu0 }
 0x297   : > { %v2131_v12 = vpop.f32.mrf.mxu2 }
 0x298   : > { %v15408_v27 = vadd.f32 %v2131_v12, %v15303_v56  ;;  %2095 = vmatmul.bf16.gmra.mxu1 %v11299_v15  ;;  %v15421_v56 = vld [vmem:[%s21089_s2] ss:$0 sm:$0xff] }
 0x299   : > { %v1141_v26 = vadd.f32 %v15421_v56, %v1140_v29  ;;  %v1139_v30 = vadd.f32 %v15421_v56, %v1138_v3  ;;  %v15429_v54 = vpop.f32.mrf.mxu1  ;;  %v1136_v31 = vadd.f32 %v15421_v56, %v1135_v55  ;;  %v1134_v44 = vadd.f32 %v15421_v56, %v1133_v28  ;;  %v13879_v55 = vld [vmem:[%s21092_s5 + $0x108] sm:$0xf0]  ;;  %v13916_v28 = vld [vmem:[%s21092_s5 + $0x234] sm:$0xf] }
 0x29a   : > { %v1143_v36 = vpop.f32.mrf.mxu0  ;;  %v1131_v53 = vadd.f32 %v15421_v56, %v15337_v23  ;;  %v1129_v29 = vadd.f32 %v15421_v56, %v15330_v9  ;;  %v11107_v40 = vor.u32 %v13879_v55, %v11106_v49  ;;  %v11263_v17 = vor.u32 %v13916_v28, %v11260_v52 }
 0x29b   : > { %v1144_v24 = vadd.f32 %v15421_v56, %v1143_v36  ;;  %v1229_v60 = vmax.f32 %v1141_v26, 0.0  ;;  %v1228_v0 = vmax.f32 %v1139_v30, 0.0  ;;  %v1227_v63 = vmax.f32 %v1136_v31, 0.0 }
 0x29c   : > { %2226 = vmatmul.bf16.gmra.mxu3 %v11087_v22  ;;  %2173 = vmatmul.bf16.gmra.mxu2 %v11243_v35  ;;  %v1226_v39 = vmax.f32 %v1134_v44, 0.0  ;;  %v1126_v7 = vadd.f32 %v15421_v56, %v15305_v14  ;;  %v1225_v35 = vmax.f32 %v1131_v53, 0.0  ;;  %v1124_v26 = vadd.f32 %v15421_v56, %v15297_v11 }
 0x29d   : > { %v1230_v41 = vmax.f32 %v1144_v24, 0.0  ;;  %v1305_v3 = vmul.f32 %v15437_v42, %v1229_v60  ;;  %v1304_v21 = vmul.f32 %v15437_v42, %v1228_v0  ;;  %v1303_v36 = vmul.f32 %v15437_v42, %v1227_v63 }
 0x29e   : > { %v1302_v30 = vmul.f32 %v15437_v42, %v1226_v39  ;;  %v1121_v14 = vadd.f32 %v15421_v56, %v15271_v45  ;;  %v1301_v31 = vmul.f32 %v15437_v42, %v1225_v35  ;;  %v1119_v11 = vadd.f32 %v15421_v56, %v15263_v43  ;;  %v13884_v39 = vld [vmem:[%s21092_s5 + $0x130] sm:$0xf0] }
 0x29f   : > { %v2134_v62 = vpop.f32.mrf.mxu2  ;;  %v1381_v24 = vadd.f32 %v15464_v2, %v1305_v3  ;;  %v1116_v55 = vadd.f32 %v15421_v56, %v15234_v37  ;;  %v1114_v43 = vadd.f32 %v15421_v56, %v15223_v32  ;;  %v11126_v37 = vld [vmem:[%s21092_s5 + $0x120] sm:$0xf]  ;;  %v13921_v32 = vld [vmem:[%s21092_s5 + $0x25c] sm:$0xf] }
 0x2a0   : > { %v15426_v19 = vadd.f32 %v2134_v62, %v15322_v48  ;;  %v1306_v48 = vmul.f32 %v15437_v42, %v1230_v41  ;;  %v1224_v62 = vmax.f32 %v1129_v29, 0.0  ;;  %v1380_v41 = vadd.f32 %v15464_v2, %v1304_v21  ;;  %v11280_v21 = vld [vmem:[%s21092_s5 + $0x26c] sm:$0xf0] }
 0x2a1   : > { %v15468_v22 = vpop.f32.mrf.mxu1  ;;  %v1378_v49 = vadd.f32 %v15464_v2, %v1302_v30  ;;  %v1221_v52 = vmax.f32 %v1121_v14, 0.0  ;;  %v1377_v63 = vadd.f32 %v15464_v2, %v1301_v31  ;;  %v1220_v3 = vmax.f32 %v1119_v11, 0.0 }
 0x2a2   : > { %v1145_v25 = vpop.f32.mrf.mxu0  ;;  %v1382_v23 = vadd.f32 %v15464_v2, %v1306_v48  ;;  %v1422_v60 = vpack.c.bf16 %v1381_v24, %v1380_v41  ;;  %v1222_v48 = vmax.f32 %v1124_v26, 0.0  ;;  %v11283_v30 = vor.u32 %v13921_v32, %v11280_v21  ;;  %v11300_v32 = vld [vmem:[%s21092_s5 + $0x294] sm:$0xf0] }
 0x2a3   : > { %v1146_v58 = vadd.f32 %v15421_v56, %v1145_v25  ;;  %v1223_v25 = vmax.f32 %v1126_v7, 0.0  ;;  %v1296_v24 = vmul.f32 %v15437_v42, %v1220_v3 }
 0x2a5   : > { %v1231_v46 = vmax.f32 %v1146_v58, 0.0  ;;  %v1379_v58 = vadd.f32 %v15464_v2, %v1303_v36  ;;  %v1109_v36 = vadd.f32 %v15421_v56, %v15191_v10 }
 0x2a7   : > { %v1307_v5 = vmul.f32 %v15437_v42, %v1231_v46  ;;  %v15456_v8 = vpop.f32.mrf.mxu2  ;;  %v1300_v46 = vmul.f32 %v15437_v42, %v1224_v62  ;;  %v1421_v53 = vpack.c.bf16 %v1379_v58, %v1378_v49  ;;  %v1216_v10 = vmax.f32 %v1109_v36, 0.0 }
 0x2a9   : > { %v1383_v12 = vadd.f32 %v15464_v2, %v1307_v5  ;;  %v15491_v45 = vpop.f32.mrf.mxu1  ;;  %v1298_v5 = vmul.f32 %v15437_v42, %v1222_v48  ;;  %v1376_v29 = vadd.f32 %v15464_v2, %v1300_v46 }
 0x2aa   : > { %v15472_v9 = vpop.f32.mrf.mxu0 }
 0x2ab   : > { %v1423_v15 = vpack.c.bf16 %v1383_v12, %v1382_v23  ;;  %v1219_v23 = vmax.f32 %v1116_v55, 0.0  ;;  %v1297_v12 = vmul.f32 %v15437_v42, %v1221_v52  ;;  %v1374_v26 = vadd.f32 %v15464_v2, %v1298_v5  ;;  %v11146_v5 = vld [vmem:[%s21092_s5 + $0x148] sm:$0xf] }
 0x2ac   : > { %2231 = vmatmul.bf16.gmra.mxu3 %v11107_v40  ;;  %2178 = vmatmul.bf16.gmra.mxu2 %v11263_v17  ;;  %v1111_v40 = vadd.f32 %v15421_v56, %v15204_v59  ;;  %v1420_v17 = vpack.c.bf16 %v1377_v63, %v1376_v29  ;;  %v11127_v59 = vor.u32 %v13884_v39, %v11126_v37  ;;  %v13847_v37 = vld [vmem:[%s21092_s5 + $0xc] sm:$0xf]  ;;  %v10988_v39 = vld [vmem:[%s21092_s5 + $0x1c] sm:$0xf0] }
 0x2ad   : > { %2286 = vmatpush.bf16.msrb.mxu1 %v1423_v15  ;;  %v1218_v15 = vmax.f32 %v1114_v43, 0.0  ;;  %v1292_v52 = vmul.f32 %v15437_v42, %v1216_v10 }
 0x2ae   : > { %v1217_v14 = vmax.f32 %v1111_v40, 0.0  ;;  %v13926_v40 = vld [vmem:[%s21092_s5 + $0x284] sm:$0xf] }
 0x2af   : > { %v2139_v44 = vpop.f32.mrf.mxu2  ;;  %v1294_v58 = vmul.f32 %v15437_v42, %v1218_v15  ;;  %v1368_v29 = vadd.f32 %v15464_v2, %v1292_v52  ;;  %v11303_v36 = vor.u32 %v13926_v40, %v11300_v32 }
 0x2b0   : > { %v15485_v0 = vadd.f32 %v2139_v44, %v15354_v33  ;;  %v1299_v33 = vmul.f32 %v15437_v42, %v1223_v25  ;;  %v1295_v25 = vmul.f32 %v15437_v42, %v1219_v23  ;;  %v1372_v44 = vadd.f32 %v15464_v2, %v1296_v24 }
 0x2b1   : > { %2287 = vmatpush.bf16.msrb.mxu1 %v1422_v60  ;;  %v15525_v62 = vpop.f32.mrf.mxu1  ;;  %v1373_v60 = vadd.f32 %v15464_v2, %v1297_v12  ;;  %v1293_v11 = vmul.f32 %v15437_v42, %v1217_v14 }
 0x2b2   : > { %v15495_v28 = vpop.f32.mrf.mxu0  ;;  %v1375_v7 = vadd.f32 %v15464_v2, %v1299_v33  ;;  %v1371_v46 = vadd.f32 %v15464_v2, %v1295_v25  ;;  %v1370_v33 = vadd.f32 %v15464_v2, %v1294_v58 }
 0x2b3   : > { %v1418_v48 = vpack.c.bf16 %v1373_v60, %v1372_v44  ;;  %v1369_v3 = vadd.f32 %v15464_v2, %v1293_v11  ;;  %v13894_v60 = vld [vmem:[%s21092_s5 + $0x180] sm:$0xf0] }
 0x2b4   : > { %v1419_v31 = vpack.c.bf16 %v1375_v7, %v1374_v26  ;;  %v1417_v43 = vpack.c.bf16 %v1371_v46, %v1370_v33 }
 0x2b5   : > { %2288 = vmatpush.bf16.msrb.mxu1 %v1421_v53  ;;  %v1416_v21 = vpack.c.bf16 %v1369_v3, %v1368_v29 }
 0x2b7   : > { %v15519_v35 = vpop.f32.mrf.mxu2 }
 0x2b9   : > { %2289 = vmatpush.bf16.msrb.mxu1 %v1420_v17  ;;  %v15540_v53 = vpop.f32.mrf.mxu1  ;;  %v10991_v17 = vor.u32 %v13847_v37, %v10988_v39 }
 0x2ba   : > { %v15527_v41 = vpop.f32.mrf.mxu0 }
 0x2bc   : > { %2236 = vmatmul.bf16.gmra.mxu3 %v11127_v59  ;;  %2183 = vmatmul.bf16.gmra.mxu2 %v11283_v30 }
 0x2bd   : > { %2290 = vmatpush.bf16.msrb.mxu1 %v1419_v31  ;;  %v11166_v31 = vld [vmem:[%s21092_s5 + $0x170] sm:$0xf] }
 0x2be   : > { %v11167_v44 = vor.u32 %v13894_v60, %v11166_v31 }
 0x2bf   : > { %v2144_v49 = vpop.f32.mrf.mxu2 }
 0x2c0   : > { %v15536_v55 = vadd.f32 %v2144_v49, %v15382_v50  ;;  %v13889_v50 = vld [vmem:[%s21092_s5 + $0x158] sm:$0xf0] }
 0x2c1   : > { %2291 = vmatpush.bf16.msrb.mxu1 %v1418_v48  ;;  %v11147_v12 = vor.u32 %v13889_v50, %v11146_v5 }
 0x2c2   : > { %v1155_v63 = vpop.f32.mrf.mxu0 }
 0x2c3   : > { %v1156_v40 = vadd.f32 %v15421_v56, %v1155_v63  ;;  %v13857_v63 = vld [vmem:[%s21092_s5 + $0x5c] sm:$0xf] }
 0x2c5   : > { %2292 = vmatpush.bf16.msrb.mxu1 %v1417_v43  ;;  %v15564_v7 = vpop.f32.mrf.mxu1 }
 0x2c7   : > { %v15562_v23 = vpop.f32.mrf.mxu2 }
 0x2c9   : > { %2293 = vmatpush.bf16.msrb.mxu1 %v1416_v21 }
 0x2ca   : > { %v1158_v59 = vpop.f32.mrf.mxu0 }
 0x2cc   : > { %2241 = vmatmul.bf16.gmra.mxu3 %v11147_v12  ;;  %2294 = vmatmul.bf16.vlgmr.msrb.gmra.mxu1 %v10991_v17  ;;  %v13899_v12 = vld [vmem:[%s21092_s5 + $0x1a8] sm:$0xf0] }
 0x2cd   : > { %2188 = vmatmul.bf16.gmra.mxu2 %v11303_v36  ;;  %v15572_v14 = vpop.f32.mrf.mxu1 }
 0x2ce   : > { %21281 = vst [vmem:[#allocation14_spill] sm:$0xff] %v15572_v14 }
 0x2cf   : > { %v2202_v15 = vpop.f32.mrf.mxu3  ;;  %v2149_v26 = vpop.f32.mrf.mxu2 }
 0x2d0   : > { %v15567_v24 = vadd.f32 %v2202_v15, %v15267_v1  ;;  %v15570_v30 = vadd.f32 %v2149_v26, %v15410_v16  ;;  %v13852_v1 = vld [vmem:[%s21092_s5 + $0x34] sm:$0xf]  ;;  %v11008_v16 = vld [vmem:[%s21092_s5 + $0x44] sm:$0xf0]  ;;  %v11028_v15 = vld [vmem:[%s21092_s5 + $0x6c] sm:$0xf0]  ;;  %v1151_v26 = vadd.f32 %v15421_v56, %v15495_v28 }
 0x2d1   : > { %v11011_v11 = vor.u32 %v13852_v1, %v11008_v16  ;;  %v1149_v1 = vadd.f32 %v15421_v56, %v15472_v9 }
 0x2d2   : > { %v1160_v25 = vpop.f32.mrf.mxu0 }
 0x2d3   : > { %v1161_v33 = vadd.f32 %v15421_v56, %v1160_v25  ;;  %v1235_v25 = vmax.f32 %v1156_v40, 0.0  ;;  %v1232_v9 = vmax.f32 %v1149_v1, 0.0 }
 0x2d5   : > { %v15591_v46 = vpop.f32.mrf.mxu1  ;;  %v1237_v32 = vmax.f32 %v1161_v33, 0.0 }
 0x2d7   : > { %v2204_v10 = vpop.f32.mrf.mxu3  ;;  %v15589_v48 = vpop.f32.mrf.mxu2  ;;  %v1313_v31 = vmul.f32 %v15437_v42, %v1237_v32 }
 0x2d8   : > { %v15587_v58 = vadd.f32 %v2204_v10, %v15286_v57  ;;  %v1159_v57 = vadd.f32 %v15421_v56, %v1158_v59 }
 0x2da   : > { %v1163_v49 = vpop.f32.mrf.mxu0  ;;  %v1236_v17 = vmax.f32 %v1159_v57, 0.0  ;;  %v1311_v57 = vmul.f32 %v15437_v42, %v1235_v25  ;;  %v11206_v25 = vld [vmem:[%s21092_s5 + $0x1c0] sm:$0xf] }
 0x2db   : > { %v1164_v52 = vadd.f32 %v15421_v56, %v1163_v49 }
 0x2dc   : > { %2246 = vmatmul.bf16.gmra.mxu3 %v11167_v44  ;;  %2299 = vmatmul.bf16.gmra.mxu1 %v11011_v11  ;;  %v11031_v44 = vor.u32 %v13857_v63, %v11028_v15 }
 0x2dd   : > { %v1238_v29 = vmax.f32 %v1164_v52, 0.0  ;;  %v15602_v37 = vpop.f32.mrf.mxu1  ;;  %v1312_v52 = vmul.f32 %v15437_v42, %v1236_v17  ;;  %v1308_v17 = vmul.f32 %v15437_v42, %v1232_v9  ;;  %v11226_v9 = vld [vmem:[%s21092_s5 + $0x1e8] sm:$0xf] }
 0x2de   : > { %21282 = vst [vmem:[#allocation15_spill] sm:$0xff] %v15602_v37 }
 0x2df   : > { %v2207_v43 = vpop.f32.mrf.mxu3  ;;  %v2154_v5 = vpop.f32.mrf.mxu2  ;;  %v1314_v36 = vmul.f32 %v15437_v42, %v1238_v29 }
 0x2e0   : > { %v15596_v3 = vadd.f32 %v2207_v43, %v15301_v13  ;;  %v15600_v50 = vadd.f32 %v2154_v5, %v15468_v22  ;;  %v11186_v13 = vld [vmem:[%s21092_s5 + $0x198] sm:$0xf]  ;;  %v1154_v22 = vadd.f32 %v15421_v56, %v15527_v41  ;;  %v1233_v5 = vmax.f32 %v1151_v26, 0.0 }
 0x2e1   : > { %v11187_v10 = vor.u32 %v13899_v12, %v11186_v13  ;;  %v1390_v28 = vadd.f32 %v15464_v2, %v1314_v36  ;;  %v1387_v13 = vadd.f32 %v15464_v2, %v1311_v57 }
 0x2e2   : > { %v1165_v39 = vpop.f32.mrf.mxu0  ;;  %v1234_v49 = vmax.f32 %v1154_v22, 0.0  ;;  %v1309_v40 = vmul.f32 %v15437_v42, %v1233_v5 }
 0x2e3   : > { %v1166_v21 = vadd.f32 %v15421_v56, %v1165_v39  ;;  %v1388_v39 = vadd.f32 %v15464_v2, %v1312_v52 }
 0x2e4   : > { %v1310_v29 = vmul.f32 %v15437_v42, %v1234_v49  ;;  %v1385_v26 = vadd.f32 %v15464_v2, %v1309_v40  ;;  %v13855_v40 = vld [vmem:[%s21092_s5 + $0x48] sm:$0xf0] }
 0x2e5   : > { %v1239_v59 = vmax.f32 %v1166_v21, 0.0  ;;  %v15635_v43 = vpop.f32.mrf.mxu1 }
 0x2e6   : > { %v1386_v36 = vadd.f32 %v15464_v2, %v1310_v29  ;;  %v13909_v29 = vld [vmem:[%s21092_s5 + $0x1f8] sm:$0xf0] }
 0x2e7   : > { %v1315_v41 = vmul.f32 %v15437_v42, %v1239_v59  ;;  %v2209_v60 = vpop.f32.mrf.mxu3  ;;  %v15630_v11 = vpop.f32.mrf.mxu2  ;;  %v13904_v42 = vld [vmem:[%s21092_s5 + $0x1d0] sm:$0xf0] }
 0x2e8   : > { %v15628_v16 = vadd.f32 %v2209_v60, %v15320_v47  ;;  %v1389_v47 = vadd.f32 %v15464_v2, %v1313_v31  ;;  %v1425_v15 = vpack.c.bf16 %v1387_v13, %v1386_v36  ;;  %v11048_v31 = vld [vmem:[%s21092_s5 + $0x94] sm:$0xf0]  ;;  %v11227_v13 = vor.u32 %v13909_v29, %v11226_v9 }
 0x2e9   : > { %v1391_v33 = vadd.f32 %v15464_v2, %v1315_v41  ;;  %v10994_v41 = vld [vmem:[%s21092_s5 + $0x10] sm:$0xf] }
 0x2ea   : > { %v1426_v21 = vpack.c.bf16 %v1389_v47, %v1388_v39  ;;  %v13867_v39 = vld [vmem:[%s21092_s5 + $0xac] sm:$0xf] }
 0x2eb   : > { %v1427_v56 = vpack.c.bf16 %v1391_v33, %v1390_v28 }
 0x2ec   : > { %2251 = vmatmul.bf16.gmra.mxu3 %v11187_v10  ;;  %2304 = vmatmul.bf16.gmra.mxu1 %v11031_v44  ;;  %v11207_v44 = vor.u32 %v13904_v42, %v11206_v25 }
 0x2ed   : > { %2383 = vmatpush.bf16.msrb.mxu2 %v1427_v56  ;;  %v15651_v63 = vpop.f32.mrf.mxu1 }
 0x2ee   : > { %21283 = vst [vmem:[#allocation16_spill] sm:$0xff] %v15651_v63 }
 0x2ef   : > { %v2212_v32 = vpop.f32.mrf.mxu3  ;;  %v2159_v22 = vpop.f32.mrf.mxu2 }
 0x2f0   : > { %v15644_v12 = vadd.f32 %v2212_v32, %v15333_v18  ;;  %v15649_v59 = vadd.f32 %v2159_v22, %v15525_v62  ;;  %v1384_v18 = vadd.f32 %v15464_v2, %v1308_v17  ;;  %v13862_v62 = vld [vmem:[%s21092_s5 + $0x84] sm:$0xf] }
 0x2f1   : > { %2384 = vmatpush.bf16.msrb.mxu2 %v1426_v21  ;;  %v13850_v2 = vld [vmem:[%s21092_s5 + $0x20] sm:$0xf0]  ;;  %v11051_v49 = vor.u32 %v13862_v62, %v11048_v31  ;;  %v11246_v31 = vld [vmem:[%s21092_s5 + $0x210] sm:$0xf] }
 0x2f2   : > { %v1424_v1 = vpack.c.bf16 %v1385_v26, %v1384_v18  ;;  %v10995_v28 = vor.u32 %v13850_v2, %v10994_v41  ;;  %v13872_v41 = vld [vmem:[%s21092_s5 + $0xd4] sm:$0xf]  ;;  %v11034_v2 = vld [vmem:[%s21092_s5 + $0x60] sm:$0xf] }
 0x2f5   : > { %2385 = vmatpush.bf16.msrb.mxu2 %v1425_v15  ;;  %v15678_v33 = vpop.f32.mrf.mxu1 }
 0x2f7   : > { %v2214_v60 = vpop.f32.mrf.mxu3  ;;  %v15676_v52 = vpop.f32.mrf.mxu2 }
 0x2f8   : > { %v15674_v10 = vadd.f32 %v2214_v60, %v15352_v20  ;;  %v13860_v60 = vld [vmem:[%s21092_s5 + $0x70] sm:$0xf0] }
 0x2f9   : > { %2386 = vmatpush.bf16.msrb.mxu2 %v1424_v1 }
 0x2fc   : > { %2256 = vmatmul.bf16.gmra.mxu3 %v11207_v44  ;;  %2309 = vmatmul.bf16.gmra.mxu1 %v11051_v49 }
 0x2fd   : > { %11316 = vmatmul.msk.bf16.vlgmr.msrb.gmra.mxu2 %vm1955_vm1, %v10995_v28  ;;  %v15687_v47 = vpop.f32.mrf.mxu1 }
 0x2fe   : > { %21284 = vst [vmem:[#allocation17_spill] sm:$0xff] %v15687_v47 }
 0x2ff   : > { %v2217_v5 = vpop.f32.mrf.mxu3  ;;  %v2164_v56 = vpop.f32.mrf.mxu2 }
 0x300   : > { %v15682_v57 = vadd.f32 %v2217_v5, %v15363_v34  ;;  %v15685_v20 = vadd.f32 %v2164_v56, %v15564_v7  ;;  %v11068_v34 = vld [vmem:[%s21092_s5 + $0xbc] sm:$0xf0]  ;;  %v11014_v7 = vld [vmem:[%s21092_s5 + $0x38] sm:$0xf]  ;;  %v11035_v56 = vor.u32 %v13860_v60, %v11034_v2 }
 0x301   : > { %v11071_v22 = vor.u32 %v13867_v39, %v11068_v34  ;;  %v11015_v36 = vor.u32 %v13855_v40, %v11014_v7  ;;  %v11266_v40 = vld [vmem:[%s21092_s5 + $0x238] sm:$0xf]  ;;  %v11286_v60 = vld [vmem:[%s21092_s5 + $0x260] sm:$0xf] }
 0x305   : > { %v15712_v15 = vpop.f32.mrf.mxu1 }
 0x307   : > { %v2219_v32 = vpop.f32.mrf.mxu3  ;;  %v15710_v17 = vpop.f32.mrf.mxu2 }
 0x308   : > { %v15708_v21 = vadd.f32 %v2219_v32, %v15380_v51  ;;  %21285 = vst [vmem:[#allocation18_spill] sm:$0xff] %v15710_v17  ;;  %v13970_v51 = vld [vmem:[%s21093_s6 + $0x138] sm:$0xff]  ;;  %v13919_v32 = vld [vmem:[%s21092_s5 + $0x248] sm:$0xf0] }
 0x309   : > { %3483 = vmatpush.bf16.msrb.mxu0 %v13970_v51  ;;  %v13954_v17 = vld [vmem:[%s21093_s6 + $0xb8] sm:$0xff] }
 0x30a   : > { %3063 = vmatpush.bf16.msra.mxu1 %v13954_v17 }
 0x30c   : > { %2261 = vmatmul.bf16.gmra.mxu3 %v11227_v13  ;;  %2314 = vmatmul.bf16.gmra.mxu1 %v11071_v22  ;;  %v13877_v13 = vld [vmem:[%s21092_s5 + $0xfc] sm:$0xf] }
 0x30d   : > { %11317 = vmatmul.msk.bf16.gmra.mxu2 %vm1955_vm1, %v11015_v36  ;;  %v15724_v62 = vpop.f32.mrf.mxu1  ;;  %v13865_v22 = vld [vmem:[%s21092_s5 + $0x98] sm:$0xf0] }
 0x30e   : > { %21286 = vst [vmem:[#allocation19_spill] sm:$0xff] %v15724_v62 }
 0x30f   : > { %v2222_v26 = vpop.f32.mrf.mxu3  ;;  %v2169_v18 = vpop.f32.mrf.mxu2 }
 0x310   : > { %v15716_v25 = vadd.f32 %v2222_v26, %v15391_v4  ;;  %v15722_v42 = vadd.f32 %v2169_v18, %v15591_v46  ;;  %v13914_v4 = vld [vmem:[%s21092_s5 + $0x220] sm:$0xf0]  ;;  %v11088_v46 = vld [vmem:[%s21092_s5 + $0xe4] sm:$0xf0]  ;;  %v11267_v26 = vor.u32 %v13919_v32, %v11266_v40 }
 0x311   : > { %v11247_v49 = vor.u32 %v13914_v4, %v11246_v31  ;;  %v11091_v28 = vor.u32 %v13872_v41, %v11088_v46 }
 0x315   : > { %v15749_v9 = vpop.f32.mrf.mxu1 }
 0x317   : > { %v2224_v1 = vpop.f32.mrf.mxu3  ;;  %v15747_v5 = vpop.f32.mrf.mxu2 }
 0x318   : > { %v15745_v44 = vadd.f32 %v2224_v1, %v15408_v27  ;;  %21287 = vst [vmem:[#allocation20_spill] sm:$0xff] %v15747_v5  ;;  %v13924_v1 = vld [vmem:[%s21092_s5 + $0x270] sm:$0xf0] }
 0x31c   : > { %2266 = vmatmul.bf16.gmra.mxu3 %v11247_v49  ;;  %2319 = vmatmul.bf16.gmra.mxu1 %v11091_v28  ;;  %v13882_v49 = vld [vmem:[%s21092_s5 + $0x124] sm:$0xf] }
 0x31d   : > { %11318 = vmatmul.msk.bf16.gmra.mxu2 %vm1955_vm1, %v11035_v56  ;;  %v2098_v27 = vpop.f32.mrf.mxu1  ;;  %v13870_v28 = vld [vmem:[%s21092_s5 + $0xc0] sm:$0xf0] }
 0x31f   : > { %v2227_v29 = vpop.f32.mrf.mxu3  ;;  %v2174_v34 = vpop.f32.mrf.mxu2 }
 0x320   : > { %v15753_v39 = vadd.f32 %v2227_v29, %v15426_v19  ;;  %v15756_v7 = vadd.f32 %v2174_v34, %v15635_v43  ;;  %v11108_v19 = vld [vmem:[%s21092_s5 + $0x10c] sm:$0xf0]  ;;  %v11054_v43 = vld [vmem:[%s21092_s5 + $0x88] sm:$0xf]  ;;  %v11287_v29 = vor.u32 %v13924_v1, %v11286_v60 }
 0x321   : > { %v11111_v18 = vor.u32 %v13877_v13, %v11108_v19  ;;  %v11055_v31 = vor.u32 %v13865_v22, %v11054_v43  ;;  %v11306_v22 = vld [vmem:[%s21092_s5 + $0x288] sm:$0xf] }
 0x327   : > { %v15776_v36 = vpop.f32.mrf.mxu3  ;;  %v15778_v51 = vpop.f32.mrf.mxu2 }
 0x328   : > { %21288 = vst [vmem:[#allocation21_spill] sm:$0xff] %v15778_v51 }
 0x32c   : > { %2271 = vmatmul.bf16.gmra.mxu3 %v11267_v26  ;;  %2324 = vmatmul.bf16.gmra.mxu1 %v11111_v18  ;;  %v13929_v26 = vld [vmem:[%s21092_s5 + $0x298] sm:$0xf0]  ;;  %v13887_v18 = vld [vmem:[%s21092_s5 + $0x14c] sm:$0xf] }
 0x32d   : > { %11319 = vmatmul.msk.bf16.gmra.mxu2 %vm1955_vm1, %v11055_v31  ;;  %v13875_v31 = vld [vmem:[%s21092_s5 + $0xe8] sm:$0xf0] }
 0x32f   : > { %v2232_v4 = vpop.f32.mrf.mxu3  ;;  %v2179_v46 = vpop.f32.mrf.mxu2 }
 0x330   : > { %v15782_v41 = vadd.f32 %v2232_v4, %v15485_v0  ;;  %v15785_v2 = vadd.f32 %v2179_v46, %v15678_v33  ;;  %v11128_v0 = vld [vmem:[%s21092_s5 + $0x134] sm:$0xf0]  ;;  %v11074_v33 = vld [vmem:[%s21092_s5 + $0xb0] sm:$0xf]  ;;  %v11307_v46 = vor.u32 %v13929_v26, %v11306_v22  ;;  %v11168_v22 = vld [vmem:[%s21092_s5 + $0x184] sm:$0xf0] }
 0x331   : > { %v11131_v34 = vor.u32 %v13882_v49, %v11128_v0  ;;  %v11075_v40 = vor.u32 %v13870_v28, %v11074_v33 }
 0x337   : > { %v15805_v56 = vpop.f32.mrf.mxu3  ;;  %v15807_v27 = vpop.f32.mrf.mxu2 }
 0x338   : > { %21289 = vst [vmem:[#allocation22_spill] sm:$0xff] %v15807_v27 }
 0x33c   : > { %2276 = vmatmul.bf16.gmra.mxu3 %v11287_v29  ;;  %2329 = vmatmul.bf16.gmra.mxu1 %v11131_v34 }
 0x33d   : > { %11320 = vmatmul.msk.bf16.gmra.mxu2 %vm1955_vm1, %v11075_v40 }
 0x33f   : > { %v2237_v32 = vpop.f32.mrf.mxu3  ;;  %v2184_v19 = vpop.f32.mrf.mxu2 }
 0x340   : > { %v15811_v13 = vadd.f32 %v2237_v32, %v15536_v55  ;;  %v15814_v43 = vadd.f32 %v2184_v19, %v15712_v15  ;;  %v11148_v55 = vld [vmem:[%s21092_s5 + $0x15c] sm:$0xf0]  ;;  %v11094_v15 = vld [vmem:[%s21092_s5 + $0xd8] sm:$0xf] }
 0x341   : > { %v11151_v60 = vor.u32 %v13887_v18, %v11148_v55  ;;  %v11095_v0 = vor.u32 %v13875_v31, %v11094_v15  ;;  %v13969_v31 = vld [vmem:[%s21093_s6 + $0x130] sm:$0xff] }
 0x342   : > { %3484 = vmatpush.bf16.msrb.mxu0 %v13969_v31 }
 0x347   : > { %v15834_v4 = vpop.f32.mrf.mxu3  ;;  %v15836_v1 = vpop.f32.mrf.mxu2 }
 0x348   : > { %21290 = vst [vmem:[#allocation23_spill] sm:$0xff] %v15836_v1  ;;  %v13964_v1 = vld [vmem:[%s21093_s6 + $0x108] sm:$0xff] }
 0x349   : > { %v2295_v49 = vpop.f32.mrf.mxu1 }
 0x34a   : > { %v15839_v33 = vadd.f32 %v2295_v49, %v15567_v24  ;;  %v13892_v24 = vld [vmem:[%s21092_s5 + $0x174] sm:$0xf] }
 0x34c   : > { %2281 = vmatmul.bf16.gmra.mxu3 %v11307_v46  ;;  %2334 = vmatmul.bf16.gmra.mxu1 %v11151_v60 }
 0x34d   : > { %11321 = vmatmul.msk.bf16.gmra.mxu2 %vm1955_vm1, %v11095_v0  ;;  %v13897_v0 = vld [vmem:[%s21092_s5 + $0x19c] sm:$0xf] }
 0x34f   : > { %v2242_v28 = vpop.f32.mrf.mxu3 }
 0x350   : > { %v15843_v29 = vadd.f32 %v2242_v28, %v15570_v30  ;;  %v2189_v34 = vpop.f32.mrf.mxu2  ;;  %v11114_v30 = vld [vmem:[%s21092_s5 + $0x100] sm:$0xf]  ;;  %v11188_v28 = vld [vmem:[%s21092_s5 + $0x1ac] sm:$0xf0] }
 0x351   : > { %v2297_v40 = vpop.f32.mrf.mxu1  ;;  %v15846_v32 = vadd.f32 %v2189_v34, %v15749_v9  ;;  %v13880_v9 = vld [vmem:[%s21092_s5 + $0x110] sm:$0xf0]  ;;  %v13946_v34 = vld [vmem:[%s21093_s6 + $0x78] sm:$0xff] }
 0x352   : > { %v15849_v19 = vadd.f32 %v2297_v40, %v15587_v58  ;;  %v11171_v58 = vor.u32 %v13892_v24, %v11168_v22  ;;  %v11115_v15 = vor.u32 %v13880_v9, %v11114_v30  ;;  %v11134_v40 = vld [vmem:[%s21092_s5 + $0x128] sm:$0xf]  ;;  %2762 = vmatpush.bf16.msrb.mxu3 %v13946_v34  ;;  %v11191_v22 = vor.u32 %v13897_v0, %v11188_v28  ;;  %v13943_v34 = vld [vmem:[%s21093_s6 + $0x60] sm:$0xff] }
 0x357   : > { %v15863_v26 = vpop.f32.mrf.mxu3 }
 0x358   : > { %v2191_v18 = vpop.f32.mrf.mxu2 }
 0x359   : > { %v15865_v55 = vpop.f32.mrf.mxu1  ;;  %v13968_v18 = vld [vmem:[%s21093_s6 + $0x128] sm:$0xff] }
 0x35a   : > { %3485 = vmatpush.bf16.msrb.mxu0 %v13968_v18 }
 0x35c   : > { %2339 = vmatmul.bf16.gmra.mxu1 %v11171_v58  ;;  %v13945_v58 = vld [vmem:[%s21093_s6 + $0x70] sm:$0xff] }
 0x35d   : > { %11322 = vmatmul.msk.bf16.gmra.mxu2 %vm1955_vm1, %v11115_v15  ;;  %2763 = vmatpush.bf16.msrb.mxu3 %v13945_v58  ;;  %v13944_v15 = vld [vmem:[%s21093_s6 + $0x68] sm:$0xff]  ;;  %v13890_v58 = vld [vmem:[%s21092_s5 + $0x160] sm:$0xf0] }
 0x35f   : > { %v2247_v46 = vpop.f32.mrf.mxu3 }
 0x360   : > { %v15872_v60 = vadd.f32 %v2247_v46, %v15600_v50  ;;  %v13885_v50 = vld [vmem:[%s21092_s5 + $0x138] sm:$0xf0]  ;;  %v13967_v46 = vld [vmem:[%s21093_s6 + $0x120] sm:$0xff] }
 0x361   : > { %v15874_v49 = vpop.f32.mrf.mxu1  ;;  %v11135_v9 = vor.u32 %v13885_v50, %v11134_v40  ;;  %2764 = vmatpush.bf16.msrb.mxu3 %v13944_v15  ;;  %3486 = vmatpush.bf16.msrb.mxu0 %v13967_v46  ;;  %v13966_v40 = vld [vmem:[%s21093_s6 + $0x118] sm:$0xff]  ;;  %v13902_v50 = vld [vmem:[%s21092_s5 + $0x1c4] sm:$0xf]  ;;  %v13965_v15 = vld [vmem:[%s21093_s6 + $0x110] sm:$0xff] }
 0x365   : > { %2765 = vmatpush.bf16.msrb.mxu3 %v13943_v34  ;;  %3487 = vmatpush.bf16.msrb.mxu0 %v13966_v40  ;;  %v13941_v40 = vld [vmem:[%s21093_s6 + $0x50] sm:$0xff] }
 0x367   : > { %v15891_v24 = vpop.f32.mrf.mxu3 }
 0x369   : > { %v15893_v30 = vpop.f32.mrf.mxu1  ;;  %3488 = vmatpush.bf16.msrb.mxu0 %v13965_v15 }
 0x36a   : > { %v2306_v17 = vadd.f32 %v15893_v30, %v15644_v12  ;;  %v11268_v12 = vld [vmem:[%s21092_s5 + $0x24c] sm:$0xf0]  ;;  %v13952_v30 = vld [vmem:[%s21093_s6 + $0xa8] sm:$0xff] }
 0x36c   : > { %2344 = vmatmul.bf16.gmra.mxu1 %v11191_v22  ;;  %v13942_v22 = vld [vmem:[%s21093_s6 + $0x58] sm:$0xff] }
 0x36d   : > { %11323 = vmatmul.msk.bf16.gmra.mxu2 %vm1955_vm1, %v11135_v9  ;;  %v11154_v9 = vld [vmem:[%s21092_s5 + $0x150] sm:$0xf]  ;;  %2766 = vmatpush.bf16.msrb.mxu3 %v13942_v22  ;;  %v13963_v22 = vld [vmem:[%s21093_s6 + $0x100] sm:$0xff] }
 0x36e   : > { %v11155_v34 = vor.u32 %v13890_v58, %v11154_v9  ;;  %3489 = vmatpush.bf16.msrb.mxu0 %v13964_v1  ;;  %v13939_v1 = vld [vmem:[%s21093_s6 + $0x40] sm:$0xff] }
 0x36f   : > { %v2252_v31 = vpop.f32.mrf.mxu3 }
 0x370   : > { %v15909_v0 = vadd.f32 %v2252_v31, %v15649_v59  ;;  %v11208_v59 = vld [vmem:[%s21092_s5 + $0x1d4] sm:$0xf0] }
 0x371   : > { %v15911_v28 = vpop.f32.mrf.mxu1  ;;  %v11211_v31 = vor.u32 %v13902_v50, %v11208_v59  ;;  %2767 = vmatpush.bf16.msrb.mxu3 %v13941_v40  ;;  %v13940_v50 = vld [vmem:[%s21093_s6 + $0x48] sm:$0xff]  ;;  %v11174_v40 = vld [vmem:[%s21092_s5 + $0x178] sm:$0xf] }
 0x372   : > { %3490 = vmatpush.bf16.msrb.mxu0 %v13963_v22 }
 0x375   : > { %2768 = vmatpush.bf16.msrb.mxu3 %v13940_v50  ;;  %v13895_v50 = vld [vmem:[%s21092_s5 + $0x188] sm:$0xf0] }
 0x376   : > { %v11175_v27 = vor.u32 %v13895_v50, %v11174_v40 }
 0x377   : > { %v15934_v18 = vpop.f32.mrf.mxu3 }
 0x379   : > { %v15939_v46 = vpop.f32.mrf.mxu1  ;;  %2769 = vmatpush.bf16.msrb.mxu3 %v13939_v1 }
 0x37c   : > { %2349 = vmatmul.bf16.gmra.mxu1 %v11211_v31 }
 0x37d   : > { %11324 = vmatmul.msk.bf16.gmra.mxu2 %vm1955_vm1, %v11155_v34  ;;  %v13907_v34 = vld [vmem:[%s21092_s5 + $0x1ec] sm:$0xf] }
 0x37f   : > { %v2257_v59 = vpop.f32.mrf.mxu3 }
 0x380   : > { %v15955_v9 = vadd.f32 %v2257_v59, %v15685_v20  ;;  %v2388_v58 = vpop.f32.mrf.mxu2  ;;  %v11228_v20 = vld [vmem:[%s21092_s5 + $0x1fc] sm:$0xf0] }
 0x381   : > { %v15957_v15 = vpop.f32.mrf.mxu1  ;;  %v2389_v31 = vadd.f32 %v2388_v58, %v15839_v33  ;;  %v11231_v33 = vor.u32 %v13907_v34, %v11228_v20  ;;  %v2301_v20 = vadd.f32 %v15865_v55, %v15596_v3  ;;  %v13900_v3 = vld [vmem:[%s21092_s5 + $0x1b0] sm:$0xf0] }
 0x382   : > { %21291 = vst [vmem:[#allocation24_spill] sm:$0xff] %v15955_v9 }
 0x383   : > { %v2472_v58 = vpack.c.bf16 %v2389_v31, %v2389_v31 }
 0x385   : > { %v2563_v51 = vunpack.c.l.b16 %v2472_v58 }
 0x387   : > { %v15975_v59 = vpop.f32.mrf.mxu3 }
 0x388   : > { %21292 = vst [vmem:[#allocation25_spill] sm:$0xff] %v15975_v59  ;;  %v2390_v22 = vpop.f32.mrf.mxu2 }
 0x389   : > { %v2391_v1 = vadd.f32 %v2390_v22, %v15849_v19  ;;  %v15978_v62 = vpop.f32.mrf.mxu1 }
 0x38b   : > { %v2473_v47 = vpack.c.bf16 %v2391_v1, %v2391_v1 }
 0x38c   : > { %2354 = vmatmul.bf16.gmra.mxu1 %v11231_v33 }
 0x38d   : > { %v2564_v63 = vunpack.c.l.b16 %v2473_v47  ;;  %11325 = vmatmul.msk.bf16.gmra.mxu2 %vm1955_vm1, %v11175_v27  ;;  %v2303_v27 = vadd.f32 %v15874_v49, %v15628_v16 }
 0x38f   : > { %v15981_v5 = vpack.c.b16 %v2564_v63, %v2563_v51  ;;  %v2262_v37 = vpop.f32.mrf.mxu3  ;;  %v13912_v63 = vld [vmem:[%s21092_s5 + $0x214] sm:$0xf]  ;;  %v11194_v51 = vld [vmem:[%s21092_s5 + $0x1a0] sm:$0xf] }
 0x390   : > { %v15984_v9 = vadd.f32 %v2262_v37, %v15722_v42  ;;  %v2393_v59 = vpop.f32.mrf.mxu2  ;;  %v11248_v37 = vld [vmem:[%s21092_s5 + $0x224] sm:$0xf0] }
 0x391   : > { %v15986_v34 = vpop.f32.mrf.mxu1  ;;  %v2603_v19 = vshrl.u32 %v15981_v5, 16  ;;  %v2605_v31 = vshll.u32 %v15981_v5, 16  ;;  %v2394_v50 = vadd.f32 %v2393_v59, %v2301_v20  ;;  %v11251_v22 = vor.u32 %v13912_v63, %v11248_v37 }
 0x392   : > { %21293 = vst [vmem:[#allocation26_spill] sm:$0xff] %v15984_v9  ;;  %v11195_v20 = vor.u32 %v13900_v3, %v11194_v51  ;;  %v3398_v51 = vrot.slane %v15981_v5, 2 }
 0x393   : > { %v3174_v40 = vrot.slane %v2603_v19, 1  ;;  %v3175_v47 = vrot.slane %v2605_v31, 2  ;;  %v2474_v33 = vpack.c.bf16 %v2394_v50, %v2394_v50 }
 0x395   : > { %v3176_v42 = vor.u32 %v3175_v47, %v3174_v40  ;;  %v2565_v47 = vunpack.c.l.b16 %v2474_v33 }
 0x397   : > { %v16006_v55 = vpop.f32.mrf.mxu3 }
 0x398   : > { %21294 = vst [vmem:[#allocation27_spill] sm:$0xff] %v16006_v55  ;;  %v2395_v59 = vpop.f32.mrf.mxu2  ;;  %v2607_v55 = vrot.slane %v2605_v31, 1 }
 0x399   : > { %v2396_v58 = vadd.f32 %v2395_v59, %v2303_v27  ;;  %v16008_v1 = vpop.f32.mrf.mxu1 }
 0x39a   : > { %v2608_v31 = vor.u32 %v2607_v55, %v2603_v19  ;;  %v11214_v19 = vld [vmem:[%s21092_s5 + $0x1c8] sm:$0xf]  ;;  %v13905_v55 = vld [vmem:[%s21092_s5 + $0x1d8] sm:$0xf0] }
 0x39b   : > { %v2475_v40 = vpack.c.bf16 %v2396_v58, %v2396_v58  ;;  %v11215_v14 = vor.u32 %v13905_v55, %v11214_v19 }
 0x39c   : > { %2359 = vmatmul.bf16.gmra.mxu1 %v11251_v22 }
 0x39d   : > { %v2566_v9 = vunpack.c.l.b16 %v2475_v40  ;;  %11326 = vmatmul.msk.bf16.gmra.mxu2 %vm1955_vm1, %v11195_v20 }
 0x39f   : > { %v16014_v16 = vpack.c.b16 %v2566_v9, %v2565_v47  ;;  %v2267_v49 = vpop.f32.mrf.mxu3  ;;  %v13953_v9 = vld [vmem:[%s21093_s6 + $0xb0] sm:$0xff]  ;;  %v13917_v47 = vld [vmem:[%s21092_s5 + $0x23c] sm:$0xf] }
 0x3a0   : > { %v16017_v50 = vadd.f32 %v2267_v49, %v15756_v7  ;;  %v2398_v63 = vpop.f32.mrf.mxu2  ;;  %3064 = vmatpush.bf16.msra.mxu1 %v13953_v9  ;;  %v11271_v9 = vor.u32 %v13917_v47, %v11268_v12 }
 0x3a1   : > { %v16019_v37 = vpop.f32.mrf.mxu1  ;;  %v3399_v3 = vrot.slane %v16014_v16, 2  ;;  %v2610_v27 = vshll.u32 %v16014_v16, 16  ;;  %v2614_v59 = vshrl.u32 %v16014_v16, 16  ;;  %v2399_v20 = vadd.f32 %v2398_v63, %v2306_v17 }
 0x3a2   : > { %v2308_v63 = vadd.f32 %v15911_v28, %v15674_v10 }
 0x3a3   : > { %v3400_v7 = vsel %vm3397_vm2, %v3398_v51, %v3399_v3  ;;  %v2612_v22 = vrot.slane %v2610_v27, 1  ;;  %v3178_v33 = vrot.slane %v2610_v27, 2  ;;  %v3177_v58 = vrot.slane %v2614_v59, 1 }
 0x3a4   : > { %3491 = vmatmul.bf16.vlgmr.msrb.gmra.mxu0 %v3400_v7  ;;  %3065 = vmatpush.bf16.msra.mxu1 %v13952_v30  ;;  %v2476_v7 = vpack.c.bf16 %v2399_v20, %v2399_v20 }
 0x3a5   : > { %v2613_v40 = vsel %vm2601_vm3, %v2608_v31, %v2612_v22  ;;  %v3179_v49 = vor.u32 %v3178_v33, %v3177_v58  ;;  %v13951_v33 = vld [vmem:[%s21093_s6 + $0xa0] sm:$0xff] }
 0x3a6   : > { %2770 = vmatmul.bf16.vlgmr.msrb.gmra.mxu3 %v2613_v40  ;;  %v2567_v10 = vunpack.c.l.b16 %v2476_v7 }
 0x3a7   : > { %v16049_v51 = vpop.f32.mrf.mxu3  ;;  %v16052_v17 = vsel %vm3173_vm4, %v3176_v42, %v3179_v49  ;;  %v13950_v42 = vld [vmem:[%s21093_s6 + $0x98] sm:$0xff] }
 0x3a8   : > { %21295 = vst [vmem:[#allocation28_spill] sm:$0xff] %v16049_v51  ;;  %v2400_v27 = vpop.f32.mrf.mxu2  ;;  %3066 = vmatpush.bf16.msra.mxu1 %v13951_v33 }
 0x3a9   : > { %v2401_v31 = vadd.f32 %v2400_v27, %v2308_v63  ;;  %v16054_v40 = vpop.f32.mrf.mxu1  ;;  %v13949_v27 = vld [vmem:[%s21093_s6 + $0x90] sm:$0xff] }
 0x3ab   : > { %v2477_v58 = vpack.c.bf16 %v2401_v31, %v2401_v31 }
 0x3ac   : > { %2364 = vmatmul.bf16.gmra.mxu1 %v11271_v9  ;;  %v2311_v9 = vadd.f32 %v15939_v46, %v15682_v57  ;;  %v11288_v57 = vld [vmem:[%s21092_s5 + $0x274] sm:$0xf0]  ;;  %v13948_v46 = vld [vmem:[%s21093_s6 + $0x88] sm:$0xff] }
 0x3ad   : > { %v2568_v28 = vunpack.c.l.b16 %v2477_v58  ;;  %11327 = vmatmul.msk.bf16.gmra.mxu2 %vm1955_vm1, %v11215_v14  ;;  %3067 = vmatpush.bf16.msra.mxu1 %v13950_v42  ;;  %v13922_v42 = vld [vmem:[%s21092_s5 + $0x264] sm:$0xf] }
 0x3af   : > { %v16063_v20 = vpack.c.b16 %v2568_v28, %v2567_v10  ;;  %v2272_v47 = vpop.f32.mrf.mxu3 }
 0x3b0   : > { %v16066_v12 = vadd.f32 %v2272_v47, %v15785_v2  ;;  %v2403_v30 = vpop.f32.mrf.mxu2  ;;  %v2616_v2 = vor.u32 %v2614_v59, %v2612_v22  ;;  %v13910_v59 = vld [vmem:[%s21092_s5 + $0x200] sm:$0xf0]  ;;  %v2313_v47 = vadd.f32 %v15957_v15, %v15708_v21 }
 0x3b1   : > { %v16068_v19 = vpop.f32.mrf.mxu1  ;;  %v3401_v55 = vrot.slane %v16063_v20, 2  ;;  %v2618_v63 = vshll.u32 %v16063_v20, 16  ;;  %v2622_v14 = vshrl.u32 %v16063_v20, 16  ;;  %3068 = vmatpush.bf16.msra.mxu1 %v13949_v27  ;;  %v2404_v10 = vadd.f32 %v2403_v30, %v2311_v9 }
 0x3b2   : > { %21296 = vst [vmem:[#allocation29_spill] sm:$0xff] %v16066_v12  ;;  %v11291_v27 = vor.u32 %v13922_v42, %v11288_v57 }
 0x3b3   : > { %v16079_v7 = vsel %vm3397_vm2, %v3399_v3, %v3401_v55  ;;  %v2620_v31 = vrot.slane %v2618_v63, 1  ;;  %v3181_v33 = vrot.slane %v2622_v14, 1  ;;  %v3182_v58 = vrot.slane %v2618_v63, 2  ;;  %v11234_v3 = vld [vmem:[%s21092_s5 + $0x1f0] sm:$0xf] }
 0x3b4   : > { %21297 = vst [vmem:[#allocation30_spill] sm:$0xff] %v16079_v7  ;;  %3496 = vmatmul.bf16.gmra.mxu0 %v16079_v7  ;;  %v11235_v51 = vor.u32 %v13910_v59, %v11234_v3 }
 0x3b5   : > { %v16083_v28 = vsel %vm2601_vm3, %v2616_v2, %v2620_v31  ;;  %v3183_v22 = vor.u32 %v3182_v58, %v3181_v33  ;;  %3069 = vmatpush.bf16.msra.mxu1 %v13948_v46  ;;  %v2478_v2 = vpack.c.bf16 %v2404_v10, %v2404_v10  ;;  %v13947_v33 = vld [vmem:[%s21093_s6 + $0x80] sm:$0xff] }
 0x3b6   : > { %21298 = vst [vmem:[#allocation31_spill] sm:$0xff] %v16083_v28  ;;  %2775 = vmatmul.bf16.gmra.mxu3 %v16083_v28 }
 0x3b7   : > { %v16103_v30 = vpop.f32.mrf.mxu3  ;;  %v16106_v9 = vsel %vm3173_vm4, %v3179_v49, %v3183_v22  ;;  %v2569_v21 = vunpack.c.l.b16 %v2478_v2 }
 0x3b8   : > { %21299 = vst [vmem:[#allocation32_spill] sm:$0xff] %v16103_v30  ;;  %v2405_v63 = vpop.f32.mrf.mxu2 }
 0x3b9   : > { %v2406_v7 = vadd.f32 %v2405_v63, %v2313_v47  ;;  %v16108_v28 = vpop.f32.mrf.mxu1  ;;  %3070 = vmatpush.bf16.msra.mxu1 %v13947_v33  ;;  %v2316_v47 = vadd.f32 %v15978_v62, %v15716_v25  ;;  %v2624_v63 = vor.u32 %v2622_v14, %v2620_v31  ;;  %v11308_v25 = vld [vmem:[%s21092_s5 + $0x29c] sm:$0xf0]  ;;  %v11254_v62 = vld [vmem:[%s21092_s5 + $0x218] sm:$0xf]  ;;  %v2318_v31 = vadd.f32 %v15986_v34, %v15745_v44 }
 0x3ba   : > { %v13962_v44 = vld [vmem:[%s21093_s6 + $0xf8] sm:$0xff] }
 0x3bb   : > { %v2479_v58 = vpack.c.bf16 %v2406_v7, %v2406_v7  ;;  %3287 = vmatpush.bf16.msra.mxu2 %v13962_v44 }
 0x3bc   : > { %2369 = vmatmul.bf16.gmra.mxu1 %v11291_v27 }
 0x3bd   : > { %v2570_v15 = vunpack.c.l.b16 %v2479_v58  ;;  %11328 = vmatmul.msk.bf16.gmra.mxu2 %vm1955_vm1, %v11235_v51 }
 0x3bf   : > { %v16114_v42 = vpack.c.b16 %v2570_v15, %v2569_v21  ;;  %v2277_v49 = vpop.f32.mrf.mxu3  ;;  %v13927_v21 = vld [vmem:[%s21092_s5 + $0x28c] sm:$0xf] }
 0x3c0   : > { %v16117_v10 = vadd.f32 %v2277_v49, %v15814_v43  ;;  %v2408_v57 = vpop.f32.mrf.mxu2 }
 0x3c1   : > { %21300 = vst [vmem:[#allocation33_spill] sm:$0xff] %v16114_v42  ;;  %v16119_v46 = vpop.f32.mrf.mxu1  ;;  %v3403_v3 = vrot.slane %v16114_v42, 2  ;;  %v2626_v59 = vshll.u32 %v16114_v42, 16  ;;  %v2630_v7 = vshrl.u32 %v16114_v42, 16  ;;  %v2409_v33 = vadd.f32 %v2408_v57, %v2316_v47 }
 0x3c2   : > { %21301 = vst [vmem:[#allocation34_spill] sm:$0xff] %v16117_v10  ;;  %v11311_v57 = vor.u32 %v13927_v21, %v11308_v25  ;;  %v13961_v25 = vld [vmem:[%s21093_s6 + $0xf0] sm:$0xff] }
 0x3c3   : > { %v16127_v51 = vsel %vm3397_vm2, %v3401_v55, %v3403_v3  ;;  %v2628_v27 = vrot.slane %v2626_v59, 1  ;;  %v3185_v2 = vrot.slane %v2630_v7, 1  ;;  %v3186_v43 = vrot.slane %v2626_v59, 2  ;;  %v13915_v55 = vld [vmem:[%s21092_s5 + $0x228] sm:$0xf0]  ;;  %3288 = vmatpush.bf16.msra.mxu2 %v13961_v25 }
 0x3c4   : > { %21302 = vst [vmem:[#allocation35_spill] sm:$0xff] %v16127_v51  ;;  %3501 = vmatmul.bf16.gmra.mxu0 %v16127_v51  ;;  %v2480_v47 = vpack.c.bf16 %v2409_v33, %v2409_v33 }
 0x3c5   : > { %v16131_v58 = vsel %vm2601_vm3, %v2624_v63, %v2628_v27  ;;  %v3187_v14 = vor.u32 %v3186_v43, %v3185_v2 }
 0x3c6   : > { %21303 = vst [vmem:[#allocation36_spill] sm:$0xff] %v16131_v58  ;;  %2780 = vmatmul.bf16.gmra.mxu3 %v16131_v58  ;;  %v11255_v58 = vor.u32 %v13915_v55, %v11254_v62  ;;  %v2571_v10 = vunpack.c.l.b16 %v2480_v47  ;;  %v2632_v62 = vor.u32 %v2630_v7, %v2628_v27 }
 0x3c7   : > { %v16148_v15 = vpop.f32.mrf.mxu3  ;;  %v16151_v59 = vsel %vm3173_vm4, %v3183_v22, %v3187_v14 }
 0x3c8   : > { %v2410_v49 = vpop.f32.mrf.mxu2  ;;  %21304 = vst [vmem:[#allocation37_spill] sm:$0xff] %v16151_v59 }
 0x3c9   : > { %v2411_v63 = vadd.f32 %v2410_v49, %v2318_v31  ;;  %v16153_v51 = vpop.f32.mrf.mxu1 }
 0x3cb   : > { %v2481_v30 = vpack.c.bf16 %v2411_v63, %v2411_v63 }
 0x3cc   : > { %2374 = vmatmul.bf16.gmra.mxu1 %v11311_v57 }
 0x3cd   : > { %v2572_v12 = vunpack.c.l.b16 %v2481_v30  ;;  %11329 = vmatmul.msk.bf16.gmra.mxu2 %vm1955_vm1, %v11255_v58 }
 0x3cf   : > { %v16159_v34 = vpack.c.b16 %v2572_v12, %v2571_v10  ;;  %v2282_v2 = vpop.f32.mrf.mxu3  ;;  %v2137_v12 = vadd.f32 %v15456_v8, %v15335_v38  ;;  %v13960_v38 = vld [vmem:[%s21093_s6 + $0xe8] sm:$0xff]  ;;  %v11274_v8 = vld [vmem:[%s21092_s5 + $0x240] sm:$0xf] }
 0x3d0   : > { %v16162_v22 = vadd.f32 %v2282_v2, %v15846_v32  ;;  %v2413_v43 = vpop.f32.mrf.mxu2  ;;  %v2321_v32 = vadd.f32 %v16008_v1, %v15753_v39  ;;  %v13920_v39 = vld [vmem:[%s21092_s5 + $0x250] sm:$0xf0]  ;;  %3289 = vmatpush.bf16.msra.mxu2 %v13960_v38 }
 0x3d1   : > { %21305 = vst [vmem:[#allocation38_spill] sm:$0xff] %v16159_v34  ;;  %v16164_v33 = vpop.f32.mrf.mxu1  ;;  %v3405_v21 = vrot.slane %v16159_v34, 2  ;;  %v2634_v30 = vshll.u32 %v16159_v34, 16  ;;  %v2638_v58 = vshrl.u32 %v16159_v34, 16  ;;  %v2230_v57 = vadd.f32 %v15776_v36, %v2137_v12 }
 0x3d2   : > { %v2414_v47 = vadd.f32 %v2413_v43, %v2321_v32  ;;  %v11275_v25 = vor.u32 %v13920_v39, %v11274_v8  ;;  %v2978_v12 = vrot.slane %v15981_v5, 1 }
 0x3d3   : > { %v16177_v10 = vsel %vm3397_vm2, %v3403_v3, %v3405_v21  ;;  %v2636_v55 = vrot.slane %v2634_v30, 1  ;;  %v3189_v31 = vrot.slane %v2638_v58, 1  ;;  %v3190_v49 = vrot.slane %v2634_v30, 2 }
 0x3d4   : > { %21306 = vst [vmem:[#allocation39_spill] sm:$0xff] %v16177_v10  ;;  %3506 = vmatmul.bf16.gmra.mxu0 %v16177_v10  ;;  %v2323_v36 = vadd.f32 %v16019_v37, %v2230_v57  ;;  %v2979_v3 = vrot.slane %v16014_v16, 1  ;;  %v2482_v2 = vpack.c.bf16 %v2414_v47, %v2414_v47  ;;  %v13959_v37 = vld [vmem:[%s21093_s6 + $0xe0] sm:$0xff]  ;;  %v21338_v10 = vld [vmem:[#allocation25_spill] sm:$0xff] }
 0x3d5   : > { %v16182_v63 = vsel %vm2601_vm3, %v2632_v62, %v2636_v55  ;;  %v3191_v1 = vor.u32 %v3190_v49, %v3189_v31  ;;  %3290 = vmatpush.bf16.msra.mxu2 %v13959_v37 }
 0x3d6   : > { %2785 = vmatmul.bf16.gmra.mxu3 %v16182_v63  ;;  %v2980_v62 = vsel %vm2977_vm5, %v2978_v12, %v2979_v3  ;;  %v2573_v31 = vunpack.c.l.b16 %v2482_v2  ;;  %v2326_v2 = vadd.f32 %v16054_v40, %v15782_v41  ;;  %v13925_v41 = vld [vmem:[%s21092_s5 + $0x278] sm:$0xf0] }
 0x3d7   : > { %v2284_v7 = vpop.f32.mrf.mxu3  ;;  %v16197_v44 = vsel %vm3173_vm4, %v3187_v14, %v3191_v1  ;;  %v13958_v14 = vld [vmem:[%s21093_s6 + $0xd8] sm:$0xff] }
 0x3d8   : > { %v2415_v27 = vpop.f32.mrf.mxu2  ;;  %21307 = vst [vmem:[#allocation40_spill] sm:$0xff] %v16197_v44  ;;  %v13957_v7 = vld [vmem:[%s21093_s6 + $0xd0] sm:$0xff] }
 0x3d9   : > { %v2416_v43 = vadd.f32 %v2415_v27, %v2323_v36  ;;  %v16199_v30 = vpop.f32.mrf.mxu1  ;;  %3291 = vmatpush.bf16.msra.mxu2 %v13958_v14  ;;  %v2142_v27 = vadd.f32 %v15519_v35, %v15365_v6  ;;  %v13956_v6 = vld [vmem:[%s21093_s6 + $0xc8] sm:$0xff] }
 0x3da   : > { %v11294_v35 = vld [vmem:[%s21092_s5 + $0x268] sm:$0xf] }
 0x3db   : > { %v2483_v32 = vpack.c.bf16 %v2416_v43, %v2416_v43  ;;  %v2640_v43 = vor.u32 %v2638_v58, %v2636_v55 }
 0x3dc   : > { %3071 = vmatmul.bf16.vlgmr.msra.gmra.mxu1 %v2980_v62  ;;  %v2235_v62 = vadd.f32 %v15805_v56, %v2142_v27  ;;  %v13955_v27 = vld [vmem:[%s21093_s6 + $0xc0] sm:$0xff] }
 0x3dd   : > { %v2574_v49 = vunpack.c.l.b16 %v2483_v32  ;;  %11330 = vmatmul.msk.bf16.gmra.mxu2 %vm1955_vm1, %v11275_v25 }
 0x3de   : > { %3292 = vmatpush.bf16.msra.mxu2 %v13957_v7  ;;  %v2328_v56 = vadd.f32 %v16068_v19, %v2235_v62  ;;  %v11295_v7 = vor.u32 %v13925_v41, %v11294_v35  ;;  %v2331_v41 = vadd.f32 %v16108_v28, %v15811_v13 }
 0x3df   : > { %v16210_v57 = vpack.c.b16 %v2574_v49, %v2573_v31 }
 0x3e0   : > { %v2418_v47 = vpop.f32.mrf.mxu2 }
 0x3e1   : > { %21308 = vst [vmem:[#allocation41_spill] sm:$0xff] %v16210_v57  ;;  %v16212_v38 = vpop.f32.mrf.mxu1  ;;  %v3407_v8 = vrot.slane %v16210_v57, 2  ;;  %v2642_v39 = vshll.u32 %v16210_v57, 16  ;;  %v2646_v36 = vshrl.u32 %v16210_v57, 16  ;;  %v2419_v31 = vadd.f32 %v2418_v47, %v2326_v2 }
 0x3e2   : > { %3293 = vmatpush.bf16.msra.mxu2 %v13956_v6 }
 0x3e3   : > { %v16225_v25 = vsel %vm3397_vm2, %v3405_v21, %v3407_v8  ;;  %v2644_v12 = vrot.slane %v2642_v39, 1  ;;  %v3193_v37 = vrot.slane %v2646_v36, 1  ;;  %v3194_v32 = vrot.slane %v2642_v39, 2 }
 0x3e4   : > { %21309 = vst [vmem:[#allocation42_spill] sm:$0xff] %v16225_v25  ;;  %3511 = vmatmul.bf16.gmra.mxu0 %v16225_v25  ;;  %v2981_v21 = vrot.slane %v16063_v20, 1  ;;  %v2484_v14 = vpack.c.bf16 %v2419_v31, %v2419_v31 }
 0x3e5   : > { %v16230_v49 = vsel %vm2601_vm3, %v2640_v43, %v2644_v12  ;;  %v3195_v40 = vor.u32 %v3194_v32, %v3193_v37 }
 0x3e6   : > { %21310 = vst [vmem:[#allocation43_spill] sm:$0xff] %v16230_v49  ;;  %2790 = vmatmul.bf16.gmra.mxu3 %v16230_v49  ;;  %v16253_v43 = vsel %vm2977_vm5, %v2979_v3, %v2981_v21  ;;  %3294 = vmatpush.bf16.msra.mxu2 %v13955_v27  ;;  %v2575_v19 = vunpack.c.l.b16 %v2484_v14  ;;  %v2147_v3 = vadd.f32 %v15562_v23, %v15393_v61  ;;  %v11314_v61 = vld [vmem:[%s21092_s5 + $0x290] sm:$0xf]  ;;  %v13930_v23 = vld [vmem:[%s21092_s5 + $0x2a0] sm:$0xf0] }
 0x3e7   : > { %v16245_v55 = vsel %vm3173_vm4, %v3191_v1, %v3195_v40 }
 0x3e8   : > { %v2420_v58 = vpop.f32.mrf.mxu2  ;;  %21311 = vst [vmem:[#allocation44_spill] sm:$0xff] %v16245_v55  ;;  %v2240_v27 = vadd.f32 %v15834_v4, %v2147_v3 }
 0x3e9   : > { %v2421_v47 = vadd.f32 %v2420_v58, %v2328_v56  ;;  %v16247_v39 = vpop.f32.mrf.mxu1  ;;  %v2648_v58 = vor.u32 %v2646_v36, %v2644_v12 }
 0x3ea   : > { %v2333_v28 = vadd.f32 %v16119_v46, %v2240_v27 }
 0x3eb   : > { %v2485_v2 = vpack.c.bf16 %v2421_v47, %v2421_v47 }
 0x3ec   : > { %3076 = vmatmul.bf16.gmra.mxu1 %v16253_v43 }
 0x3ed   : > { %v2576_v37 = vunpack.c.l.b16 %v2485_v2  ;;  %11331 = vmatmul.msk.bf16.gmra.mxu2 %vm1955_vm1, %v11295_v7 }
 0x3ef   : > { %v16257_v1 = vpack.c.b16 %v2576_v37, %v2575_v19 }
 0x3f0   : > { %v2423_v32 = vpop.f32.mrf.mxu2 }
 0x3f1   : > { %v16259_v62 = vpop.f32.mrf.mxu1  ;;  %v3409_v31 = vrot.slane %v16257_v1, 2  ;;  %v2650_v6 = vshll.u32 %v16257_v1, 16  ;;  %v2654_v35 = vshrl.u32 %v16257_v1, 16  ;;  %v2424_v2 = vadd.f32 %v2423_v32, %v2331_v41 }
 0x3f3   : > { %v16269_v56 = vsel %vm3397_vm2, %v3407_v8, %v3409_v31  ;;  %v2652_v14 = vrot.slane %v2650_v6, 1  ;;  %v3197_v47 = vrot.slane %v2654_v35, 1  ;;  %v3198_v7 = vrot.slane %v2650_v6, 2 }
 0x3f4   : > { %21312 = vst [vmem:[#allocation45_spill] sm:$0xff] %v16269_v56  ;;  %3516 = vmatmul.bf16.gmra.mxu0 %v16269_v56  ;;  %v2983_v8 = vrot.slane %v16114_v42, 1  ;;  %v2486_v12 = vpack.c.bf16 %v2424_v2, %v2424_v2  ;;  %v11315_v6 = vor.u32 %v13930_v23, %v11314_v61  ;;  %v2336_v23 = vadd.f32 %v16153_v51, %v15843_v29 }
 0x3f5   : > { %v16274_v19 = vsel %vm2601_vm3, %v2648_v58, %v2652_v14  ;;  %v3199_v13 = vor.u32 %v3198_v7, %v3197_v47  ;;  %v2985_v29 = vrot.slane %v16159_v34, 1 }
 0x3f6   : > { %21313 = vst [vmem:[#allocation46_spill] sm:$0xff] %v16274_v19  ;;  %2795 = vmatmul.bf16.gmra.mxu3 %v16274_v19  ;;  %v16291_v41 = vsel %vm2977_vm5, %v2981_v21, %v2983_v8  ;;  %v2577_v58 = vunpack.c.l.b16 %v2486_v12  ;;  %v2152_v21 = vadd.f32 %v15589_v48, %v15429_v54 }
 0x3f7   : > { %v16286_v36 = vsel %vm3173_vm4, %v3195_v40, %v3199_v13 }
 0x3f8   : > { %v2425_v4 = vpop.f32.mrf.mxu2  ;;  %21314 = vst [vmem:[#allocation47_spill] sm:$0xff] %v16286_v36 }
 0x3f9   : > { %v2426_v37 = vadd.f32 %v2425_v4, %v2333_v28  ;;  %v16288_v32 = vpop.f32.mrf.mxu1  ;;  %v2656_v4 = vor.u32 %v2654_v35, %v2652_v14 }
 0x3fb   : > { %v2487_v3 = vpack.c.bf16 %v2426_v37, %v2426_v37 }
 0x3fc   : > { %3081 = vmatmul.bf16.gmra.mxu1 %v16291_v41 }
 0x3fd   : > { %v2578_v47 = vunpack.c.l.b16 %v2487_v3  ;;  %11332 = vmatmul.msk.bf16.gmra.mxu2 %vm1955_vm1, %v11315_v6  ;;  %v2245_v3 = vadd.f32 %v15863_v26, %v2152_v21 }
 0x3ff   : > { %v16295_v46 = vpack.c.b16 %v2578_v47, %v2577_v58  ;;  %v2338_v48 = vadd.f32 %v16164_v33, %v2245_v3 }
 0x400   : > { %v2428_v7 = vpop.f32.mrf.mxu2 }
 0x401   : > { %v16297_v40 = vpop.f32.mrf.mxu1  ;;  %v3411_v27 = vrot.slane %v16295_v46, 2  ;;  %v2658_v2 = vshll.u32 %v16295_v46, 16  ;;  %v2662_v61 = vshrl.u32 %v16295_v46, 16  ;;  %v2429_v58 = vadd.f32 %v2428_v7, %v2336_v23 }
 0x402   : > { %v16323_v7 = vsel %vm2977_vm5, %v2983_v8, %v2985_v29  ;;  %v2157_v8 = vadd.f32 %v15630_v11, %v15491_v45 }
 0x403   : > { %v16307_v28 = vsel %vm3397_vm2, %v3409_v31, %v3411_v27  ;;  %v2660_v12 = vrot.slane %v2658_v2, 1  ;;  %v3201_v37 = vrot.slane %v2662_v61, 1  ;;  %v3202_v6 = vrot.slane %v2658_v2, 2  ;;  %21318 = vst [vmem:[#allocation51_spill] sm:$0xff] %v16323_v7 }
 0x404   : > { %21315 = vst [vmem:[#allocation48_spill] sm:$0xff] %v16307_v28  ;;  %3521 = vmatmul.bf16.gmra.mxu0 %v16307_v28  ;;  %v2488_v35 = vpack.c.bf16 %v2429_v58, %v2429_v58  ;;  %v2341_v58 = vadd.f32 %v16199_v30, %v15872_v60  ;;  %v2987_v60 = vrot.slane %v16210_v57, 1 }
 0x405   : > { %v16312_v47 = vsel %vm2601_vm3, %v2656_v4, %v2660_v12  ;;  %v3203_v54 = vor.u32 %v3202_v6, %v3201_v37 }
 0x406   : > { %21316 = vst [vmem:[#allocation49_spill] sm:$0xff] %v16312_v47  ;;  %2800 = vmatmul.bf16.gmra.mxu3 %v16312_v47  ;;  %v2579_v21 = vunpack.c.l.b16 %v2488_v35 }
 0x407   : > { %v16318_v31 = vsel %vm3173_vm4, %v3199_v13, %v3203_v54 }
 0x408   : > { %v2430_v51 = vpop.f32.mrf.mxu2  ;;  %21317 = vst [vmem:[#allocation50_spill] sm:$0xff] %v16318_v31 }
 0x409   : > { %v2431_v14 = vadd.f32 %v2430_v51, %v2338_v48  ;;  %v16320_v2 = vpop.f32.mrf.mxu1 }
 0x40b   : > { %v2489_v26 = vpack.c.bf16 %v2431_v14, %v2431_v14 }
 0x40c   : > { %3086 = vmatmul.bf16.gmra.mxu1 %v16323_v7 }
 0x40d   : > { %v2580_v23 = vunpack.c.l.b16 %v2489_v26  ;;  %3295 = vmatmul.bf16.vlgmr.msra.gmra.mxu2 %v16052_v17  ;;  %v2664_v17 = vor.u32 %v2662_v61, %v2660_v12  ;;  %v2250_v26 = vadd.f32 %v15891_v24, %v2157_v8  ;;  %v16356_v8 = vsel %vm2977_vm5, %v2985_v29, %v2987_v60 }
 0x40e   : > { %21322 = vst [vmem:[#allocation55_spill] sm:$0xff] %v16356_v8 }
 0x40f   : > { %v16327_v33 = vpack.c.b16 %v2580_v23, %v2579_v21  ;;  %v2343_v11 = vadd.f32 %v16212_v38, %v2250_v26 }
 0x410   : > { %v2433_v4 = vpop.f32.mrf.mxu2 }
 0x411   : > { %v16329_v37 = vpop.f32.mrf.mxu1  ;;  %v3413_v13 = vrot.slane %v16327_v33, 2  ;;  %v2666_v6 = vshll.u32 %v16327_v33, 16  ;;  %v2670_v3 = vshrl.u32 %v16327_v33, 16  ;;  %v2434_v21 = vadd.f32 %v2433_v4, %v2341_v58 }
 0x413   : > { %v16339_v48 = vsel %vm3397_vm2, %v3411_v27, %v3413_v13  ;;  %v2668_v51 = vrot.slane %v2666_v6, 1  ;;  %v3205_v35 = vrot.slane %v2670_v3, 1  ;;  %v3206_v14 = vrot.slane %v2666_v6, 2 }
 0x414   : > { %21319 = vst [vmem:[#allocation52_spill] sm:$0xff] %v16339_v48  ;;  %3526 = vmatmul.bf16.gmra.mxu0 %v16339_v48  ;;  %v2490_v61 = vpack.c.bf16 %v2434_v21, %v2434_v21  ;;  %v2162_v21 = vadd.f32 %v15676_v52, %v15540_v53  ;;  %v13938_v52 = vld [vmem:[%s21093_s6 + $0x38] sm:$0xff] }
 0x415   : > { %v16344_v23 = vsel %vm2601_vm3, %v2664_v17, %v2668_v51  ;;  %v3207_v45 = vor.u32 %v3206_v14, %v3205_v35  ;;  %2891 = vmatpush.bf16.msra.mxu3 %v13938_v52 }
 0x416   : > { %21320 = vst [vmem:[#allocation53_spill] sm:$0xff] %v16344_v23  ;;  %2805 = vmatmul.bf16.gmra.mxu3 %v16344_v23  ;;  %v2581_v58 = vunpack.c.l.b16 %v2490_v61  ;;  %v2672_v61 = vor.u32 %v2670_v3, %v2668_v51 }
 0x417   : > { %v16350_v27 = vsel %vm3173_vm4, %v3203_v54, %v3207_v45 }
 0x418   : > { %v2435_v30 = vpop.f32.mrf.mxu2  ;;  %21321 = vst [vmem:[#allocation54_spill] sm:$0xff] %v16350_v27 }
 0x419   : > { %v2436_v12 = vadd.f32 %v2435_v30, %v2343_v11  ;;  %v2360_v6 = vpop.f32.mrf.mxu1  ;;  %v2346_v11 = vadd.f32 %v16247_v39, %v15909_v0 }
 0x41a   : > { %v16353_v24 = vadd.f32 %v2360_v6, %v16017_v50 }
 0x41b   : > { %v2491_v4 = vpack.c.bf16 %v2436_v12, %v2436_v12 }
 0x41c   : > { %3091 = vmatmul.bf16.gmra.mxu1 %v16356_v8 }
 0x41d   : > { %v2582_v38 = vunpack.c.l.b16 %v2491_v4  ;;  %3300 = vmatmul.bf16.gmra.mxu2 %v16106_v9  ;;  %v14002_v4 = vld [vmem:[%s21093_s6 + $0x238] sm:$0xff] }
 0x41e   : > { %4155 = vmatpush.bf16.msra.mxu0 %v14002_v4  ;;  %v21329_v4 = vld [vmem:[#allocation29_spill] sm:$0xff] }
 0x41f   : > { %v16360_v17 = vpack.c.b16 %v2582_v38, %v2581_v58  ;;  %v2255_v38 = vadd.f32 %v15934_v18, %v2162_v21  ;;  %v14001_v18 = vld [vmem:[%s21093_s6 + $0x230] sm:$0xff] }
 0x420   : > { %v2438_v54 = vpop.f32.mrf.mxu2 }
 0x421   : > { %v16362_v35 = vpop.f32.mrf.mxu0  ;;  %v16364_v14 = vpop.f32.mrf.mxu1  ;;  %v3415_v50 = vrot.slane %v16360_v17, 2  ;;  %v2674_v26 = vshll.u32 %v16360_v17, 16  ;;  %v2678_v29 = vshrl.u32 %v16360_v17, 16  ;;  %v2439_v48 = vadd.f32 %v2438_v54, %v2346_v11 }
 0x422   : > { %21323 = vst [vmem:[#allocation56_spill] sm:$0xff] %v16362_v35  ;;  %v2348_v39 = vadd.f32 %v16259_v62, %v2255_v38  ;;  %4156 = vmatpush.bf16.msra.mxu0 %v14001_v18  ;;  %v13937_v62 = vld [vmem:[%s21093_s6 + $0x30] sm:$0xff]  ;;  %v13999_v18 = vld [vmem:[%s21093_s6 + $0x220] sm:$0xff] }
 0x423   : > { %v16374_v30 = vsel %vm3397_vm2, %v3413_v13, %v3415_v50  ;;  %v2676_v12 = vrot.slane %v2674_v26, 1  ;;  %v3209_v6 = vrot.slane %v2678_v29, 1  ;;  %v3210_v58 = vrot.slane %v2674_v26, 2  ;;  %2892 = vmatpush.bf16.msra.mxu3 %v13937_v62 }
 0x424   : > { %21324 = vst [vmem:[#allocation57_spill] sm:$0xff] %v16374_v30  ;;  %3531 = vmatmul.bf16.gmra.mxu0 %v16374_v30  ;;  %v21113_v13 = vrot.slane %v16257_v1, 1  ;;  %v2492_v54 = vpack.c.bf16 %v2439_v48, %v2439_v48  ;;  %v14000_v48 = vld [vmem:[%s21093_s6 + $0x228] sm:$0xff] }
 0x425   : > { %v16382_v53 = vsel %vm2601_vm3, %v2672_v61, %v2676_v12  ;;  %v3211_v0 = vor.u32 %v3210_v58, %v3209_v6  ;;  %v2680_v56 = vor.u32 %v2678_v29, %v2676_v12 }
 0x426   : > { %21325 = vst [vmem:[#allocation58_spill] sm:$0xff] %v16382_v53  ;;  %2810 = vmatmul.bf16.gmra.mxu3 %v16382_v53  ;;  %v2583_v38 = vunpack.c.l.b16 %v2492_v54  ;;  %4157 = vmatpush.bf16.msra.mxu0 %v14000_v48  ;;  %v21334_v48 = vld [vmem:[#allocation18_spill] sm:$0xff] }
 0x427   : > { %v16394_v51 = vsel %vm3173_vm4, %v3207_v45, %v3211_v0  ;;  %v16409_v45 = vsel %vm2977_vm5, %v2987_v60, %v21113_v13  ;;  %v21335_v13 = vld [vmem:[#allocation24_spill] sm:$0xff] }
 0x428   : > { %v2440_v3 = vpop.f32.mrf.mxu2  ;;  %21326 = vst [vmem:[#allocation59_spill] sm:$0xff] %v16394_v51  ;;  %v2351_v30 = vadd.f32 %v16288_v32, %v21335_v13 }
 0x429   : > { %v2441_v26 = vadd.f32 %v2440_v3, %v2348_v39  ;;  %v16396_v21 = vpop.f32.mrf.mxu3  ;;  %v16398_v11 = vpop.f32.mrf.mxu0  ;;  %21330 = vst [vmem:[#allocation29_spill] sm:$0xff] %v16409_v45  ;;  %v13936_v39 = vld [vmem:[%s21093_s6 + $0x28] sm:$0xff] }
 0x42a   : > { %21327 = vst [vmem:[#allocation60_spill] sm:$0xff] %v16396_v21  ;;  %v2365_v61 = vpop.f32.mrf.mxu1  ;;  %2893 = vmatpush.bf16.msra.mxu3 %v13936_v39  ;;  %4158 = vmatpush.bf16.msra.mxu0 %v13999_v18  ;;  %v13935_v39 = vld [vmem:[%s21093_s6 + $0x20] sm:$0xff]  ;;  %v13998_v18 = vld [vmem:[%s21093_s6 + $0x218] sm:$0xff] }
 0x42b   : > { %21328 = vst [vmem:[#allocation61_spill] sm:$0xff] %v16398_v11  ;;  %v2493_v6 = vpack.c.bf16 %v2441_v26, %v2441_v26  ;;  %v16404_v58 = vadd.f32 %v2365_v61, %v21329_v4  ;;  %v21333_v4 = vld [vmem:[#allocation14_spill] sm:$0xff] }
 0x42c   : > { %3096 = vmatmul.bf16.gmra.mxu1 %v16409_v45  ;;  %v21367_v45 = vld [vmem:[#allocation28_spill] sm:$0xff] }
 0x42d   : > { %v2584_v52 = vunpack.c.l.b16 %v2493_v6  ;;  %3305 = vmatmul.bf16.gmra.mxu2 %v16151_v59 }
 0x42e   : > { %2894 = vmatpush.bf16.msra.mxu3 %v13935_v39  ;;  %4159 = vmatpush.bf16.msra.mxu0 %v13998_v18  ;;  %v21124_v39 = vrot.slane %v16295_v46, 1 }
 0x42f   : > { %v16419_v3 = vpack.c.b16 %v2584_v52, %v2583_v38  ;;  %v2167_v38 = vadd.f32 %v21334_v48, %v21333_v4 }
 0x430   : > { %v2443_v60 = vpop.f32.mrf.mxu2 }
 0x431   : > { %v16424_v26 = vpop.f32.mrf.mxu3  ;;  %v16426_v61 = vpop.f32.mrf.mxu0  ;;  %v21125_v54 = vrot.slane %v16419_v3, 2  ;;  %v2682_v62 = vshll.u32 %v16419_v3, 16  ;;  %v21337_v4 = vshrl.u32 %v16419_v3, 16  ;;  %v2260_v32 = vadd.f32 %v21338_v10, %v2167_v38  ;;  %v13997_v10 = vld [vmem:[%s21093_s6 + $0x210] sm:$0xff] }
 0x432   : > { %21331 = vst [vmem:[#allocation62_spill] sm:$0xff] %v16424_v26  ;;  %v16433_v52 = vpop.f32.mrf.mxu1  ;;  %v2444_v13 = vadd.f32 %v2443_v60, %v2351_v30  ;;  %4160 = vmatpush.bf16.msra.mxu0 %v13997_v10  ;;  %v13932_v10 = vld [vmem:[%s21093_s6 + $0x8] sm:$0xff] }
 0x433   : > { %21332 = vst [vmem:[#allocation63_spill] sm:$0xff] %v16426_v61  ;;  %v16443_v28 = vsel %vm3397_vm2, %v3415_v50, %v21125_v54  ;;  %v2684_v6 = vrot.slane %v2682_v62, 1  ;;  %v3213_v48 = vrot.slane %v21337_v4, 1  ;;  %v3214_v25 = vrot.slane %v2682_v62, 2  ;;  %v13934_v50 = vld [vmem:[%s21093_s6 + $0x18] sm:$0xff] }
 0x434   : > { %21336 = vst [vmem:[#allocation14_spill] sm:$0xff] %v16443_v28  ;;  %3536 = vmatmul.bf16.gmra.mxu0 %v16443_v28  ;;  %v2353_v12 = vadd.f32 %v16297_v40, %v2260_v32  ;;  %2895 = vmatpush.bf16.msra.mxu3 %v13934_v50  ;;  %v2494_v30 = vpack.c.bf16 %v2444_v13, %v2444_v13  ;;  %v13933_v40 = vld [vmem:[%s21093_s6 + $0x10] sm:$0xff]  ;;  %v13996_v50 = vld [vmem:[%s21093_s6 + $0x208] sm:$0xff]  ;;  %v21352_v28 = vrot.slane %v16419_v3, 2 }
 0x435   : > { %v16453_v61 = vsel %vm2601_vm3, %v2680_v56, %v2684_v6  ;;  %v3215_v29 = vor.u32 %v3214_v25, %v3213_v48  ;;  %v21343_v48 = vld [vmem:[#allocation34_spill] sm:$0xff] }
 0x436   : > { %21339 = vst [vmem:[#allocation18_spill] sm:$0xff] %v16453_v61  ;;  %2815 = vmatmul.bf16.gmra.mxu3 %v16453_v61  ;;  %4161 = vmatpush.bf16.msra.mxu0 %v13996_v50 }
 0x437   : > { %v16465_v56 = vsel %vm3173_vm4, %v3211_v0, %v3215_v29  ;;  %v21344_v0 = vrot.slane %v16257_v1, 1 }
 0x438   : > { %v2445_v4 = vpop.f32.mrf.mxu2  ;;  %21340 = vst [vmem:[#allocation24_spill] sm:$0xff] %v16465_v56  ;;  %2896 = vmatpush.bf16.msra.mxu3 %v13933_v40  ;;  %v13995_v40 = vld [vmem:[%s21093_s6 + $0x200] sm:$0xff] }
 0x439   : > { %v2446_v60 = vadd.f32 %v2445_v4, %v2353_v12  ;;  %v16467_v62 = vpop.f32.mrf.mxu3  ;;  %v16469_v38 = vpop.f32.mrf.mxu0  ;;  %v16482_v13 = vsel %vm2977_vm5, %v21344_v0, %v21124_v39  ;;  %v2585_v12 = vunpack.c.l.b16 %v2494_v30 }
 0x43a   : > { %21341 = vst [vmem:[#allocation25_spill] sm:$0xff] %v16467_v62  ;;  %v2370_v25 = vpop.f32.mrf.mxu1  ;;  %4162 = vmatpush.bf16.msra.mxu0 %v13995_v40 }
 0x43b   : > { %21342 = vst [vmem:[#allocation64_spill] sm:$0xff] %v16469_v38  ;;  %v2495_v18 = vpack.c.bf16 %v2446_v60, %v2446_v60  ;;  %v16475_v32 = vadd.f32 %v2370_v25, %v21343_v48  ;;  %v21346_v60 = vld [vmem:[#allocation26_spill] sm:$0xff]  ;;  %v21354_v38 = vshrl.u32 %v16419_v3, 16 }
 0x43c   : > { %21345 = vst [vmem:[#allocation34_spill] sm:$0xff] %v16482_v13  ;;  %3101 = vmatmul.bf16.gmra.mxu1 %v16482_v13  ;;  %v2356_v25 = vadd.f32 %v16320_v2, %v21346_v60  ;;  %2897 = vmatpush.bf16.msra.mxu3 %v13932_v10  ;;  %v21366_v13 = vld [vmem:[#allocation21_spill] sm:$0xff] }
 0x43d   : > { %v2586_v4 = vunpack.c.l.b16 %v2495_v18  ;;  %3310 = vmatmul.bf16.gmra.mxu2 %v16197_v44 }
 0x43f   : > { %v16494_v48 = vpack.c.b16 %v2586_v4, %v2585_v12  ;;  %v21350_v12 = vld [vmem:[#allocation15_spill] sm:$0xff]  ;;  %v21351_v4 = vld [vmem:[#allocation20_spill] sm:$0xff] }
 0x440   : > { %v2448_v0 = vpop.f32.mrf.mxu2  ;;  %v2172_v60 = vadd.f32 %v21351_v4, %v21350_v12  ;;  %v21355_v4 = vld [vmem:[#allocation27_spill] sm:$0xff] }
 0x441   : > { %v2449_v30 = vadd.f32 %v2448_v0, %v2356_v25  ;;  %v16499_v18 = vpop.f32.mrf.mxu3  ;;  %v16501_v39 = vpop.f32.mrf.mxu0  ;;  %v16504_v50 = vrot.slane %v16494_v48, 2  ;;  %v2690_v54 = vshll.u32 %v16494_v48, 16  ;;  %v2694_v2 = vshrl.u32 %v16494_v48, 16  ;;  %v13931_v25 = vld [vmem:[%s21093_s6] sm:$0xff] }
 0x442   : > { %21347 = vst [vmem:[#allocation26_spill] sm:$0xff] %v16499_v18  ;;  %v16510_v10 = vpop.f32.mrf.mxu1  ;;  %v2688_v18 = vor.u32 %v21354_v38, %v2684_v6  ;;  %2898 = vmatpush.bf16.msra.mxu3 %v13931_v25  ;;  %v2265_v62 = vadd.f32 %v21355_v4, %v2172_v60  ;;  %v2993_v6 = vrot.slane %v16327_v33, 1  ;;  %v21360_v4 = vrot.slane %v16295_v46, 1 }
 0x443   : > { %21348 = vst [vmem:[#allocation65_spill] sm:$0xff] %v16501_v39  ;;  %v2496_v0 = vpack.c.bf16 %v2449_v30, %v2449_v30  ;;  %v16519_v39 = vsel %vm3397_vm2, %v21352_v28, %v16504_v50  ;;  %v2692_v11 = vrot.slane %v2690_v54, 1  ;;  %v3217_v12 = vrot.slane %v2694_v2, 1 }
 0x444   : > { %21349 = vst [vmem:[#allocation66_spill] sm:$0xff] %v16504_v50  ;;  %3541 = vmatmul.bf16.gmra.mxu0 %v16519_v39  ;;  %v3218_v40 = vrot.slane %v2690_v54, 2  ;;  %v2358_v28 = vadd.f32 %v16329_v37, %v2265_v62 }
 0x445   : > { %21353 = vst [vmem:[#allocation15_spill] sm:$0xff] %v16519_v39  ;;  %v2587_v35 = vunpack.c.l.b16 %v2496_v0  ;;  %v16526_v30 = vsel %vm2601_vm3, %v2688_v18, %v2692_v11  ;;  %v16551_v39 = vsel %vm2977_vm5, %v21360_v4, %v2993_v6 }
 0x446   : > { %21356 = vst [vmem:[#allocation20_spill] sm:$0xff] %v16526_v30  ;;  %2820 = vmatmul.bf16.gmra.mxu3 %v16526_v30  ;;  %v16529_v26 = vor.u32 %v3218_v40, %v3217_v12 }
 0x447   : > { %v16532_v21 = vpack.c.b16 %v2587_v35, %v2587_v35  ;;  %21361 = vst [vmem:[#allocation69_spill] sm:$0xff] %v16551_v39 }
 0x448   : > { %v2450_v38 = vpop.f32.mrf.mxu2  ;;  %v16537_v54 = vsel %vm3173_vm4, %v3215_v29, %v16529_v26 }
 0x449   : > { %21357 = vst [vmem:[#allocation27_spill] sm:$0xff] %v16537_v54  ;;  %v2451_v60 = vadd.f32 %v2450_v38, %v2358_v28  ;;  %v16539_v25 = vpop.f32.mrf.mxu3  ;;  %v16541_v18 = vpop.f32.mrf.mxu0  ;;  %v2698_v0 = vshll.u32 %v16532_v21, 16  ;;  %v3221_v40 = vshrl.u32 %v16532_v21, 16 }
 0x44a   : > { %21358 = vst [vmem:[#allocation67_spill] sm:$0xff] %v16539_v25  ;;  %v2375_v12 = vpop.f32.mrf.mxu1 }
 0x44b   : > { %21359 = vst [vmem:[#allocation68_spill] sm:$0xff] %v16541_v18  ;;  %v2497_v37 = vpack.c.bf16 %v2451_v60, %v2451_v60  ;;  %v16546_v62 = vadd.f32 %v2375_v12, %v16162_v22  ;;  %v3223_v29 = vrot.slane %v3221_v40, 1  ;;  %v3224_v28 = vrot.slane %v2698_v0, 2 }
 0x44c   : > { %3106 = vmatmul.bf16.gmra.mxu1 %v16551_v39  ;;  %v3421_v60 = vrot.slane %v16532_v21, 2  ;;  %v2700_v40 = vrot.slane %v2698_v0, 1 }
 0x44d   : > { %v3594_v38 = vunpack.c.l.b16 %v2497_v37  ;;  %3315 = vmatmul.bf16.gmra.mxu2 %v16245_v55  ;;  %v3225_v18 = vor.u32 %v3224_v28, %v3223_v29  ;;  %v21365_v37 = vld [vmem:[#allocation16_spill] sm:$0xff] }
 0x44e   : > { %v2177_v61 = vadd.f32 %v21366_v13, %v21365_v37  ;;  %v3422_v28 = vsel %vm3397_vm2, %v16504_v50, %v3421_v60 }
 0x44f   : > { %v16555_v25 = vpack.c.b16 %v3594_v38, %v2587_v35  ;;  %v16560_v22 = vsel %vm3173_vm4, %v16529_v26, %v3225_v18  ;;  %v16571_v38 = vor.u32 %v2694_v2, %v2692_v11 }
 0x450   : > { %v2453_v30 = vpop.f32.mrf.mxu2 }
 0x451   : > { %21362 = vst [vmem:[#allocation70_spill] sm:$0xff] %v16555_v25  ;;  %v2454_v12 = vadd.f32 %v2453_v30, %v16353_v24  ;;  %v16563_v4 = vpop.f32.mrf.mxu3  ;;  %v16565_v39 = vpop.f32.mrf.mxu0  ;;  %v3759_v18 = vshll.u32 %v16555_v25, 16  ;;  %v2270_v24 = vadd.f32 %v21367_v45, %v2177_v61  ;;  %v3763_v45 = vshrl.u32 %v16555_v25, 16 }
 0x452   : > { %21363 = vst [vmem:[#allocation71_spill] sm:$0xff] %v16563_v4  ;;  %v2377_v29 = vpop.f32.mrf.mxu1 }
 0x453   : > { %21364 = vst [vmem:[#allocation72_spill] sm:$0xff] %v16565_v39  ;;  %v2498_v35 = vpack.c.bf16 %v2454_v12, %v2454_v12  ;;  %v2701_v39 = vsel %vm2601_vm3, %v16571_v38, %v2700_v40  ;;  %v2363_v0 = vadd.f32 %v16364_v14, %v2270_v24  ;;  %v2995_v12 = vrot.slane %v16360_v17, 1 }
 0x454   : > { %3546 = vmatmul.bf16.gmra.mxu0 %v3422_v28  ;;  %v16581_v37 = vrot.slane %v3759_v18, 1 }
 0x455   : > { %v3756_v30 = vunpack.c.l.b16 %v2498_v35  ;;  %v16592_v14 = vsel %vm2977_vm5, %v2993_v6, %v2995_v12 }
 0x456   : > { %2825 = vmatmul.bf16.gmra.mxu3 %v2701_v39  ;;  %21372 = vst [vmem:[#allocation74_spill] sm:$0xff] %v16592_v14  ;;  %v16595_v35 = vor.u32 %v3763_v45, %v16581_v37 }
 0x457   : > { %v16578_v13 = vpack.c.b16 %v3756_v30, %v3756_v30 }
 0x458   : > { %v2455_v11 = vpop.f32.mrf.mxu2  ;;  %21373 = vst [vmem:[#allocation75_spill] sm:$0xff] %v16595_v35 }
 0x459   : > { %21368 = vst [vmem:[#allocation16_spill] sm:$0xff] %v16578_v13  ;;  %v2456_v2 = vadd.f32 %v2455_v11, %v2363_v0  ;;  %v16583_v60 = vpop.f32.mrf.mxu3  ;;  %v16585_v29 = vpop.f32.mrf.mxu0  ;;  %v21141_v61 = vshll.u32 %v16578_v13, 16  ;;  %v13986_v0 = vld [vmem:[%s21093_s6 + $0x1b8] sm:$0xff] }
 0x45a   : > { %21369 = vst [vmem:[#allocation21_spill] sm:$0xff] %v16583_v60  ;;  %v16589_v40 = vpop.f32.mrf.mxu1  ;;  %3821 = vmatpush.bf16.msrb.mxu1 %v13986_v0  ;;  %v21377_v0 = vld [vmem:[#allocation17_spill] sm:$0xff] }
 0x45b   : > { %21370 = vst [vmem:[#allocation28_spill] sm:$0xff] %v16585_v29  ;;  %v2499_v39 = vpack.c.bf16 %v2456_v2, %v2456_v2  ;;  %v3769_v28 = vrot.slane %v21141_v61, 1 }
 0x45c   : > { %21371 = vst [vmem:[#allocation73_spill] sm:$0xff] %v16589_v40  ;;  %3111 = vmatmul.bf16.gmra.mxu1 %v16592_v14 }
 0x45d   : > { %v4430_v24 = vunpack.c.l.b16 %v2499_v39  ;;  %3320 = vmatmul.bf16.gmra.mxu2 %v16286_v36  ;;  %v16606_v11 = vsel %vm2601_vm3, %v16595_v35, %v3769_v28  ;;  %v13985_v39 = vld [vmem:[%s21093_s6 + $0x1b0] sm:$0xff] }
 0x45e   : > { %21374 = vst [vmem:[#allocation76_spill] sm:$0xff] %v16606_v11  ;;  %v21378_v35 = vld [vmem:[#allocation22_spill] sm:$0xff]  ;;  %3822 = vmatpush.bf16.msrb.mxu1 %v13985_v39 }
 0x45f   : > { %v16608_v6 = vpack.c.b16 %v4430_v24, %v3756_v30  ;;  %v4095_v30 = vrot.slane %v3763_v45, 1  ;;  %v4096_v24 = vrot.slane %v3759_v18, 2  ;;  %v2182_v40 = vadd.f32 %v21378_v35, %v21377_v0  ;;  %v13984_v18 = vld [vmem:[%s21093_s6 + $0x1a8] sm:$0xff] }
 0x460   : > { %v2458_v2 = vpop.f32.mrf.mxu2 }
 0x461   : > { %v2459_v50 = vadd.f32 %v2458_v2, %v16404_v58  ;;  %v16611_v61 = vpop.f32.mrf.mxu3  ;;  %v16613_v29 = vpop.f32.mrf.mxu0  ;;  %v21146_v60 = vshll.u32 %v16608_v6, 16  ;;  %v21145_v4 = vshrl.u32 %v16608_v6, 16  ;;  %v16634_v45 = vor.u32 %v4096_v24, %v4095_v30 }
 0x462   : > { %21375 = vst [vmem:[#allocation77_spill] sm:$0xff] %v16611_v61  ;;  %v16620_v28 = vpop.f32.mrf.mxu1  ;;  %v21379_v61 = vld [vmem:[#allocation32_spill] sm:$0xff]  ;;  %3823 = vmatpush.bf16.msrb.mxu1 %v13984_v18 }
 0x463   : > { %21376 = vst [vmem:[#allocation78_spill] sm:$0xff] %v16613_v29  ;;  %v2500_v58 = vpack.c.bf16 %v2459_v50, %v2459_v50  ;;  %v4931_v2 = vrot.slane %v21145_v4, 1  ;;  %v4932_v29 = vrot.slane %v21146_v60, 2  ;;  %v2275_v25 = vadd.f32 %v21379_v61, %v2182_v40 }
 0x464   : > { %4163 = vmatmul.bf16.vlgmr.msra.gmra.mxu0 %v16106_v9  ;;  %v2997_v9 = vrot.slane %v16419_v3, 1 }
 0x465   : > { %v4592_v11 = vunpack.c.l.b16 %v2500_v58  ;;  %v4933_v50 = vor.u32 %v4932_v29, %v4931_v2  ;;  %v2368_v35 = vadd.f32 %v16433_v52, %v2275_v25 }
 0x466   : > { %2899 = vmatmul.bf16.vlgmr.msra.gmra.mxu3 %v15981_v5  ;;  %v13983_v5 = vld [vmem:[%s21093_s6 + $0x1a0] sm:$0xff]  ;;  %v16656_v24 = vsel %vm2977_vm5, %v2995_v12, %v2997_v9 }
 0x467   : > { %v16637_v39 = vpack.c.b16 %v4592_v11, %v4592_v11  ;;  %v16642_v61 = vsel %vm3173_vm4, %v16634_v45, %v4933_v50  ;;  %21383 = vst [vmem:[#allocation79_spill] sm:$0xff] %v16656_v24  ;;  %3824 = vmatpush.bf16.msrb.mxu1 %v13983_v5 }
 0x468   : > { %v2460_v0 = vpop.f32.mrf.mxu2  ;;  %21380 = vst [vmem:[#allocation17_spill] sm:$0xff] %v16642_v61 }
 0x469   : > { %v2461_v40 = vadd.f32 %v2460_v0, %v2368_v35  ;;  %v16644_v58 = vpop.f32.mrf.mxu3  ;;  %v16646_v4 = vpop.f32.mrf.mxu0  ;;  %v21148_v52 = vshll.u32 %v16637_v39, 16  ;;  %v4935_v29 = vshrl.u32 %v16637_v39, 16  ;;  %v13982_v0 = vld [vmem:[%s21093_s6 + $0x198] sm:$0xff] }
 0x46a   : > { %21381 = vst [vmem:[#allocation22_spill] sm:$0xff] %v16644_v58  ;;  %v16652_v25 = vpop.f32.mrf.mxu1 }
 0x46b   : > { %21382 = vst [vmem:[#allocation32_spill] sm:$0xff] %v16646_v4  ;;  %v2501_v30 = vpack.c.bf16 %v2461_v40, %v2461_v40  ;;  %v4937_v2 = vrot.slane %v4935_v29, 1  ;;  %v4938_v18 = vrot.slane %v21148_v52, 2  ;;  %3825 = vmatpush.bf16.msrb.mxu1 %v13982_v0 }
 0x46c   : > { %3116 = vmatmul.bf16.gmra.mxu1 %v16656_v24 }
 0x46d   : > { %v5266_v35 = vunpack.c.l.b16 %v2501_v30  ;;  %3325 = vmatmul.bf16.gmra.mxu2 %v16318_v31  ;;  %v4939_v60 = vor.u32 %v4938_v18, %v4937_v2  ;;  %v13981_v30 = vld [vmem:[%s21093_s6 + $0x190] sm:$0xff]  ;;  %v21388_v18 = vld [vmem:[#allocation19_spill] sm:$0xff] }
 0x46f   : > { %v16665_v61 = vpack.c.b16 %v5266_v35, %v4592_v11  ;;  %v16668_v40 = vsel %vm3173_vm4, %v4933_v50, %v4939_v60  ;;  %v21389_v35 = vld [vmem:[#allocation23_spill] sm:$0xff]  ;;  %3826 = vmatpush.bf16.msrb.mxu1 %v13981_v30 }
 0x470   : > { %v2463_v12 = vpop.f32.mrf.mxu2  ;;  %21385 = vst [vmem:[#allocation81_spill] sm:$0xff] %v16668_v40  ;;  %v2187_v60 = vadd.f32 %v21389_v35, %v21388_v18 }
 0x471   : > { %21384 = vst [vmem:[#allocation80_spill] sm:$0xff] %v16665_v61  ;;  %v2464_v5 = vadd.f32 %v2463_v12, %v16475_v32  ;;  %v16671_v29 = vpop.f32.mrf.mxu3  ;;  %v16673_v52 = vpop.f32.mrf.mxu0  ;;  %v5431_v4 = vshll.u32 %v16665_v61, 16  ;;  %v5435_v11 = vshrl.u32 %v16665_v61, 16 }
 0x472   : > { %21386 = vst [vmem:[#allocation82_spill] sm:$0xff] %v16671_v29  ;;  %v16680_v2 = vpop.f32.mrf.mxu1  ;;  %v2280_v40 = vadd.f32 %v16148_v15, %v2187_v60  ;;  %v13980_v29 = vld [vmem:[%s21093_s6 + $0x188] sm:$0xff] }
 0x473   : > { %21387 = vst [vmem:[#allocation83_spill] sm:$0xff] %v16673_v52  ;;  %v2502_v0 = vpack.c.bf16 %v2464_v5, %v2464_v5  ;;  %v5767_v32 = vrot.slane %v5435_v11, 1  ;;  %v5768_v12 = vrot.slane %v5431_v4, 2  ;;  %v16696_v5 = vrot.slane %v16494_v48, 1  ;;  %3827 = vmatpush.bf16.msrb.mxu1 %v13980_v29 }
 0x474   : > { %4168 = vmatmul.bf16.gmra.mxu0 %v16151_v59  ;;  %v2373_v61 = vadd.f32 %v16510_v10, %v2280_v40  ;;  %v13979_v10 = vld [vmem:[%s21093_s6 + $0x180] sm:$0xff] }
 0x475   : > { %v5428_v52 = vunpack.c.l.b16 %v2502_v0  ;;  %v16689_v58 = vor.u32 %v5768_v12, %v5767_v32 }
 0x476   : > { %2904 = vmatmul.bf16.gmra.mxu3 %v16014_v16 }
 0x477   : > { %21390 = vst [vmem:[#allocation19_spill] sm:$0xff] %v16689_v58  ;;  %v16693_v18 = vpack.c.b16 %v5428_v52, %v5428_v52  ;;  %v16700_v15 = vsel %vm3173_vm4, %v4933_v50, %v16689_v58  ;;  %v16715_v50 = vsel %vm2977_vm5, %v2997_v9, %v16696_v5  ;;  %3828 = vmatpush.bf16.msrb.mxu1 %v13979_v10  ;;  %v16727_v9 = vrot.slane %v5431_v4, 1 }
 0x478   : > { %21392 = vst [vmem:[#allocation84_spill] sm:$0xff] %v16700_v15  ;;  %v2465_v30 = vpop.f32.mrf.mxu2 }
 0x479   : > { %21391 = vst [vmem:[#allocation23_spill] sm:$0xff] %v16693_v18  ;;  %v2466_v35 = vadd.f32 %v2465_v30, %v2373_v61  ;;  %v16702_v60 = vpop.f32.mrf.mxu3  ;;  %v16704_v0 = vpop.f32.mrf.mxu0  ;;  %v21153_v40 = vshll.u32 %v16693_v18, 16  ;;  %v5771_v32 = vshrl.u32 %v16693_v18, 16 }
 0x47a   : > { %21393 = vst [vmem:[#allocation85_spill] sm:$0xff] %v16702_v60  ;;  %v16711_v12 = vpop.f32.mrf.mxu1 }
 0x47b   : > { %21394 = vst [vmem:[#allocation86_spill] sm:$0xff] %v16704_v0  ;;  %v2503_v29 = vpack.c.bf16 %v2466_v35, %v2466_v35  ;;  %v5773_v61 = vrot.slane %v5771_v32, 1  ;;  %v5774_v30 = vrot.slane %v21153_v40, 2 }
 0x47c   : > { %21395 = vst [vmem:[#allocation87_spill] sm:$0xff] %v16715_v50  ;;  %3121 = vmatmul.bf16.gmra.mxu1 %v16715_v50 }
 0x47d   : > { %v6102_v15 = vunpack.c.l.b16 %v2503_v29  ;;  %3330 = vmatmul.bf16.gmra.mxu2 %v16350_v27  ;;  %v5775_v59 = vor.u32 %v5774_v30, %v5773_v61  ;;  %21398 = vst [vmem:[#allocation90_spill] sm:$0xff] %v16727_v9 }
 0x47f   : > { %v16721_v0 = vpack.c.b16 %v6102_v15, %v5428_v52  ;;  %v16725_v35 = vsel %vm3173_vm4, %v16689_v58, %v5775_v59  ;;  %v16739_v52 = vor.u32 %v5435_v11, %v16727_v9  ;;  %v3001_v11 = vrot.slane %v16532_v21, 1  ;;  %v13994_v21 = vld [vmem:[%s21093_s6 + $0x1f8] sm:$0xff]  ;;  %v13989_v9 = vld [vmem:[%s21093_s6 + $0x1d0] sm:$0xff] }
 0x480   : > { %21397 = vst [vmem:[#allocation89_spill] sm:$0xff] %v16725_v35  ;;  %v2468_v60 = vpop.f32.mrf.mxu2  ;;  %3985 = vmatpush.bf16.msrb.mxu2 %v13994_v21 }
 0x481   : > { %21396 = vst [vmem:[#allocation88_spill] sm:$0xff] %v16721_v0  ;;  %v2469_v10 = vadd.f32 %v2468_v60, %v16546_v62  ;;  %v16730_v32 = vpop.f32.mrf.mxu3  ;;  %v16732_v40 = vpop.f32.mrf.mxu0  ;;  %v21157_v29 = vshll.u32 %v16721_v0, 16  ;;  %v21160_v59 = vshrl.u32 %v16721_v0, 16 }
 0x482   : > { %21399 = vst [vmem:[#allocation91_spill] sm:$0xff] %v16730_v32  ;;  %v16735_v18 = vpop.f32.mrf.mxu1 }
 0x483   : > { %21400 = vst [vmem:[#allocation92_spill] sm:$0xff] %v16732_v40  ;;  %v2504_v61 = vpack.c.bf16 %v2469_v10, %v2469_v10  ;;  %v6269_v4 = vrot.slane %v21157_v29, 1 }
 0x484   : > { %4173 = vmatmul.bf16.gmra.mxu0 %v16197_v44  ;;  %21401 = vst [vmem:[#allocation93_spill] sm:$0xff] %v16739_v52  ;;  %v3002_v44 = vsel %vm2977_vm5, %v16696_v5, %v3001_v11 }
 0x485   : > { %v6264_v62 = vunpack.c.l.b16 %v2504_v61  ;;  %v16747_v15 = vsel %vm2601_vm3, %v16739_v52, %v6269_v4  ;;  %v6273_v60 = vor.u32 %v21160_v59, %v6269_v4 }
 0x486   : > { %2909 = vmatmul.bf16.gmra.mxu3 %v16063_v20  ;;  %21402 = vst [vmem:[#allocation94_spill] sm:$0xff] %v16747_v15 }
 0x487   : > { %v16751_v30 = vpack.c.b16 %v6264_v62, %v6264_v62 }
 0x488   : > { %v2470_v10 = vpop.f32.mrf.mxu2 }
 0x489   : > { %21403 = vst [vmem:[#allocation95_spill] sm:$0xff] %v16751_v30  ;;  %v21161_v58 = vshll.u32 %v16751_v30, 16  ;;  %v16755_v35 = vpop.f32.mrf.mxu3  ;;  %v16757_v29 = vpop.f32.mrf.mxu0  ;;  %v21411_v30 = vld [vmem:[#allocation31_spill] sm:$0xff] }
 0x48a   : > { %21404 = vst [vmem:[#allocation96_spill] sm:$0xff] %v16755_v35  ;;  %v16759_v61 = vpop.f32.mrf.mxu1 }
 0x48b   : > { %21405 = vst [vmem:[#allocation97_spill] sm:$0xff] %v16757_v29  ;;  %v6277_v4 = vrot.slane %v21161_v58, 1 }
 0x48c   : > { %3126 = vmatmul.bf16.gmra.mxu1 %v3002_v44  ;;  %v13993_v44 = vld [vmem:[%s21093_s6 + $0x1f0] sm:$0xff] }
 0x48d   : > { %3335 = vmatmul.bf16.gmra.mxu2 %v16394_v51  ;;  %v16770_v62 = vsel %vm2601_vm3, %v6273_v60, %v6277_v4  ;;  %v13992_v60 = vld [vmem:[%s21093_s6 + $0x1e8] sm:$0xff] }
 0x48e   : > { %21406 = vst [vmem:[#allocation98_spill] sm:$0xff] %v16770_v62  ;;  %3986 = vmatpush.bf16.msrb.mxu2 %v13993_v44  ;;  %v13991_v62 = vld [vmem:[%s21093_s6 + $0x1e0] sm:$0xff] }
 0x490   : > { %v16772_v10 = vpop.f32.mrf.mxu2 }
 0x491   : > { %v16774_v59 = vpop.f32.mrf.mxu3  ;;  %v16776_v15 = vpop.f32.mrf.mxu0 }
 0x492   : > { %21407 = vst [vmem:[#allocation99_spill] sm:$0xff] %v16774_v59  ;;  %v16781_v11 = vpop.f32.mrf.mxu1  ;;  %3987 = vmatpush.bf16.msrb.mxu2 %v13992_v60  ;;  %v13990_v60 = vld [vmem:[%s21093_s6 + $0x1d8] sm:$0xff] }
 0x493   : > { %21408 = vst [vmem:[#allocation100_spill] sm:$0xff] %v16776_v15  ;;  %v13987_v15 = vld [vmem:[%s21093_s6 + $0x1c0] sm:$0xff] }
 0x494   : > { %4178 = vmatmul.bf16.gmra.mxu0 %v16245_v55 }
 0x496   : > { %2914 = vmatmul.bf16.gmra.mxu3 %v16114_v42  ;;  %3988 = vmatpush.bf16.msrb.mxu2 %v13991_v62 }
 0x498   : > { %v16788_v4 = vpop.f32.mrf.mxu2 }
 0x499   : > { %v16790_v21 = vpop.f32.mrf.mxu3  ;;  %v16792_v58 = vpop.f32.mrf.mxu0 }
 0x49a   : > { %21409 = vst [vmem:[#allocation101_spill] sm:$0xff] %v16790_v21  ;;  %v16797_v44 = vpop.f32.mrf.mxu1  ;;  %3989 = vmatpush.bf16.msrb.mxu2 %v13990_v60 }
 0x49b   : > { %21410 = vst [vmem:[#allocation102_spill] sm:$0xff] %v16792_v58 }
 0x49c   : > { %3829 = vmatmul.bf16.vlgmr.msrb.gmra.mxu1 %v21411_v30  ;;  %v13988_v30 = vld [vmem:[%s21093_s6 + $0x1c8] sm:$0xff] }
 0x49d   : > { %3340 = vmatmul.bf16.gmra.mxu2 %v16465_v56 }
 0x49e   : > { %3990 = vmatpush.bf16.msrb.mxu2 %v13989_v9 }
 0x4a0   : > { %v16804_v0 = vpop.f32.mrf.mxu2 }
 0x4a1   : > { %v16806_v55 = vpop.f32.mrf.mxu3  ;;  %v16808_v52 = vpop.f32.mrf.mxu0 }
 0x4a2   : > { %21412 = vst [vmem:[#allocation31_spill] sm:$0xff] %v16806_v55  ;;  %v16813_v62 = vpop.f32.mrf.mxu1  ;;  %3991 = vmatpush.bf16.msrb.mxu2 %v13988_v30 }
 0x4a3   : > { %21413 = vst [vmem:[#allocation103_spill] sm:$0xff] %v16808_v52 }
 0x4a4   : > { %21414 = vst [vmem:[#allocation104_spill] sm:$0xff] %v16813_v62  ;;  %4183 = vmatmul.bf16.gmra.mxu0 %v16286_v36  ;;  %v21418_v36 = vld [vmem:[#allocation36_spill] sm:$0xff] }
 0x4a6   : > { %2919 = vmatmul.bf16.gmra.mxu3 %v16159_v34  ;;  %3992 = vmatpush.bf16.msrb.mxu2 %v13987_v15 }
 0x4a8   : > { %v16820_v60 = vpop.f32.mrf.mxu2 }
 0x4a9   : > { %v16822_v58 = vpop.f32.mrf.mxu3  ;;  %v16824_v52 = vpop.f32.mrf.mxu0 }
 0x4aa   : > { %21415 = vst [vmem:[#allocation105_spill] sm:$0xff] %v16822_v58  ;;  %v16829_v9 = vpop.f32.mrf.mxu1 }
 0x4ab   : > { %21416 = vst [vmem:[#allocation106_spill] sm:$0xff] %v16824_v52 }
 0x4ac   : > { %21417 = vst [vmem:[#allocation107_spill] sm:$0xff] %v16829_v9  ;;  %3834 = vmatmul.bf16.gmra.mxu1 %v21418_v36  ;;  %v21459_v9 = vshll.u32 %v16578_v13, 16 }
 0x4ad   : > { %3345 = vmatmul.bf16.gmra.mxu2 %v16537_v54 }
 0x4b0   : > { %v16833_v55 = vpop.f32.mrf.mxu2 }
 0x4b1   : > { %v16835_v30 = vpop.f32.mrf.mxu3  ;;  %v16837_v29 = vpop.f32.mrf.mxu0 }
 0x4b2   : > { %21419 = vst [vmem:[#allocation36_spill] sm:$0xff] %v16835_v30  ;;  %v16839_v58 = vpop.f32.mrf.mxu1 }
 0x4b3   : > { %21420 = vst [vmem:[#allocation108_spill] sm:$0xff] %v16837_v29 }
 0x4b4   : > { %21421 = vst [vmem:[#allocation109_spill] sm:$0xff] %v16839_v58  ;;  %4188 = vmatmul.bf16.gmra.mxu0 %v16318_v31  ;;  %v13975_v58 = vld [vmem:[%s21093_s6 + $0x160] sm:$0xff] }
 0x4b6   : > { %2924 = vmatmul.bf16.gmra.mxu3 %v16210_v57 }
 0x4b8   : > { %v16843_v52 = vpop.f32.mrf.mxu2 }
 0x4b9   : > { %v16845_v21 = vpop.f32.mrf.mxu3  ;;  %v16847_v15 = vpop.f32.mrf.mxu0 }
 0x4ba   : > { %21422 = vst [vmem:[#allocation110_spill] sm:$0xff] %v16845_v21  ;;  %v16849_v40 = vpop.f32.mrf.mxu1 }
 0x4bb   : > { %21423 = vst [vmem:[#allocation111_spill] sm:$0xff] %v16847_v15 }
 0x4bc   : > { %21424 = vst [vmem:[#allocation112_spill] sm:$0xff] %v16849_v40  ;;  %3839 = vmatmul.bf16.gmra.mxu1 %v16182_v63 }
 0x4bd   : > { %3350 = vmatmul.bf16.gmra.mxu2 %v16560_v22 }
 0x4c0   : > { %v16853_v30 = vpop.f32.mrf.mxu2 }
 0x4c1   : > { %v16855_v29 = vpop.f32.mrf.mxu3  ;;  %v16857_v59 = vpop.f32.mrf.mxu0 }
 0x4c2   : > { %21425 = vst [vmem:[#allocation113_spill] sm:$0xff] %v16855_v29  ;;  %v16859_v31 = vpop.f32.mrf.mxu1 }
 0x4c3   : > { %21426 = vst [vmem:[#allocation114_spill] sm:$0xff] %v16857_v59 }
 0x4c4   : > { %21427 = vst [vmem:[#allocation115_spill] sm:$0xff] %v16859_v31  ;;  %4193 = vmatmul.bf16.gmra.mxu0 %v16350_v27 }
 0x4c6   : > { %2929 = vmatmul.bf16.gmra.mxu3 %v16257_v1 }
 0x4c8   : > { %v16863_v21 = vpop.f32.mrf.mxu2 }
 0x4c9   : > { %v16865_v15 = vpop.f32.mrf.mxu3  ;;  %v16867_v40 = vpop.f32.mrf.mxu0 }
 0x4ca   : > { %21428 = vst [vmem:[#allocation116_spill] sm:$0xff] %v16865_v15  ;;  %v16869_v35 = vpop.f32.mrf.mxu1 }
 0x4cb   : > { %21429 = vst [vmem:[#allocation117_spill] sm:$0xff] %v16867_v40 }
 0x4cc   : > { %21430 = vst [vmem:[#allocation118_spill] sm:$0xff] %v16869_v35  ;;  %3844 = vmatmul.bf16.gmra.mxu1 %v16230_v49 }
 0x4cd   : > { %3993 = vmatmul.bf16.vlgmr.msrb.gmra.mxu2 %v16253_v43 }
 0x4d0   : > { %v16873_v22 = vpop.f32.mrf.mxu2 }
 0x4d1   : > { %21431 = vst [vmem:[#allocation119_spill] sm:$0xff] %v16873_v22  ;;  %v16875_v59 = vpop.f32.mrf.mxu3  ;;  %v16877_v29 = vpop.f32.mrf.mxu0 }
 0x4d2   : > { %21432 = vst [vmem:[#allocation120_spill] sm:$0xff] %v16875_v59  ;;  %v16879_v27 = vpop.f32.mrf.mxu1 }
 0x4d3   : > { %21433 = vst [vmem:[#allocation121_spill] sm:$0xff] %v16877_v29 }
 0x4d4   : > { %21434 = vst [vmem:[#allocation122_spill] sm:$0xff] %v16879_v27  ;;  %4198 = vmatmul.bf16.gmra.mxu0 %v16394_v51 }
 0x4d6   : > { %2934 = vmatmul.bf16.gmra.mxu3 %v16295_v46 }
 0x4d8   : > { %v16883_v15 = vpop.f32.mrf.mxu2 }
 0x4d9   : > { %21435 = vst [vmem:[#allocation123_spill] sm:$0xff] %v16883_v15  ;;  %v16885_v40 = vpop.f32.mrf.mxu3  ;;  %v16887_v35 = vpop.f32.mrf.mxu0 }
 0x4da   : > { %21436 = vst [vmem:[#allocation124_spill] sm:$0xff] %v16885_v40  ;;  %v16889_v31 = vpop.f32.mrf.mxu1  ;;  %v13978_v40 = vld [vmem:[%s21093_s6 + $0x178] sm:$0xff] }
 0x4db   : > { %21437 = vst [vmem:[#allocation125_spill] sm:$0xff] %v16887_v35  ;;  %v14034_v35 = vld [vmem:[%s21093_s6 + $0x338] sm:$0xff]  ;;  %3645 = vmatpush.bf16.msrb.mxu3 %v13978_v40  ;;  %v14032_v40 = vld [vmem:[%s21093_s6 + $0x328] sm:$0xff] }
 0x4dc   : > { %21438 = vst [vmem:[#allocation126_spill] sm:$0xff] %v16889_v31  ;;  %3849 = vmatmul.bf16.gmra.mxu1 %v16274_v19  ;;  %4821 = vmatpush.bf16.msrb.mxu0 %v14034_v35  ;;  %v13977_v35 = vld [vmem:[%s21093_s6 + $0x170] sm:$0xff] }
 0x4dd   : > { %3998 = vmatmul.bf16.gmra.mxu2 %v16291_v41 }
 0x4df   : > { %3646 = vmatpush.bf16.msrb.mxu3 %v13977_v35 }
 0x4e0   : > { %v16893_v43 = vpop.f32.mrf.mxu2 }
 0x4e1   : > { %21439 = vst [vmem:[#allocation127_spill] sm:$0xff] %v16893_v43  ;;  %v16895_v29 = vpop.f32.mrf.mxu3  ;;  %v16897_v59 = vpop.f32.mrf.mxu0  ;;  %v13971_v43 = vld [vmem:[%s21093_s6 + $0x140] sm:$0xff] }
 0x4e2   : > { %21440 = vst [vmem:[#allocation128_spill] sm:$0xff] %v16895_v29  ;;  %v16899_v51 = vpop.f32.mrf.mxu1 }
 0x4e3   : > { %21441 = vst [vmem:[#allocation129_spill] sm:$0xff] %v16897_v59  ;;  %v14033_v59 = vld [vmem:[%s21093_s6 + $0x330] sm:$0xff] }
 0x4e4   : > { %21442 = vst [vmem:[#allocation130_spill] sm:$0xff] %v16899_v51  ;;  %4203 = vmatmul.bf16.gmra.mxu0 %v16465_v56 }
 0x4e5   : > { %4822 = vmatpush.bf16.msrb.mxu0 %v14033_v59  ;;  %v14031_v59 = vld [vmem:[%s21093_s6 + $0x320] sm:$0xff] }
 0x4e6   : > { %2939 = vmatmul.bf16.gmra.mxu3 %v16327_v33 }
 0x4e8   : > { %v16909_v31 = vpop.f32.mrf.mxu2 }
 0x4e9   : > { %21443 = vst [vmem:[#allocation131_spill] sm:$0xff] %v16909_v31  ;;  %v16914_v29 = vpop.f32.mrf.mxu3  ;;  %v16916_v56 = vpop.f32.mrf.mxu0  ;;  %4823 = vmatpush.bf16.msrb.mxu0 %v14032_v40  ;;  %v13974_v40 = vld [vmem:[%s21093_s6 + $0x158] sm:$0xff] }
 0x4ea   : > { %21444 = vst [vmem:[#allocation132_spill] sm:$0xff] %v16916_v56  ;;  %v16918_v51 = vpop.f32.mrf.mxu1  ;;  %v13976_v56 = vld [vmem:[%s21093_s6 + $0x168] sm:$0xff] }
 0x4eb   : > { %21445 = vst [vmem:[#allocation133_spill] sm:$0xff] %v16918_v51  ;;  %3647 = vmatpush.bf16.msrb.mxu3 %v13976_v56  ;;  %v14030_v56 = vld [vmem:[%s21093_s6 + $0x318] sm:$0xff] }
 0x4ec   : > { %3854 = vmatmul.bf16.gmra.mxu1 %v16312_v47 }
 0x4ed   : > { %4003 = vmatmul.bf16.gmra.mxu2 %v16323_v7  ;;  %4824 = vmatpush.bf16.msrb.mxu0 %v14031_v59  ;;  %v14029_v59 = vld [vmem:[%s21093_s6 + $0x310] sm:$0xff] }
 0x4ef   : > { %3648 = vmatpush.bf16.msrb.mxu3 %v13975_v58 }
 0x4f0   : > { %v16931_v51 = vpop.f32.mrf.mxu2 }
 0x4f1   : > { %21446 = vst [vmem:[#allocation134_spill] sm:$0xff] %v16931_v51  ;;  %v16936_v27 = vpop.f32.mrf.mxu3  ;;  %v16938_v35 = vpop.f32.mrf.mxu0  ;;  %4825 = vmatpush.bf16.msrb.mxu0 %v14030_v56  ;;  %v13973_v56 = vld [vmem:[%s21093_s6 + $0x150] sm:$0xff] }
 0x4f2   : > { %21447 = vst [vmem:[#allocation135_spill] sm:$0xff] %v16938_v35  ;;  %v16940_v31 = vpop.f32.mrf.mxu1 }
 0x4f3   : > { %21448 = vst [vmem:[#allocation136_spill] sm:$0xff] %v16940_v31  ;;  %3649 = vmatpush.bf16.msrb.mxu3 %v13974_v40  ;;  %v14028_v40 = vld [vmem:[%s21093_s6 + $0x308] sm:$0xff] }
 0x4f4   : > { %4208 = vmatmul.bf16.gmra.mxu0 %v16537_v54 }
 0x4f5   : > { %4826 = vmatpush.bf16.msrb.mxu0 %v14029_v59  ;;  %v14027_v59 = vld [vmem:[%s21093_s6 + $0x300] sm:$0xff] }
 0x4f6   : > { %2944 = vmatmul.bf16.gmra.mxu3 %v16360_v17 }
 0x4f7   : > { %3650 = vmatpush.bf16.msrb.mxu3 %v13973_v56 }
 0x4f8   : > { %v16953_v35 = vpop.f32.mrf.mxu2 }
 0x4f9   : > { %21449 = vst [vmem:[#allocation137_spill] sm:$0xff] %v16953_v35  ;;  %v16958_v54 = vpop.f32.mrf.mxu3  ;;  %v16960_v58 = vpop.f32.mrf.mxu0  ;;  %4827 = vmatpush.bf16.msrb.mxu0 %v14028_v40  ;;  %v16992_v40 = vsel %vm3173_vm4, %v16529_v26, %v16634_v45  ;;  %v4102_v26 = vrot.slane %v21459_v9, 2 }
 0x4fa   : > { %21450 = vst [vmem:[#allocation138_spill] sm:$0xff] %v16960_v58  ;;  %v16962_v31 = vpop.f32.mrf.mxu1  ;;  %v13972_v58 = vld [vmem:[%s21093_s6 + $0x148] sm:$0xff] }
 0x4fb   : > { %21451 = vst [vmem:[#allocation139_spill] sm:$0xff] %v16962_v31  ;;  %3651 = vmatpush.bf16.msrb.mxu3 %v13972_v58  ;;  %v4099_v58 = vshrl.u32 %v16578_v13, 16 }
 0x4fc   : > { %3859 = vmatmul.bf16.gmra.mxu1 %v16344_v23  ;;  %21455 = vst [vmem:[#allocation143_spill] sm:$0xff] %v16992_v40 }
 0x4fd   : > { %4008 = vmatmul.bf16.gmra.mxu2 %v16356_v8  ;;  %4828 = vmatpush.bf16.msrb.mxu0 %v14027_v59  ;;  %v4101_v32 = vrot.slane %v4099_v58, 1 }
 0x4ff   : > { %3652 = vmatpush.bf16.msrb.mxu3 %v13971_v43  ;;  %v4103_v43 = vor.u32 %v4102_v26, %v4101_v32  ;;  %v21467_v26 = vld [vmem:[#allocation18_spill] sm:$0xff] }
 0x500   : > { %v16975_v31 = vpop.f32.mrf.mxu2 }
 0x501   : > { %21452 = vst [vmem:[#allocation140_spill] sm:$0xff] %v16975_v31  ;;  %v16980_v35 = vpop.f32.mrf.mxu3  ;;  %v16982_v56 = vpop.f32.mrf.mxu0 }
 0x502   : > { %21453 = vst [vmem:[#allocation141_spill] sm:$0xff] %v16982_v56  ;;  %v16984_v51 = vpop.f32.mrf.mxu1 }
 0x503   : > { %21454 = vst [vmem:[#allocation142_spill] sm:$0xff] %v16984_v51 }
 0x504   : > { %4213 = vmatmul.bf16.gmra.mxu0 %v16992_v40  ;;  %v21460_v40 = vld [vmem:[#allocation29_spill] sm:$0xff] }
 0x506   : > { %2949 = vmatmul.bf16.gmra.mxu3 %v16419_v3 }
 0x508   : > { %v16997_v56 = vpop.f32.mrf.mxu2 }
 0x509   : > { %21456 = vst [vmem:[#allocation144_spill] sm:$0xff] %v16997_v56  ;;  %v16999_v51 = vpop.f32.mrf.mxu3  ;;  %v17001_v59 = vpop.f32.mrf.mxu0 }
 0x50a   : > { %21457 = vst [vmem:[#allocation145_spill] sm:$0xff] %v17001_v59  ;;  %v17003_v31 = vpop.f32.mrf.mxu1  ;;  %v4104_v59 = vsel %vm3173_vm4, %v16634_v45, %v4103_v43 }
 0x50b   : > { %21458 = vst [vmem:[#allocation146_spill] sm:$0xff] %v17003_v31 }
 0x50c   : > { %3864 = vmatmul.bf16.gmra.mxu1 %v16382_v53 }
 0x50d   : > { %4013 = vmatmul.bf16.gmra.mxu2 %v21460_v40 }
 0x510   : > { %v17009_v15 = vpop.f32.mrf.mxu2 }
 0x511   : > { %21461 = vst [vmem:[#allocation147_spill] sm:$0xff] %v17009_v15  ;;  %v17011_v62 = vpop.f32.mrf.mxu3  ;;  %v17013_v56 = vpop.f32.mrf.mxu0  ;;  %v21468_v15 = vld [vmem:[#allocation34_spill] sm:$0xff] }
 0x512   : > { %21462 = vst [vmem:[#allocation148_spill] sm:$0xff] %v17013_v56  ;;  %v17015_v22 = vpop.f32.mrf.mxu1  ;;  %v14018_v56 = vld [vmem:[%s21093_s6 + $0x2b8] sm:$0xff] }
 0x513   : > { %21463 = vst [vmem:[#allocation149_spill] sm:$0xff] %v17015_v22  ;;  %4481 = vmatpush.bf16.msra.mxu1 %v14018_v56  ;;  %v14016_v22 = vld [vmem:[%s21093_s6 + $0x2a8] sm:$0xff] }
 0x514   : > { %4218 = vmatmul.bf16.gmra.mxu0 %v4104_v59 }
 0x516   : > { %2954 = vmatmul.bf16.gmra.mxu3 %v16494_v48 }
 0x518   : > { %v17020_v9 = vpop.f32.mrf.mxu2 }
 0x519   : > { %21464 = vst [vmem:[#allocation150_spill] sm:$0xff] %v17020_v9  ;;  %v17022_v58 = vpop.f32.mrf.mxu3  ;;  %v17024_v31 = vpop.f32.mrf.mxu0  ;;  %v21476_v9 = vld [vmem:[#allocation69_spill] sm:$0xff] }
 0x51a   : > { %21465 = vst [vmem:[#allocation151_spill] sm:$0xff] %v17024_v31  ;;  %v17026_v32 = vpop.f32.mrf.mxu1  ;;  %v14017_v31 = vld [vmem:[%s21093_s6 + $0x2b0] sm:$0xff] }
 0x51b   : > { %21466 = vst [vmem:[#allocation152_spill] sm:$0xff] %v17026_v32  ;;  %4482 = vmatpush.bf16.msra.mxu1 %v14017_v31 }
 0x51c   : > { %3869 = vmatmul.bf16.gmra.mxu1 %v21467_v26 }
 0x51d   : > { %4018 = vmatmul.bf16.gmra.mxu2 %v21468_v15 }
 0x51f   : > { %4483 = vmatpush.bf16.msra.mxu1 %v14016_v22 }
 0x520   : > { %v17033_v45 = vpop.f32.mrf.mxu2 }
 0x521   : > { %21469 = vst [vmem:[#allocation153_spill] sm:$0xff] %v17033_v45  ;;  %v17035_v59 = vpop.f32.mrf.mxu3  ;;  %v17037_v43 = vpop.f32.mrf.mxu0 }
 0x522   : > { %21470 = vst [vmem:[#allocation154_spill] sm:$0xff] %v17037_v43  ;;  %v17042_v32 = vpop.f32.mrf.mxu1 }
 0x523   : > { %21471 = vst [vmem:[#allocation155_spill] sm:$0xff] %v17042_v32  ;;  %v14015_v32 = vld [vmem:[%s21093_s6 + $0x2a0] sm:$0xff] }
 0x524   : > { %4829 = vmatmul.bf16.vlgmr.msrb.gmra.mxu0 %v16291_v41  ;;  %4484 = vmatpush.bf16.msra.mxu1 %v14015_v32  ;;  %v21475_v41 = vld [vmem:[#allocation20_spill] sm:$0xff] }
 0x526   : > { %3653 = vmatmul.bf16.vlgmr.msrb.gmra.mxu3 %v16014_v16  ;;  %v14014_v16 = vld [vmem:[%s21093_s6 + $0x298] sm:$0xff] }
 0x528   : > { %v17049_v56 = vpop.f32.mrf.mxu2  ;;  %4485 = vmatpush.bf16.msra.mxu1 %v14014_v16 }
 0x529   : > { %21472 = vst [vmem:[#allocation156_spill] sm:$0xff] %v17049_v56  ;;  %v17051_v45 = vpop.f32.mrf.mxu3  ;;  %v17053_v43 = vpop.f32.mrf.mxu0 }
 0x52a   : > { %21473 = vst [vmem:[#allocation157_spill] sm:$0xff] %v17053_v43  ;;  %v17058_v31 = vpop.f32.mrf.mxu1 }
 0x52b   : > { %21474 = vst [vmem:[#allocation158_spill] sm:$0xff] %v17058_v31  ;;  %v14013_v31 = vld [vmem:[%s21093_s6 + $0x290] sm:$0xff] }
 0x52c   : > { %3874 = vmatmul.bf16.gmra.mxu1 %v21475_v41  ;;  %v14012_v41 = vld [vmem:[%s21093_s6 + $0x288] sm:$0xff] }
 0x52d   : > { %4023 = vmatmul.bf16.gmra.mxu2 %v21476_v9  ;;  %4486 = vmatpush.bf16.msra.mxu1 %v14013_v31 }
 0x530   : > { %v17065_v22 = vpop.f32.mrf.mxu2 }
 0x531   : > { %21477 = vst [vmem:[#allocation159_spill] sm:$0xff] %v17065_v22  ;;  %v17067_v56 = vpop.f32.mrf.mxu3  ;;  %v17069_v43 = vpop.f32.mrf.mxu0  ;;  %4487 = vmatpush.bf16.msra.mxu1 %v14012_v41 }
 0x532   : > { %21478 = vst [vmem:[#allocation160_spill] sm:$0xff] %v17069_v43  ;;  %v17074_v32 = vpop.f32.mrf.mxu1 }
 0x533   : > { %21479 = vst [vmem:[#allocation161_spill] sm:$0xff] %v17074_v32  ;;  %v14011_v32 = vld [vmem:[%s21093_s6 + $0x280] sm:$0xff] }
 0x534   : > { %4834 = vmatmul.bf16.gmra.mxu0 %v16323_v7  ;;  %v17095_v7 = vsel %vm2601_vm3, %v16571_v38, %v16581_v37 }
 0x535   : > { %21483 = vst [vmem:[#allocation165_spill] sm:$0xff] %v17095_v7  ;;  %4488 = vmatpush.bf16.msra.mxu1 %v14011_v32 }
 0x536   : > { %3658 = vmatmul.bf16.gmra.mxu3 %v16063_v20 }
 0x538   : > { %v17081_v16 = vpop.f32.mrf.mxu2 }
 0x539   : > { %21480 = vst [vmem:[#allocation162_spill] sm:$0xff] %v17081_v16  ;;  %v17083_v22 = vpop.f32.mrf.mxu3  ;;  %v17085_v43 = vpop.f32.mrf.mxu0 }
 0x53a   : > { %21481 = vst [vmem:[#allocation163_spill] sm:$0xff] %v17085_v43  ;;  %v17090_v31 = vpop.f32.mrf.mxu1 }
 0x53b   : > { %21482 = vst [vmem:[#allocation164_spill] sm:$0xff] %v17090_v31 }
 0x53c   : > { %3879 = vmatmul.bf16.gmra.mxu1 %v17095_v7  ;;  %v21490_v7 = vld [vmem:[#allocation76_spill] sm:$0xff] }
 0x53d   : > { %4028 = vmatmul.bf16.gmra.mxu2 %v16592_v14 }
 0x540   : > { %v17099_v41 = vpop.f32.mrf.mxu2 }
 0x541   : > { %21484 = vst [vmem:[#allocation166_spill] sm:$0xff] %v17099_v41  ;;  %v17101_v16 = vpop.f32.mrf.mxu3  ;;  %v17103_v43 = vpop.f32.mrf.mxu0 }
 0x542   : > { %21485 = vst [vmem:[#allocation167_spill] sm:$0xff] %v17103_v43  ;;  %v17105_v26 = vpop.f32.mrf.mxu1  ;;  %v14026_v43 = vld [vmem:[%s21093_s6 + $0x2f8] sm:$0xff] }
 0x543   : > { %21486 = vst [vmem:[#allocation168_spill] sm:$0xff] %v17105_v26  ;;  %4657 = vmatpush.bf16.msra.mxu2 %v14026_v43 }
 0x544   : > { %4839 = vmatmul.bf16.gmra.mxu0 %v16356_v8 }
 0x546   : > { %3663 = vmatmul.bf16.gmra.mxu3 %v16114_v42 }
 0x548   : > { %v17109_v31 = vpop.f32.mrf.mxu2 }
 0x549   : > { %21487 = vst [vmem:[#allocation169_spill] sm:$0xff] %v17109_v31  ;;  %v17111_v38 = vpop.f32.mrf.mxu3  ;;  %v17113_v37 = vpop.f32.mrf.mxu0 }
 0x54a   : > { %21488 = vst [vmem:[#allocation170_spill] sm:$0xff] %v17113_v37  ;;  %v17115_v32 = vpop.f32.mrf.mxu1  ;;  %v14025_v37 = vld [vmem:[%s21093_s6 + $0x2f0] sm:$0xff] }
 0x54b   : > { %21489 = vst [vmem:[#allocation171_spill] sm:$0xff] %v17115_v32  ;;  %4658 = vmatpush.bf16.msra.mxu2 %v14025_v37 }
 0x54c   : > { %3884 = vmatmul.bf16.gmra.mxu1 %v21490_v7  ;;  %v14024_v7 = vld [vmem:[%s21093_s6 + $0x2e8] sm:$0xff] }
 0x54d   : > { %4033 = vmatmul.bf16.gmra.mxu2 %v16656_v24 }
 0x54f   : > { %4659 = vmatpush.bf16.msra.mxu2 %v14024_v7  ;;  %v14022_v7 = vld [vmem:[%s21093_s6 + $0x2d8] sm:$0xff] }
 0x550   : > { %v17122_v8 = vpop.f32.mrf.mxu2 }
 0x551   : > { %21491 = vst [vmem:[#allocation76_spill] sm:$0xff] %v17122_v8  ;;  %v17124_v26 = vpop.f32.mrf.mxu3  ;;  %v17126_v31 = vpop.f32.mrf.mxu0 }
 0x552   : > { %21492 = vst [vmem:[#allocation172_spill] sm:$0xff] %v17126_v31  ;;  %v17131_v32 = vpop.f32.mrf.mxu1 }
 0x553   : > { %21493 = vst [vmem:[#allocation173_spill] sm:$0xff] %v17131_v32  ;;  %v14023_v32 = vld [vmem:[%s21093_s6 + $0x2e0] sm:$0xff] }
 0x554   : > { %4844 = vmatmul.bf16.gmra.mxu0 %v21460_v40  ;;  %4660 = vmatpush.bf16.msra.mxu2 %v14023_v32 }
 0x556   : > { %3668 = vmatmul.bf16.gmra.mxu3 %v16159_v34 }
 0x558   : > { %v17138_v43 = vpop.f32.mrf.mxu2  ;;  %4661 = vmatpush.bf16.msra.mxu2 %v14022_v7 }
 0x559   : > { %21494 = vst [vmem:[#allocation174_spill] sm:$0xff] %v17138_v43  ;;  %v17140_v8 = vpop.f32.mrf.mxu3  ;;  %v17142_v31 = vpop.f32.mrf.mxu0 }
 0x55a   : > { %21495 = vst [vmem:[#allocation175_spill] sm:$0xff] %v17140_v8  ;;  %v17147_v37 = vpop.f32.mrf.mxu1 }
 0x55b   : > { %21496 = vst [vmem:[#allocation176_spill] sm:$0xff] %v17142_v31 }
 0x55c   : > { %21497 = vst [vmem:[#allocation177_spill] sm:$0xff] %v17147_v37  ;;  %4489 = vmatmul.bf16.vlgmr.msra.gmra.mxu1 %v16063_v20  ;;  %v14021_v37 = vld [vmem:[%s21093_s6 + $0x2d0] sm:$0xff]  ;;  %v14020_v20 = vld [vmem:[%s21093_s6 + $0x2c8] sm:$0xff] }
 0x55d   : > { %4038 = vmatmul.bf16.gmra.mxu2 %v16715_v50 }
 0x55e   : > { %4662 = vmatpush.bf16.msra.mxu2 %v14021_v37  ;;  %v14019_v37 = vld [vmem:[%s21093_s6 + $0x2c0] sm:$0xff] }
 0x560   : > { %v17154_v40 = vpop.f32.mrf.mxu2 }
 0x561   : > { %21498 = vst [vmem:[#allocation178_spill] sm:$0xff] %v17154_v40  ;;  %v17156_v43 = vpop.f32.mrf.mxu3  ;;  %v17158_v31 = vpop.f32.mrf.mxu0  ;;  %v21503_v40 = vld [vmem:[#allocation70_spill] sm:$0xff] }
 0x562   : > { %21499 = vst [vmem:[#allocation179_spill] sm:$0xff] %v17156_v43  ;;  %v17163_v32 = vpop.f32.mrf.mxu1  ;;  %4663 = vmatpush.bf16.msra.mxu2 %v14020_v20 }
 0x563   : > { %21500 = vst [vmem:[#allocation180_spill] sm:$0xff] %v17158_v31  ;;  %v17173_v31 = vrot.slane %v21503_v40, 1 }
 0x564   : > { %21501 = vst [vmem:[#allocation181_spill] sm:$0xff] %v17163_v32  ;;  %4849 = vmatmul.bf16.gmra.mxu0 %v21468_v15 }
 0x565   : > { %v17187_v20 = vsel %vm2977_vm5, %v16696_v5, %v17173_v31  ;;  %v3933_v5 = vrot.slane %v16578_v13, 1 }
 0x566   : > { %3673 = vmatmul.bf16.gmra.mxu3 %v16210_v57  ;;  %4664 = vmatpush.bf16.msra.mxu2 %v14019_v37  ;;  %21507 = vst [vmem:[#allocation185_spill] sm:$0xff] %v17187_v20 }
 0x568   : > { %v17170_v7 = vpop.f32.mrf.mxu2 }
 0x569   : > { %21502 = vst [vmem:[#allocation182_spill] sm:$0xff] %v17170_v7  ;;  %v17175_v41 = vpop.f32.mrf.mxu3  ;;  %v17177_v43 = vpop.f32.mrf.mxu0 }
 0x56a   : > { %21504 = vst [vmem:[#allocation70_spill] sm:$0xff] %v17175_v41  ;;  %v17182_v15 = vpop.f32.mrf.mxu1 }
 0x56b   : > { %21505 = vst [vmem:[#allocation183_spill] sm:$0xff] %v17177_v43 }
 0x56c   : > { %21506 = vst [vmem:[#allocation184_spill] sm:$0xff] %v17182_v15  ;;  %4494 = vmatmul.bf16.gmra.mxu1 %v16114_v42 }
 0x56d   : > { %4043 = vmatmul.bf16.gmra.mxu2 %v17187_v20 }
 0x570   : > { %v17191_v32 = vpop.f32.mrf.mxu2 }
 0x571   : > { %21508 = vst [vmem:[#allocation186_spill] sm:$0xff] %v17191_v32  ;;  %v17193_v7 = vpop.f32.mrf.mxu3  ;;  %v17195_v43 = vpop.f32.mrf.mxu0  ;;  %v3934_v32 = vsel %vm2977_vm5, %v17173_v31, %v3933_v5 }
 0x572   : > { %21509 = vst [vmem:[#allocation187_spill] sm:$0xff] %v17195_v43  ;;  %v17197_v41 = vpop.f32.mrf.mxu1 }
 0x573   : > { %21510 = vst [vmem:[#allocation188_spill] sm:$0xff] %v17197_v41 }
 0x574   : > { %4854 = vmatmul.bf16.gmra.mxu0 %v21476_v9 }
 0x576   : > { %3678 = vmatmul.bf16.gmra.mxu3 %v16257_v1 }
 0x578   : > { %v17201_v37 = vpop.f32.mrf.mxu2 }
 0x579   : > { %21511 = vst [vmem:[#allocation189_spill] sm:$0xff] %v17201_v37  ;;  %v17204_v15 = vpop.f32.mrf.mxu3  ;;  %v17206_v42 = vpop.f32.mrf.mxu0 }
 0x57a   : > { %21512 = vst [vmem:[#allocation190_spill] sm:$0xff] %v17206_v42  ;;  %v17208_v8 = vpop.f32.mrf.mxu1 }
 0x57b   : > { %21513 = vst [vmem:[#allocation191_spill] sm:$0xff] %v17208_v8 }
 0x57c   : > { %4499 = vmatmul.bf16.gmra.mxu1 %v16159_v34 }
 0x57d   : > { %4048 = vmatmul.bf16.gmra.mxu2 %v3934_v32 }
 0x580   : > { %v17213_v43 = vpop.f32.mrf.mxu2 }
 0x581   : > { %21514 = vst [vmem:[#allocation192_spill] sm:$0xff] %v17213_v43  ;;  %v17215_v9 = vpop.f32.mrf.mxu3  ;;  %v17217_v41 = vpop.f32.mrf.mxu0 }
 0x582   : > { %21515 = vst [vmem:[#allocation193_spill] sm:$0xff] %v17217_v41  ;;  %v17219_v37 = vpop.f32.mrf.mxu1 }
 0x583   : > { %21516 = vst [vmem:[#allocation194_spill] sm:$0xff] %v17219_v37 }
 0x584   : > { %4859 = vmatmul.bf16.gmra.mxu0 %v16592_v14 }
 0x586   : > { %3683 = vmatmul.bf16.gmra.mxu3 %v16295_v46 }
 0x588   : > { %v17223_v42 = vpop.f32.mrf.mxu2 }
 0x589   : > { %21517 = vst [vmem:[#allocation195_spill] sm:$0xff] %v17223_v42  ;;  %v17225_v8 = vpop.f32.mrf.mxu3  ;;  %v17227_v5 = vpop.f32.mrf.mxu0 }
 0x58a   : > { %21518 = vst [vmem:[#allocation196_spill] sm:$0xff] %v17227_v5  ;;  %v17229_v13 = vpop.f32.mrf.mxu1 }
 0x58b   : > { %21519 = vst [vmem:[#allocation197_spill] sm:$0xff] %v17229_v13 }
 0x58c   : > { %4504 = vmatmul.bf16.gmra.mxu1 %v16210_v57 }
 0x58d   : > { %4665 = vmatmul.bf16.vlgmr.msra.gmra.mxu2 %v21418_v36  ;;  %v21526_v36 = vld [vmem:[#allocation60_spill] sm:$0xff] }
 0x590   : > { %v17233_v32 = vpop.f32.mrf.mxu2 }
 0x591   : > { %21520 = vst [vmem:[#allocation198_spill] sm:$0xff] %v17233_v32  ;;  %v17235_v41 = vpop.f32.mrf.mxu3  ;;  %v17237_v37 = vpop.f32.mrf.mxu0  ;;  %v2901_v32 = vadd.f32 %v16914_v29, %v21526_v36  ;;  %v14066_v36 = vld [vmem:[%s21093_s6 + $0x438] sm:$0xff] }
 0x592   : > { %21521 = vst [vmem:[#allocation199_spill] sm:$0xff] %v17237_v37  ;;  %v17239_v14 = vpop.f32.mrf.mxu1  ;;  %v21527_v37 = vld [vmem:[#allocation73_spill] sm:$0xff]  ;;  %5493 = vmatpush.bf16.msra.mxu0 %v14066_v36 }
 0x593   : > { %21522 = vst [vmem:[#allocation200_spill] sm:$0xff] %v17239_v14  ;;  %v3132_v14 = vadd.f32 %v21527_v37, %v2901_v32  ;;  %v14010_v37 = vld [vmem:[%s21093_s6 + $0x278] sm:$0xff] }
 0x594   : > { %4864 = vmatmul.bf16.gmra.mxu0 %v16656_v24  ;;  %4319 = vmatpush.bf16.msra.mxu3 %v14010_v37 }
 0x595   : > { %v3356_v29 = vadd.f32 %v16772_v10, %v3132_v14  ;;  %v14065_v14 = vld [vmem:[%s21093_s6 + $0x430] sm:$0xff] }
 0x596   : > { %3688 = vmatmul.bf16.gmra.mxu3 %v16327_v33  ;;  %5494 = vmatpush.bf16.msra.mxu0 %v14065_v14 }
 0x598   : > { %v17243_v42 = vpop.f32.mrf.mxu2 }
 0x599   : > { %21523 = vst [vmem:[#allocation201_spill] sm:$0xff] %v17243_v42  ;;  %v17245_v5 = vpop.f32.mrf.mxu3  ;;  %v17247_v13 = vpop.f32.mrf.mxu0 }
 0x59a   : > { %21524 = vst [vmem:[#allocation202_spill] sm:$0xff] %v17247_v13  ;;  %v17249_v43 = vpop.f32.mrf.mxu1  ;;  %v21530_v13 = vld [vmem:[#allocation62_spill] sm:$0xff] }
 0x59b   : > { %21525 = vst [vmem:[#allocation203_spill] sm:$0xff] %v17249_v43  ;;  %v2903_v43 = vadd.f32 %v16936_v27, %v21530_v13  ;;  %v21531_v27 = vld [vmem:[#allocation56_spill] sm:$0xff] }
 0x59c   : > { %4509 = vmatmul.bf16.gmra.mxu1 %v16257_v1  ;;  %v3552_v13 = vadd.f32 %v21531_v27, %v3356_v29  ;;  %v14064_v27 = vld [vmem:[%s21093_s6 + $0x428] sm:$0xff] }
 0x59d   : > { %4670 = vmatmul.bf16.gmra.mxu2 %v16182_v63  ;;  %v3133_v32 = vadd.f32 %v16620_v28, %v2903_v43  ;;  %v14009_v28 = vld [vmem:[%s21093_s6 + $0x270] sm:$0xff]  ;;  %v21534_v43 = vld [vmem:[#allocation25_spill] sm:$0xff]  ;;  %5495 = vmatpush.bf16.msra.mxu0 %v14064_v27 }
 0x59e   : > { %v2906_v29 = vadd.f32 %v16958_v54, %v21534_v43  ;;  %4320 = vmatpush.bf16.msra.mxu3 %v14009_v28  ;;  %v21535_v54 = vld [vmem:[#allocation61_spill] sm:$0xff] }
 0x59f   : > { %v3357_v37 = vadd.f32 %v16788_v4, %v3133_v32  ;;  %v14063_v4 = vld [vmem:[%s21093_s6 + $0x420] sm:$0xff] }
 0x5a0   : > { %v17256_v24 = vpop.f32.mrf.mxu2  ;;  %v3134_v14 = vadd.f32 %v16652_v25, %v2906_v29  ;;  %v14007_v25 = vld [vmem:[%s21093_s6 + $0x260] sm:$0xff]  ;;  %v21538_v29 = vld [vmem:[#allocation26_spill] sm:$0xff] }
 0x5a1   : > { %v17258_v57 = vpop.f32.mrf.mxu3  ;;  %v17260_v42 = vpop.f32.mrf.mxu0  ;;  %v3553_v43 = vadd.f32 %v21535_v54, %v3357_v37  ;;  %5496 = vmatpush.bf16.msra.mxu0 %v14063_v4  ;;  %v2908_v37 = vadd.f32 %v16980_v35, %v21538_v29  ;;  %v14006_v54 = vld [vmem:[%s21093_s6 + $0x258] sm:$0xff] }
 0x5a2   : > { %21528 = vst [vmem:[#allocation60_spill] sm:$0xff] %v17260_v42  ;;  %v17262_v34 = vpop.f32.mrf.mxu1  ;;  %v3358_v27 = vadd.f32 %v16804_v0, %v3134_v14  ;;  %v21539_v35 = vld [vmem:[#allocation63_spill] sm:$0xff]  ;;  %v14061_v0 = vld [vmem:[%s21093_s6 + $0x410] sm:$0xff] }
 0x5a3   : > { %21529 = vst [vmem:[#allocation73_spill] sm:$0xff] %v17262_v34 }
 0x5a4   : > { %4869 = vmatmul.bf16.gmra.mxu0 %v16715_v50 }
 0x5a6   : > { %3693 = vmatmul.bf16.gmra.mxu3 %v16360_v17 }
 0x5a8   : > { %v17276_v42 = vpop.f32.mrf.mxu2 }
 0x5a9   : > { %v3654_v10 = vpop.f32.mrf.mxu3  ;;  %v17282_v50 = vpop.f32.mrf.mxu0 }
 0x5aa   : > { %21532 = vst [vmem:[#allocation62_spill] sm:$0xff] %v17282_v50  ;;  %v17284_v34 = vadd.f32 %v3654_v10, %v3552_v13  ;;  %v17286_v36 = vpop.f32.mrf.mxu1  ;;  %v14008_v13 = vld [vmem:[%s21093_s6 + $0x268] sm:$0xff] }
 0x5ab   : > { %21533 = vst [vmem:[#allocation56_spill] sm:$0xff] %v17286_v36  ;;  %4321 = vmatpush.bf16.msra.mxu3 %v14008_v13  ;;  %v14062_v13 = vld [vmem:[%s21093_s6 + $0x418] sm:$0xff] }
 0x5ac   : > { %4514 = vmatmul.bf16.gmra.mxu1 %v16295_v46  ;;  %5497 = vmatpush.bf16.msra.mxu0 %v14062_v13 }
 0x5ad   : > { %4675 = vmatmul.bf16.gmra.mxu2 %v16230_v49 }
 0x5af   : > { %4322 = vmatpush.bf16.msra.mxu3 %v14007_v25 }
 0x5b0   : > { %v17303_v10 = vpop.f32.mrf.mxu2  ;;  %5498 = vmatpush.bf16.msra.mxu0 %v14061_v0  ;;  %v17357_v0 = vrot.slane %v16608_v6, 1 }
 0x5b1   : > { %v3656_v32 = vpop.f32.mrf.mxu3  ;;  %v17309_v28 = vpop.f32.mrf.mxu0 }
 0x5b2   : > { %21536 = vst [vmem:[#allocation25_spill] sm:$0xff] %v17309_v28  ;;  %v17311_v50 = vadd.f32 %v3656_v32, %v3553_v43  ;;  %v17313_v36 = vpop.f32.mrf.mxu1  ;;  %v3135_v43 = vadd.f32 %v16680_v2, %v2908_v37  ;;  %v3554_v32 = vadd.f32 %v21539_v35, %v3358_v27  ;;  %v14005_v2 = vld [vmem:[%s21093_s6 + $0x250] sm:$0xff]  ;;  %v21542_v37 = vld [vmem:[#allocation67_spill] sm:$0xff]  ;;  %v14060_v35 = vld [vmem:[%s21093_s6 + $0x408] sm:$0xff] }
 0x5b3   : > { %21537 = vst [vmem:[#allocation61_spill] sm:$0xff] %v17313_v36  ;;  %4323 = vmatpush.bf16.msra.mxu3 %v14006_v54  ;;  %v2911_v27 = vadd.f32 %v16999_v51, %v21542_v37  ;;  %v21651_v36 = vld [vmem:[#allocation48_spill] sm:$0xff] }
 0x5b4   : > { %4874 = vmatmul.bf16.gmra.mxu0 %v17187_v20  ;;  %v3359_v54 = vadd.f32 %v16820_v60, %v3135_v43  ;;  %21543 = vst [vmem:[#allocation67_spill] sm:$0xff] %v17357_v0  ;;  %v21544_v60 = vld [vmem:[#allocation64_spill] sm:$0xff] }
 0x5b5   : > { %5499 = vmatpush.bf16.msra.mxu0 %v14060_v35  ;;  %v3136_v51 = vadd.f32 %v16711_v12, %v2911_v27  ;;  %v14003_v12 = vld [vmem:[%s21093_s6 + $0x240] sm:$0xff]  ;;  %v17378_v27 = vsel %vm2977_vm5, %v17173_v31, %v17357_v0 }
 0x5b6   : > { %3698 = vmatmul.bf16.gmra.mxu3 %v16419_v3  ;;  %v3555_v43 = vadd.f32 %v21544_v60, %v3359_v54  ;;  %21547 = vst [vmem:[#allocation205_spill] sm:$0xff] %v17378_v27  ;;  %v21548_v54 = vld [vmem:[#allocation71_spill] sm:$0xff] }
 0x5b7   : > { %4324 = vmatpush.bf16.msra.mxu3 %v14005_v2  ;;  %v14059_v2 = vld [vmem:[%s21093_s6 + $0x400] sm:$0xff]  ;;  %v3360_v60 = vadd.f32 %v16833_v55, %v3136_v51 }
 0x5b8   : > { %v17330_v4 = vpop.f32.mrf.mxu2 }
 0x5b9   : > { %v3659_v14 = vpop.f32.mrf.mxu3  ;;  %v17336_v25 = vpop.f32.mrf.mxu0  ;;  %5500 = vmatpush.bf16.msra.mxu0 %v14059_v2 }
 0x5ba   : > { %21540 = vst [vmem:[#allocation26_spill] sm:$0xff] %v17336_v25  ;;  %v17338_v29 = vadd.f32 %v3659_v14, %v3554_v32  ;;  %v17340_v13 = vpop.f32.mrf.mxu1  ;;  %v14004_v32 = vld [vmem:[%s21093_s6 + $0x248] sm:$0xff] }
 0x5bb   : > { %21541 = vst [vmem:[#allocation63_spill] sm:$0xff] %v17340_v13  ;;  %4325 = vmatpush.bf16.msra.mxu3 %v14004_v32  ;;  %v2913_v32 = vadd.f32 %v17011_v62, %v21548_v54  ;;  %v21552_v62 = vld [vmem:[#allocation21_spill] sm:$0xff] }
 0x5bc   : > { %4519 = vmatmul.bf16.gmra.mxu1 %v16327_v33  ;;  %v2916_v54 = vadd.f32 %v17022_v58, %v21552_v62 }
 0x5bd   : > { %4680 = vmatmul.bf16.gmra.mxu2 %v16274_v19 }
 0x5be   : > { %v3138_v51 = vadd.f32 %v16759_v61, %v2916_v54 }
 0x5bf   : > { %4326 = vmatpush.bf16.msra.mxu3 %v14003_v12 }
 0x5c0   : > { %v17360_v14 = vpop.f32.mrf.mxu2  ;;  %v3362_v61 = vadd.f32 %v16853_v30, %v3138_v51 }
 0x5c1   : > { %v3661_v37 = vpop.f32.mrf.mxu3  ;;  %v17366_v20 = vpop.f32.mrf.mxu0 }
 0x5c2   : > { %21545 = vst [vmem:[#allocation64_spill] sm:$0xff] %v17366_v20  ;;  %v17368_v25 = vadd.f32 %v3661_v37, %v3555_v43  ;;  %v17370_v35 = vpop.f32.mrf.mxu1  ;;  %v3137_v43 = vadd.f32 %v16735_v18, %v2913_v32  ;;  %v21549_v37 = vld [vmem:[#allocation65_spill] sm:$0xff]  ;;  %v4769_v18 = vrot.slane %v16637_v39, 1  ;;  %v21553_v32 = vld [vmem:[#allocation68_spill] sm:$0xff] }
 0x5c3   : > { %21546 = vst [vmem:[#allocation204_spill] sm:$0xff] %v17370_v35  ;;  %v3556_v20 = vadd.f32 %v21549_v37, %v3360_v60 }
 0x5c4   : > { %4879 = vmatmul.bf16.gmra.mxu0 %v17378_v27  ;;  %v3361_v55 = vadd.f32 %v16843_v52, %v3137_v43  ;;  %v4770_v52 = vsel %vm2977_vm5, %v17357_v0, %v4769_v18  ;;  %v21556_v43 = vld [vmem:[#allocation77_spill] sm:$0xff]  ;;  %v21560_v0 = vld [vmem:[#allocation22_spill] sm:$0xff] }
 0x5c5   : > { %v2918_v62 = vadd.f32 %v17035_v59, %v21556_v43  ;;  %v2921_v59 = vadd.f32 %v17051_v45, %v21560_v0  ;;  %v21562_v43 = vld [vmem:[#allocation28_spill] sm:$0xff] }
 0x5c6   : > { %3703 = vmatmul.bf16.gmra.mxu3 %v16494_v48 }
 0x5c7   : > { %v3139_v54 = vadd.f32 %v16781_v11, %v2918_v62  ;;  %v14050_v11 = vld [vmem:[%s21093_s6 + $0x3b8] sm:$0xff]  ;;  %v3140_v51 = vadd.f32 %v16797_v44, %v2921_v59  ;;  %v14048_v59 = vld [vmem:[%s21093_s6 + $0x3a8] sm:$0xff] }
 0x5c8   : > { %v17386_v2 = vpop.f32.mrf.mxu2  ;;  %5155 = vmatpush.bf16.msrb.mxu1 %v14050_v11  ;;  %v21566_v44 = vld [vmem:[#allocation119_spill] sm:$0xff]  ;;  %v21568_v11 = vld [vmem:[#allocation104_spill] sm:$0xff] }
 0x5c9   : > { %v3664_v28 = vpop.f32.mrf.mxu3  ;;  %v17389_v35 = vpop.f32.mrf.mxu0  ;;  %v3363_v30 = vadd.f32 %v16863_v21, %v3139_v54  ;;  %v14049_v21 = vld [vmem:[%s21093_s6 + $0x3b0] sm:$0xff] }
 0x5ca   : > { %21550 = vst [vmem:[#allocation71_spill] sm:$0xff] %v17389_v35  ;;  %v17391_v31 = vadd.f32 %v3664_v28, %v3556_v20  ;;  %v17393_v13 = vpop.f32.mrf.mxu1  ;;  %v3557_v20 = vadd.f32 %v21553_v32, %v3361_v55  ;;  %v21557_v32 = vld [vmem:[#allocation72_spill] sm:$0xff]  ;;  %v21565_v54 = vld [vmem:[#allocation82_spill] sm:$0xff]  ;;  %v21585_v35 = vld [vmem:[#allocation83_spill] sm:$0xff] }
 0x5cb   : > { %21551 = vst [vmem:[#allocation65_spill] sm:$0xff] %v17393_v13  ;;  %v3559_v62 = vadd.f32 %v21562_v43, %v3363_v30  ;;  %v21567_v30 = vld [vmem:[#allocation30_spill] sm:$0xff]  ;;  %v21607_v13 = vld [vmem:[#allocation20_spill] sm:$0xff] }
 0x5cc   : > { %4524 = vmatmul.bf16.gmra.mxu1 %v16360_v17 }
 0x5cd   : > { %4685 = vmatmul.bf16.gmra.mxu2 %v16312_v47  ;;  %5156 = vmatpush.bf16.msrb.mxu1 %v14049_v21 }
 0x5d0   : > { %v17402_v12 = vpop.f32.mrf.mxu2 }
 0x5d1   : > { %v3666_v28 = vpop.f32.mrf.mxu3  ;;  %v17405_v60 = vpop.f32.mrf.mxu0  ;;  %5157 = vmatpush.bf16.msrb.mxu1 %v14048_v59 }
 0x5d2   : > { %21554 = vst [vmem:[#allocation21_spill] sm:$0xff] %v17405_v60  ;;  %v17407_v37 = vadd.f32 %v3666_v28, %v3557_v20  ;;  %v17409_v58 = vpop.f32.mrf.mxu1  ;;  %v3558_v20 = vadd.f32 %v21557_v32, %v3362_v61 }
 0x5d3   : > { %21555 = vst [vmem:[#allocation68_spill] sm:$0xff] %v17409_v58  ;;  %v21598_v58 = vld [vmem:[#allocation39_spill] sm:$0xff] }
 0x5d4   : > { %4884 = vmatmul.bf16.gmra.mxu0 %v4770_v52 }
 0x5d6   : > { %3708 = vmatmul.bf16.gmra.mxu3 %v21503_v40 }
 0x5d8   : > { %v17418_v55 = vpop.f32.mrf.mxu2 }
 0x5d9   : > { %v3669_v28 = vpop.f32.mrf.mxu3  ;;  %v17421_v27 = vpop.f32.mrf.mxu0 }
 0x5da   : > { %21558 = vst [vmem:[#allocation77_spill] sm:$0xff] %v17421_v27  ;;  %v17423_v60 = vadd.f32 %v3669_v28, %v3558_v20  ;;  %v17425_v18 = vpop.f32.mrf.mxu1  ;;  %v2923_v20 = vadd.f32 %v17067_v56, %v21565_v54  ;;  %v3364_v28 = vadd.f32 %v21566_v44, %v3140_v51  ;;  %v21573_v54 = vld [vmem:[#allocation85_spill] sm:$0xff] }
 0x5db   : > { %21559 = vst [vmem:[#allocation72_spill] sm:$0xff] %v17425_v18  ;;  %v2926_v44 = vadd.f32 %v17083_v22, %v21573_v54  ;;  %v14045_v22 = vld [vmem:[%s21093_s6 + $0x390] sm:$0xff] }
 0x5dc   : > { %4529 = vmatmul.bf16.gmra.mxu1 %v16419_v3  ;;  %v3141_v43 = vadd.f32 %v21568_v11, %v2923_v20  ;;  %v21574_v20 = vld [vmem:[#allocation123_spill] sm:$0xff] }
 0x5dd   : > { %4690 = vmatmul.bf16.gmra.mxu2 %v16344_v23 }
 0x5de   : > { %v3365_v59 = vadd.f32 %v21574_v20, %v3141_v43  ;;  %v21580_v20 = vld [vmem:[#allocation91_spill] sm:$0xff] }
 0x5e0   : > { %v17436_v52 = vpop.f32.mrf.mxu2 }
 0x5e1   : > { %21561 = vst [vmem:[#allocation22_spill] sm:$0xff] %v17436_v52  ;;  %v3671_v61 = vpop.f32.mrf.mxu3  ;;  %v17439_v32 = vpop.f32.mrf.mxu0 }
 0x5e2   : > { %21563 = vst [vmem:[#allocation28_spill] sm:$0xff] %v17439_v32  ;;  %v17444_v45 = vadd.f32 %v3671_v61, %v3559_v62  ;;  %v17446_v0 = vpop.f32.mrf.mxu1  ;;  %v21570_v61 = vld [vmem:[#allocation78_spill] sm:$0xff] }
 0x5e3   : > { %21564 = vst [vmem:[#allocation206_spill] sm:$0xff] %v17446_v0  ;;  %v3560_v21 = vadd.f32 %v21570_v61, %v3364_v28  ;;  %v14046_v28 = vld [vmem:[%s21093_s6 + $0x398] sm:$0xff]  ;;  %v21577_v61 = vld [vmem:[#allocation32_spill] sm:$0xff]  ;;  %v21593_v0 = vld [vmem:[#allocation86_spill] sm:$0xff] }
 0x5e4   : > { %5501 = vmatmul.bf16.vlgmr.msra.gmra.mxu0 %v16182_v63  ;;  %v14047_v63 = vld [vmem:[%s21093_s6 + $0x3a0] sm:$0xff] }
 0x5e5   : > { %5158 = vmatpush.bf16.msrb.mxu1 %v14047_v63 }
 0x5e6   : > { %4327 = vmatmul.bf16.vlgmr.msra.gmra.mxu3 %v21567_v30  ;;  %v21575_v30 = vld [vmem:[#allocation107_spill] sm:$0xff] }
 0x5e8   : > { %v17457_v62 = vpop.f32.mrf.mxu2 }
 0x5e9   : > { %21569 = vst [vmem:[#allocation82_spill] sm:$0xff] %v17457_v62  ;;  %v3674_v32 = vpop.f32.mrf.mxu3  ;;  %v17460_v27 = vpop.f32.mrf.mxu0  ;;  %5159 = vmatpush.bf16.msrb.mxu1 %v14046_v28  ;;  %v2928_v28 = vadd.f32 %v17101_v16, %v21580_v20  ;;  %v14043_v16 = vld [vmem:[%s21093_s6 + $0x380] sm:$0xff] }
 0x5ea   : > { %21571 = vst [vmem:[#allocation119_spill] sm:$0xff] %v17460_v27  ;;  %v17465_v56 = vadd.f32 %v3674_v32, %v3560_v21  ;;  %v17467_v51 = vpop.f32.mrf.mxu1  ;;  %v3142_v32 = vadd.f32 %v21575_v30, %v2926_v44  ;;  %v3561_v21 = vadd.f32 %v21577_v61, %v3365_v59  ;;  %v21581_v44 = vld [vmem:[#allocation127_spill] sm:$0xff]  ;;  %v14044_v59 = vld [vmem:[%s21093_s6 + $0x388] sm:$0xff] }
 0x5eb   : > { %21572 = vst [vmem:[#allocation30_spill] sm:$0xff] %v17467_v51  ;;  %v21582_v61 = vld [vmem:[#allocation35_spill] sm:$0xff] }
 0x5ec   : > { %4534 = vmatmul.bf16.gmra.mxu1 %v16494_v48  ;;  %v3366_v30 = vadd.f32 %v21581_v44, %v3142_v32  ;;  %v21588_v44 = vld [vmem:[#allocation96_spill] sm:$0xff] }
 0x5ed   : > { %4695 = vmatmul.bf16.gmra.mxu2 %v16382_v53  ;;  %5160 = vmatpush.bf16.msrb.mxu1 %v14045_v22 }
 0x5ee   : > { %v3562_v22 = vadd.f32 %v21585_v35, %v3366_v30  ;;  %v21590_v35 = vld [vmem:[#allocation18_spill] sm:$0xff]  ;;  %v21591_v30 = vld [vmem:[#allocation112_spill] sm:$0xff] }
 0x5f0   : > { %v17478_v11 = vpop.f32.mrf.mxu2 }
 0x5f1   : > { %21576 = vst [vmem:[#allocation104_spill] sm:$0xff] %v17478_v11  ;;  %v3676_v63 = vpop.f32.mrf.mxu3  ;;  %v17481_v27 = vpop.f32.mrf.mxu0  ;;  %5161 = vmatpush.bf16.msrb.mxu1 %v14044_v59  ;;  %v2931_v59 = vadd.f32 %v17111_v38, %v21588_v44  ;;  %v21596_v38 = vld [vmem:[#allocation99_spill] sm:$0xff] }
 0x5f2   : > { %21578 = vst [vmem:[#allocation78_spill] sm:$0xff] %v17481_v27  ;;  %v17486_v43 = vadd.f32 %v3676_v63, %v3561_v21  ;;  %v17488_v54 = vpop.f32.mrf.mxu1  ;;  %v21583_v27 = vld [vmem:[#allocation109_spill] sm:$0xff]  ;;  %v2933_v44 = vadd.f32 %v17124_v26, %v21596_v38  ;;  %v21605_v38 = vld [vmem:[#allocation175_spill] sm:$0xff] }
 0x5f3   : > { %21579 = vst [vmem:[#allocation85_spill] sm:$0xff] %v17488_v54  ;;  %v3143_v21 = vadd.f32 %v21583_v27, %v2928_v28  ;;  %v21589_v27 = vld [vmem:[#allocation131_spill] sm:$0xff]  ;;  %v21604_v26 = vld [vmem:[#allocation101_spill] sm:$0xff] }
 0x5f4   : > { %5506 = vmatmul.bf16.gmra.mxu0 %v16230_v49  ;;  %v3144_v49 = vadd.f32 %v21591_v30, %v2931_v59  ;;  %v21599_v59 = vld [vmem:[#allocation115_spill] sm:$0xff] }
 0x5f5   : > { %5162 = vmatpush.bf16.msrb.mxu1 %v14043_v16  ;;  %v3367_v28 = vadd.f32 %v21589_v27, %v3143_v21  ;;  %v21597_v21 = vld [vmem:[#allocation134_spill] sm:$0xff]  ;;  %v3145_v30 = vadd.f32 %v21599_v59, %v2933_v44  ;;  %v14058_v44 = vld [vmem:[%s21093_s6 + $0x3f8] sm:$0xff] }
 0x5f6   : > { %4332 = vmatmul.bf16.gmra.mxu3 %v21582_v61  ;;  %v3368_v27 = vadd.f32 %v21597_v21, %v3144_v49  ;;  %v21606_v49 = vld [vmem:[#allocation137_spill] sm:$0xff]  ;;  %5317 = vmatpush.bf16.msrb.mxu2 %v14058_v44  ;;  %v21614_v44 = vld [vmem:[#allocation179_spill] sm:$0xff] }
 0x5f7   : > { %v3563_v18 = vadd.f32 %v21593_v0, %v3367_v28  ;;  %v21601_v0 = vld [vmem:[#allocation92_spill] sm:$0xff]  ;;  %v3369_v21 = vadd.f32 %v21606_v49, %v3145_v30  ;;  %v14057_v30 = vld [vmem:[%s21093_s6 + $0x3f0] sm:$0xff]  ;;  %v21613_v49 = vld [vmem:[#allocation31_spill] sm:$0xff] }
 0x5f8   : > { %v17499_v63 = vpop.f32.mrf.mxu2  ;;  %v3564_v28 = vadd.f32 %v21601_v0, %v3368_v27  ;;  %v21608_v27 = vld [vmem:[#allocation118_spill] sm:$0xff]  ;;  %v21610_v0 = vld [vmem:[#allocation97_spill] sm:$0xff] }
 0x5f9   : > { %21584 = vst [vmem:[#allocation123_spill] sm:$0xff] %v17499_v63  ;;  %v3679_v54 = vpop.f32.mrf.mxu3  ;;  %v17502_v51 = vpop.f32.mrf.mxu0 }
 0x5fa   : > { %21586 = vst [vmem:[#allocation107_spill] sm:$0xff] %v17502_v51  ;;  %v17507_v32 = vadd.f32 %v3679_v54, %v3562_v22  ;;  %v17509_v20 = vpop.f32.mrf.mxu1  ;;  %5318 = vmatpush.bf16.msrb.mxu2 %v14057_v30 }
 0x5fb   : > { %21587 = vst [vmem:[#allocation32_spill] sm:$0xff] %v17509_v20 }
 0x5fc   : > { %4539 = vmatmul.bf16.gmra.mxu1 %v21503_v40 }
 0x5fd   : > { %4700 = vmatmul.bf16.gmra.mxu2 %v21590_v35 }
 0x600   : > { %v17517_v51 = vpop.f32.mrf.mxu2 }
 0x601   : > { %21592 = vst [vmem:[#allocation91_spill] sm:$0xff] %v17517_v51  ;;  %v3681_v54 = vpop.f32.mrf.mxu3  ;;  %v17520_v22 = vpop.f32.mrf.mxu0 }
 0x602   : > { %21594 = vst [vmem:[#allocation127_spill] sm:$0xff] %v17520_v22  ;;  %v17522_v20 = vadd.f32 %v3681_v54, %v3563_v18  ;;  %v17524_v16 = vpop.f32.mrf.mxu1 }
 0x603   : > { %21595 = vst [vmem:[#allocation35_spill] sm:$0xff] %v17524_v16 }
 0x604   : > { %5511 = vmatmul.bf16.gmra.mxu0 %v16274_v19  ;;  %v2936_v19 = vadd.f32 %v21605_v38, %v21604_v26 }
 0x606   : > { %4337 = vmatmul.bf16.gmra.mxu3 %v21598_v58  ;;  %v3146_v59 = vadd.f32 %v21608_v27, %v2936_v19  ;;  %v21615_v19 = vld [vmem:[#allocation140_spill] sm:$0xff] }
 0x608   : > { %v17532_v51 = vpop.f32.mrf.mxu2  ;;  %v3370_v27 = vadd.f32 %v21615_v19, %v3146_v59  ;;  %v14055_v59 = vld [vmem:[%s21093_s6 + $0x3e0] sm:$0xff]  ;;  %v21622_v19 = vld [vmem:[#allocation105_spill] sm:$0xff] }
 0x609   : > { %21600 = vst [vmem:[#allocation109_spill] sm:$0xff] %v17532_v51  ;;  %v3684_v22 = vpop.f32.mrf.mxu3  ;;  %v17535_v18 = vpop.f32.mrf.mxu0  ;;  %v2938_v51 = vadd.f32 %v21614_v44, %v21613_v49 }
 0x60a   : > { %21602 = vst [vmem:[#allocation83_spill] sm:$0xff] %v17535_v18  ;;  %v17537_v54 = vadd.f32 %v3684_v22, %v3564_v28  ;;  %v17539_v16 = vpop.f32.mrf.mxu1  ;;  %v3565_v28 = vadd.f32 %v21610_v0, %v3369_v21  ;;  %v14056_v21 = vld [vmem:[%s21093_s6 + $0x3e8] sm:$0xff]  ;;  %v21616_v0 = vld [vmem:[#allocation42_spill] sm:$0xff] }
 0x60b   : > { %21603 = vst [vmem:[#allocation96_spill] sm:$0xff] %v17539_v16  ;;  %5319 = vmatpush.bf16.msrb.mxu2 %v14056_v21  ;;  %v21623_v21 = vld [vmem:[#allocation70_spill] sm:$0xff] }
 0x60c   : > { %4544 = vmatmul.bf16.gmra.mxu1 %v16608_v6 }
 0x60d   : > { %4705 = vmatmul.bf16.gmra.mxu2 %v21607_v13 }
 0x60f   : > { %5320 = vmatpush.bf16.msrb.mxu2 %v14055_v59 }
 0x610   : > { %v17550_v22 = vpop.f32.mrf.mxu2 }
 0x611   : > { %21609 = vst [vmem:[#allocation131_spill] sm:$0xff] %v17550_v22  ;;  %v3686_v18 = vpop.f32.mrf.mxu3  ;;  %v17553_v16 = vpop.f32.mrf.mxu0 }
 0x612   : > { %21611 = vst [vmem:[#allocation112_spill] sm:$0xff] %v17553_v16  ;;  %v17558_v26 = vadd.f32 %v3686_v18, %v3565_v28  ;;  %v17560_v38 = vpop.f32.mrf.mxu1  ;;  %v21617_v16 = vld [vmem:[#allocation122_spill] sm:$0xff] }
 0x613   : > { %21612 = vst [vmem:[#allocation86_spill] sm:$0xff] %v17560_v38  ;;  %v3147_v18 = vadd.f32 %v21617_v16, %v2938_v51  ;;  %v21619_v38 = vld [vmem:[#allocation100_spill] sm:$0xff] }
 0x614   : > { %5516 = vmatmul.bf16.gmra.mxu0 %v16312_v47  ;;  %v3566_v30 = vadd.f32 %v21619_v38, %v3370_v27  ;;  %v2941_v47 = vadd.f32 %v21623_v21, %v21622_v19  ;;  %v21624_v51 = vld [vmem:[#allocation144_spill] sm:$0xff]  ;;  %v21625_v38 = vld [vmem:[#allocation165_spill] sm:$0xff]  ;;  %v14054_v27 = vld [vmem:[%s21093_s6 + $0x3d8] sm:$0xff] }
 0x615   : > { %v3371_v16 = vadd.f32 %v21624_v51, %v3147_v18  ;;  %5321 = vmatpush.bf16.msrb.mxu2 %v14054_v27  ;;  %v21631_v21 = vld [vmem:[#allocation36_spill] sm:$0xff]  ;;  %v21634_v27 = vld [vmem:[#allocation130_spill] sm:$0xff] }
 0x616   : > { %4342 = vmatmul.bf16.gmra.mxu3 %v21616_v0  ;;  %v2943_v51 = vadd.f32 %v17193_v7, %v21631_v21 }
 0x618   : > { %v17571_v28 = vpop.f32.mrf.mxu2 }
 0x619   : > { %21618 = vst [vmem:[#allocation99_spill] sm:$0xff] %v17571_v28  ;;  %v3689_v22 = vpop.f32.mrf.mxu3  ;;  %v17574_v63 = vpop.f32.mrf.mxu0 }
 0x61a   : > { %21620 = vst [vmem:[#allocation134_spill] sm:$0xff] %v17574_v63  ;;  %v17579_v49 = vadd.f32 %v3689_v22, %v3566_v30  ;;  %v17581_v44 = vpop.f32.mrf.mxu1  ;;  %v21626_v63 = vld [vmem:[#allocation126_spill] sm:$0xff] }
 0x61b   : > { %21621 = vst [vmem:[#allocation115_spill] sm:$0xff] %v17581_v44  ;;  %v3148_v22 = vadd.f32 %v21626_v63, %v2941_v47  ;;  %v21628_v44 = vld [vmem:[#allocation102_spill] sm:$0xff]  ;;  %v21632_v47 = vld [vmem:[#allocation147_spill] sm:$0xff] }
 0x61c   : > { %5163 = vmatmul.bf16.vlgmr.msrb.gmra.mxu1 %v21582_v61  ;;  %v3567_v59 = vadd.f32 %v21628_v44, %v3371_v16  ;;  %v14053_v61 = vld [vmem:[%s21093_s6 + $0x3d0] sm:$0xff]  ;;  %v14052_v44 = vld [vmem:[%s21093_s6 + $0x3c8] sm:$0xff] }
 0x61d   : > { %4710 = vmatmul.bf16.gmra.mxu2 %v21625_v38  ;;  %v3372_v63 = vadd.f32 %v21632_v47, %v3148_v22  ;;  %v21633_v16 = vld [vmem:[#allocation45_spill] sm:$0xff]  ;;  %v14051_v22 = vld [vmem:[%s21093_s6 + $0x3c0] sm:$0xff] }
 0x61e   : > { %5322 = vmatpush.bf16.msrb.mxu2 %v14053_v61 }
 0x620   : > { %v17592_v30 = vpop.f32.mrf.mxu2 }
 0x621   : > { %21627 = vst [vmem:[#allocation92_spill] sm:$0xff] %v17592_v30  ;;  %v3691_v28 = vpop.f32.mrf.mxu3  ;;  %v17595_v11 = vpop.f32.mrf.mxu0 }
 0x622   : > { %21629 = vst [vmem:[#allocation101_spill] sm:$0xff] %v17595_v11  ;;  %v17600_v18 = vadd.f32 %v3691_v28, %v3567_v59  ;;  %v17602_v19 = vpop.f32.mrf.mxu1  ;;  %5323 = vmatpush.bf16.msrb.mxu2 %v14052_v44  ;;  %v3149_v28 = vadd.f32 %v21634_v27, %v2943_v51  ;;  %v21636_v11 = vld [vmem:[#allocation103_spill] sm:$0xff]  ;;  %v21640_v51 = vld [vmem:[#allocation110_spill] sm:$0xff] }
 0x623   : > { %21630 = vst [vmem:[#allocation175_spill] sm:$0xff] %v17602_v19  ;;  %v3568_v61 = vadd.f32 %v21636_v11, %v3372_v63  ;;  %v21637_v19 = vshll.u32 %v16608_v6, 16  ;;  %v2946_v44 = vadd.f32 %v17204_v15, %v21640_v51  ;;  %v21641_v27 = vld [vmem:[#allocation75_spill] sm:$0xff] }
 0x624   : > { %5521 = vmatmul.bf16.gmra.mxu0 %v16344_v23 }
 0x625   : > { %v4597_v7 = vrot.slane %v21637_v19, 1  ;;  %v21643_v19 = vld [vmem:[#allocation150_spill] sm:$0xff] }
 0x626   : > { %4347 = vmatmul.bf16.gmra.mxu3 %v21633_v16  ;;  %5324 = vmatpush.bf16.msrb.mxu2 %v14051_v22  ;;  %v3373_v63 = vadd.f32 %v21643_v19, %v3149_v28  ;;  %v21650_v28 = vld [vmem:[#allocation153_spill] sm:$0xff] }
 0x627   : > { %v17631_v11 = vsel %vm2601_vm3, %v21641_v27, %v4597_v7  ;;  %v21649_v27 = vld [vmem:[#allocation113_spill] sm:$0xff] }
 0x628   : > { %v17613_v59 = vpop.f32.mrf.mxu2  ;;  %21642 = vst [vmem:[#allocation31_spill] sm:$0xff] %v17631_v11 }
 0x629   : > { %21635 = vst [vmem:[#allocation137_spill] sm:$0xff] %v17613_v59  ;;  %v3694_v21 = vpop.f32.mrf.mxu3  ;;  %v17618_v23 = vpop.f32.mrf.mxu0 }
 0x62a   : > { %21638 = vst [vmem:[#allocation118_spill] sm:$0xff] %v17618_v23  ;;  %v17623_v47 = vadd.f32 %v3694_v21, %v3568_v61  ;;  %v17625_v30 = vpop.f32.mrf.mxu1  ;;  %v21644_v23 = vld [vmem:[#allocation133_spill] sm:$0xff]  ;;  %v21646_v21 = vld [vmem:[#allocation106_spill] sm:$0xff] }
 0x62b   : > { %21639 = vst [vmem:[#allocation97_spill] sm:$0xff] %v17625_v30  ;;  %v3150_v59 = vadd.f32 %v21644_v23, %v2946_v44  ;;  %v3569_v30 = vadd.f32 %v21646_v21, %v3373_v63  ;;  %v21652_v23 = vld [vmem:[#allocation136_spill] sm:$0xff] }
 0x62c   : > { %5168 = vmatmul.bf16.gmra.mxu1 %v21598_v58  ;;  %v2948_v58 = vadd.f32 %v17215_v9, %v21649_v27  ;;  %v21654_v63 = vld [vmem:[#allocation108_spill] sm:$0xff] }
 0x62d   : > { %4715 = vmatmul.bf16.gmra.mxu2 %v17631_v11  ;;  %v3374_v19 = vadd.f32 %v21650_v28, %v3150_v59  ;;  %v21658_v59 = vshrl.u32 %v16608_v6, 16  ;;  %v21659_v28 = vld [vmem:[#allocation116_spill] sm:$0xff] }
 0x62e   : > { %v3151_v44 = vadd.f32 %v21652_v23, %v2948_v58  ;;  %v2951_v58 = vadd.f32 %v17225_v8, %v21659_v28  ;;  %v21660_v23 = vld [vmem:[#allocation156_spill] sm:$0xff] }
 0x62f   : > { %v3570_v21 = vadd.f32 %v21654_v63, %v3374_v19  ;;  %v17665_v27 = vor.u32 %v21658_v59, %v4597_v7  ;;  %v21666_v28 = vld [vmem:[#allocation120_spill] sm:$0xff] }
 0x630   : > { %v17637_v61 = vpop.f32.mrf.mxu2  ;;  %v3375_v63 = vadd.f32 %v21660_v23, %v3151_v44  ;;  %v21667_v44 = vld [vmem:[#allocation159_spill] sm:$0xff]  ;;  %v21668_v23 = vld [vmem:[#allocation52_spill] sm:$0xff] }
 0x631   : > { %21645 = vst [vmem:[#allocation179_spill] sm:$0xff] %v17637_v61  ;;  %v3696_v22 = vpop.f32.mrf.mxu3  ;;  %v17640_v62 = vpop.f32.mrf.mxu0 }
 0x632   : > { %21647 = vst [vmem:[#allocation140_spill] sm:$0xff] %v17640_v62  ;;  %v17642_v15 = vadd.f32 %v3696_v22, %v3569_v30  ;;  %v17644_v51 = vpop.f32.mrf.mxu1  ;;  %v21655_v30 = vshll.u32 %v16637_v39, 16 }
 0x633   : > { %21648 = vst [vmem:[#allocation42_spill] sm:$0xff] %v17644_v51 }
 0x634   : > { %5526 = vmatmul.bf16.gmra.mxu0 %v16382_v53  ;;  %v4605_v22 = vrot.slane %v21655_v30, 1  ;;  %v21661_v30 = vld [vmem:[#allocation139_spill] sm:$0xff] }
 0x635   : > { %v21663_v53 = vld [vmem:[#allocation111_spill] sm:$0xff] }
 0x636   : > { %4352 = vmatmul.bf16.gmra.mxu3 %v21651_v36  ;;  %v4606_v19 = vsel %vm2601_vm3, %v17665_v27, %v4605_v22  ;;  %v2953_v22 = vadd.f32 %v17235_v41, %v21666_v28  ;;  %v21674_v41 = vld [vmem:[#allocation124_spill] sm:$0xff] }
 0x637   : > { %v2956_v28 = vadd.f32 %v17245_v5, %v21674_v41  ;;  %v21682_v5 = vld [vmem:[#allocation128_spill] sm:$0xff] }
 0x638   : > { %v17652_v61 = vpop.f32.mrf.mxu2  ;;  %v2958_v41 = vadd.f32 %v17258_v57, %v21682_v5  ;;  %v21690_v57 = vld [vmem:[#allocation169_spill] sm:$0xff] }
 0x639   : > { %21653 = vst [vmem:[#allocation122_spill] sm:$0xff] %v17652_v61  ;;  %v3699_v62 = vpop.f32.mrf.mxu3  ;;  %v17657_v51 = vpop.f32.mrf.mxu0 }
 0x63a   : > { %21656 = vst [vmem:[#allocation100_spill] sm:$0xff] %v17657_v51  ;;  %v17659_v52 = vadd.f32 %v3699_v62, %v3570_v21  ;;  %v17661_v9 = vpop.f32.mrf.mxu1  ;;  %v3152_v62 = vadd.f32 %v21661_v30, %v2951_v58  ;;  %v3571_v51 = vadd.f32 %v21663_v53, %v3375_v63  ;;  %v21669_v58 = vld [vmem:[#allocation142_spill] sm:$0xff] }
 0x63b   : > { %21657 = vst [vmem:[#allocation105_spill] sm:$0xff] %v17661_v9  ;;  %v3153_v30 = vadd.f32 %v21669_v58, %v2953_v22  ;;  %v21671_v53 = vld [vmem:[#allocation114_spill] sm:$0xff] }
 0x63c   : > { %5173 = vmatmul.bf16.gmra.mxu1 %v21616_v0  ;;  %v21677_v22 = vld [vmem:[#allocation146_spill] sm:$0xff] }
 0x63d   : > { %4720 = vmatmul.bf16.gmra.mxu2 %v4606_v19  ;;  %v3376_v19 = vadd.f32 %v21667_v44, %v3152_v62  ;;  %v21675_v62 = vld [vmem:[#allocation162_spill] sm:$0xff]  ;;  %v3154_v58 = vadd.f32 %v21677_v22, %v2956_v28  ;;  %v21685_v28 = vld [vmem:[#allocation149_spill] sm:$0xff] }
 0x63e   : > { %v3377_v44 = vadd.f32 %v21675_v62, %v3153_v30  ;;  %v21683_v30 = vld [vmem:[#allocation166_spill] sm:$0xff]  ;;  %v21684_v62 = vld [vmem:[#allocation57_spill] sm:$0xff]  ;;  %v3155_v22 = vadd.f32 %v21685_v28, %v2958_v41 }
 0x63f   : > { %v3572_v63 = vadd.f32 %v21671_v53, %v3376_v19  ;;  %v21679_v19 = vld [vmem:[#allocation117_spill] sm:$0xff] }
 0x640   : > { %v17674_v21 = vpop.f32.mrf.mxu2  ;;  %v3573_v53 = vadd.f32 %v21679_v19, %v3377_v44  ;;  %v21687_v44 = vld [vmem:[#allocation121_spill] sm:$0xff]  ;;  %v3379_v5 = vadd.f32 %v21690_v57, %v3155_v22  ;;  %v14098_v57 = vld [vmem:[%s21093_s6 + $0x538] sm:$0xff] }
 0x641   : > { %21662 = vst [vmem:[#allocation70_spill] sm:$0xff] %v17674_v21  ;;  %v3701_v9 = vpop.f32.mrf.mxu3  ;;  %v17677_v7 = vpop.f32.mrf.mxu0  ;;  %6153 = vmatpush.bf16.msrb.mxu0 %v14098_v57 }
 0x642   : > { %21664 = vst [vmem:[#allocation144_spill] sm:$0xff] %v17677_v7  ;;  %v17679_v59 = vadd.f32 %v3701_v9, %v3571_v51  ;;  %v17681_v8 = vpop.f32.mrf.mxu1 }
 0x643   : > { %21665 = vst [vmem:[#allocation126_spill] sm:$0xff] %v17681_v8 }
 0x644   : > { %5531 = vmatmul.bf16.gmra.mxu0 %v21590_v35  ;;  %v21676_v35 = vld [vmem:[#allocation33_spill] sm:$0xff] }
 0x646   : > { %4357 = vmatmul.bf16.gmra.mxu3 %v21668_v23 }
 0x648   : > { %v17689_v21 = vpop.f32.mrf.mxu2 }
 0x649   : > { %21670 = vst [vmem:[#allocation102_spill] sm:$0xff] %v17689_v21  ;;  %v3704_v7 = vpop.f32.mrf.mxu3  ;;  %v17692_v51 = vpop.f32.mrf.mxu0 }
 0x64a   : > { %21672 = vst [vmem:[#allocation36_spill] sm:$0xff] %v17692_v51  ;;  %v17694_v9 = vadd.f32 %v3704_v7, %v3572_v63  ;;  %v17696_v8 = vpop.f32.mrf.mxu1 }
 0x64b   : > { %21673 = vst [vmem:[#allocation147_spill] sm:$0xff] %v17696_v8 }
 0x64c   : > { %5178 = vmatmul.bf16.gmra.mxu1 %v21633_v16 }
 0x64d   : > { %5325 = vmatmul.bf16.vlgmr.msrb.gmra.mxu2 %v21676_v35  ;;  %v3378_v35 = vadd.f32 %v21683_v30, %v3154_v58  ;;  %v21691_v58 = vld [vmem:[#allocation38_spill] sm:$0xff]  ;;  %v21692_v30 = vld [vmem:[#allocation152_spill] sm:$0xff] }
 0x64e   : > { %v3890_v41 = vadd.f32 %v21692_v30, %v17284_v34  ;;  %v21698_v34 = vld [vmem:[#allocation14_spill] sm:$0xff] }
 0x64f   : > { %v3574_v19 = vadd.f32 %v21687_v44, %v3378_v35 }
 0x650   : > { %v17704_v21 = vpop.f32.mrf.mxu2 }
 0x651   : > { %21678 = vst [vmem:[#allocation45_spill] sm:$0xff] %v17704_v21  ;;  %v3706_v51 = vpop.f32.mrf.mxu3  ;;  %v17707_v7 = vpop.f32.mrf.mxu0 }
 0x652   : > { %21680 = vst [vmem:[#allocation130_spill] sm:$0xff] %v17707_v7  ;;  %v17709_v63 = vadd.f32 %v3706_v51, %v3573_v53  ;;  %v17711_v8 = vpop.f32.mrf.mxu1 }
 0x653   : > { %21681 = vst [vmem:[#allocation103_spill] sm:$0xff] %v17711_v8 }
 0x654   : > { %5536 = vmatmul.bf16.gmra.mxu0 %v21607_v13  ;;  %v21694_v13 = vld [vmem:[#allocation125_spill] sm:$0xff] }
 0x655   : > { %v3575_v35 = vadd.f32 %v21694_v13, %v3379_v5  ;;  %v14042_v13 = vld [vmem:[%s21093_s6 + $0x378] sm:$0xff] }
 0x656   : > { %4362 = vmatmul.bf16.gmra.mxu3 %v21684_v62  ;;  %v21699_v5 = vld [vmem:[#allocation155_spill] sm:$0xff] }
 0x657   : > { %v3891_v30 = vadd.f32 %v21699_v5, %v17311_v50  ;;  %4991 = vmatpush.bf16.msrb.mxu3 %v14042_v13  ;;  %v14041_v50 = vld [vmem:[%s21093_s6 + $0x370] sm:$0xff]  ;;  %v14096_v5 = vld [vmem:[%s21093_s6 + $0x528] sm:$0xff] }
 0x658   : > { %v17719_v21 = vpop.f32.mrf.mxu2 }
 0x659   : > { %21686 = vst [vmem:[#allocation110_spill] sm:$0xff] %v17719_v21  ;;  %v3709_v7 = vpop.f32.mrf.mxu3  ;;  %v17722_v51 = vpop.f32.mrf.mxu0 }
 0x65a   : > { %21688 = vst [vmem:[#allocation75_spill] sm:$0xff] %v17722_v51  ;;  %v17724_v53 = vadd.f32 %v3709_v7, %v3574_v19  ;;  %v17726_v8 = vpop.f32.mrf.mxu1  ;;  %v21697_v51 = vld [vmem:[#allocation76_spill] sm:$0xff] }
 0x65b   : > { %21689 = vst [vmem:[#allocation150_spill] sm:$0xff] %v17726_v8  ;;  %v4054_v22 = vadd.f32 %v21697_v51, %v3890_v41  ;;  %v14097_v51 = vld [vmem:[%s21093_s6 + $0x530] sm:$0xff]  ;;  %4992 = vmatpush.bf16.msrb.mxu3 %v14041_v50 }
 0x65c   : > { %5183 = vmatmul.bf16.gmra.mxu1 %v21651_v36  ;;  %6154 = vmatpush.bf16.msrb.mxu0 %v14097_v51  ;;  %v21706_v51 = vld [vmem:[#allocation158_spill] sm:$0xff] }
 0x65d   : > { %5330 = vmatmul.bf16.gmra.mxu2 %v21691_v58 }
 0x660   : > { %v17733_v28 = vpop.f32.mrf.mxu2  ;;  %6155 = vmatpush.bf16.msrb.mxu0 %v14096_v5  ;;  %v14094_v5 = vld [vmem:[%s21093_s6 + $0x518] sm:$0xff] }
 0x661   : > { %21693 = vst [vmem:[#allocation133_spill] sm:$0xff] %v17733_v28  ;;  %v3711_v44 = vpop.f32.mrf.mxu3  ;;  %v17736_v21 = vpop.f32.mrf.mxu0 }
 0x662   : > { %21695 = vst [vmem:[#allocation106_spill] sm:$0xff] %v17736_v21  ;;  %v17738_v7 = vadd.f32 %v3711_v44, %v3575_v35  ;;  %v17740_v19 = vpop.f32.mrf.mxu1  ;;  %v21701_v44 = vld [vmem:[#allocation129_spill] sm:$0xff] }
 0x663   : > { %21696 = vst [vmem:[#allocation113_spill] sm:$0xff] %v17740_v19 }
 0x664   : > { %5541 = vmatmul.bf16.gmra.mxu0 %v21625_v38  ;;  %v4224_v38 = vadd.f32 %v21701_v44, %v4054_v22  ;;  %v21704_v22 = vld [vmem:[#allocation174_spill] sm:$0xff]  ;;  %v21705_v44 = vld [vmem:[#allocation41_spill] sm:$0xff] }
 0x665   : > { %v4055_v13 = vadd.f32 %v21704_v22, %v3891_v30  ;;  %v14095_v30 = vld [vmem:[%s21093_s6 + $0x520] sm:$0xff] }
 0x666   : > { %4367 = vmatmul.bf16.gmra.mxu3 %v21698_v34  ;;  %6156 = vmatpush.bf16.msrb.mxu0 %v14095_v30 }
 0x668   : > { %v17753_v35 = vpop.f32.mrf.mxu2 }
 0x669   : > { %21700 = vst [vmem:[#allocation153_spill] sm:$0xff] %v17753_v35  ;;  %v4328_v41 = vpop.f32.mrf.mxu3  ;;  %v17759_v21 = vpop.f32.mrf.mxu0 }
 0x66a   : > { %21702 = vst [vmem:[#allocation48_spill] sm:$0xff] %v17759_v21  ;;  %v17761_v57 = vadd.f32 %v4328_v41, %v4224_v38  ;;  %v17763_v19 = vpop.f32.mrf.mxu1  ;;  %v14040_v38 = vld [vmem:[%s21093_s6 + $0x368] sm:$0xff]  ;;  %v3892_v41 = vadd.f32 %v21706_v51, %v17338_v29  ;;  %v14039_v29 = vld [vmem:[%s21093_s6 + $0x360] sm:$0xff]  ;;  %6157 = vmatpush.bf16.msrb.mxu0 %v14094_v5 }
 0x66b   : > { %21703 = vst [vmem:[#allocation136_spill] sm:$0xff] %v17763_v19  ;;  %v21708_v19 = vld [vmem:[#allocation132_spill] sm:$0xff]  ;;  %4993 = vmatpush.bf16.msrb.mxu3 %v14040_v38  ;;  %v21712_v38 = vld [vmem:[#allocation15_spill] sm:$0xff]  ;;  %v21713_v51 = vld [vmem:[#allocation161_spill] sm:$0xff] }
 0x66c   : > { %5188 = vmatmul.bf16.gmra.mxu1 %v21668_v23  ;;  %v4225_v8 = vadd.f32 %v21708_v19, %v4055_v13  ;;  %v21711_v19 = vld [vmem:[#allocation178_spill] sm:$0xff]  ;;  %v3893_v30 = vadd.f32 %v21713_v51, %v17368_v25  ;;  %v21719_v51 = vld [vmem:[#allocation164_spill] sm:$0xff] }
 0x66d   : > { %5335 = vmatmul.bf16.gmra.mxu2 %v21705_v44  ;;  %v4056_v13 = vadd.f32 %v21711_v19, %v3892_v41  ;;  %v14093_v41 = vld [vmem:[%s21093_s6 + $0x510] sm:$0xff] }
 0x66e   : > { %6158 = vmatpush.bf16.msrb.mxu0 %v14093_v41  ;;  %v14037_v25 = vld [vmem:[%s21093_s6 + $0x350] sm:$0xff]  ;;  %v3894_v41 = vadd.f32 %v21719_v51, %v17391_v31  ;;  %v14035_v31 = vld [vmem:[%s21093_s6 + $0x340] sm:$0xff] }
 0x66f   : > { %4994 = vmatpush.bf16.msrb.mxu3 %v14039_v29 }
 0x670   : > { %v17779_v21 = vpop.f32.mrf.mxu2 }
 0x671   : > { %21707 = vst [vmem:[#allocation108_spill] sm:$0xff] %v17779_v21  ;;  %v4330_v50 = vpop.f32.mrf.mxu3  ;;  %v17785_v22 = vpop.f32.mrf.mxu0 }
 0x672   : > { %21709 = vst [vmem:[#allocation116_spill] sm:$0xff] %v17785_v22  ;;  %v17787_v35 = vadd.f32 %v4330_v50, %v4225_v8  ;;  %v17789_v28 = vpop.f32.mrf.mxu1  ;;  %v14038_v8 = vld [vmem:[%s21093_s6 + $0x358] sm:$0xff] }
 0x673   : > { %21710 = vst [vmem:[#allocation156_spill] sm:$0xff] %v17789_v28  ;;  %4995 = vmatpush.bf16.msrb.mxu3 %v14038_v8  ;;  %v14092_v8 = vld [vmem:[%s21093_s6 + $0x508] sm:$0xff] }
 0x674   : > { %5546 = vmatmul.bf16.gmra.mxu0 %v17631_v11  ;;  %v21715_v11 = vld [vmem:[#allocation135_spill] sm:$0xff] }
 0x675   : > { %v4226_v22 = vadd.f32 %v21715_v11, %v4056_v13  ;;  %v21718_v11 = vld [vmem:[#allocation182_spill] sm:$0xff]  ;;  %6159 = vmatpush.bf16.msrb.mxu0 %v14092_v8 }
 0x676   : > { %4372 = vmatmul.bf16.gmra.mxu3 %v21712_v38  ;;  %v4057_v13 = vadd.f32 %v21718_v11, %v3893_v30  ;;  %v14091_v30 = vld [vmem:[%s21093_s6 + $0x500] sm:$0xff] }
 0x677   : > { %4996 = vmatpush.bf16.msrb.mxu3 %v14037_v25 }
 0x678   : > { %v17805_v50 = vpop.f32.mrf.mxu2 }
 0x679   : > { %21714 = vst [vmem:[#allocation139_spill] sm:$0xff] %v17805_v50  ;;  %v4333_v29 = vpop.f32.mrf.mxu3  ;;  %v17811_v19 = vpop.f32.mrf.mxu0  ;;  %v17840_v50 = vrot.slane %v21503_v40, 2  ;;  %6160 = vmatpush.bf16.msrb.mxu0 %v14091_v30  ;;  %v21728_v30 = vld [vmem:[#allocation168_spill] sm:$0xff] }
 0x67a   : > { %21716 = vst [vmem:[#allocation111_spill] sm:$0xff] %v17811_v19  ;;  %v17813_v5 = vadd.f32 %v4333_v29, %v4226_v22  ;;  %v17815_v28 = vpop.f32.mrf.mxu1  ;;  %v14036_v22 = vld [vmem:[%s21093_s6 + $0x348] sm:$0xff]  ;;  %v21721_v19 = vld [vmem:[#allocation138_spill] sm:$0xff] }
 0x67b   : > { %21717 = vst [vmem:[#allocation120_spill] sm:$0xff] %v17815_v28  ;;  %v4227_v28 = vadd.f32 %v21721_v19, %v4057_v13  ;;  %4997 = vmatpush.bf16.msrb.mxu3 %v14036_v22  ;;  %v21724_v19 = vld [vmem:[#allocation90_spill] sm:$0xff] }
 0x67c   : > { %5193 = vmatmul.bf16.gmra.mxu1 %v21684_v62  ;;  %v17852_v13 = vsel %vm2601_vm3, %v17665_v27, %v21724_v19  ;;  %v21726_v22 = vld [vmem:[#allocation186_spill] sm:$0xff] }
 0x67d   : > { %5340 = vmatmul.bf16.gmra.mxu2 %v16257_v1  ;;  %21725 = vst [vmem:[#allocation124_spill] sm:$0xff] %v17852_v13  ;;  %v4058_v51 = vadd.f32 %v21726_v22, %v3894_v41 }
 0x67f   : > { %4998 = vmatpush.bf16.msrb.mxu3 %v14035_v31  ;;  %v21734_v31 = vld [vmem:[#allocation189_spill] sm:$0xff] }
 0x680   : > { %v17831_v29 = vpop.f32.mrf.mxu2 }
 0x681   : > { %21720 = vst [vmem:[#allocation159_spill] sm:$0xff] %v17831_v29  ;;  %v4335_v25 = vpop.f32.mrf.mxu3  ;;  %v17837_v11 = vpop.f32.mrf.mxu0  ;;  %v21730_v29 = vld [vmem:[#allocation141_spill] sm:$0xff] }
 0x682   : > { %21722 = vst [vmem:[#allocation142_spill] sm:$0xff] %v17837_v11  ;;  %v17842_v21 = vadd.f32 %v4335_v25, %v4227_v28  ;;  %v17844_v8 = vpop.f32.mrf.mxu1  ;;  %v21727_v28 = vld [vmem:[#allocation66_spill] sm:$0xff]  ;;  %v3895_v11 = vadd.f32 %v21728_v30, %v17407_v37  ;;  %v4228_v27 = vadd.f32 %v21730_v29, %v4058_v51  ;;  %v21737_v30 = vld [vmem:[#allocation171_spill] sm:$0xff]  ;;  %v21738_v51 = vld [vmem:[#allocation145_spill] sm:$0xff] }
 0x683   : > { %21723 = vst [vmem:[#allocation114_spill] sm:$0xff] %v17844_v8  ;;  %v17859_v25 = vsel %vm3397_vm2, %v21727_v28, %v17840_v50  ;;  %v21735_v28 = vld [vmem:[#allocation23_spill] sm:$0xff] }
 0x684   : > { %5551 = vmatmul.bf16.gmra.mxu0 %v17852_v13  ;;  %v4059_v22 = vadd.f32 %v21734_v31, %v3895_v11  ;;  %v21736_v23 = vshll.u32 %v21735_v28, 16  ;;  %v21742_v31 = vld [vmem:[#allocation93_spill] sm:$0xff] }
 0x686   : > { %4377 = vmatmul.bf16.gmra.mxu3 %v17859_v25  ;;  %v5441_v37 = vrot.slane %v21736_v23, 1  ;;  %v21743_v23 = vld [vmem:[#allocation192_spill] sm:$0xff] }
 0x688   : > { %v17864_v8 = vpop.f32.mrf.mxu2  ;;  %v5442_v28 = vsel %vm2601_vm3, %v21742_v31, %v5441_v37 }
 0x689   : > { %21729 = vst [vmem:[#allocation162_spill] sm:$0xff] %v17864_v8  ;;  %v4338_v19 = vpop.f32.mrf.mxu3  ;;  %v17867_v62 = vpop.f32.mrf.mxu0  ;;  %v3896_v8 = vadd.f32 %v21737_v30, %v17423_v60 }
 0x68a   : > { %21731 = vst [vmem:[#allocation33_spill] sm:$0xff] %v17867_v62  ;;  %v17869_v13 = vadd.f32 %v4338_v19, %v4228_v27  ;;  %v17871_v41 = vpop.f32.mrf.mxu1  ;;  %v4229_v62 = vadd.f32 %v21738_v51, %v4059_v22  ;;  %v21744_v22 = vld [vmem:[#allocation173_spill] sm:$0xff] }
 0x68b   : > { %21733 = vst [vmem:[#allocation117_spill] sm:$0xff] %v17871_v41  ;;  %v21740_v41 = vld [vmem:[#allocation16_spill] sm:$0xff]  ;;  %v3897_v30 = vadd.f32 %v21744_v22, %v17444_v45  ;;  %v14082_v45 = vld [vmem:[%s21093_s6 + $0x4b8] sm:$0xff] }
 0x68c   : > { %21732 = vst [vmem:[#allocation146_spill] sm:$0xff] %v17869_v13  ;;  %5198 = vmatmul.bf16.gmra.mxu1 %v21698_v34  ;;  %v4267_v61 = vrot.slane %v21740_v41, 2  ;;  %v4060_v13 = vadd.f32 %v21743_v23, %v3896_v8  ;;  %v21745_v41 = vld [vmem:[#allocation148_spill] sm:$0xff]  ;;  %v21748_v8 = vld [vmem:[#allocation195_spill] sm:$0xff] }
 0x68d   : > { %5345 = vmatmul.bf16.gmra.mxu2 %v16295_v46  ;;  %5827 = vmatpush.bf16.msra.mxu1 %v14082_v45  ;;  %v21750_v23 = vld [vmem:[#allocation151_spill] sm:$0xff]  ;;  %v21754_v45 = vld [vmem:[#allocation37_spill] sm:$0xff] }
 0x68e   : > { %v4268_v60 = vsel %vm3397_vm2, %v17840_v50, %v4267_v61  ;;  %v21749_v61 = vld [vmem:[#allocation177_spill] sm:$0xff] }
 0x690   : > { %v17880_v29 = vpop.f32.mrf.mxu2 }
 0x691   : > { %v4340_v27 = vpop.f32.mrf.mxu3  ;;  %v17883_v19 = vpop.f32.mrf.mxu0 }
 0x692   : > { %21739 = vst [vmem:[#allocation128_spill] sm:$0xff] %v17883_v19  ;;  %v17886_v34 = vadd.f32 %v4340_v27, %v4229_v62  ;;  %v17888_v11 = vpop.f32.mrf.mxu1  ;;  %v4230_v62 = vadd.f32 %v21745_v41, %v4060_v13  ;;  %v3898_v13 = vadd.f32 %v21749_v61, %v17465_v56  ;;  %v21755_v61 = vld [vmem:[#allocation181_spill] sm:$0xff] }
 0x693   : > { %21741 = vst [vmem:[#allocation166_spill] sm:$0xff] %v17888_v11 }
 0x694   : > { %5556 = vmatmul.bf16.gmra.mxu0 %v5442_v28  ;;  %v4061_v28 = vadd.f32 %v21748_v8, %v3897_v30  ;;  %v14081_v30 = vld [vmem:[%s21093_s6 + $0x4b0] sm:$0xff] }
 0x695   : > { %5828 = vmatpush.bf16.msra.mxu1 %v14081_v30  ;;  %v21753_v8 = vld [vmem:[#allocation198_spill] sm:$0xff] }
 0x696   : > { %4382 = vmatmul.bf16.gmra.mxu3 %v4268_v60  ;;  %v4231_v60 = vadd.f32 %v21750_v23, %v4061_v28  ;;  %v4062_v56 = vadd.f32 %v21753_v8, %v3898_v13  ;;  %v14080_v28 = vld [vmem:[%s21093_s6 + $0x4a8] sm:$0xff]  ;;  %v3899_v23 = vadd.f32 %v21755_v61, %v17486_v43 }
 0x698   : > { %v17897_v51 = vpop.f32.mrf.mxu2 }
 0x699   : > { %v4343_v27 = vpop.f32.mrf.mxu3  ;;  %v17900_v19 = vpop.f32.mrf.mxu0  ;;  %5829 = vmatpush.bf16.msra.mxu1 %v14080_v28  ;;  %v21759_v28 = vld [vmem:[#allocation201_spill] sm:$0xff] }
 0x69a   : > { %21746 = vst [vmem:[#allocation149_spill] sm:$0xff] %v17900_v19  ;;  %v17902_v11 = vadd.f32 %v4343_v27, %v4230_v62  ;;  %v17904_v37 = vpop.f32.mrf.mxu1  ;;  %v4063_v43 = vadd.f32 %v21759_v28, %v3899_v23  ;;  %v14077_v23 = vld [vmem:[%s21093_s6 + $0x490] sm:$0xff] }
 0x69b   : > { %21747 = vst [vmem:[#allocation121_spill] sm:$0xff] %v17904_v37 }
 0x69c   : > { %5203 = vmatmul.bf16.gmra.mxu1 %v21712_v38 }
 0x69d   : > { %5350 = vmatmul.bf16.gmra.mxu2 %v16327_v33 }
 0x6a0   : > { %v17914_v31 = vpop.f32.mrf.mxu2 }
 0x6a1   : > { %v4345_v22 = vpop.f32.mrf.mxu3  ;;  %v17917_v41 = vpop.f32.mrf.mxu0 }
 0x6a2   : > { %21751 = vst [vmem:[#allocation169_spill] sm:$0xff] %v17917_v41  ;;  %v17922_v62 = vadd.f32 %v4345_v22, %v4231_v60  ;;  %v17924_v27 = vpop.f32.mrf.mxu1  ;;  %v21756_v60 = vld [vmem:[#allocation154_spill] sm:$0xff] }
 0x6a3   : > { %21752 = vst [vmem:[#allocation38_spill] sm:$0xff] %v17924_v27  ;;  %v4232_v22 = vadd.f32 %v21756_v60, %v4062_v56  ;;  %v14078_v56 = vld [vmem:[%s21093_s6 + $0x498] sm:$0xff] }
 0x6a4   : > { %6161 = vmatmul.bf16.vlgmr.msrb.gmra.mxu0 %v21691_v58  ;;  %v14079_v58 = vld [vmem:[%s21093_s6 + $0x4a0] sm:$0xff] }
 0x6a5   : > { %5830 = vmatpush.bf16.msra.mxu1 %v14079_v58 }
 0x6a6   : > { %4999 = vmatmul.bf16.vlgmr.msrb.gmra.mxu3 %v21754_v45  ;;  %v21760_v45 = vld [vmem:[#allocation184_spill] sm:$0xff] }
 0x6a7   : > { %v3900_v61 = vadd.f32 %v21760_v45, %v17507_v32  ;;  %v17973_v45 = vrot.slane %v16608_v6, 2 }
 0x6a8   : > { %v17934_v41 = vpop.f32.mrf.mxu2 }
 0x6a9   : > { %v4348_v19 = vpop.f32.mrf.mxu3  ;;  %v17937_v30 = vpop.f32.mrf.mxu0  ;;  %5831 = vmatpush.bf16.msra.mxu1 %v14078_v56  ;;  %v4064_v32 = vadd.f32 %v17256_v24, %v3900_v61  ;;  %v21764_v56 = vld [vmem:[#allocation40_spill] sm:$0xff] }
 0x6aa   : > { %21757 = vst [vmem:[#allocation152_spill] sm:$0xff] %v17937_v30  ;;  %v17942_v13 = vadd.f32 %v4348_v19, %v4232_v22  ;;  %v17944_v8 = vpop.f32.mrf.mxu1  ;;  %v21761_v19 = vld [vmem:[#allocation157_spill] sm:$0xff]  ;;  %v14075_v24 = vld [vmem:[%s21093_s6 + $0x480] sm:$0xff] }
 0x6ab   : > { %21758 = vst [vmem:[#allocation125_spill] sm:$0xff] %v17944_v8  ;;  %v4233_v22 = vadd.f32 %v21761_v19, %v4063_v43  ;;  %v14076_v43 = vld [vmem:[%s21093_s6 + $0x488] sm:$0xff] }
 0x6ac   : > { %5208 = vmatmul.bf16.gmra.mxu1 %v17859_v25 }
 0x6ad   : > { %5355 = vmatmul.bf16.gmra.mxu2 %v16360_v17  ;;  %5832 = vmatpush.bf16.msra.mxu1 %v14077_v23  ;;  %v21766_v23 = vld [vmem:[#allocation160_spill] sm:$0xff] }
 0x6b0   : > { %v17954_v60 = vpop.f32.mrf.mxu2 }
 0x6b1   : > { %v4350_v30 = vpop.f32.mrf.mxu3  ;;  %v17957_v58 = vpop.f32.mrf.mxu0  ;;  %5833 = vmatpush.bf16.msra.mxu1 %v14076_v43  ;;  %v17992_v43 = vsel %vm3397_vm2, %v17840_v50, %v17973_v45 }
 0x6b2   : > { %21762 = vst [vmem:[#allocation76_spill] sm:$0xff] %v17957_v58  ;;  %v17962_v28 = vadd.f32 %v4350_v30, %v4233_v22  ;;  %v17964_v8 = vpop.f32.mrf.mxu1  ;;  %v21765_v30 = vld [vmem:[#allocation188_spill] sm:$0xff]  ;;  %v4234_v58 = vadd.f32 %v21766_v23, %v4064_v32  ;;  %v21769_v32 = vld [vmem:[#allocation191_spill] sm:$0xff] }
 0x6b3   : > { %21763 = vst [vmem:[#allocation155_spill] sm:$0xff] %v17964_v8  ;;  %v3901_v19 = vadd.f32 %v21765_v30, %v17522_v20  ;;  %v3902_v30 = vadd.f32 %v21769_v32, %v17537_v54  ;;  %v21775_v54 = vld [vmem:[#allocation194_spill] sm:$0xff] }
 0x6b4   : > { %6166 = vmatmul.bf16.gmra.mxu0 %v21705_v44  ;;  %v3903_v32 = vadd.f32 %v21775_v54, %v17558_v26  ;;  %v21779_v26 = vld [vmem:[#allocation197_spill] sm:$0xff] }
 0x6b5   : > { %5834 = vmatpush.bf16.msra.mxu1 %v14075_v24  ;;  %v4065_v20 = vadd.f32 %v17276_v42, %v3901_v19  ;;  %v4066_v42 = vadd.f32 %v17303_v10, %v3902_v30  ;;  %v21774_v19 = vld [vmem:[#allocation44_spill] sm:$0xff]  ;;  %v5103_v24 = vrot.slane %v16637_v39, 2  ;;  %v14090_v10 = vld [vmem:[%s21093_s6 + $0x4f8] sm:$0xff]  ;;  %v3904_v30 = vadd.f32 %v21779_v26, %v17579_v49 }
 0x6b6   : > { %5004 = vmatmul.bf16.gmra.mxu3 %v21764_v56  ;;  %v4067_v39 = vadd.f32 %v17330_v4, %v3903_v32  ;;  %5991 = vmatpush.bf16.msra.mxu2 %v14090_v10  ;;  %v14089_v4 = vld [vmem:[%s21093_s6 + $0x4f0] sm:$0xff]  ;;  %v21784_v10 = vld [vmem:[#allocation200_spill] sm:$0xff] }
 0x6b7   : > { %v4068_v49 = vadd.f32 %v17360_v14, %v3904_v30  ;;  %v3905_v26 = vadd.f32 %v21784_v10, %v17600_v18 }
 0x6b8   : > { %v17977_v22 = vpop.f32.mrf.mxu2 }
 0x6b9   : > { %v4353_v44 = vpop.f32.mrf.mxu3  ;;  %v17980_v8 = vpop.f32.mrf.mxu0  ;;  %v4069_v18 = vadd.f32 %v17386_v2, %v3905_v26  ;;  %v14085_v2 = vld [vmem:[%s21093_s6 + $0x4d0] sm:$0xff] }
 0x6ba   : > { %21767 = vst [vmem:[#allocation129_spill] sm:$0xff] %v17980_v8  ;;  %v17985_v61 = vadd.f32 %v4353_v44, %v4234_v58  ;;  %v17987_v27 = vpop.f32.mrf.mxu1  ;;  %v21771_v58 = vld [vmem:[#allocation163_spill] sm:$0xff]  ;;  %5992 = vmatpush.bf16.msra.mxu2 %v14089_v4 }
 0x6bb   : > { %21768 = vst [vmem:[#allocation174_spill] sm:$0xff] %v17987_v27  ;;  %v4235_v44 = vadd.f32 %v21771_v58, %v4065_v20  ;;  %v21776_v20 = vld [vmem:[#allocation167_spill] sm:$0xff] }
 0x6bc   : > { %5213 = vmatmul.bf16.gmra.mxu1 %v17992_v43  ;;  %v4236_v58 = vadd.f32 %v21776_v20, %v4066_v42  ;;  %v21780_v42 = vld [vmem:[#allocation170_spill] sm:$0xff] }
 0x6bd   : > { %5360 = vmatmul.bf16.gmra.mxu2 %v16419_v3  ;;  %v4237_v54 = vadd.f32 %v21780_v42, %v4067_v39  ;;  %v21783_v39 = vld [vmem:[#allocation47_spill] sm:$0xff] }
 0x6c0   : > { %v17999_v23 = vpop.f32.mrf.mxu2 }
 0x6c1   : > { %21770 = vst [vmem:[#allocation41_spill] sm:$0xff] %v17999_v23  ;;  %v4355_v8 = vpop.f32.mrf.mxu3  ;;  %v18002_v27 = vpop.f32.mrf.mxu0 }
 0x6c2   : > { %21772 = vst [vmem:[#allocation158_spill] sm:$0xff] %v18002_v27  ;;  %v18004_v37 = vadd.f32 %v4355_v8, %v4235_v44  ;;  %v18006_v50 = vpop.f32.mrf.mxu1 }
 0x6c3   : > { %21773 = vst [vmem:[#allocation132_spill] sm:$0xff] %v18006_v50 }
 0x6c4   : > { %6171 = vmatmul.bf16.gmra.mxu0 %v16257_v1  ;;  %v5104_v1 = vsel %vm3397_vm2, %v17973_v45, %v5103_v24 }
 0x6c6   : > { %5009 = vmatmul.bf16.gmra.mxu3 %v21774_v19 }
 0x6c8   : > { %v18014_v23 = vpop.f32.mrf.mxu2 }
 0x6c9   : > { %v4358_v27 = vpop.f32.mrf.mxu3  ;;  %v18017_v8 = vpop.f32.mrf.mxu0 }
 0x6ca   : > { %21777 = vst [vmem:[#allocation178_spill] sm:$0xff] %v18017_v8  ;;  %v18019_v44 = vadd.f32 %v4358_v27, %v4236_v58  ;;  %v18021_v50 = vpop.f32.mrf.mxu1 }
 0x6cb   : > { %21778 = vst [vmem:[#allocation15_spill] sm:$0xff] %v18021_v50  ;;  %v21813_v50 = vld [vmem:[#allocation190_spill] sm:$0xff] }
 0x6cc   : > { %5218 = vmatmul.bf16.gmra.mxu1 %v5104_v1  ;;  %v14088_v1 = vld [vmem:[%s21093_s6 + $0x4e8] sm:$0xff] }
 0x6cd   : > { %5365 = vmatmul.bf16.gmra.mxu2 %v16494_v48 }
 0x6ce   : > { %5993 = vmatpush.bf16.msra.mxu2 %v14088_v1  ;;  %v21788_v1 = vld [vmem:[#allocation203_spill] sm:$0xff] }
 0x6cf   : > { %v3906_v10 = vadd.f32 %v21788_v1, %v17623_v47  ;;  %v21793_v1 = vld [vmem:[#allocation73_spill] sm:$0xff] }
 0x6d0   : > { %v18032_v27 = vpop.f32.mrf.mxu2 }
 0x6d1   : > { %v4360_v20 = vpop.f32.mrf.mxu3  ;;  %v18035_v58 = vpop.f32.mrf.mxu0  ;;  %v4070_v47 = vadd.f32 %v17402_v12, %v3906_v10 }
 0x6d2   : > { %21781 = vst [vmem:[#allocation161_spill] sm:$0xff] %v18035_v58  ;;  %v18040_v24 = vadd.f32 %v4360_v20, %v4237_v54  ;;  %v18042_v32 = vpop.f32.mrf.mxu1  ;;  %v21785_v54 = vld [vmem:[#allocation172_spill] sm:$0xff] }
 0x6d3   : > { %21782 = vst [vmem:[#allocation135_spill] sm:$0xff] %v18042_v32  ;;  %v4238_v20 = vadd.f32 %v21785_v54, %v4068_v49  ;;  %v14086_v49 = vld [vmem:[%s21093_s6 + $0x4d8] sm:$0xff] }
 0x6d4   : > { %6176 = vmatmul.bf16.gmra.mxu0 %v16295_v46  ;;  %v14087_v46 = vld [vmem:[%s21093_s6 + $0x4e0] sm:$0xff]  ;;  %v21806_v32 = vld [vmem:[#allocation187_spill] sm:$0xff] }
 0x6d5   : > { %5994 = vmatpush.bf16.msra.mxu2 %v14087_v46 }
 0x6d6   : > { %5014 = vmatmul.bf16.gmra.mxu3 %v21783_v39 }
 0x6d8   : > { %v18052_v42 = vpop.f32.mrf.mxu2 }
 0x6d9   : > { %v4363_v58 = vpop.f32.mrf.mxu3  ;;  %v18055_v4 = vpop.f32.mrf.mxu0  ;;  %5995 = vmatpush.bf16.msra.mxu2 %v14086_v49  ;;  %v21792_v49 = vld [vmem:[#allocation50_spill] sm:$0xff] }
 0x6da   : > { %21786 = vst [vmem:[#allocation182_spill] sm:$0xff] %v18055_v4  ;;  %v18060_v14 = vadd.f32 %v4363_v58, %v4238_v20  ;;  %v18062_v30 = vpop.f32.mrf.mxu1  ;;  %v21789_v58 = vld [vmem:[#allocation176_spill] sm:$0xff] }
 0x6db   : > { %21787 = vst [vmem:[#allocation164_spill] sm:$0xff] %v18062_v30  ;;  %v4239_v20 = vadd.f32 %v21789_v58, %v4069_v18  ;;  %v14084_v18 = vld [vmem:[%s21093_s6 + $0x4c8] sm:$0xff]  ;;  %v3907_v58 = vadd.f32 %v21793_v1, %v17642_v15 }
 0x6dc   : > { %5835 = vmatmul.bf16.vlgmr.msra.gmra.mxu1 %v21764_v56 }
 0x6dd   : > { %5370 = vmatmul.bf16.gmra.mxu2 %v21503_v40  ;;  %v4071_v15 = vadd.f32 %v17418_v55, %v3907_v58  ;;  %v21803_v58 = vld [vmem:[#allocation54_spill] sm:$0xff] }
 0x6de   : > { %5996 = vmatpush.bf16.msra.mxu2 %v14085_v2 }
 0x6e0   : > { %v18072_v54 = vpop.f32.mrf.mxu2 }
 0x6e1   : > { %v4365_v4 = vpop.f32.mrf.mxu3  ;;  %v18075_v46 = vpop.f32.mrf.mxu0 }
 0x6e2   : > { %21790 = vst [vmem:[#allocation138_spill] sm:$0xff] %v18075_v46  ;;  %v18080_v56 = vadd.f32 %v4365_v4, %v4239_v20  ;;  %v18082_v26 = vpop.f32.mrf.mxu1  ;;  %5997 = vmatpush.bf16.msra.mxu2 %v14084_v18  ;;  %v21794_v4 = vld [vmem:[#allocation180_spill] sm:$0xff] }
 0x6e3   : > { %21791 = vst [vmem:[#allocation90_spill] sm:$0xff] %v18082_v26  ;;  %v4240_v20 = vadd.f32 %v21794_v4, %v4070_v47  ;;  %v21797_v47 = vld [vmem:[#allocation56_spill] sm:$0xff]  ;;  %v21799_v4 = vld [vmem:[#allocation183_spill] sm:$0xff] }
 0x6e4   : > { %6181 = vmatmul.bf16.gmra.mxu0 %v16327_v33  ;;  %v14083_v33 = vld [vmem:[%s21093_s6 + $0x4c0] sm:$0xff]  ;;  %v3908_v18 = vadd.f32 %v21797_v47, %v17659_v52 }
 0x6e6   : > { %5019 = vmatmul.bf16.gmra.mxu3 %v21792_v49  ;;  %5998 = vmatpush.bf16.msra.mxu2 %v14083_v33  ;;  %v21802_v33 = vld [vmem:[#allocation22_spill] sm:$0xff] }
 0x6e7   : > { %v4072_v55 = vadd.f32 %v21802_v33, %v3908_v18  ;;  %v21810_v33 = vld [vmem:[#allocation80_spill] sm:$0xff] }
 0x6e8   : > { %v18092_v46 = vpop.f32.mrf.mxu2 }
 0x6e9   : > { %v4368_v8 = vpop.f32.mrf.mxu3  ;;  %v18095_v2 = vpop.f32.mrf.mxu0 }
 0x6ea   : > { %21795 = vst [vmem:[#allocation186_spill] sm:$0xff] %v18095_v2  ;;  %v18100_v12 = vadd.f32 %v4368_v8, %v4240_v20  ;;  %v18102_v10 = vpop.f32.mrf.mxu1  ;;  %v4241_v2 = vadd.f32 %v21799_v4, %v4071_v15  ;;  %v4242_v15 = vadd.f32 %v21806_v32, %v4072_v55 }
 0x6eb   : > { %21796 = vst [vmem:[#allocation66_spill] sm:$0xff] %v18102_v10  ;;  %v21804_v10 = vld [vmem:[#allocation61_spill] sm:$0xff] }
 0x6ec   : > { %5840 = vmatmul.bf16.gmra.mxu1 %v21774_v19  ;;  %v3909_v52 = vadd.f32 %v21804_v10, %v17679_v59 }
 0x6ed   : > { %5375 = vmatmul.bf16.gmra.mxu2 %v16608_v6 }
 0x6f0   : > { %v18109_v1 = vpop.f32.mrf.mxu2 }
 0x6f1   : > { %21798 = vst [vmem:[#allocation168_spill] sm:$0xff] %v18109_v1  ;;  %v4370_v26 = vpop.f32.mrf.mxu3  ;;  %v18114_v8 = vpop.f32.mrf.mxu0 }
 0x6f2   : > { %v18112_v30 = vadd.f32 %v4370_v26, %v4241_v2  ;;  %21800 = vst [vmem:[#allocation141_spill] sm:$0xff] %v18114_v8  ;;  %v18116_v20 = vpop.f32.mrf.mxu1 }
 0x6f3   : > { %21801 = vst [vmem:[#allocation189_spill] sm:$0xff] %v18116_v20  ;;  %v21811_v20 = vld [vmem:[#allocation63_spill] sm:$0xff] }
 0x6f4   : > { %6186 = vmatmul.bf16.gmra.mxu0 %v16360_v17  ;;  %v21809_v17 = vld [vmem:[#allocation82_spill] sm:$0xff]  ;;  %v3910_v59 = vadd.f32 %v21811_v20, %v17694_v9 }
 0x6f5   : > { %v4073_v18 = vadd.f32 %v21809_v17, %v3909_v52  ;;  %v21817_v52 = vld [vmem:[#allocation59_spill] sm:$0xff]  ;;  %v21818_v17 = vld [vmem:[#allocation204_spill] sm:$0xff] }
 0x6f6   : > { %5024 = vmatmul.bf16.gmra.mxu3 %v21803_v58  ;;  %v3911_v9 = vadd.f32 %v21818_v17, %v17709_v63  ;;  %v21827_v17 = vld [vmem:[#allocation196_spill] sm:$0xff] }
 0x6f7   : > { %v4243_v32 = vadd.f32 %v21813_v50, %v4073_v18 }
 0x6f8   : > { %v18123_v47 = vpop.f32.mrf.mxu2 }
 0x6f9   : > { %21805 = vst [vmem:[#allocation171_spill] sm:$0xff] %v18123_v47  ;;  %v4373_v4 = vpop.f32.mrf.mxu3  ;;  %v18130_v8 = vpop.f32.mrf.mxu0 }
 0x6fa   : > { %v18126_v26 = vadd.f32 %v4373_v4, %v4242_v15  ;;  %v18128_v2 = vpop.f32.mrf.mxu1  ;;  %21808 = vst [vmem:[#allocation16_spill] sm:$0xff] %v18130_v8  ;;  %v21815_v8 = vld [vmem:[#allocation104_spill] sm:$0xff] }
 0x6fb   : > { %21807 = vst [vmem:[#allocation145_spill] sm:$0xff] %v18128_v2  ;;  %v4074_v2 = vadd.f32 %v21815_v8, %v3910_v59  ;;  %v21823_v59 = vld [vmem:[#allocation39_spill] sm:$0xff] }
 0x6fc   : > { %5845 = vmatmul.bf16.gmra.mxu1 %v21783_v39 }
 0x6fd   : > { %5380 = vmatmul.bf16.gmra.mxu2 %v21810_v33 }
 0x700   : > { %v18137_v10 = vpop.f32.mrf.mxu2 }
 0x701   : > { %21812 = vst [vmem:[#allocation93_spill] sm:$0xff] %v18137_v10  ;;  %v4375_v55 = vpop.f32.mrf.mxu3  ;;  %v18146_v47 = vpop.f32.mrf.mxu0  ;;  %v21820_v10 = vld [vmem:[#allocation193_spill] sm:$0xff] }
 0x702   : > { %v18140_v15 = vadd.f32 %v4375_v55, %v4243_v32  ;;  %v18142_v4 = vpop.f32.mrf.mxu1  ;;  %21816 = vst [vmem:[#allocation173_spill] sm:$0xff] %v18146_v47  ;;  %v4244_v50 = vadd.f32 %v21820_v10, %v4074_v2  ;;  %v21824_v47 = vld [vmem:[#allocation65_spill] sm:$0xff] }
 0x703   : > { %21814 = vst [vmem:[#allocation192_spill] sm:$0xff] %v18142_v4  ;;  %v3912_v4 = vadd.f32 %v21824_v47, %v17724_v53 }
 0x704   : > { %6191 = vmatmul.bf16.gmra.mxu0 %v16419_v3  ;;  %v21822_v3 = vld [vmem:[#allocation123_spill] sm:$0xff] }
 0x705   : > { %v4075_v8 = vadd.f32 %v21822_v3, %v3911_v9  ;;  %v21830_v3 = vld [vmem:[#allocation24_spill] sm:$0xff] }
 0x706   : > { %5029 = vmatmul.bf16.gmra.mxu3 %v21817_v52 }
 0x707   : > { %v4245_v2 = vadd.f32 %v21827_v17, %v4075_v8 }
 0x708   : > { %v18151_v20 = vpop.f32.mrf.mxu2 }
 0x709   : > { %21819 = vst [vmem:[#allocation148_spill] sm:$0xff] %v18151_v20  ;;  %v4378_v18 = vpop.f32.mrf.mxu3  ;;  %v18163_v1 = vpop.f32.mrf.mxu0 }
 0x70a   : > { %v18154_v32 = vadd.f32 %v4378_v18, %v4244_v50  ;;  %v18156_v55 = vpop.f32.mrf.mxu1  ;;  %21825 = vst [vmem:[#allocation177_spill] sm:$0xff] %v18163_v1  ;;  %v21833_v1 = vld [vmem:[#allocation199_spill] sm:$0xff] }
 0x70b   : > { %21821 = vst [vmem:[#allocation195_spill] sm:$0xff] %v18156_v55  ;;  %v21829_v55 = vld [vmem:[#allocation91_spill] sm:$0xff] }
 0x70c   : > { %5850 = vmatmul.bf16.gmra.mxu1 %v21792_v49  ;;  %v4076_v9 = vadd.f32 %v21829_v55, %v3912_v4  ;;  %v21837_v55 = vld [vmem:[#allocation72_spill] sm:$0xff] }
 0x70d   : > { %5999 = vmatmul.bf16.vlgmr.msra.gmra.mxu2 %v21823_v59  ;;  %v21831_v59 = vld [vmem:[#allocation68_spill] sm:$0xff] }
 0x70e   : > { %v3913_v53 = vadd.f32 %v21831_v59, %v17738_v7  ;;  %v4550_v7 = vadd.f32 %v21837_v55, %v17761_v57  ;;  %v21839_v59 = vld [vmem:[#allocation202_spill] sm:$0xff]  ;;  %v21843_v57 = vld [vmem:[#allocation27_spill] sm:$0xff] }
 0x70f   : > { %v21844_v55 = vld [vmem:[#allocation206_spill] sm:$0xff] }
 0x710   : > { %v18165_v63 = vpop.f32.mrf.mxu2 }
 0x711   : > { %21826 = vst [vmem:[#allocation151_spill] sm:$0xff] %v18165_v63  ;;  %v4380_v10 = vpop.f32.mrf.mxu3  ;;  %v4246_v63 = vadd.f32 %v21833_v1, %v4076_v9  ;;  %v18180_v8 = vpop.f32.mrf.mxu0 }
 0x712   : > { %v18168_v50 = vadd.f32 %v4380_v10, %v4245_v2  ;;  %v18170_v18 = vpop.f32.mrf.mxu1  ;;  %21834 = vst [vmem:[#allocation181_spill] sm:$0xff] %v18180_v8  ;;  %v21842_v8 = vld [vmem:[#allocation131_spill] sm:$0xff] }
 0x713   : > { %21828 = vst [vmem:[#allocation198_spill] sm:$0xff] %v18170_v18 }
 0x714   : > { %6196 = vmatmul.bf16.gmra.mxu0 %v16494_v48  ;;  %v21836_v48 = vld [vmem:[#allocation109_spill] sm:$0xff] }
 0x715   : > { %v4077_v4 = vadd.f32 %v21836_v48, %v3913_v53  ;;  %v4726_v53 = vadd.f32 %v21842_v8, %v4550_v7  ;;  %v14130_v48 = vld [vmem:[%s21093_s6 + $0x638] sm:$0xff]  ;;  %v14129_v8 = vld [vmem:[%s21093_s6 + $0x630] sm:$0xff] }
 0x716   : > { %5034 = vmatmul.bf16.gmra.mxu3 %v21830_v3  ;;  %6827 = vmatpush.bf16.msra.mxu0 %v14130_v48 }
 0x717   : > { %v4247_v1 = vadd.f32 %v21839_v59, %v4077_v4  ;;  %v14074_v4 = vld [vmem:[%s21093_s6 + $0x478] sm:$0xff]  ;;  %v4551_v59 = vadd.f32 %v21844_v55, %v17787_v35 }
 0x718   : > { %v18177_v47 = vpop.f32.mrf.mxu2  ;;  %5657 = vmatpush.bf16.msra.mxu3 %v14074_v4  ;;  %v21848_v35 = vld [vmem:[#allocation99_spill] sm:$0xff]  ;;  %v14072_v4 = vld [vmem:[%s21093_s6 + $0x468] sm:$0xff] }
 0x719   : > { %21832 = vst [vmem:[#allocation37_spill] sm:$0xff] %v18177_v47  ;;  %v4383_v20 = vpop.f32.mrf.mxu3  ;;  %v4727_v55 = vadd.f32 %v21848_v35, %v4551_v59  ;;  %v21852_v59 = vld [vmem:[#allocation62_spill] sm:$0xff]  ;;  %v14127_v35 = vld [vmem:[%s21093_s6 + $0x620] sm:$0xff] }
 0x71a   : > { %v18182_v17 = vadd.f32 %v4383_v20, %v4246_v63  ;;  %v18184_v2 = vpop.f32.mrf.mxu1  ;;  %v18198_v63 = vpop.f32.mrf.mxu0  ;;  %6828 = vmatpush.bf16.msra.mxu0 %v14129_v8 }
 0x71b   : > { %21835 = vst [vmem:[#allocation154_spill] sm:$0xff] %v18184_v2 }
 0x71c   : > { %5855 = vmatmul.bf16.gmra.mxu1 %v21803_v58  ;;  %21841 = vst [vmem:[#allocation157_spill] sm:$0xff] %v18198_v63 }
 0x71d   : > { %6004 = vmatmul.bf16.gmra.mxu2 %v21616_v0 }
 0x720   : > { %v18191_v10 = vpop.f32.mrf.mxu2 }
 0x721   : > { %21838 = vst [vmem:[#allocation201_spill] sm:$0xff] %v18191_v10  ;;  %v4385_v9 = vpop.f32.mrf.mxu3 }
 0x722   : > { %v18194_v18 = vadd.f32 %v4385_v9, %v4247_v1  ;;  %v18196_v20 = vpop.f32.mrf.mxu1  ;;  %v21846_v9 = vld [vmem:[#allocation60_spill] sm:$0xff] }
 0x723   : > { %21840 = vst [vmem:[#allocation184_spill] sm:$0xff] %v18196_v20  ;;  %v14073_v20 = vld [vmem:[%s21093_s6 + $0x470] sm:$0xff] }
 0x724   : > { %6201 = vmatmul.bf16.gmra.mxu0 %v21503_v40  ;;  %v4890_v40 = vadd.f32 %v21846_v9, %v4726_v53  ;;  %5658 = vmatpush.bf16.msra.mxu3 %v14073_v20  ;;  %v14128_v53 = vld [vmem:[%s21093_s6 + $0x628] sm:$0xff]  ;;  %v18233_v9 = vpop.f32.mrf.mxu0  ;;  %v4891_v20 = vadd.f32 %v21852_v59, %v4727_v55  ;;  %v14126_v55 = vld [vmem:[%s21093_s6 + $0x618] sm:$0xff] }
 0x725   : > { %21849 = vst [vmem:[#allocation160_spill] sm:$0xff] %v18233_v9  ;;  %6829 = vmatpush.bf16.msra.mxu0 %v14128_v53  ;;  %v14071_v53 = vld [vmem:[%s21093_s6 + $0x460] sm:$0xff]  ;;  %v21856_v59 = vld [vmem:[#allocation85_spill] sm:$0xff] }
 0x726   : > { %5039 = vmatmul.bf16.gmra.mxu3 %v21843_v57 }
 0x728   : > { %v18211_v1 = vpop.f32.mrf.mxu2  ;;  %5659 = vmatpush.bf16.msra.mxu3 %v14072_v4  ;;  %v21855_v4 = vld [vmem:[#allocation143_spill] sm:$0xff] }
 0x729   : > { %21845 = vst [vmem:[#allocation40_spill] sm:$0xff] %v18211_v1  ;;  %v5000_v7 = vpop.f32.mrf.mxu3  ;;  %6830 = vmatpush.bf16.msra.mxu0 %v14127_v35 }
 0x72a   : > { %v18217_v63 = vadd.f32 %v5000_v7, %v4890_v40  ;;  %v18219_v48 = vpop.f32.mrf.mxu1  ;;  %v21850_v40 = vld [vmem:[#allocation30_spill] sm:$0xff] }
 0x72b   : > { %21847 = vst [vmem:[#allocation188_spill] sm:$0xff] %v18219_v48  ;;  %v4552_v8 = vadd.f32 %v21850_v40, %v17813_v5  ;;  %v21854_v5 = vld [vmem:[#allocation92_spill] sm:$0xff] }
 0x72c   : > { %5860 = vmatmul.bf16.gmra.mxu1 %v21817_v52  ;;  %5660 = vmatpush.bf16.msra.mxu3 %v14071_v53  ;;  %v18261_v35 = vpop.f32.mrf.mxu0 }
 0x72d   : > { %6009 = vmatmul.bf16.gmra.mxu2 %v21633_v16  ;;  %v4728_v40 = vadd.f32 %v21854_v5, %v4552_v8  ;;  %6831 = vmatpush.bf16.msra.mxu0 %v14126_v55  ;;  %21857 = vst [vmem:[#allocation44_spill] sm:$0xff] %v18261_v35  ;;  %v21859_v8 = vld [vmem:[#allocation25_spill] sm:$0xff]  ;;  %v14125_v5 = vld [vmem:[%s21093_s6 + $0x610] sm:$0xff] }
 0x72f   : > { %v4892_v53 = vadd.f32 %v21859_v8, %v4728_v40  ;;  %v14124_v40 = vld [vmem:[%s21093_s6 + $0x608] sm:$0xff]  ;;  %v21862_v8 = vld [vmem:[#allocation146_spill] sm:$0xff] }
 0x730   : > { %v18237_v7 = vpop.f32.mrf.mxu2 }
 0x731   : > { %21851 = vst [vmem:[#allocation191_spill] sm:$0xff] %v18237_v7  ;;  %v5002_v48 = vpop.f32.mrf.mxu3  ;;  %6832 = vmatpush.bf16.msra.mxu0 %v14125_v5  ;;  %v14069_v7 = vld [vmem:[%s21093_s6 + $0x450] sm:$0xff] }
 0x732   : > { %v18243_v2 = vadd.f32 %v5002_v48, %v4891_v20  ;;  %v18248_v9 = vpop.f32.mrf.mxu1  ;;  %v14070_v48 = vld [vmem:[%s21093_s6 + $0x458] sm:$0xff]  ;;  %v4553_v20 = vadd.f32 %v21856_v59, %v17842_v21  ;;  %v21860_v21 = vld [vmem:[#allocation137_spill] sm:$0xff] }
 0x733   : > { %21853 = vst [vmem:[#allocation163_spill] sm:$0xff] %v18248_v9  ;;  %5661 = vmatpush.bf16.msra.mxu3 %v14070_v48 }
 0x734   : > { %6206 = vmatmul.bf16.gmra.mxu0 %v16608_v6  ;;  %v4729_v59 = vadd.f32 %v21860_v21, %v4553_v20  ;;  %v21865_v20 = vld [vmem:[#allocation26_spill] sm:$0xff]  ;;  %v14123_v21 = vld [vmem:[%s21093_s6 + $0x600] sm:$0xff]  ;;  %v18293_v1 = vpop.f32.mrf.mxu0 }
 0x735   : > { %6833 = vmatpush.bf16.msra.mxu0 %v14124_v40  ;;  %21866 = vst [vmem:[#allocation170_spill] sm:$0xff] %v18293_v1  ;;  %v14067_v40 = vld [vmem:[%s21093_s6 + $0x440] sm:$0xff] }
 0x736   : > { %5044 = vmatmul.bf16.gmra.mxu3 %v21855_v4 }
 0x737   : > { %5662 = vmatpush.bf16.msra.mxu3 %v14069_v7  ;;  %v4893_v7 = vadd.f32 %v21865_v20, %v4729_v59  ;;  %v21868_v59 = vld [vmem:[#allocation17_spill] sm:$0xff] }
 0x738   : > { %v18263_v6 = vpop.f32.mrf.mxu2 }
 0x739   : > { %21858 = vst [vmem:[#allocation194_spill] sm:$0xff] %v18263_v6  ;;  %v5005_v9 = vpop.f32.mrf.mxu3  ;;  %6834 = vmatpush.bf16.msra.mxu0 %v14123_v21 }
 0x73a   : > { %v18269_v55 = vadd.f32 %v5005_v9, %v4892_v53  ;;  %v14068_v9 = vld [vmem:[%s21093_s6 + $0x448] sm:$0xff]  ;;  %v18283_v48 = vpop.f32.mrf.mxu1  ;;  %v21863_v53 = vld [vmem:[#allocation32_spill] sm:$0xff] }
 0x73b   : > { %21861 = vst [vmem:[#allocation167_spill] sm:$0xff] %v18283_v48  ;;  %v4554_v5 = vadd.f32 %v21863_v53, %v21862_v8  ;;  %5663 = vmatpush.bf16.msra.mxu3 %v14068_v9  ;;  %v21867_v8 = vld [vmem:[#allocation179_spill] sm:$0xff] }
 0x73c   : > { %5865 = vmatmul.bf16.gmra.mxu1 %v21830_v3  ;;  %v21869_v9 = vld [vmem:[#allocation35_spill] sm:$0xff]  ;;  %v18312_v47 = vpop.f32.mrf.mxu0  ;;  %v21877_v3 = vld [vmem:[#allocation96_spill] sm:$0xff] }
 0x73d   : > { %6014 = vmatmul.bf16.gmra.mxu2 %v21651_v36  ;;  %v4730_v53 = vadd.f32 %v21867_v8, %v4554_v5  ;;  %v4555_v20 = vadd.f32 %v21869_v9, %v17886_v34  ;;  %21874 = vst [vmem:[#allocation203_spill] sm:$0xff] %v18312_v47  ;;  %v21875_v5 = vld [vmem:[#allocation122_spill] sm:$0xff]  ;;  %v21876_v8 = vld [vmem:[#allocation52_spill] sm:$0xff]  ;;  %v4556_v34 = vadd.f32 %v21877_v3, %v17902_v11 }
 0x73f   : > { %5664 = vmatpush.bf16.msra.mxu3 %v14067_v40  ;;  %v4731_v40 = vadd.f32 %v21875_v5, %v4555_v20  ;;  %v21884_v20 = vld [vmem:[#allocation81_spill] sm:$0xff]  ;;  %v21885_v5 = vld [vmem:[#allocation86_spill] sm:$0xff] }
 0x740   : > { %v18287_v35 = vpop.f32.mrf.mxu2  ;;  %v4557_v11 = vadd.f32 %v21885_v5, %v17922_v62  ;;  %v21891_v62 = vld [vmem:[#allocation115_spill] sm:$0xff] }
 0x741   : > { %21864 = vst [vmem:[#allocation197_spill] sm:$0xff] %v18287_v35  ;;  %v5007_v6 = vpop.f32.mrf.mxu3  ;;  %v4558_v5 = vadd.f32 %v21891_v62, %v17942_v13  ;;  %v14112_v13 = vld [vmem:[%s21093_s6 + $0x5a8] sm:$0xff] }
 0x742   : > { %v18295_v10 = vadd.f32 %v5007_v6, %v4893_v7  ;;  %v18305_v48 = vpop.f32.mrf.mxu1  ;;  %v21872_v6 = vld [vmem:[#allocation64_spill] sm:$0xff] }
 0x743   : > { %21870 = vst [vmem:[#allocation47_spill] sm:$0xff] %v18305_v48  ;;  %v4894_v7 = vadd.f32 %v21872_v6, %v4730_v53  ;;  %v21879_v48 = vld [vmem:[#allocation71_spill] sm:$0xff] }
 0x744   : > { %6211 = vmatmul.bf16.gmra.mxu0 %v21810_v33 }
 0x746   : > { %5049 = vmatmul.bf16.gmra.mxu3 %v21868_v59 }
 0x748   : > { %v18307_v1 = vpop.f32.mrf.mxu2 }
 0x749   : > { %21871 = vst [vmem:[#allocation200_spill] sm:$0xff] %v18307_v1  ;;  %v5010_v21 = vpop.f32.mrf.mxu3  ;;  %v4895_v1 = vadd.f32 %v21879_v48, %v4731_v40 }
 0x74a   : > { %v18310_v35 = vadd.f32 %v5010_v21, %v4894_v7  ;;  %v18322_v53 = vpop.f32.mrf.mxu1  ;;  %v21881_v7 = vld [vmem:[#allocation88_spill] sm:$0xff]  ;;  %v21882_v21 = vld [vmem:[#allocation70_spill] sm:$0xff] }
 0x74b   : > { %21880 = vst [vmem:[#allocation50_spill] sm:$0xff] %v18322_v53  ;;  %v4732_v47 = vadd.f32 %v21882_v21, %v4556_v34  ;;  %v21890_v21 = vld [vmem:[#allocation57_spill] sm:$0xff] }
 0x74c   : > { %21873 = vst [vmem:[#allocation172_spill] sm:$0xff] %v18310_v35  ;;  %5870 = vmatmul.bf16.gmra.mxu1 %v21843_v57  ;;  %v18328_v57 = vpop.f32.mrf.mxu0 }
 0x74d   : > { %6019 = vmatmul.bf16.gmra.mxu2 %v21876_v8  ;;  %21883 = vst [vmem:[#allocation73_spill] sm:$0xff] %v18328_v57 }
 0x750   : > { %v18319_v9 = vpop.f32.mrf.mxu2 }
 0x751   : > { %21878 = vst [vmem:[#allocation176_spill] sm:$0xff] %v18319_v9  ;;  %v5012_v52 = vpop.f32.mrf.mxu3  ;;  %v21887_v9 = vld [vmem:[#allocation21_spill] sm:$0xff] }
 0x752   : > { %v18324_v6 = vadd.f32 %v5012_v52, %v4895_v1  ;;  %v4896_v48 = vadd.f32 %v21887_v9, %v4732_v47  ;;  %v18338_v52 = vpop.f32.mrf.mxu1  ;;  %v21889_v1 = vld [vmem:[#allocation102_spill] sm:$0xff] }
 0x753   : > { %21888 = vst [vmem:[#allocation56_spill] sm:$0xff] %v18338_v52  ;;  %v4733_v34 = vadd.f32 %v21889_v1, %v4557_v11  ;;  %v14113_v11 = vld [vmem:[%s21093_s6 + $0x5b0] sm:$0xff] }
 0x754   : > { %6216 = vmatmul.bf16.gmra.mxu0 %v21881_v7  ;;  %v18348_v47 = vpop.f32.mrf.mxu0 }
 0x755   : > { %21892 = vst [vmem:[#allocation183_spill] sm:$0xff] %v18348_v47  ;;  %v21897_v47 = vld [vmem:[#allocation51_spill] sm:$0xff] }
 0x756   : > { %5054 = vmatmul.bf16.gmra.mxu3 %v21884_v20  ;;  %v14114_v20 = vld [vmem:[%s21093_s6 + $0x5b8] sm:$0xff] }
 0x757   : > { %6493 = vmatpush.bf16.msrb.mxu1 %v14114_v20  ;;  %v21895_v20 = vld [vmem:[#allocation45_spill] sm:$0xff] }
 0x758   : > { %v18333_v3 = vpop.f32.mrf.mxu2  ;;  %v4734_v52 = vadd.f32 %v21895_v20, %v4558_v5 }
 0x759   : > { %21886 = vst [vmem:[#allocation180_spill] sm:$0xff] %v18333_v3  ;;  %v5015_v40 = vpop.f32.mrf.mxu3 }
 0x75a   : > { %v18336_v35 = vadd.f32 %v5015_v40, %v4896_v48  ;;  %v21894_v48 = vld [vmem:[#allocation77_spill] sm:$0xff]  ;;  %v18363_v62 = vpop.f32.mrf.mxu1 }
 0x75b   : > { %v4897_v40 = vadd.f32 %v21894_v48, %v4733_v34  ;;  %6494 = vmatpush.bf16.msrb.mxu1 %v14113_v11  ;;  %21896 = vst [vmem:[#allocation54_spill] sm:$0xff] %v18363_v62  ;;  %v21898_v34 = vld [vmem:[#allocation175_spill] sm:$0xff]  ;;  %v21903_v62 = vld [vmem:[#allocation14_spill] sm:$0xff] }
 0x75c   : > { %5875 = vmatmul.bf16.gmra.mxu1 %v21855_v4  ;;  %v4559_v48 = vadd.f32 %v21898_v34, %v17962_v28  ;;  %v18374_v5 = vpop.f32.mrf.mxu0  ;;  %v14110_v28 = vld [vmem:[%s21093_s6 + $0x598] sm:$0xff] }
 0x75d   : > { %6024 = vmatmul.bf16.gmra.mxu2 %v21890_v21  ;;  %21901 = vst [vmem:[#allocation187_spill] sm:$0xff] %v18374_v5 }
 0x75f   : > { %6495 = vmatpush.bf16.msrb.mxu1 %v14112_v13 }
 0x760   : > { %v18350_v9 = vpop.f32.mrf.mxu2 }
 0x761   : > { %21893 = vst [vmem:[#allocation22_spill] sm:$0xff] %v18350_v9  ;;  %v5017_v57 = vpop.f32.mrf.mxu3 }
 0x762   : > { %v18356_v1 = vadd.f32 %v5017_v57, %v4897_v40  ;;  %v21900_v57 = vld [vmem:[#allocation28_spill] sm:$0xff] }
 0x763   : > { %v4898_v40 = vadd.f32 %v21900_v57, %v4734_v52  ;;  %v21904_v52 = vld [vmem:[#allocation97_spill] sm:$0xff]  ;;  %v18386_v57 = vpop.f32.mrf.mxu1 }
 0x764   : > { %6835 = vmatmul.bf16.vlgmr.msra.gmra.mxu0 %v21616_v0  ;;  %v14111_v0 = vld [vmem:[%s21093_s6 + $0x5a0] sm:$0xff]  ;;  %v4560_v34 = vadd.f32 %v21904_v52, %v17985_v61  ;;  %21905 = vst [vmem:[#allocation82_spill] sm:$0xff] %v18386_v57  ;;  %v14108_v52 = vld [vmem:[%s21093_s6 + $0x588] sm:$0xff]  ;;  %v21910_v57 = vld [vmem:[#allocation55_spill] sm:$0xff] }
 0x765   : > { %6496 = vmatpush.bf16.msrb.mxu1 %v14111_v0 }
 0x766   : > { %5665 = vmatmul.bf16.vlgmr.msra.gmra.mxu3 %v21897_v47  ;;  %v21902_v47 = vld [vmem:[#allocation110_spill] sm:$0xff] }
 0x767   : > { %v4735_v13 = vadd.f32 %v21902_v47, %v4559_v48  ;;  %v14109_v48 = vld [vmem:[%s21093_s6 + $0x590] sm:$0xff] }
 0x768   : > { %v18368_v53 = vpop.f32.mrf.mxu2 }
 0x769   : > { %21899 = vst [vmem:[#allocation61_spill] sm:$0xff] %v18368_v53  ;;  %v5020_v11 = vpop.f32.mrf.mxu3  ;;  %6497 = vmatpush.bf16.msrb.mxu1 %v14110_v28  ;;  %v18396_v53 = vpop.f32.mrf.mxu0  ;;  %v21909_v28 = vld [vmem:[#allocation133_spill] sm:$0xff] }
 0x76a   : > { %v18376_v20 = vadd.f32 %v5020_v11, %v4898_v40  ;;  %v21907_v40 = vld [vmem:[#allocation119_spill] sm:$0xff]  ;;  %21908 = vst [vmem:[#allocation63_spill] sm:$0xff] %v18396_v53  ;;  %v4736_v61 = vadd.f32 %v21909_v28, %v4560_v34  ;;  %v21915_v53 = vld [vmem:[#allocation84_spill] sm:$0xff] }
 0x76b   : > { %v4899_v11 = vadd.f32 %v21907_v40, %v4735_v13  ;;  %v21911_v13 = vld [vmem:[#allocation42_spill] sm:$0xff]  ;;  %v18412_v34 = vpop.f32.mrf.mxu1 }
 0x76c   : > { %5880 = vmatmul.bf16.gmra.mxu1 %v21868_v59  ;;  %v4561_v40 = vadd.f32 %v21911_v13, %v18004_v37  ;;  %21914 = vst [vmem:[#allocation104_spill] sm:$0xff] %v18412_v34 }
 0x76d   : > { %6029 = vmatmul.bf16.gmra.mxu2 %v21903_v62  ;;  %6498 = vmatpush.bf16.msrb.mxu1 %v14109_v48 }
 0x770   : > { %v18388_v5 = vpop.f32.mrf.mxu2 }
 0x771   : > { %21906 = vst [vmem:[#allocation80_spill] sm:$0xff] %v18388_v5  ;;  %v5022_v0 = vpop.f32.mrf.mxu3  ;;  %6499 = vmatpush.bf16.msrb.mxu1 %v14108_v52  ;;  %v21916_v52 = vld [vmem:[#allocation153_spill] sm:$0xff]  ;;  %v18419_v37 = vpop.f32.mrf.mxu0 }
 0x772   : > { %v18394_v47 = vadd.f32 %v5022_v0, %v4899_v11  ;;  %v21913_v11 = vld [vmem:[#allocation78_spill] sm:$0xff]  ;;  %v4737_v9 = vadd.f32 %v21916_v52, %v4561_v40  ;;  %21917 = vst [vmem:[#allocation204_spill] sm:$0xff] %v18419_v37 }
 0x773   : > { %v4900_v0 = vadd.f32 %v21913_v11, %v4736_v61  ;;  %v21918_v61 = vld [vmem:[#allocation105_spill] sm:$0xff]  ;;  %v21923_v52 = vld [vmem:[#allocation126_spill] sm:$0xff] }
 0x774   : > { %6840 = vmatmul.bf16.gmra.mxu0 %v21633_v16  ;;  %v14107_v16 = vld [vmem:[%s21093_s6 + $0x580] sm:$0xff]  ;;  %v4562_v13 = vadd.f32 %v21918_v61, %v18019_v44  ;;  %v4563_v37 = vadd.f32 %v21923_v52, %v18040_v24  ;;  %v21925_v61 = vld [vmem:[#allocation127_spill] sm:$0xff] }
 0x775   : > { %6500 = vmatpush.bf16.msrb.mxu1 %v14107_v16  ;;  %v21922_v16 = vld [vmem:[#allocation29_spill] sm:$0xff] }
 0x776   : > { %5670 = vmatmul.bf16.gmra.mxu3 %v21910_v57 }
 0x778   : > { %v18406_v5 = vpop.f32.mrf.mxu2 }
 0x779   : > { %21912 = vst [vmem:[#allocation190_spill] sm:$0xff] %v18406_v5  ;;  %v5025_v48 = vpop.f32.mrf.mxu3  ;;  %v21919_v5 = vld [vmem:[#allocation107_spill] sm:$0xff] }
 0x77a   : > { %v18414_v28 = vadd.f32 %v5025_v48, %v4900_v0  ;;  %v4901_v3 = vadd.f32 %v21919_v5, %v4737_v9  ;;  %v18428_v0 = vpop.f32.mrf.mxu1  ;;  %v21921_v48 = vld [vmem:[#allocation108_spill] sm:$0xff] }
 0x77b   : > { %21920 = vst [vmem:[#allocation193_spill] sm:$0xff] %v18428_v0  ;;  %v4738_v40 = vadd.f32 %v21921_v48, %v4562_v13  ;;  %v21927_v0 = vld [vmem:[#allocation139_spill] sm:$0xff] }
 0x77c   : > { %5885 = vmatmul.bf16.gmra.mxu1 %v21915_v53  ;;  %v18435_v53 = vpop.f32.mrf.mxu0  ;;  %v14122_v13 = vld [vmem:[%s21093_s6 + $0x5f8] sm:$0xff] }
 0x77d   : > { %6034 = vmatmul.bf16.gmra.mxu2 %v21712_v38  ;;  %21924 = vst [vmem:[#allocation123_spill] sm:$0xff] %v18435_v53  ;;  %v4902_v9 = vadd.f32 %v21925_v61, %v4738_v40  ;;  %v21929_v48 = vld [vmem:[#allocation147_spill] sm:$0xff] }
 0x77e   : > { %6663 = vmatpush.bf16.msrb.mxu2 %v14122_v13  ;;  %v4564_v52 = vadd.f32 %v21929_v48, %v18060_v14  ;;  %v21930_v61 = vld [vmem:[#allocation83_spill] sm:$0xff]  ;;  %v14120_v14 = vld [vmem:[%s21093_s6 + $0x5e8] sm:$0xff]  ;;  %v21933_v48 = vld [vmem:[#allocation34_spill] sm:$0xff] }
 0x77f   : > { %v21932_v13 = vld [vmem:[#allocation159_spill] sm:$0xff] }
 0x780   : > { %v18423_v11 = vpop.f32.mrf.mxu2  ;;  %v4740_v53 = vadd.f32 %v21932_v13, %v4564_v52 }
 0x781   : > { %v5027_v59 = vpop.f32.mrf.mxu3 }
 0x782   : > { %v18426_v34 = vadd.f32 %v5027_v59, %v4901_v3  ;;  %v21926_v3 = vld [vmem:[#allocation89_spill] sm:$0xff]  ;;  %v18448_v24 = vpop.f32.mrf.mxu1 }
 0x783   : > { %21928 = vst [vmem:[#allocation39_spill] sm:$0xff] %v18448_v24 }
 0x784   : > { %6845 = vmatmul.bf16.gmra.mxu0 %v21651_v36  ;;  %v4739_v36 = vadd.f32 %v21927_v0, %v4563_v37  ;;  %v14121_v37 = vld [vmem:[%s21093_s6 + $0x5f0] sm:$0xff]  ;;  %v18458_v0 = vpop.f32.mrf.mxu0 }
 0x785   : > { %21931 = vst [vmem:[#allocation65_spill] sm:$0xff] %v18458_v0  ;;  %6664 = vmatpush.bf16.msrb.mxu2 %v14121_v37  ;;  %v21936_v0 = vld [vmem:[#allocation112_spill] sm:$0xff] }
 0x786   : > { %5675 = vmatmul.bf16.gmra.mxu3 %v21922_v16 }
 0x788   : > { %v18437_v44 = vpop.f32.mrf.mxu2 }
 0x789   : > { %v5030_v5 = vpop.f32.mrf.mxu3  ;;  %6665 = vmatpush.bf16.msrb.mxu2 %v14120_v14  ;;  %v21938_v14 = vld [vmem:[#allocation162_spill] sm:$0xff] }
 0x78a   : > { %v18440_v59 = vadd.f32 %v5030_v5, %v4902_v9  ;;  %v4903_v9 = vadd.f32 %v21930_v61, %v4739_v36  ;;  %v21934_v36 = vld [vmem:[#allocation103_spill] sm:$0xff]  ;;  %v18470_v24 = vpop.f32.mrf.mxu1 }
 0x78b   : > { %v4565_v61 = vadd.f32 %v21934_v36, %v18080_v56  ;;  %21935 = vst [vmem:[#allocation196_spill] sm:$0xff] %v18470_v24  ;;  %v21940_v24 = vld [vmem:[#allocation134_spill] sm:$0xff] }
 0x78c   : > { %5890 = vmatmul.bf16.gmra.mxu1 %v21926_v3  ;;  %v18480_v13 = vpop.f32.mrf.mxu0 }
 0x78d   : > { %6039 = vmatmul.bf16.gmra.mxu2 %v17859_v25  ;;  %21937 = vst [vmem:[#allocation91_spill] sm:$0xff] %v18480_v13  ;;  %v4741_v56 = vadd.f32 %v21938_v14, %v4565_v61 }
 0x790   : > { %v18452_v40 = vpop.f32.mrf.mxu2 }
 0x791   : > { %v5032_v5 = vpop.f32.mrf.mxu3 }
 0x792   : > { %v18460_v3 = vadd.f32 %v5032_v5, %v4903_v9  ;;  %v4904_v9 = vadd.f32 %v21936_v0, %v4740_v53  ;;  %v14118_v53 = vld [vmem:[%s21093_s6 + $0x5d8] sm:$0xff]  ;;  %v21939_v0 = vld [vmem:[#allocation150_spill] sm:$0xff] }
 0x793   : > { %v4566_v36 = vadd.f32 %v21939_v0, %v18100_v12  ;;  %v14116_v12 = vld [vmem:[%s21093_s6 + $0x5c8] sm:$0xff] }
 0x794   : > { %6850 = vmatmul.bf16.gmra.mxu0 %v21876_v8  ;;  %v14119_v8 = vld [vmem:[%s21093_s6 + $0x5e0] sm:$0xff]  ;;  %v21945_v0 = vld [vmem:[#allocation113_spill] sm:$0xff] }
 0x795   : > { %6666 = vmatpush.bf16.msrb.mxu2 %v14119_v8  ;;  %v14117_v8 = vld [vmem:[%s21093_s6 + $0x5d0] sm:$0xff] }
 0x796   : > { %5680 = vmatmul.bf16.gmra.mxu3 %v21933_v48 }
 0x798   : > { %v18473_v5 = vpop.f32.mrf.mxu2 }
 0x799   : > { %v5035_v37 = vpop.f32.mrf.mxu3  ;;  %6667 = vmatpush.bf16.msrb.mxu2 %v14118_v53  ;;  %v4742_v53 = vadd.f32 %v17880_v29, %v4566_v36  ;;  %v14115_v29 = vld [vmem:[%s21093_s6 + $0x5c0] sm:$0xff] }
 0x79a   : > { %v18478_v52 = vadd.f32 %v5035_v37, %v4904_v9  ;;  %v4905_v9 = vadd.f32 %v21940_v24, %v4741_v56  ;;  %v18505_v24 = vpop.f32.mrf.mxu0  ;;  %v21944_v56 = vld [vmem:[#allocation69_spill] sm:$0xff] }
 0x79b   : > { %21943 = vst [vmem:[#allocation109_spill] sm:$0xff] %v18505_v24 }
 0x79c   : > { %6501 = vmatmul.bf16.vlgmr.msrb.gmra.mxu1 %v21910_v57  ;;  %v18494_v57 = vpop.f32.mrf.mxu1 }
 0x79d   : > { %6044 = vmatmul.bf16.gmra.mxu2 %v17992_v43  ;;  %21941 = vst [vmem:[#allocation68_spill] sm:$0xff] %v18494_v57 }
 0x79e   : > { %6668 = vmatpush.bf16.msrb.mxu2 %v14117_v8  ;;  %v18512_v8 = vrot.slane %v21810_v33, 2 }
 0x7a0   : > { %v18498_v14 = vpop.f32.mrf.mxu2 }
 0x7a1   : > { %v5037_v37 = vpop.f32.mrf.mxu3  ;;  %21942 = vst [vmem:[#allocation199_spill] sm:$0xff] %v18498_v14  ;;  %v21956_v14 = vld [vmem:[#allocation23_spill] sm:$0xff] }
 0x7a2   : > { %v18496_v61 = vadd.f32 %v5037_v37, %v4905_v9  ;;  %6669 = vmatpush.bf16.msrb.mxu2 %v14116_v12  ;;  %v4567_v9 = vadd.f32 %v21945_v0, %v18112_v30  ;;  %v21946_v37 = vld [vmem:[#allocation101_spill] sm:$0xff]  ;;  %v18524_v12 = vsel %vm3397_vm2, %v17973_v45, %v18512_v8  ;;  %v21949_v0 = vld [vmem:[#allocation136_spill] sm:$0xff] }
 0x7a3   : > { %v4906_v13 = vadd.f32 %v21946_v37, %v4742_v53  ;;  %v18533_v37 = vpop.f32.mrf.mxu0 }
 0x7a4   : > { %6855 = vmatmul.bf16.gmra.mxu0 %v21890_v21  ;;  %v18519_v24 = vpop.f32.mrf.mxu1  ;;  %v4743_v30 = vadd.f32 %v17897_v51, %v4567_v9  ;;  %21950 = vst [vmem:[#allocation131_spill] sm:$0xff] %v18533_v37  ;;  %v21953_v51 = vld [vmem:[#allocation74_spill] sm:$0xff] }
 0x7a5   : > { %21947 = vst [vmem:[#allocation72_spill] sm:$0xff] %v18519_v24 }
 0x7a6   : > { %5685 = vmatmul.bf16.gmra.mxu3 %v21944_v56  ;;  %6670 = vmatpush.bf16.msrb.mxu2 %v14115_v29 }
 0x7a8   : > { %v18528_v53 = vpop.f32.mrf.mxu2 }
 0x7a9   : > { %v5040_v21 = vpop.f32.mrf.mxu3  ;;  %21948 = vst [vmem:[#allocation202_spill] sm:$0xff] %v18528_v53  ;;  %v21954_v53 = vld [vmem:[#allocation156_spill] sm:$0xff] }
 0x7aa   : > { %v18517_v36 = vadd.f32 %v5040_v21, %v4906_v13  ;;  %v4568_v13 = vadd.f32 %v21949_v0, %v18126_v26  ;;  %v21951_v21 = vld [vmem:[#allocation118_spill] sm:$0xff]  ;;  %v4569_v26 = vadd.f32 %v21954_v53, %v18140_v15  ;;  %v21955_v0 = vld [vmem:[#allocation140_spill] sm:$0xff] }
 0x7ab   : > { %v4907_v29 = vadd.f32 %v21951_v21, %v4743_v30  ;;  %v5939_v30 = vrot.slane %v21956_v14, 2 }
 0x7ac   : > { %6506 = vmatmul.bf16.gmra.mxu1 %v21922_v16  ;;  %v4744_v45 = vadd.f32 %v17914_v31, %v4568_v13  ;;  %v18540_v16 = vpop.f32.mrf.mxu1  ;;  %v21958_v13 = vld [vmem:[#allocation120_spill] sm:$0xff] }
 0x7ad   : > { %6049 = vmatmul.bf16.gmra.mxu2 %v18524_v12  ;;  %21952 = vst [vmem:[#allocation206_spill] sm:$0xff] %v18540_v16  ;;  %v5940_v31 = vsel %vm3397_vm2, %v18512_v8, %v5939_v30  ;;  %v4570_v15 = vadd.f32 %v21958_v13, %v18154_v32  ;;  %v21963_v30 = vld [vmem:[#allocation144_spill] sm:$0xff] }
 0x7ae   : > { %v4908_v37 = vadd.f32 %v21955_v0, %v4744_v45  ;;  %v21959_v45 = vld [vmem:[#allocation100_spill] sm:$0xff] }
 0x7b0   : > { %v18543_v9 = vpop.f32.mrf.mxu2 }
 0x7b1   : > { %v5042_v24 = vpop.f32.mrf.mxu3 }
 0x7b2   : > { %v18536_v57 = vadd.f32 %v5042_v24, %v4907_v29  ;;  %v18549_v24 = vpop.f32.mrf.mxu0 }
 0x7b3   : > { %21957 = vst [vmem:[#allocation60_spill] sm:$0xff] %v18549_v24 }
 0x7b4   : > { %6860 = vmatmul.bf16.gmra.mxu0 %v21903_v62  ;;  %v4745_v62 = vadd.f32 %v17934_v41, %v4569_v26  ;;  %v18559_v53 = vpop.f32.mrf.mxu1  ;;  %v21961_v41 = vld [vmem:[#allocation79_spill] sm:$0xff]  ;;  %v21962_v26 = vld [vmem:[#allocation114_spill] sm:$0xff] }
 0x7b5   : > { %v4571_v32 = vadd.f32 %v21962_v26, %v18168_v50 }
 0x7b6   : > { %5690 = vmatmul.bf16.gmra.mxu3 %v21953_v51  ;;  %v4909_v0 = vadd.f32 %v21959_v45, %v4745_v62 }
 0x7b8   : > { %v18562_v16 = vpop.f32.mrf.mxu2 }
 0x7b9   : > { %v5045_v21 = vpop.f32.mrf.mxu3 }
 0x7ba   : > { %v18551_v29 = vadd.f32 %v5045_v21, %v4908_v37  ;;  %v18566_v21 = vpop.f32.mrf.mxu0 }
 0x7bb   : > { %21960 = vst [vmem:[#allocation99_spill] sm:$0xff] %v18566_v21 }
 0x7bc   : > { %6511 = vmatmul.bf16.gmra.mxu1 %v21933_v48  ;;  %v4746_v48 = vadd.f32 %v17954_v60, %v4570_v15  ;;  %v18574_v62 = vpop.f32.mrf.mxu1  ;;  %v21965_v15 = vld [vmem:[#allocation117_spill] sm:$0xff] }
 0x7bd   : > { %6054 = vmatmul.bf16.gmra.mxu2 %v5940_v31  ;;  %v4572_v50 = vadd.f32 %v21965_v15, %v18182_v17  ;;  %v21971_v17 = vld [vmem:[#allocation130_spill] sm:$0xff] }
 0x7be   : > { %v4910_v31 = vadd.f32 %v21963_v30, %v4746_v48 }
 0x7c1   : > { %v5047_v24 = vpop.f32.mrf.mxu3 }
 0x7c2   : > { %v18564_v37 = vadd.f32 %v5047_v24, %v4909_v0  ;;  %v18578_v24 = vpop.f32.mrf.mxu2  ;;  %v18583_v60 = vpop.f32.mrf.mxu0  ;;  %v21966_v0 = vld [vmem:[#allocation36_spill] sm:$0xff] }
 0x7c3   : > { %21964 = vst [vmem:[#allocation30_spill] sm:$0xff] %v18583_v60 }
 0x7c4   : > { %6865 = vmatmul.bf16.gmra.mxu0 %v21712_v38  ;;  %v4747_v38 = vadd.f32 %v17977_v22, %v4571_v32  ;;  %v21968_v22 = vld [vmem:[#allocation87_spill] sm:$0xff] }
 0x7c6   : > { %5695 = vmatmul.bf16.gmra.mxu3 %v21961_v41  ;;  %v4911_v48 = vadd.f32 %v21966_v0, %v4747_v38 }
 0x7c9   : > { %v5050_v13 = vpop.f32.mrf.mxu3 }
 0x7ca   : > { %v18576_v45 = vadd.f32 %v5050_v13, %v4910_v31  ;;  %v18590_v31 = vpop.f32.mrf.mxu1  ;;  %v21967_v13 = vld [vmem:[#allocation41_spill] sm:$0xff]  ;;  %v18594_v21 = vpop.f32.mrf.mxu2 }
 0x7cb   : > { %v18599_v60 = vpop.f32.mrf.mxu0 }
 0x7cc   : > { %6516 = vmatmul.bf16.gmra.mxu1 %v21944_v56  ;;  %v4748_v56 = vadd.f32 %v21967_v13, %v4572_v50  ;;  %21970 = vst [vmem:[#allocation62_spill] sm:$0xff] %v18599_v60  ;;  %v21973_v13 = vld [vmem:[#allocation75_spill] sm:$0xff] }
 0x7cd   : > { %6671 = vmatmul.bf16.vlgmr.msrb.gmra.mxu2 %v21774_v19  ;;  %v21969_v19 = vld [vmem:[#allocation166_spill] sm:$0xff] }
 0x7ce   : > { %v4573_v32 = vadd.f32 %v21969_v19, %v18194_v18  ;;  %v4912_v38 = vadd.f32 %v21971_v17, %v4748_v56 }
 0x7d1   : > { %v5052_v26 = vpop.f32.mrf.mxu3 }
 0x7d2   : > { %v18588_v30 = vadd.f32 %v5052_v26, %v4911_v48  ;;  %v18607_v50 = vpop.f32.mrf.mxu1  ;;  %v18609_v48 = vpop.f32.mrf.mxu2  ;;  %v21972_v26 = vld [vmem:[#allocation121_spill] sm:$0xff] }
 0x7d3   : > { %v5224_v18 = vadd.f32 %v21972_v26, %v18217_v63  ;;  %v18614_v56 = vpop.f32.mrf.mxu0 }
 0x7d4   : > { %6870 = vmatmul.bf16.gmra.mxu0 %v17859_v25  ;;  %v4749_v25 = vadd.f32 %v18014_v23, %v4573_v32  ;;  %21974 = vst [vmem:[#allocation92_spill] sm:$0xff] %v18614_v56  ;;  %v21976_v32 = vld [vmem:[#allocation38_spill] sm:$0xff] }
 0x7d5   : > { %v5386_v23 = vadd.f32 %v18032_v27, %v5224_v18  ;;  %v5225_v63 = vadd.f32 %v21976_v32, %v18243_v2  ;;  %v14105_v27 = vld [vmem:[%s21093_s6 + $0x570] sm:$0xff] }
 0x7d6   : > { %5700 = vmatmul.bf16.gmra.mxu3 %v21968_v22  ;;  %v4913_v19 = vadd.f32 %v21973_v13, %v4749_v25  ;;  %v14104_v13 = vld [vmem:[%s21093_s6 + $0x568] sm:$0xff] }
 0x7d7   : > { %v5387_v2 = vadd.f32 %v18052_v42, %v5225_v63  ;;  %v14103_v42 = vld [vmem:[%s21093_s6 + $0x560] sm:$0xff]  ;;  %v21984_v63 = vld [vmem:[#allocation205_spill] sm:$0xff] }
 0x7d9   : > { %v5055_v15 = vpop.f32.mrf.mxu3 }
 0x7da   : > { %v18602_v0 = vadd.f32 %v5055_v15, %v4912_v38  ;;  %v18626_v38 = vpop.f32.mrf.mxu1  ;;  %v21978_v15 = vld [vmem:[#allocation106_spill] sm:$0xff] }
 0x7db   : > { %21977 = vst [vmem:[#allocation143_spill] sm:$0xff] %v18626_v38  ;;  %v5562_v25 = vadd.f32 %v21978_v15, %v5386_v23  ;;  %v18636_v18 = vpop.f32.mrf.mxu0 }
 0x7dc   : > { %6521 = vmatmul.bf16.gmra.mxu1 %v21953_v51  ;;  %v21975_v51 = vld [vmem:[#allocation185_spill] sm:$0xff]  ;;  %21979 = vst [vmem:[#allocation85_spill] sm:$0xff] %v18636_v18 }
 0x7dd   : > { %6676 = vmatmul.bf16.gmra.mxu2 %v21783_v39  ;;  %v14106_v39 = vld [vmem:[%s21093_s6 + $0x578] sm:$0xff] }
 0x7de   : > { %6329 = vmatpush.bf16.msrb.mxu3 %v14106_v39  ;;  %v21981_v39 = vld [vmem:[#allocation48_spill] sm:$0xff] }
 0x7df   : > { %v5563_v32 = vadd.f32 %v21981_v39, %v5387_v2  ;;  %v21985_v2 = vld [vmem:[#allocation155_spill] sm:$0xff] }
 0x7e1   : > { %v5057_v60 = vpop.f32.mrf.mxu3 }
 0x7e2   : > { %v18616_v17 = vadd.f32 %v5057_v60, %v4913_v19  ;;  %v18629_v60 = vpop.f32.mrf.mxu2  ;;  %6330 = vmatpush.bf16.msrb.mxu3 %v14105_v27  ;;  %v21980_v19 = vld [vmem:[#allocation125_spill] sm:$0xff]  ;;  %v14102_v27 = vld [vmem:[%s21093_s6 + $0x558] sm:$0xff] }
 0x7e3   : > { %v5226_v23 = vadd.f32 %v21980_v19, %v18269_v55  ;;  %v18658_v55 = vpop.f32.mrf.mxu0  ;;  %v21986_v19 = vld [vmem:[#allocation116_spill] sm:$0xff] }
 0x7e4   : > { %6875 = vmatmul.bf16.gmra.mxu0 %v17992_v43  ;;  %21983 = vst [vmem:[#allocation137_spill] sm:$0xff] %v18658_v55 }
 0x7e6   : > { %5705 = vmatmul.bf16.gmra.mxu3 %v21975_v51 }
 0x7e7   : > { %6331 = vmatpush.bf16.msrb.mxu3 %v14104_v13  ;;  %v5227_v13 = vadd.f32 %v21985_v2, %v18295_v10  ;;  %v14100_v10 = vld [vmem:[%s21093_s6 + $0x548] sm:$0xff]  ;;  %v21989_v2 = vld [vmem:[#allocation174_spill] sm:$0xff] }
 0x7e9   : > { %v5666_v26 = vpop.f32.mrf.mxu3 }
 0x7ea   : > { %v18631_v43 = vadd.f32 %v5666_v26, %v5562_v25  ;;  %v18647_v25 = vpop.f32.mrf.mxu1 }
 0x7eb   : > { %21982 = vst [vmem:[#allocation25_spill] sm:$0xff] %v18647_v25  ;;  %6332 = vmatpush.bf16.msrb.mxu3 %v14103_v42 }
 0x7ec   : > { %6526 = vmatmul.bf16.gmra.mxu1 %v21961_v41  ;;  %v5388_v41 = vadd.f32 %v18072_v54, %v5226_v23  ;;  %v14101_v54 = vld [vmem:[%s21093_s6 + $0x550] sm:$0xff]  ;;  %v5389_v23 = vadd.f32 %v18092_v46, %v5227_v13  ;;  %v18689_v13 = vrot.slane %v21810_v33, 1 }
 0x7ed   : > { %6681 = vmatmul.bf16.gmra.mxu2 %v21792_v49  ;;  %v18654_v49 = vpop.f32.mrf.mxu2 }
 0x7ee   : > { %v5564_v39 = vadd.f32 %v21986_v19, %v5388_v41  ;;  %v6773_v41 = vrot.slane %v21881_v7, 2 }
 0x7ef   : > { %6333 = vmatpush.bf16.msrb.mxu3 %v14102_v27  ;;  %v21988_v27 = vld [vmem:[#allocation172_spill] sm:$0xff] }
 0x7f0   : > { %v5228_v19 = vadd.f32 %v21989_v2, %v21988_v27  ;;  %v6774_v55 = vsel %vm3397_vm2, %v18512_v8, %v6773_v41  ;;  %v21992_v27 = vld [vmem:[#allocation168_spill] sm:$0xff] }
 0x7f1   : > { %v5668_v15 = vpop.f32.mrf.mxu3 }
 0x7f2   : > { %v18649_v26 = vadd.f32 %v5668_v15, %v5563_v32  ;;  %v5390_v2 = vadd.f32 %v21992_v27, %v5228_v19  ;;  %v21998_v19 = vld [vmem:[#allocation171_spill] sm:$0xff] }
 0x7f3   : > { %6334 = vmatpush.bf16.msrb.mxu3 %v14101_v54  ;;  %v21999_v27 = vld [vmem:[#allocation59_spill] sm:$0xff] }
 0x7f4   : > { %6880 = vmatmul.bf16.gmra.mxu0 %v18524_v12  ;;  %v18672_v12 = vpop.f32.mrf.mxu1 }
 0x7f5   : > { %21987 = vst [vmem:[#allocation146_spill] sm:$0xff] %v18672_v12  ;;  %v18676_v42 = vpop.f32.mrf.mxu2  ;;  %v22001_v12 = vld [vmem:[#allocation15_spill] sm:$0xff] }
 0x7f6   : > { %5710 = vmatmul.bf16.gmra.mxu3 %v21984_v63  ;;  %v5230_v25 = vadd.f32 %v22001_v12, %v18336_v35  ;;  %v22006_v12 = vld [vmem:[#allocation135_spill] sm:$0xff] }
 0x7f7   : > { %6335 = vmatpush.bf16.msrb.mxu3 %v14100_v10 }
 0x7f9   : > { %v5671_v32 = vpop.f32.mrf.mxu3 }
 0x7fa   : > { %v18667_v15 = vadd.f32 %v5671_v32, %v5564_v39  ;;  %v18685_v39 = vpop.f32.mrf.mxu0  ;;  %v21991_v32 = vld [vmem:[#allocation111_spill] sm:$0xff] }
 0x7fb   : > { %21990 = vst [vmem:[#allocation32_spill] sm:$0xff] %v18685_v39  ;;  %v21996_v39 = vld [vmem:[#allocation142_spill] sm:$0xff] }
 0x7fc   : > { %6531 = vmatmul.bf16.gmra.mxu1 %v21968_v22  ;;  %v5565_v22 = vadd.f32 %v21991_v32, %v5389_v23  ;;  %v21993_v23 = vld [vmem:[#allocation67_spill] sm:$0xff]  ;;  %v18702_v32 = vpop.f32.mrf.mxu1  ;;  %v5566_v18 = vadd.f32 %v21996_v39, %v5390_v2 }
 0x7fd   : > { %6686 = vmatmul.bf16.gmra.mxu2 %v21803_v58  ;;  %v14099_v58 = vld [vmem:[%s21093_s6 + $0x540] sm:$0xff]  ;;  %v5604_v10 = vsel %vm2977_vm5, %v21993_v23, %v18689_v13  ;;  %21994 = vst [vmem:[#allocation26_spill] sm:$0xff] %v18702_v32  ;;  %v18704_v33 = vpop.f32.mrf.mxu2  ;;  %v22000_v23 = vld [vmem:[#allocation95_spill] sm:$0xff] }
 0x7fe   : > { %6336 = vmatpush.bf16.msrb.mxu3 %v14099_v58  ;;  %v6775_v32 = vrot.slane %v22000_v23, 2 }
 0x801   : > { %v5673_v46 = vpop.f32.mrf.mxu3 }
 0x802   : > { %v18691_v54 = vadd.f32 %v5673_v46, %v5565_v22  ;;  %v21995_v22 = vld [vmem:[#allocation132_spill] sm:$0xff]  ;;  %v18709_v8 = vpop.f32.mrf.mxu0 }
 0x803   : > { %v5229_v46 = vadd.f32 %v21995_v22, %v18324_v6  ;;  %21997 = vst [vmem:[#allocation179_spill] sm:$0xff] %v18709_v8  ;;  %v22003_v6 = vld [vmem:[#allocation33_spill] sm:$0xff] }
 0x804   : > { %6885 = vmatmul.bf16.gmra.mxu0 %v6774_v55  ;;  %v18719_v38 = vpop.f32.mrf.mxu1 }
 0x805   : > { %v5391_v58 = vadd.f32 %v21998_v19, %v5229_v46  ;;  %22002 = vst [vmem:[#allocation35_spill] sm:$0xff] %v18719_v38  ;;  %v18722_v2 = vpop.f32.mrf.mxu2  ;;  %v22005_v19 = vld [vmem:[#allocation93_spill] sm:$0xff] }
 0x806   : > { %5715 = vmatmul.bf16.gmra.mxu3 %v5604_v10 }
 0x807   : > { %v5567_v39 = vadd.f32 %v22003_v6, %v5391_v58  ;;  %v5231_v58 = vadd.f32 %v22006_v12, %v18356_v1  ;;  %v22007_v6 = vld [vmem:[#allocation128_spill] sm:$0xff] }
 0x809   : > { %v5676_v56 = vpop.f32.mrf.mxu3 }
 0x80a   : > { %v18711_v55 = vadd.f32 %v5676_v56, %v5566_v18  ;;  %v5605_v56 = vrot.slane %v21956_v14, 1  ;;  %v18728_v46 = vpop.f32.mrf.mxu0 }
 0x80b   : > { %22004 = vst [vmem:[#allocation64_spill] sm:$0xff] %v18728_v46  ;;  %v22015_v46 = vld [vmem:[#allocation43_spill] sm:$0xff] }
 0x80c   : > { %6536 = vmatmul.bf16.gmra.mxu1 %v21975_v51  ;;  %v6776_v51 = vsel %vm3397_vm2, %v6773_v41, %v6775_v32  ;;  %v5606_v35 = vsel %vm2977_vm5, %v18689_v13, %v5605_v56  ;;  %v18736_v14 = vpop.f32.mrf.mxu1  ;;  %v22009_v32 = vld [vmem:[#allocation148_spill] sm:$0xff] }
 0x80d   : > { %6691 = vmatmul.bf16.gmra.mxu2 %v21999_v27  ;;  %v5392_v27 = vadd.f32 %v22005_v19, %v5230_v25  ;;  %22008 = vst [vmem:[#allocation122_spill] sm:$0xff] %v18736_v14  ;;  %v18740_v41 = vpop.f32.mrf.mxu2  ;;  %v5393_v25 = vadd.f32 %v22009_v32, %v5231_v58  ;;  %v22011_v56 = vld [vmem:[#allocation164_spill] sm:$0xff]  ;;  %v22012_v19 = vld [vmem:[#allocation149_spill] sm:$0xff] }
 0x80e   : > { %v22017_v32 = vld [vmem:[#allocation169_spill] sm:$0xff] }
 0x80f   : > { %v5568_v8 = vadd.f32 %v22007_v6, %v5392_v27  ;;  %v5569_v1 = vadd.f32 %v22012_v19, %v5393_v25  ;;  %v22018_v25 = vld [vmem:[#allocation37_spill] sm:$0xff]  ;;  %v22019_v19 = vld [vmem:[#allocation27_spill] sm:$0xff] }
 0x811   : > { %v5678_v22 = vpop.f32.mrf.mxu3 }
 0x812   : > { %v18725_v18 = vadd.f32 %v5678_v22, %v5567_v39  ;;  %v22010_v22 = vld [vmem:[#allocation24_spill] sm:$0xff] }
 0x814   : > { %6890 = vmatmul.bf16.gmra.mxu0 %v6776_v51  ;;  %v5232_v51 = vadd.f32 %v22011_v56, %v18376_v20  ;;  %v18750_v12 = vpop.f32.mrf.mxu1 }
 0x815   : > { %22013 = vst [vmem:[#allocation52_spill] sm:$0xff] %v18750_v12  ;;  %v18753_v6 = vpop.f32.mrf.mxu2 }
 0x816   : > { %5720 = vmatmul.bf16.gmra.mxu3 %v5606_v35 }
 0x819   : > { %v5681_v38 = vpop.f32.mrf.mxu3 }
 0x81a   : > { %v18738_v39 = vadd.f32 %v5681_v38, %v5568_v8  ;;  %v22014_v38 = vld [vmem:[#allocation151_spill] sm:$0xff] }
 0x81b   : > { %v5394_v8 = vadd.f32 %v22014_v38, %v5232_v51  ;;  %v22023_v38 = vld [vmem:[#allocation152_spill] sm:$0xff] }
 0x81c   : > { %6541 = vmatmul.bf16.gmra.mxu1 %v21984_v63  ;;  %v22016_v63 = vld [vmem:[#allocation90_spill] sm:$0xff] }
 0x81d   : > { %6696 = vmatmul.bf16.gmra.mxu2 %v22010_v22  ;;  %v5233_v58 = vadd.f32 %v22016_v63, %v18394_v47  ;;  %v5570_v22 = vadd.f32 %v22017_v32, %v5394_v8  ;;  %v18765_v51 = vpop.f32.mrf.mxu2  ;;  %v22024_v8 = vld [vmem:[#allocation201_spill] sm:$0xff]  ;;  %v22025_v32 = vld [vmem:[#allocation46_spill] sm:$0xff] }
 0x81e   : > { %22021 = vst [vmem:[#allocation71_spill] sm:$0xff] %v18765_v51 }
 0x81f   : > { %v5395_v56 = vadd.f32 %v22018_v25, %v5233_v58  ;;  %v22026_v58 = vld [vmem:[#allocation189_spill] sm:$0xff] }
 0x821   : > { %v5683_v35 = vpop.f32.mrf.mxu3  ;;  %v5571_v12 = vadd.f32 %v22023_v38, %v5395_v56  ;;  %v22031_v38 = vld [vmem:[#allocation145_spill] sm:$0xff] }
 0x822   : > { %v18748_v27 = vadd.f32 %v5683_v35, %v5569_v1  ;;  %v18763_v1 = vpop.f32.mrf.mxu1  ;;  %v22022_v35 = vld [vmem:[#allocation66_spill] sm:$0xff] }
 0x823   : > { %22020 = vst [vmem:[#allocation96_spill] sm:$0xff] %v18763_v1 }
 0x825   : > { %v18780_v51 = vpop.f32.mrf.mxu2 }
 0x826   : > { %6337 = vmatmul.bf16.vlgmr.msrb.gmra.mxu3 %v22015_v46  ;;  %v5234_v46 = vadd.f32 %v22022_v35, %v18414_v28  ;;  %22029 = vst [vmem:[#allocation70_spill] sm:$0xff] %v18780_v51  ;;  %v22030_v35 = vld [vmem:[#allocation40_spill] sm:$0xff]  ;;  %v6836_v51 = vpop.f32.mrf.mxu0 }
 0x829   : > { %v5686_v14 = vpop.f32.mrf.mxu3 }
 0x82a   : > { %v18759_v20 = vadd.f32 %v5686_v14, %v5570_v22  ;;  %v5396_v14 = vadd.f32 %v22024_v8, %v5234_v46  ;;  %v5235_v22 = vadd.f32 %v22026_v58, %v18426_v34  ;;  %v18777_v25 = vpop.f32.mrf.mxu1  ;;  %v5236_v34 = vadd.f32 %v22031_v38, %v18440_v59 }
 0x82b   : > { %22027 = vst [vmem:[#allocation88_spill] sm:$0xff] %v18777_v25 }
 0x82c   : > { %6546 = vmatmul.bf16.gmra.mxu1 %v5604_v10  ;;  %v6439_v10 = vrot.slane %v21881_v7, 1  ;;  %v5397_v46 = vadd.f32 %v22030_v35, %v5235_v22  ;;  %v6441_v22 = vrot.slane %v22000_v23, 1  ;;  %v22038_v35 = vld [vmem:[#allocation158_spill] sm:$0xff] }
 0x82d   : > { %6701 = vmatmul.bf16.gmra.mxu2 %v22019_v19  ;;  %v22028_v19 = vld [vmem:[#allocation76_spill] sm:$0xff] }
 0x82e   : > { %v5572_v1 = vadd.f32 %v22028_v19, %v5396_v14  ;;  %v22035_v19 = vld [vmem:[#allocation191_spill] sm:$0xff] }
 0x831   : > { %v5688_v47 = vpop.f32.mrf.mxu3 }
 0x832   : > { %v18770_v63 = vadd.f32 %v5688_v47, %v5571_v12  ;;  %v6440_v12 = vsel %vm2977_vm5, %v18689_v13, %v6439_v10  ;;  %v22032_v47 = vld [vmem:[#allocation129_spill] sm:$0xff]  ;;  %v18791_v14 = vpop.f32.mrf.mxu1 }
 0x833   : > { %v5573_v8 = vadd.f32 %v22032_v47, %v5397_v46  ;;  %22033 = vst [vmem:[#allocation81_spill] sm:$0xff] %v18791_v14  ;;  %v22036_v13 = vld [vmem:[#allocation49_spill] sm:$0xff]  ;;  %v6442_v47 = vsel %vm2977_vm5, %v6439_v10, %v6441_v22 }
 0x834   : > { %v22046_v10 = vld [vmem:[#allocation53_spill] sm:$0xff] }
 0x836   : > { %6342 = vmatmul.bf16.gmra.mxu3 %v22025_v32 }
 0x839   : > { %v5691_v28 = vpop.f32.mrf.mxu3 }
 0x83a   : > { %v18782_v56 = vadd.f32 %v5691_v28, %v5572_v1  ;;  %v18795_v1 = vpop.f32.mrf.mxu2  ;;  %v5398_v28 = vadd.f32 %v22035_v19, %v5236_v34  ;;  %v22042_v19 = vld [vmem:[#allocation17_spill] sm:$0xff] }
 0x83b   : > { %22034 = vst [vmem:[#allocation86_spill] sm:$0xff] %v18795_v1 }
 0x83c   : > { %6551 = vmatmul.bf16.gmra.mxu1 %v6440_v12  ;;  %v5574_v59 = vadd.f32 %v22038_v35, %v5398_v28 }
 0x83d   : > { %6706 = vmatmul.bf16.gmra.mxu2 %v21855_v4  ;;  %v22037_v4 = vld [vmem:[#allocation192_spill] sm:$0xff] }
 0x83e   : > { %v5237_v12 = vadd.f32 %v22037_v4, %v18460_v3  ;;  %v22044_v3 = vld [vmem:[#allocation178_spill] sm:$0xff] }
 0x841   : > { %v5693_v32 = vpop.f32.mrf.mxu3 }
 0x842   : > { %v18793_v58 = vadd.f32 %v5693_v32, %v5573_v8  ;;  %v18806_v8 = vpop.f32.mrf.mxu1  ;;  %v22040_v32 = vld [vmem:[#allocation194_spill] sm:$0xff]  ;;  %v18809_v34 = vpop.f32.mrf.mxu2 }
 0x843   : > { %22039 = vst [vmem:[#allocation21_spill] sm:$0xff] %v18806_v8  ;;  %v5399_v14 = vadd.f32 %v22040_v32, %v5237_v12  ;;  %v22048_v12 = vld [vmem:[#allocation198_spill] sm:$0xff]  ;;  %v22049_v32 = vld [vmem:[#allocation161_spill] sm:$0xff] }
 0x844   : > { %22041 = vst [vmem:[#allocation102_spill] sm:$0xff] %v18809_v34 }
 0x845   : > { %v5575_v4 = vadd.f32 %v22044_v3, %v5399_v14  ;;  %v22051_v14 = vld [vmem:[#allocation84_spill] sm:$0xff]  ;;  %v22052_v3 = vld [vmem:[#allocation154_spill] sm:$0xff] }
 0x846   : > { %6347 = vmatmul.bf16.gmra.mxu3 %v22036_v13  ;;  %v22043_v13 = vld [vmem:[#allocation195_spill] sm:$0xff] }
 0x847   : > { %v5238_v25 = vadd.f32 %v22043_v13, %v18478_v52  ;;  %v22050_v52 = vld [vmem:[#allocation200_spill] sm:$0xff] }
 0x849   : > { %v5696_v38 = vpop.f32.mrf.mxu3 }
 0x84a   : > { %v18803_v46 = vadd.f32 %v5696_v38, %v5574_v59  ;;  %v22045_v59 = vld [vmem:[#allocation197_spill] sm:$0xff]  ;;  %v18819_v22 = vpop.f32.mrf.mxu2 }
 0x84b   : > { %v5400_v38 = vadd.f32 %v22045_v59, %v5238_v25  ;;  %22047 = vst [vmem:[#allocation57_spill] sm:$0xff] %v18819_v22  ;;  %v22053_v25 = vld [vmem:[#allocation182_spill] sm:$0xff] }
 0x84c   : > { %6556 = vmatmul.bf16.gmra.mxu1 %v6442_v47  ;;  %v5239_v47 = vadd.f32 %v22048_v12, %v18496_v61  ;;  %v22055_v61 = vld [vmem:[#allocation176_spill] sm:$0xff] }
 0x84d   : > { %6711 = vmatmul.bf16.gmra.mxu2 %v22042_v19  ;;  %v5576_v8 = vadd.f32 %v22049_v32, %v5400_v38  ;;  %v22056_v38 = vshrl.u32 %v21881_v7, 16  ;;  %v22057_v32 = vshll.u32 %v21881_v7, 16  ;;  %v22064_v7 = vld [vmem:[#allocation188_spill] sm:$0xff] }
 0x84e   : > { %v5401_v13 = vadd.f32 %v22050_v52, %v5239_v47  ;;  %v22059_v52 = vld [vmem:[#allocation184_spill] sm:$0xff] }
 0x84f   : > { %v6604_v47 = vrot.slane %v22057_v32, 2  ;;  %v5242_v32 = vadd.f32 %v22064_v7, %v18551_v29 }
 0x851   : > { %v5698_v28 = vpop.f32.mrf.mxu3 }
 0x852   : > { %v18815_v35 = vadd.f32 %v5698_v28, %v5575_v4  ;;  %v5240_v4 = vadd.f32 %v22052_v3, %v18517_v36  ;;  %v5577_v28 = vadd.f32 %v22053_v25, %v5401_v13  ;;  %v18831_v59 = vpop.f32.mrf.mxu2  ;;  %v5241_v36 = vadd.f32 %v22059_v52, %v18536_v57 }
 0x853   : > { %22054 = vst [vmem:[#allocation115_spill] sm:$0xff] %v18831_v59  ;;  %v6607_v57 = vshrl.u32 %v22000_v23, 16 }
 0x854   : > { %v5402_v12 = vadd.f32 %v22055_v61, %v5240_v4  ;;  %v22062_v4 = vld [vmem:[#allocation19_spill] sm:$0xff]  ;;  %v22063_v61 = vld [vmem:[#allocation180_spill] sm:$0xff] }
 0x856   : > { %6352 = vmatmul.bf16.gmra.mxu3 %v22046_v10 }
 0x859   : > { %v5701_v19 = vpop.f32.mrf.mxu3 }
 0x85a   : > { %v18824_v34 = vadd.f32 %v5701_v19, %v5576_v8  ;;  %v6603_v8 = vrot.slane %v22056_v38, 1  ;;  %v22058_v19 = vld [vmem:[#allocation58_spill] sm:$0xff]  ;;  %v5403_v38 = vadd.f32 %v22063_v61, %v5241_v36  ;;  %v22072_v61 = vld [vmem:[#allocation141_spill] sm:$0xff] }
 0x85b   : > { %v22070_v36 = vld [vmem:[#allocation18_spill] sm:$0xff] }
 0x85c   : > { %v6605_v3 = vor.u32 %v6604_v47, %v6603_v8  ;;  %v22067_v47 = vld [vmem:[#allocation22_spill] sm:$0xff] }
 0x85d   : > { %6716 = vmatmul.bf16.gmra.mxu2 %v22051_v14  ;;  %v22060_v14 = vld [vmem:[#allocation138_spill] sm:$0xff]  ;;  %v5404_v52 = vadd.f32 %v22067_v47, %v5242_v32  ;;  %v22074_v32 = vld [vmem:[#allocation61_spill] sm:$0xff]  ;;  %v22075_v47 = vld [vmem:[#allocation167_spill] sm:$0xff] }
 0x85e   : > { %v5578_v13 = vadd.f32 %v22060_v14, %v5402_v12  ;;  %v6609_v14 = vrot.slane %v6607_v57, 1 }
 0x861   : > { %v5703_v10 = vpop.f32.mrf.mxu3 }
 0x862   : > { %v18833_v22 = vadd.f32 %v5703_v10, %v5577_v28  ;;  %v18846_v28 = vpop.f32.mrf.mxu2  ;;  %v6606_v10 = vsel %vm3173_vm4, %v22062_v4, %v6605_v3 }
 0x863   : > { %22061 = vst [vmem:[#allocation77_spill] sm:$0xff] %v18846_v28 }
 0x866   : > { %6357 = vmatmul.bf16.gmra.mxu3 %v22058_v19  ;;  %v22065_v19 = vld [vmem:[#allocation186_spill] sm:$0xff] }
 0x867   : > { %v5579_v1 = vadd.f32 %v22065_v19, %v5403_v38  ;;  %v5580_v38 = vadd.f32 %v22072_v61, %v5404_v52  ;;  %v22078_v52 = vld [vmem:[#allocation80_spill] sm:$0xff] }
 0x869   : > { %v5706_v25 = vpop.f32.mrf.mxu3 }
 0x86a   : > { %v18844_v59 = vadd.f32 %v5706_v25, %v5578_v13  ;;  %v22068_v13 = vshll.u32 %v22000_v23, 16  ;;  %v18860_v4 = vpop.f32.mrf.mxu2 }
 0x86b   : > { %22069 = vst [vmem:[#allocation51_spill] sm:$0xff] %v18860_v4 }
 0x86c   : > { %v6610_v25 = vrot.slane %v22068_v13, 2  ;;  %v5244_v13 = vadd.f32 %v22075_v47, %v18576_v45  ;;  %v6838_v45 = vpop.f32.mrf.mxu0 }
 0x86d   : > { %6721 = vmatmul.bf16.gmra.mxu2 %v6606_v10  ;;  %v22071_v10 = vld [vmem:[#allocation163_spill] sm:$0xff] }
 0x86e   : > { %v5243_v29 = vadd.f32 %v22071_v10, %v18564_v37  ;;  %v6611_v7 = vor.u32 %v6610_v25, %v6609_v14  ;;  %v5406_v14 = vadd.f32 %v22078_v52, %v5244_v13  ;;  %v22079_v25 = vld [vmem:[#allocation20_spill] sm:$0xff] }
 0x870   : > { %v5405_v57 = vadd.f32 %v22074_v32, %v5243_v29 }
 0x871   : > { %v5708_v12 = vpop.f32.mrf.mxu3 }
 0x872   : > { %v18855_v8 = vadd.f32 %v5708_v12, %v5579_v1  ;;  %v6612_v1 = vsel %vm3173_vm4, %v6605_v3, %v6611_v7  ;;  %v6502_v12 = vpop.f32.mrf.mxu1  ;;  %v6672_v23 = vpop.f32.mrf.mxu2  ;;  %v22080_v3 = vld [vmem:[#allocation47_spill] sm:$0xff] }
 0x873   : > { %v5245_v29 = vadd.f32 %v22080_v3, %v18588_v30  ;;  %v22087_v3 = vld [vmem:[#allocation165_spill] sm:$0xff] }
 0x874   : > { %22066 = vst [vmem:[#allocation45_spill] sm:$0xff] %v18855_v8 }
 0x876   : > { %6362 = vmatmul.bf16.gmra.mxu3 %v22070_v36  ;;  %v22076_v36 = vld [vmem:[#allocation16_spill] sm:$0xff] }
 0x877   : > { %v5581_v4 = vadd.f32 %v22076_v36, %v5405_v57  ;;  %v22083_v57 = vld [vmem:[#allocation190_spill] sm:$0xff] }
 0x878   : > { %v5407_v47 = vadd.f32 %v22083_v57, %v5245_v29 }
 0x879   : > { %v5711_v19 = vpop.f32.mrf.mxu3 }
 0x87a   : > { %v18866_v28 = vadd.f32 %v5711_v19, %v5580_v38  ;;  %v6504_v61 = vpop.f32.mrf.mxu1  ;;  %v22081_v38 = vld [vmem:[#allocation173_spill] sm:$0xff]  ;;  %v6674_v19 = vpop.f32.mrf.mxu2 }
 0x87b   : > { %v5582_v7 = vadd.f32 %v22081_v38, %v5406_v14  ;;  %v6841_v14 = vpop.f32.mrf.mxu0  ;;  %v22088_v38 = vld [vmem:[#allocation56_spill] sm:$0xff] }
 0x87c   : > { %22073 = vst [vmem:[#allocation175_spill] sm:$0xff] %v18866_v28 }
 0x87d   : > { %6726 = vmatmul.bf16.gmra.mxu2 %v6612_v1 }
 0x881   : > { %v5713_v37 = vpop.f32.mrf.mxu3 }
 0x882   : > { %v18873_v10 = vadd.f32 %v5713_v37, %v5581_v4  ;;  %v22084_v4 = vld [vmem:[#allocation50_spill] sm:$0xff]  ;;  %v22085_v37 = vld [vmem:[#allocation177_spill] sm:$0xff]  ;;  %v6507_v52 = vpop.f32.mrf.mxu1  ;;  %v6677_v28 = vpop.f32.mrf.mxu2 }
 0x883   : > { %v5246_v36 = vadd.f32 %v22084_v4, %v18602_v0  ;;  %v5583_v13 = vadd.f32 %v22085_v37, %v5407_v47  ;;  %v18898_v37 = vpop.f32.mrf.mxu0 }
 0x884   : > { %22077 = vst [vmem:[#allocation28_spill] sm:$0xff] %v18873_v10 }
 0x885   : > { %v5408_v30 = vadd.f32 %v18423_v11, %v5246_v36  ;;  %v22091_v11 = vld [vmem:[#allocation54_spill] sm:$0xff] }
 0x886   : > { %6367 = vmatmul.bf16.gmra.mxu3 %v22079_v25  ;;  %v5896_v36 = vadd.f32 %v22091_v11, %v18631_v43 }
 0x889   : > { %v5716_v1 = vpop.f32.mrf.mxu3 }
 0x88a   : > { %v18880_v32 = vadd.f32 %v5716_v1, %v5582_v7  ;;  %v5247_v7 = vadd.f32 %v22088_v38, %v18616_v17  ;;  %v22089_v1 = vld [vmem:[#allocation181_spill] sm:$0xff]  ;;  %v6509_v0 = vpop.f32.mrf.mxu1  ;;  %v18896_v4 = vpop.f32.mrf.mxu2  ;;  %v6060_v17 = vadd.f32 %v18452_v40, %v5896_v36  ;;  %v22094_v38 = vld [vmem:[#allocation31_spill] sm:$0xff]  ;;  %v22097_v36 = vld [vmem:[#allocation104_spill] sm:$0xff] }
 0x88b   : > { %v5584_v29 = vadd.f32 %v22089_v1, %v5408_v30 }
 0x88c   : > { %22082 = vst [vmem:[#allocation110_spill] sm:$0xff] %v18880_v32  ;;  %v5409_v47 = vadd.f32 %v18437_v44, %v5247_v7  ;;  %v22095_v44 = vld [vmem:[#allocation82_spill] sm:$0xff] }
 0x88d   : > { %v5897_v7 = vadd.f32 %v22095_v44, %v18649_v26  ;;  %v18924_v26 = vld [vmem:[%s21094_s7] ss:$0 sm:$0xff] }
 0x891   : > { %v5718_v25 = vpop.f32.mrf.mxu3 }
 0x892   : > { %v18886_v10 = vadd.f32 %v5718_v25, %v5583_v13  ;;  %v22092_v13 = vld [vmem:[#allocation157_spill] sm:$0xff]  ;;  %v18906_v30 = vpop.f32.mrf.mxu1  ;;  %v18909_v1 = vpop.f32.mrf.mxu2 }
 0x893   : > { %v5585_v25 = vadd.f32 %v22092_v13, %v5409_v47  ;;  %v6061_v13 = vadd.f32 %v18473_v5, %v5897_v7  ;;  %v22099_v7 = vld [vmem:[#allocation199_spill] sm:$0xff] }
 0x894   : > { %22086 = vst [vmem:[#allocation14_spill] sm:$0xff] %v18886_v10 }
 0x896   : > { %6372 = vmatmul.bf16.gmra.mxu3 %v22087_v3 }
 0x899   : > { %v5721_v57 = vpop.f32.mrf.mxu3 }
 0x89a   : > { %v18893_v32 = vadd.f32 %v5721_v57, %v5584_v29  ;;  %v22096_v29 = vld [vmem:[#allocation160_spill] sm:$0xff]  ;;  %v18917_v40 = vpop.f32.mrf.mxu1 }
 0x89b   : > { %v6222_v57 = vadd.f32 %v22096_v29, %v6060_v17  ;;  %v22098_v17 = vld [vmem:[#allocation44_spill] sm:$0xff]  ;;  %v18927_v29 = vpop.f32.mrf.mxu2 }
 0x89c   : > { %22090 = vst [vmem:[#allocation97_spill] sm:$0xff] %v18893_v32  ;;  %v18914_v32 = vpop.f32.mrf.mxu0  ;;  %v6223_v44 = vadd.f32 %v22098_v17, %v6061_v13  ;;  %v22102_v13 = vld [vmem:[#allocation170_spill] sm:$0xff] }
 0x8a1   : > { %v5723_v3 = vpop.f32.mrf.mxu3 }
 0x8a2   : > { %v18903_v10 = vadd.f32 %v5723_v3, %v5585_v25  ;;  %v5898_v3 = vadd.f32 %v22097_v36, %v18667_v15 }
 0x8a4   : > { %22093 = vst [vmem:[#allocation119_spill] sm:$0xff] %v18903_v10 }
 0x8a6   : > { %6377 = vmatmul.bf16.gmra.mxu3 %v22094_v38 }
 0x8a9   : > { %v6338_v43 = vpop.f32.mrf.mxu3 }
 0x8aa   : > { %v6398_v47 = vadd.f32 %v6338_v43, %v6222_v57  ;;  %v18929_v43 = vpop.f32.mrf.mxu0 }
 0x8ac   : > { %v6562_v11 = vadd.f32 %v6502_v12, %v6398_v47  ;;  %v6062_v47 = vadd.f32 %v22099_v7, %v5898_v3 }
 0x8ae   : > { %v6732_v25 = vadd.f32 %v6672_v23, %v6562_v11  ;;  %v22101_v11 = vld [vmem:[#allocation193_spill] sm:$0xff]  ;;  %v6224_v17 = vadd.f32 %v22102_v13, %v6062_v47 }
 0x8b0   : > { %v6896_v38 = vadd.f32 %v6836_v51, %v6732_v25  ;;  %v22100_v51 = vld [vmem:[#allocation124_spill] sm:$0xff]  ;;  %v5899_v25 = vadd.f32 %v22101_v11, %v18691_v54  ;;  %v22104_v11 = vld [vmem:[#allocation203_spill] sm:$0xff] }
 0x8b1   : > { %v6340_v57 = vpop.f32.mrf.mxu3 }
 0x8b2   : > { %v6399_v12 = vadd.f32 %v6340_v57, %v6223_v44  ;;  %v6924_v5 = vadd.f32 %v18924_v26, %v6896_v38  ;;  %v18940_v44 = vld [vmem:[%s21095_s8] ss:$0 sm:$0xff]  ;;  %v18942_v57 = vpop.f32.mrf.mxu1  ;;  %v18945_v38 = vpop.f32.mrf.mxu2 }
 0x8b3   : > { %v18951_v47 = vpop.f32.mrf.mxu0 }
 0x8b4   : > { %v6563_v23 = vadd.f32 %v6504_v61, %v6399_v12  ;;  %v6948_v36 = vmax.f32 %v6924_v5, 0.0  ;;  %v22103_v12 = vld [vmem:[#allocation202_spill] sm:$0xff]  ;;  %v18948_v5 = vld [vmem:[#allocation2] ss:$0 sm:$0xff] }
 0x8b6   : > { %v6733_v15 = vadd.f32 %v6674_v19, %v6563_v23  ;;  %6382 = vmatmul.bf16.gmra.mxu3 %v22100_v51  ;;  %v6063_v23 = vadd.f32 %v22103_v12, %v5899_v25  ;;  %v6976_v7 = vmul.f32 %v18940_v44, %v6948_v36 }
 0x8b8   : > { %v6897_v10 = vadd.f32 %v6838_v45, %v6733_v15  ;;  %v6225_v13 = vadd.f32 %v22104_v11, %v6063_v23  ;;  %v18958_v8 = vadd.f32 %v18948_v5, %v6976_v7 }
 0x8b9   : > { %v6343_v61 = vpop.f32.mrf.mxu3 }
 0x8ba   : > { %v6925_v3 = vadd.f32 %v18924_v26, %v6897_v10  ;;  %v6400_v19 = vadd.f32 %v6343_v61, %v6224_v17  ;;  %v22105_v10 = vld [vmem:[#allocation39_spill] sm:$0xff] }
 0x8bb   : > { %v5900_v17 = vadd.f32 %v22105_v10, %v18711_v55  ;;  %v18969_v55 = vpop.f32.mrf.mxu2 }
 0x8bc   : > { %v6564_v54 = vadd.f32 %v6507_v52, %v6400_v19  ;;  %v6949_v45 = vmax.f32 %v6925_v3, 0.0 }
 0x8bd   : > { %v6064_v23 = vadd.f32 %v18543_v9, %v5900_v17 }
 0x8be   : > { %v6734_v15 = vadd.f32 %v6677_v28, %v6564_v54  ;;  %v6977_v51 = vmul.f32 %v18940_v44, %v6949_v45  ;;  %v18965_v28 = vpop.f32.mrf.mxu1  ;;  %v22106_v54 = vld [vmem:[#allocation94_spill] sm:$0xff]  ;;  %v22107_v45 = vld [vmem:[#allocation196_spill] sm:$0xff] }
 0x8bf   : > { %v5901_v7 = vadd.f32 %v22107_v45, %v18725_v18 }
 0x8c0   : > { %v6898_v61 = vadd.f32 %v6841_v14, %v6734_v15  ;;  %v18961_v52 = vadd.f32 %v18948_v5, %v6977_v51  ;;  %v6853_v15 = vpop.f32.mrf.mxu0 }
 0x8c1   : > { %v6345_v25 = vpop.f32.mrf.mxu3  ;;  %v6065_v9 = vadd.f32 %v18562_v16, %v5901_v7 }
 0x8c2   : > { %v6401_v3 = vadd.f32 %v6345_v25, %v6225_v13  ;;  %v7050_v36 = vpack.c.bf16 %v18961_v52, %v18958_v8  ;;  %v6926_v19 = vadd.f32 %v18924_v26, %v6898_v61  ;;  %v22108_v13 = vld [vmem:[#allocation73_spill] sm:$0xff] }
 0x8c3   : > { %v6226_v10 = vadd.f32 %v22108_v13, %v6064_v23  ;;  %v22110_v23 = vld [vmem:[#allocation68_spill] sm:$0xff]  ;;  %v14132_v8 = vld [vmem:[%s21097_s10 + $0x4] sm:$0xf0] }
 0x8c4   : > { %v6565_v12 = vadd.f32 %v6509_v0, %v6401_v3  ;;  %v6950_v51 = vmax.f32 %v6926_v19, 0.0  ;;  %v5902_v45 = vadd.f32 %v22110_v23, %v18738_v39 }
 0x8c6   : > { %v6735_v14 = vadd.f32 %v18896_v4, %v6565_v12  ;;  %6387 = vmatmul.bf16.gmra.mxu3 %v22106_v54  ;;  %v6978_v3 = vmul.f32 %v18940_v44, %v6950_v51  ;;  %v6522_v12 = vpop.f32.mrf.mxu1  ;;  %v6692_v54 = vpop.f32.mrf.mxu2  ;;  %v6066_v39 = vadd.f32 %v18578_v24, %v5902_v45 }
 0x8c8   : > { %v6899_v11 = vadd.f32 %v18898_v37, %v6735_v14  ;;  %v22109_v37 = vld [vmem:[#allocation183_spill] sm:$0xff]  ;;  %v18988_v16 = vadd.f32 %v18948_v5, %v6978_v3  ;;  %v6856_v7 = vpop.f32.mrf.mxu0 }
 0x8c9   : > { %v6348_v25 = vpop.f32.mrf.mxu3  ;;  %v6227_v14 = vadd.f32 %v22109_v37, %v6065_v9 }
 0x8ca   : > { %v6927_v0 = vadd.f32 %v18924_v26, %v6899_v11  ;;  %v6402_v61 = vadd.f32 %v6348_v25, %v6226_v10 }
 0x8cc   : > { %v6566_v17 = vadd.f32 %v18906_v30, %v6402_v61  ;;  %v6951_v4 = vmax.f32 %v6927_v0, 0.0  ;;  %v22111_v0 = vld [vmem:[#allocation98_spill] sm:$0xff]  ;;  %v22112_v61 = vld [vmem:[#allocation72_spill] sm:$0xff] }
 0x8cd   : > { %v5903_v9 = vadd.f32 %v22112_v61, %v18748_v27 }
 0x8ce   : > { %v6736_v18 = vadd.f32 %v18909_v1, %v6566_v17  ;;  %v6979_v19 = vmul.f32 %v18940_v44, %v6951_v4  ;;  %v6524_v17 = vpop.f32.mrf.mxu1  ;;  %v6694_v37 = vpop.f32.mrf.mxu2 }
 0x8cf   : > { %v6067_v24 = vadd.f32 %v18594_v21, %v5903_v9 }
 0x8d0   : > { %v6900_v11 = vadd.f32 %v18914_v32, %v6736_v18  ;;  %v18991_v30 = vadd.f32 %v18948_v5, %v6979_v19  ;;  %v22113_v18 = vld [vmem:[#allocation187_spill] sm:$0xff] }
 0x8d1   : > { %v6350_v51 = vpop.f32.mrf.mxu3  ;;  %v6228_v19 = vadd.f32 %v22113_v18, %v6066_v39 }
 0x8d2   : > { %v6403_v13 = vadd.f32 %v6350_v51, %v6227_v14  ;;  %v7051_v1 = vpack.c.bf16 %v18991_v30, %v18988_v16  ;;  %v6928_v10 = vadd.f32 %v18924_v26, %v6900_v11  ;;  %v6858_v11 = vpop.f32.mrf.mxu0 }
 0x8d4   : > { %v6567_v25 = vadd.f32 %v18917_v40, %v6403_v13  ;;  %v6952_v4 = vmax.f32 %v6928_v10, 0.0 }
 0x8d6   : > { %v6737_v32 = vadd.f32 %v18927_v29, %v6567_v25  ;;  %6392 = vmatmul.bf16.gmra.mxu3 %v22111_v0  ;;  %v6980_v51 = vmul.f32 %v18940_v44, %v6952_v4  ;;  %v22115_v25 = vld [vmem:[#allocation206_spill] sm:$0xff]  ;;  %v6697_v4 = vpop.f32.mrf.mxu2 }
 0x8d7   : > { %v5904_v39 = vadd.f32 %v22115_v25, %v18759_v20 }
 0x8d8   : > { %v6901_v3 = vadd.f32 %v18929_v43, %v6737_v32  ;;  %v22114_v43 = vld [vmem:[#allocation63_spill] sm:$0xff]  ;;  %v19015_v0 = vadd.f32 %v18948_v5, %v6980_v51 }
 0x8d9   : > { %v6353_v14 = vpop.f32.mrf.mxu3  ;;  %v6229_v10 = vadd.f32 %v22114_v43, %v6067_v24  ;;  %v6068_v20 = vadd.f32 %v18609_v48, %v5904_v39  ;;  %v22116_v24 = vld [vmem:[#allocation204_spill] sm:$0xff] }
 0x8da   : > { %v6929_v23 = vadd.f32 %v18924_v26, %v6901_v3  ;;  %v6404_v40 = vadd.f32 %v6353_v14, %v6228_v19  ;;  %v5905_v14 = vadd.f32 %v18559_v53, %v18770_v63  ;;  %v22117_v63 = vld [vmem:[#allocation123_spill] sm:$0xff] }
 0x8dc   : > { %v6568_v29 = vadd.f32 %v18942_v57, %v6404_v40  ;;  %v6953_v45 = vmax.f32 %v6929_v23, 0.0  ;;  %v6527_v57 = vpop.f32.mrf.mxu1  ;;  %v6069_v43 = vadd.f32 %v18629_v60, %v5905_v14 }
 0x8de   : > { %v6738_v27 = vadd.f32 %v18945_v38, %v6568_v29  ;;  %v6981_v13 = vmul.f32 %v18940_v44, %v6953_v45  ;;  %v6230_v29 = vadd.f32 %v22116_v24, %v6068_v20  ;;  %v6699_v25 = vpop.f32.mrf.mxu2  ;;  %v22118_v24 = vld [vmem:[#allocation65_spill] sm:$0xff] }
 0x8e0   : > { %v6902_v32 = vadd.f32 %v18951_v47, %v6738_v27  ;;  %v19018_v21 = vadd.f32 %v18948_v5, %v6981_v13  ;;  %v6861_v47 = vpop.f32.mrf.mxu0 }
 0x8e1   : > { %v6355_v61 = vpop.f32.mrf.mxu3 }
 0x8e2   : > { %v6405_v9 = vadd.f32 %v6355_v61, %v6229_v10  ;;  %v7052_v38 = vpack.c.bf16 %v19018_v21, %v19015_v0  ;;  %v6930_v3 = vadd.f32 %v18924_v26, %v6902_v32  ;;  %v5906_v32 = vadd.f32 %v18574_v62, %v18782_v56 }
 0x8e3   : > { %v5907_v62 = vadd.f32 %v18590_v31, %v18793_v58  ;;  %v22119_v58 = vld [vmem:[#allocation91_spill] sm:$0xff] }
 0x8e4   : > { %v6569_v18 = vadd.f32 %v18965_v28, %v6405_v9  ;;  %v6954_v23 = vmax.f32 %v6930_v3, 0.0  ;;  %v6529_v13 = vpop.f32.mrf.mxu1 }
 0x8e6   : > { %v6739_v19 = vadd.f32 %v18969_v55, %v6569_v18  ;;  %v6982_v48 = vmul.f32 %v18940_v44, %v6954_v23  ;;  %v6702_v56 = vpop.f32.mrf.mxu2 }
 0x8e8   : > { %v6903_v40 = vadd.f32 %v6853_v15, %v6739_v19  ;;  %v6863_v53 = vpop.f32.mrf.mxu0  ;;  %v6231_v15 = vadd.f32 %v22117_v63, %v6069_v43  ;;  %v19037_v9 = vadd.f32 %v18948_v5, %v6982_v48  ;;  %v6070_v19 = vadd.f32 %v18654_v49, %v5906_v32 }
 0x8e9   : > { %v6358_v45 = vpop.f32.mrf.mxu3 }
 0x8ea   : > { %v6931_v51 = vadd.f32 %v18924_v26, %v6903_v40  ;;  %v6406_v27 = vadd.f32 %v6358_v45, %v6230_v29  ;;  %v6232_v29 = vadd.f32 %v22118_v24, %v6070_v19 }
 0x8ec   : > { %v6570_v28 = vadd.f32 %v6522_v12, %v6406_v27  ;;  %v6955_v10 = vmax.f32 %v6931_v51, 0.0  ;;  %v6532_v14 = vpop.f32.mrf.mxu1 }
 0x8ee   : > { %v6740_v55 = vadd.f32 %v6692_v54, %v6570_v28  ;;  %v6983_v39 = vmul.f32 %v18940_v44, %v6955_v10  ;;  %v6071_v28 = vadd.f32 %v18676_v42, %v5907_v62  ;;  %v6704_v42 = vpop.f32.mrf.mxu2 }
 0x8f0   : > { %v6904_v61 = vadd.f32 %v6856_v7, %v6740_v55  ;;  %v19040_v60 = vadd.f32 %v18948_v5, %v6983_v39  ;;  %v6866_v45 = vpop.f32.mrf.mxu0  ;;  %v6233_v55 = vadd.f32 %v22119_v58, %v6071_v28 }
 0x8f1   : > { %v6360_v12 = vpop.f32.mrf.mxu3 }
 0x8f2   : > { %v6407_v3 = vadd.f32 %v6360_v12, %v6231_v15  ;;  %v7053_v54 = vpack.c.bf16 %v19040_v60, %v19037_v9  ;;  %v6932_v18 = vadd.f32 %v18924_v26, %v6904_v61 }
 0x8f4   : > { %v6571_v20 = vadd.f32 %v6524_v17, %v6407_v3  ;;  %v6956_v7 = vmax.f32 %v6932_v18, 0.0  ;;  %v6534_v31 = vpop.f32.mrf.mxu1 }
 0x8f6   : > { %v6741_v23 = vadd.f32 %v6694_v37, %v6571_v20  ;;  %v6984_v49 = vmul.f32 %v18940_v44, %v6956_v7 }
 0x8f8   : > { %v6905_v40 = vadd.f32 %v6858_v11, %v6741_v23  ;;  %v5908_v11 = vadd.f32 %v18607_v50, %v18803_v46  ;;  %v19057_v63 = vadd.f32 %v18948_v5, %v6984_v49  ;;  %v6868_v61 = vpop.f32.mrf.mxu0  ;;  %v22120_v46 = vld [vmem:[#allocation143_spill] sm:$0xff]  ;;  %v22121_v23 = vld [vmem:[#allocation109_spill] sm:$0xff] }
 0x8f9   : > { %v6363_v51 = vpop.f32.mrf.mxu3 }
 0x8fa   : > { %v6933_v27 = vadd.f32 %v18924_v26, %v6905_v40  ;;  %v6408_v43 = vadd.f32 %v6363_v51, %v6232_v29  ;;  %v6072_v18 = vadd.f32 %v18704_v33, %v5908_v11  ;;  %v6707_v51 = vpop.f32.mrf.mxu2 }
 0x8fc   : > { %v6572_v17 = vadd.f32 %v6527_v57, %v6408_v43  ;;  %v6957_v10 = vmax.f32 %v6933_v27, 0.0  ;;  %v6234_v62 = vadd.f32 %v22121_v23, %v6072_v18  ;;  %v6537_v7 = vpop.f32.mrf.mxu1 }
 0x8fe   : > { %v6742_v37 = vadd.f32 %v6697_v4, %v6572_v17  ;;  %v6985_v48 = vmul.f32 %v18940_v44, %v6957_v10  ;;  %v22122_v17 = vld [vmem:[#allocation131_spill] sm:$0xff]  ;;  %v22123_v10 = vld [vmem:[#allocation25_spill] sm:$0xff] }
 0x8ff   : > { %v5910_v49 = vadd.f32 %v22123_v10, %v18824_v34 }
 0x900   : > { %v6906_v39 = vadd.f32 %v6861_v47, %v6742_v37  ;;  %v19060_v15 = vadd.f32 %v18948_v5, %v6985_v48  ;;  %v5909_v47 = vadd.f32 %v22120_v46, %v18815_v35  ;;  %v22125_v46 = vld [vmem:[#allocation60_spill] sm:$0xff] }
 0x901   : > { %v6365_v57 = vpop.f32.mrf.mxu3 }
 0x902   : > { %v6409_v32 = vadd.f32 %v6365_v57, %v6233_v55  ;;  %v7054_v4 = vpack.c.bf16 %v19060_v15, %v19057_v63  ;;  %v6934_v12 = vadd.f32 %v18924_v26, %v6906_v39  ;;  %v6073_v27 = vadd.f32 %v18722_v2, %v5909_v47  ;;  %v22144_v63 = vld [vmem:[#allocation57_spill] sm:$0xff] }
 0x903   : > { %v6074_v57 = vadd.f32 %v18740_v41, %v5910_v49  ;;  %v22128_v49 = vld [vmem:[#allocation71_spill] sm:$0xff] }
 0x904   : > { %v6573_v3 = vadd.f32 %v6529_v13, %v6409_v32  ;;  %v6958_v20 = vmax.f32 %v6934_v12, 0.0  ;;  %v6709_v32 = vpop.f32.mrf.mxu2  ;;  %v22124_v12 = vld [vmem:[#allocation146_spill] sm:$0xff] }
 0x905   : > { %v6236_v47 = vadd.f32 %v22125_v46, %v6074_v57 }
 0x906   : > { %v6743_v50 = vadd.f32 %v6699_v25, %v6573_v3  ;;  %v6986_v33 = vmul.f32 %v18940_v44, %v6958_v20  ;;  %v6871_v25 = vpop.f32.mrf.mxu0  ;;  %v5911_v3 = vadd.f32 %v22124_v12, %v18833_v22  ;;  %v22126_v22 = vld [vmem:[#allocation99_spill] sm:$0xff] }
 0x908   : > { %v6907_v19 = vadd.f32 %v6863_v53, %v6743_v50  ;;  %v6235_v53 = vadd.f32 %v22122_v17, %v6073_v27  ;;  %v19077_v48 = vadd.f32 %v18948_v5, %v6986_v33 }
 0x909   : > { %v6368_v40 = vpop.f32.mrf.mxu3 }
 0x90a   : > { %v6935_v24 = vadd.f32 %v18924_v26, %v6907_v19  ;;  %v6410_v29 = vadd.f32 %v6368_v40, %v6234_v62  ;;  %v6075_v62 = vadd.f32 %v18753_v6, %v5911_v3 }
 0x90c   : > { %v6574_v43 = vadd.f32 %v6532_v14, %v6410_v29  ;;  %v6959_v13 = vmax.f32 %v6935_v24, 0.0  ;;  %v6712_v27 = vpop.f32.mrf.mxu2 }
 0x90e   : > { %v6744_v28 = vadd.f32 %v6702_v56, %v6574_v43  ;;  %v6987_v35 = vmul.f32 %v18940_v44, %v6959_v13  ;;  %v6539_v56 = vpop.f32.mrf.mxu1  ;;  %v6237_v43 = vadd.f32 %v22126_v22, %v6075_v62 }
 0x910   : > { %v6908_v37 = vadd.f32 %v6866_v45, %v6744_v28  ;;  %v19080_v58 = vadd.f32 %v18948_v5, %v6987_v35  ;;  %v6873_v45 = vpop.f32.mrf.mxu0 }
 0x911   : > { %v6370_v2 = vpop.f32.mrf.mxu3 }
 0x912   : > { %v6411_v14 = vadd.f32 %v6370_v2, %v6235_v53  ;;  %v7055_v55 = vpack.c.bf16 %v19080_v58, %v19077_v48  ;;  %v6936_v11 = vadd.f32 %v18924_v26, %v6908_v37 }
 0x914   : > { %v6575_v39 = vadd.f32 %v6534_v31, %v6411_v14  ;;  %v6960_v18 = vmax.f32 %v6936_v11, 0.0  ;;  %v22129_v14 = vld [vmem:[#allocation45_spill] sm:$0xff]  ;;  %v22130_v11 = vld [vmem:[#allocation35_spill] sm:$0xff]  ;;  %v6714_v3 = vpop.f32.mrf.mxu2 }
 0x916   : > { %v6745_v34 = vadd.f32 %v6704_v42, %v6575_v39  ;;  %v6988_v41 = vmul.f32 %v18940_v44, %v6960_v18  ;;  %v6542_v24 = vpop.f32.mrf.mxu1  ;;  %v5913_v39 = vadd.f32 %v22130_v11, %v22129_v14 }
 0x918   : > { %v6909_v50 = vadd.f32 %v6868_v61, %v6745_v34  ;;  %v22127_v61 = vld [vmem:[#allocation26_spill] sm:$0xff]  ;;  %v7016_v28 = vadd.f32 %v18948_v5, %v6988_v41  ;;  %v6876_v6 = vpop.f32.mrf.mxu0 }
 0x919   : > { %v6373_v20 = vpop.f32.mrf.mxu3  ;;  %v5912_v13 = vadd.f32 %v22127_v61, %v18844_v59  ;;  %v22131_v34 = vld [vmem:[#allocation30_spill] sm:$0xff] }
 0x91a   : > { %v6937_v19 = vadd.f32 %v18924_v26, %v6909_v50  ;;  %v6412_v23 = vadd.f32 %v6373_v20, %v6236_v47  ;;  %v22132_v20 = vld [vmem:[#allocation70_spill] sm:$0xff] }
 0x91b   : > { %v6076_v37 = vadd.f32 %v22128_v49, %v5912_v13 }
 0x91c   : > { %v6576_v40 = vadd.f32 %v6537_v7, %v6412_v23  ;;  %v6961_v31 = vmax.f32 %v6937_v19, 0.0  ;;  %v6077_v19 = vadd.f32 %v22132_v20, %v5913_v39  ;;  %v22139_v39 = vld [vmem:[#allocation92_spill] sm:$0xff] }
 0x91d   : > { %v6238_v12 = vadd.f32 %v22131_v34, %v6076_v37  ;;  %v22137_v37 = vld [vmem:[#allocation28_spill] sm:$0xff] }
 0x91e   : > { %v6746_v42 = vadd.f32 %v6707_v51, %v6576_v40  ;;  %v6989_v29 = vmul.f32 %v18940_v44, %v6961_v31  ;;  %v6544_v57 = vpop.f32.mrf.mxu1  ;;  %v22133_v31 = vld [vmem:[#allocation62_spill] sm:$0xff] }
 0x91f   : > { %v6239_v41 = vadd.f32 %v22133_v31, %v6077_v19 }
 0x920   : > { %v6910_v33 = vadd.f32 %v6871_v25, %v6746_v42  ;;  %v7017_v35 = vadd.f32 %v18948_v5, %v6989_v29  ;;  %v6878_v47 = vpop.f32.mrf.mxu0  ;;  %v22135_v42 = vld [vmem:[#allocation122_spill] sm:$0xff] }
 0x921   : > { %v6375_v7 = vpop.f32.mrf.mxu3 }
 0x922   : > { %v6413_v17 = vadd.f32 %v6375_v7, %v6237_v43  ;;  %v7056_v53 = vpack.c.bf16 %v7017_v35, %v7016_v28  ;;  %v6938_v10 = vadd.f32 %v18924_v26, %v6910_v33  ;;  %v6717_v7 = vpop.f32.mrf.mxu2 }
 0x924   : > { %v6577_v51 = vadd.f32 %v6539_v56, %v6413_v17  ;;  %v6962_v59 = vmax.f32 %v6938_v10, 0.0  ;;  %v22136_v17 = vld [vmem:[#allocation86_spill] sm:$0xff] }
 0x926   : > { %v6747_v2 = vadd.f32 %v6709_v32, %v6577_v51  ;;  %v6990_v56 = vmul.f32 %v18940_v44, %v6962_v59  ;;  %v6547_v13 = vpop.f32.mrf.mxu1 }
 0x928   : > { %v6911_v25 = vadd.f32 %v6873_v45, %v6747_v2  ;;  %v22134_v45 = vld [vmem:[#allocation175_spill] sm:$0xff]  ;;  %v7018_v43 = vadd.f32 %v18948_v5, %v6990_v56  ;;  %v6881_v51 = vpop.f32.mrf.mxu0  ;;  %v22138_v2 = vld [vmem:[#allocation52_spill] sm:$0xff] }
 0x929   : > { %v6378_v18 = vpop.f32.mrf.mxu3  ;;  %v5914_v29 = vadd.f32 %v22135_v42, %v22134_v45 }
 0x92a   : > { %v6939_v50 = vadd.f32 %v18924_v26, %v6911_v25  ;;  %v6414_v46 = vadd.f32 %v6378_v18, %v6238_v12  ;;  %v6719_v19 = vpop.f32.mrf.mxu2 }
 0x92b   : > { %v6078_v10 = vadd.f32 %v22136_v17, %v5914_v29 }
 0x92c   : > { %v6963_v23 = vmax.f32 %v6939_v50, 0.0  ;;  %v6578_v32 = vadd.f32 %v6542_v24, %v6414_v46  ;;  %v22140_v50 = vld [vmem:[#allocation102_spill] sm:$0xff] }
 0x92d   : > { %v6240_v59 = vadd.f32 %v22139_v39, %v6078_v10  ;;  %v22151_v39 = vld [vmem:[#allocation81_spill] sm:$0xff] }
 0x92e   : > { %v6748_v62 = vadd.f32 %v6712_v27, %v6578_v32  ;;  %v6991_v40 = vmul.f32 %v18940_v44, %v6963_v23  ;;  %v6549_v18 = vpop.f32.mrf.mxu1  ;;  %v22141_v23 = vld [vmem:[#allocation85_spill] sm:$0xff] }
 0x930   : > { %v6912_v22 = vadd.f32 %v6876_v6, %v6748_v62  ;;  %v7019_v61 = vadd.f32 %v18948_v5, %v6991_v40  ;;  %v5915_v6 = vadd.f32 %v22138_v2, %v22137_v37  ;;  %v6883_v56 = vpop.f32.mrf.mxu0  ;;  %v22142_v62 = vld [vmem:[#allocation110_spill] sm:$0xff]  ;;  %v22143_v40 = vld [vmem:[#allocation96_spill] sm:$0xff] }
 0x931   : > { %v6380_v33 = vpop.f32.mrf.mxu3  ;;  %v5916_v31 = vadd.f32 %v22143_v40, %v22142_v62  ;;  %v22155_v62 = vld [vmem:[#allocation179_spill] sm:$0xff] }
 0x932   : > { %v6415_v28 = vadd.f32 %v6380_v33, %v6239_v41  ;;  %v7057_v35 = vpack.c.bf16 %v7019_v61, %v7018_v43  ;;  %v6940_v24 = vadd.f32 %v18924_v26, %v6912_v22  ;;  %v22145_v61 = vld [vmem:[#allocation14_spill] sm:$0xff] }
 0x933   : > { %v6080_v15 = vadd.f32 %v22144_v63, %v5916_v31  ;;  %v22156_v63 = vld [vmem:[#allocation51_spill] sm:$0xff] }
 0x934   : > { %v6579_v27 = vadd.f32 %v6544_v57, %v6415_v28  ;;  %7194 = vmatpush.bf16.msra.mxu3 %v7057_v35  ;;  %v6964_v14 = vmax.f32 %v6940_v24, 0.0  ;;  %v6079_v57 = vadd.f32 %v22140_v50, %v5915_v6  ;;  %v6722_v28 = vpop.f32.mrf.mxu2  ;;  %v22147_v24 = vld [vmem:[#allocation137_spill] sm:$0xff] }
 0x936   : > { %v6749_v49 = vadd.f32 %v6714_v3, %v6579_v27  ;;  %v6992_v20 = vmul.f32 %v18940_v44, %v6964_v14  ;;  %v6241_v32 = vadd.f32 %v22141_v23, %v6079_v57  ;;  %v6242_v27 = vadd.f32 %v22147_v24, %v6080_v15  ;;  %v12519_v57 = vld [vmem:[%s21097_s10] sm:$0xf] }
 0x938   : > { %v6913_v11 = vadd.f32 %v6878_v47, %v6749_v49  ;;  %7195 = vmatpush.bf16.msra.mxu3 %v7056_v53  ;;  %v19131_v48 = vadd.f32 %v18948_v5, %v6992_v20  ;;  %v6886_v17 = vpop.f32.mrf.mxu0  ;;  %v12520_v20 = vor.u32 %v14132_v8, %v12519_v57  ;;  %v12543_v57 = vld [vmem:[%s21097_s10 + $0x30] sm:$0xf] }
 0x939   : > { %v6383_v25 = vpop.f32.mrf.mxu3 }
 0x93a   : > { %v6941_v34 = vadd.f32 %v18924_v26, %v6913_v11  ;;  %v6416_v12 = vadd.f32 %v6383_v25, %v6240_v59  ;;  %v22150_v11 = vld [vmem:[#allocation97_spill] sm:$0xff] }
 0x93b   : > { %v5918_v59 = vadd.f32 %v22151_v39, %v22150_v11 }
 0x93c   : > { %v6580_v46 = vadd.f32 %v6547_v13, %v6416_v12  ;;  %7196 = vmatpush.bf16.msra.mxu3 %v7055_v55  ;;  %v6965_v3 = vmax.f32 %v6941_v34, 0.0  ;;  %v22146_v13 = vld [vmem:[#allocation88_spill] sm:$0xff] }
 0x93d   : > { %v5917_v33 = vadd.f32 %v22146_v13, %v22145_v61 }
 0x93e   : > { %v6750_v47 = vadd.f32 %v6717_v7, %v6580_v46  ;;  %v6993_v53 = vmul.f32 %v18940_v44, %v6965_v3  ;;  %v22152_v46 = vld [vmem:[#allocation77_spill] sm:$0xff] }
 0x93f   : > { %v6082_v3 = vadd.f32 %v22152_v46, %v5918_v59 }
 0x940   : > { %v6914_v41 = vadd.f32 %v6881_v51, %v6750_v47  ;;  %7197 = vmatpush.bf16.msra.mxu3 %v7054_v4  ;;  %v19134_v58 = vadd.f32 %v18948_v5, %v6993_v53  ;;  %v6552_v4 = vpop.f32.mrf.mxu1  ;;  %v6888_v50 = vpop.f32.mrf.mxu0  ;;  %v22153_v47 = vld [vmem:[#allocation119_spill] sm:$0xff]  ;;  %v22154_v53 = vld [vmem:[#allocation21_spill] sm:$0xff] }
 0x941   : > { %v6385_v55 = vpop.f32.mrf.mxu3  ;;  %v6244_v40 = vadd.f32 %v22155_v62, %v6082_v3  ;;  %v14135_v3 = vld [vmem:[%s21097_s10 + $0x24] sm:$0xf] }
 0x942   : > { %v6417_v45 = vadd.f32 %v6385_v55, %v6241_v32  ;;  %v7058_v42 = vpack.c.bf16 %v19134_v58, %v19131_v48  ;;  %v6942_v29 = vadd.f32 %v18924_v26, %v6914_v41  ;;  %v12529_v48 = vld [vmem:[%s21097_s10 + $0x18] sm:$0xf0] }
 0x944   : > { %v6581_v22 = vadd.f32 %v6549_v18, %v6417_v45  ;;  %7198 = vmatpush.bf16.msra.mxu3 %v7053_v54  ;;  %v6966_v35 = vmax.f32 %v6942_v29, 0.0  ;;  %v22148_v54 = vld [vmem:[#allocation115_spill] sm:$0xff] }
 0x945   : > { %v6081_v51 = vadd.f32 %v22148_v54, %v5917_v33  ;;  %v12527_v54 = vld [vmem:[%s21097_s10 + $0x10] sm:$0xf] }
 0x946   : > { %v6751_v43 = vadd.f32 %v6719_v19, %v6581_v22  ;;  %v6994_v2 = vmul.f32 %v18940_v44, %v6966_v35  ;;  %v22157_v35 = vld [vmem:[#allocation64_spill] sm:$0xff] }
 0x948   : > { %v6915_v7 = vadd.f32 %v6883_v56, %v6751_v43  ;;  %7199 = vmatpush.bf16.msra.mxu3 %v7052_v38  ;;  %v6554_v21 = vpop.f32.mrf.mxu1  ;;  %v22149_v38 = vld [vmem:[#allocation32_spill] sm:$0xff]  ;;  %v19163_v16 = vadd.f32 %v18948_v5, %v6994_v2  ;;  %v5919_v56 = vadd.f32 %v22154_v53, %v22153_v47  ;;  %v6891_v61 = vpop.f32.mrf.mxu0  ;;  %v12559_v47 = vld [vmem:[%s21097_s10 + $0x50] sm:$0xf]  ;;  %v14142_v53 = vld [vmem:[%s21097_s10 + $0x54] sm:$0xf0] }
 0x949   : > { %v6388_v10 = vpop.f32.mrf.mxu3  ;;  %v6243_v14 = vadd.f32 %v22149_v38, %v6081_v51  ;;  %v14134_v51 = vld [vmem:[%s21097_s10 + $0x14] sm:$0xf0] }
 0x94a   : > { %v6943_v9 = vadd.f32 %v18924_v26, %v6915_v7  ;;  %v6418_v60 = vadd.f32 %v6388_v10, %v6242_v27  ;;  %v6083_v15 = vadd.f32 %v22156_v63, %v5919_v56  ;;  %v12528_v2 = vor.u32 %v14134_v51, %v12527_v54  ;;  %v14146_v63 = vld [vmem:[%s21097_s10 + $0x74] sm:$0xf0] }
 0x94b   : > { %v12560_v56 = vor.u32 %v14142_v53, %v12559_v47  ;;  %v14156_v54 = vld [vmem:[%s21098_s11 + $0x18] sm:$0xff]  ;;  %v14197_v53 = vld [vmem:[%s21098_s11 + $0x160] sm:$0xff] }
 0x94c   : > { %v6582_v49 = vadd.f32 %v6552_v4, %v6418_v60  ;;  %7200 = vmatpush.bf16.msra.mxu3 %v7051_v1  ;;  %v6967_v37 = vmax.f32 %v6943_v9, 0.0  ;;  %v6724_v1 = vpop.f32.mrf.mxu2  ;;  %v6245_v7 = vadd.f32 %v22157_v35, %v6083_v15  ;;  %v14160_v15 = vld [vmem:[%s21098_s11 + $0x38] sm:$0xff]  ;;  %v14148_v35 = vld [vmem:[%s21097_s10 + $0x84] sm:$0xf0] }
 0x94d   : > { %7606 = vmatpush.bf16.msrb.mxu0 %v14160_v15 }
 0x94e   : > { %v6752_v6 = vadd.f32 %v6722_v28, %v6582_v49  ;;  %v6995_v0 = vmul.f32 %v18940_v44, %v6967_v37 }
 0x950   : > { %v6916_v25 = vadd.f32 %v6886_v17, %v6752_v6  ;;  %7201 = vmatpush.bf16.msra.mxu3 %v7050_v36  ;;  %v7023_v30 = vadd.f32 %v18948_v5, %v6995_v0  ;;  %v6557_v31 = vpop.f32.mrf.mxu1 }
 0x951   : > { %v6390_v34 = vpop.f32.mrf.mxu3 }
 0x952   : > { %v6419_v12 = vadd.f32 %v6390_v34, %v6243_v14  ;;  %v7059_v18 = vpack.c.bf16 %v7023_v30, %v19163_v16  ;;  %v6944_v52 = vadd.f32 %v18924_v26, %v6916_v25  ;;  %v12535_v34 = vld [vmem:[%s21097_s10 + $0x20] sm:$0xf] }
 0x953   : > { %7202 = vmatmul.bf16.vlgmr.msra.gmra.mxu3 %v12520_v20  ;;  %v12537_v20 = vld [vmem:[%s21097_s10 + $0x28] sm:$0xf0] }
 0x954   : > { %v6583_v36 = vadd.f32 %v6554_v21, %v6419_v12  ;;  %v6968_v23 = vmax.f32 %v6944_v52, 0.0  ;;  %v6727_v29 = vpop.f32.mrf.mxu2  ;;  %v6893_v21 = vpop.f32.mrf.mxu0  ;;  %v14136_v12 = vld [vmem:[%s21097_s10 + $0x24] sm:$0xf0]  ;;  %v14133_v52 = vld [vmem:[%s21097_s10 + $0x14] sm:$0xf] }
 0x955   : > { %v12532_v58 = vor.u32 %v14133_v52, %v12529_v48  ;;  %v14199_v52 = vld [vmem:[%s21098_s11 + $0x170] sm:$0xff]  ;;  %v14180_v48 = vld [vmem:[%s21098_s11 + $0xd8] sm:$0xff] }
 0x956   : > { %v6753_v19 = vadd.f32 %v6724_v1, %v6583_v36  ;;  %v6996_v43 = vmul.f32 %v18940_v44, %v6968_v23  ;;  %v14140_v36 = vld [vmem:[%s21097_s10 + $0x44] sm:$0xf0]  ;;  %v14137_v23 = vld [vmem:[%s21097_s10 + $0x34] sm:$0xf] }
 0x958   : > { %v6917_v32 = vadd.f32 %v6888_v50, %v6753_v19  ;;  %v7024_v24 = vadd.f32 %v18948_v5, %v6996_v43  ;;  %v6559_v60 = vpop.f32.mrf.mxu1  ;;  %v12540_v19 = vor.u32 %v14135_v3, %v12537_v20  ;;  %v14141_v43 = vld [vmem:[%s21097_s10 + $0x54] sm:$0xf]  ;;  %v12585_v3 = vld [vmem:[%s21097_s10 + $0x88] sm:$0xf0] }
 0x959   : > { %v6393_v41 = vpop.f32.mrf.mxu3  ;;  %v14179_v20 = vld [vmem:[%s21098_s11 + $0xd0] sm:$0xff] }
 0x95a   : > { %v6945_v55 = vadd.f32 %v18924_v26, %v6917_v32  ;;  %v6420_v45 = vadd.f32 %v6393_v41, %v6244_v40  ;;  %v12545_v32 = vld [vmem:[%s21097_s10 + $0x38] sm:$0xf0]  ;;  %v12567_v40 = vld [vmem:[%s21097_s10 + $0x60] sm:$0xf] }
 0x95b   : > { %v12548_v62 = vor.u32 %v14137_v23, %v12545_v32  ;;  %v14178_v23 = vld [vmem:[%s21098_s11 + $0xc8] sm:$0xff] }
 0x95c   : > { %v6584_v22 = vadd.f32 %v6557_v31, %v6420_v45  ;;  %v6969_v4 = vmax.f32 %v6945_v55, 0.0  ;;  %v6729_v6 = vpop.f32.mrf.mxu2  ;;  %v14144_v31 = vld [vmem:[%s21097_s10 + $0x64] sm:$0xf0]  ;;  %v14139_v55 = vld [vmem:[%s21097_s10 + $0x44] sm:$0xf] }
 0x95d   : > { %v12568_v41 = vor.u32 %v14144_v31, %v12567_v40  ;;  %v12553_v45 = vld [vmem:[%s21097_s10 + $0x48] sm:$0xf0]  ;;  %v14196_v40 = vld [vmem:[%s21098_s11 + $0x158] sm:$0xff]  ;;  %v14177_v31 = vld [vmem:[%s21098_s11 + $0xc0] sm:$0xff] }
 0x95e   : > { %v6754_v13 = vadd.f32 %v6727_v29, %v6584_v22  ;;  %v6997_v33 = vmul.f32 %v18940_v44, %v6969_v4  ;;  %v12556_v29 = vor.u32 %v14139_v55, %v12553_v45  ;;  %v12575_v22 = vld [vmem:[%s21097_s10 + $0x70] sm:$0xf] }
 0x95f   : > { %v12576_v4 = vor.u32 %v14146_v63, %v12575_v22  ;;  %v14195_v55 = vld [vmem:[%s21098_s11 + $0x150] sm:$0xff] }
 0x960   : > { %v6918_v28 = vadd.f32 %v6891_v61, %v6754_v13  ;;  %v7025_v27 = vadd.f32 %v18948_v5, %v6997_v33  ;;  %v12561_v61 = vld [vmem:[%s21097_s10 + $0x58] sm:$0xf0]  ;;  %v14159_v33 = vld [vmem:[%s21098_s11 + $0x30] sm:$0xff] }
 0x961   : > { %v6395_v17 = vpop.f32.mrf.mxu3  ;;  %v12564_v13 = vor.u32 %v14141_v43, %v12561_v61  ;;  %7607 = vmatpush.bf16.msrb.mxu0 %v14159_v33  ;;  %v14149_v43 = vld [vmem:[%s21097_s10 + $0x94] sm:$0xf]  ;;  %v12593_v61 = vld [vmem:[%s21097_s10 + $0x98] sm:$0xf0] }
 0x962   : > { %v6421_v10 = vadd.f32 %v6395_v17, %v6245_v7  ;;  %v7060_v9 = vpack.c.bf16 %v7025_v27, %v7024_v24  ;;  %v6946_v49 = vadd.f32 %v18924_v26, %v6918_v28  ;;  %v12583_v28 = vld [vmem:[%s21097_s10 + $0x80] sm:$0xf]  ;;  %v14158_v24 = vld [vmem:[%s21098_s11 + $0x28] sm:$0xff] }
 0x963   : > { %7207 = vmatmul.bf16.gmra.mxu3 %v12528_v2  ;;  %v12584_v7 = vor.u32 %v14148_v35, %v12583_v28  ;;  %v14157_v17 = vld [vmem:[%s21098_s11 + $0x20] sm:$0xff]  ;;  %v12591_v2 = vld [vmem:[%s21097_s10 + $0x90] sm:$0xf]  ;;  %v12596_v35 = vor.u32 %v14149_v43, %v12593_v61 }
 0x964   : > { %v6585_v37 = vadd.f32 %v6559_v60, %v6421_v10  ;;  %v6970_v38 = vmax.f32 %v6946_v49, 0.0  ;;  %v14143_v10 = vld [vmem:[%s21097_s10 + $0x64] sm:$0xf]  ;;  %v14155_v49 = vld [vmem:[%s21098_s11 + $0x10] sm:$0xff] }
 0x965   : > { %7608 = vmatpush.bf16.msrb.mxu0 %v14158_v24 }
 0x966   : > { %v6755_v0 = vadd.f32 %v6729_v6, %v6585_v37  ;;  %v6998_v39 = vmul.f32 %v18940_v44, %v6970_v38  ;;  %v14168_v37 = vld [vmem:[%s21098_s11 + $0x78] sm:$0xff]  ;;  %v14154_v38 = vld [vmem:[%s21098_s11 + $0x8] sm:$0xff] }
 0x967   : > { %v14150_v6 = vld [vmem:[%s21097_s10 + $0x94] sm:$0xf0]  ;;  %7513 = vmatpush.bf16.msra.mxu2 %v14168_v37  ;;  %v14151_v37 = vld [vmem:[%s21097_s10 + $0xa4] sm:$0xf] }
 0x968   : > { %v6919_v14 = vadd.f32 %v6893_v21, %v6755_v0  ;;  %v7026_v16 = vadd.f32 %v18948_v5, %v6998_v39  ;;  %v12592_v0 = vor.u32 %v14150_v6, %v12591_v2  ;;  %v14184_v21 = vld [vmem:[%s21098_s11 + $0xf8] sm:$0xff]  ;;  %v14145_v39 = vld [vmem:[%s21097_s10 + $0x74] sm:$0xf]  ;;  %v12601_v2 = vld [vmem:[%s21097_s10 + $0xa8] sm:$0xf0] }
 0x969   : > { %7609 = vmatpush.bf16.msrb.mxu0 %v14157_v17  ;;  %7880 = vmatpush.bf16.msrb.mxu3 %v14184_v21 }
 0x96a   : > { %v6947_v11 = vadd.f32 %v18924_v26, %v6919_v14  ;;  %v12536_v26 = vor.u32 %v14136_v12, %v12535_v34  ;;  %v14182_v34 = vld [vmem:[%s21098_s11 + $0xe8] sm:$0xff] }
 0x96c   : > { %v6971_v59 = vmax.f32 %v6947_v11, 0.0  ;;  %v14167_v11 = vld [vmem:[%s21098_s11 + $0x70] sm:$0xff] }
 0x96d   : > { %7610 = vmatpush.bf16.msrb.mxu0 %v14156_v54  ;;  %7514 = vmatpush.bf16.msra.mxu2 %v14167_v11 }
 0x96e   : > { %v6999_v25 = vmul.f32 %v18940_v44, %v6971_v59  ;;  %v14131_v44 = vld [vmem:[%s21097_s10 + $0x4] sm:$0xf]  ;;  %v12577_v59 = vld [vmem:[%s21097_s10 + $0x78] sm:$0xf0] }
 0x970   : > { %v7027_v30 = vadd.f32 %v18948_v5, %v6999_v25  ;;  %v12521_v5 = vld [vmem:[%s21097_s10 + $0x8] sm:$0xf0]  ;;  %v14183_v25 = vld [vmem:[%s21098_s11 + $0xf0] sm:$0xff] }
 0x971   : > { %v12524_v50 = vor.u32 %v14131_v44, %v12521_v5  ;;  %7611 = vmatpush.bf16.msrb.mxu0 %v14155_v49  ;;  %7881 = vmatpush.bf16.msrb.mxu3 %v14183_v25  ;;  %v14200_v44 = vld [vmem:[%s21098_s11 + $0x178] sm:$0xff]  ;;  %v14181_v5 = vld [vmem:[%s21098_s11 + $0xe0] sm:$0xff] }
 0x972   : > { %v7061_v1 = vpack.c.bf16 %v7027_v30, %v7026_v16  ;;  %v14153_v16 = vld [vmem:[%s21098_s11] sm:$0xff]  ;;  %v14166_v30 = vld [vmem:[%s21098_s11 + $0x68] sm:$0xff] }
 0x973   : > { %7212 = vmatmul.bf16.gmra.mxu3 %v12536_v26  ;;  %7515 = vmatpush.bf16.msra.mxu2 %v14166_v30  ;;  %v14165_v26 = vld [vmem:[%s21098_s11 + $0x60] sm:$0xff] }
 0x974   : > { %7261 = vmatpush.bf16.msra.mxu1 %v7061_v1  ;;  %v12580_v1 = vor.u32 %v14145_v39, %v12577_v59 }
 0x975   : > { %7612 = vmatpush.bf16.msrb.mxu0 %v14154_v38  ;;  %7882 = vmatpush.bf16.msrb.mxu3 %v14182_v34 }
 0x977   : > { %7516 = vmatpush.bf16.msra.mxu2 %v14165_v26 }
 0x978   : > { %7262 = vmatpush.bf16.msra.mxu1 %v7060_v9  ;;  %v12569_v9 = vld [vmem:[%s21097_s10 + $0x68] sm:$0xf0] }
 0x979   : > { %v12572_v60 = vor.u32 %v14143_v10, %v12569_v9  ;;  %7613 = vmatpush.bf16.msrb.mxu0 %v14153_v16  ;;  %7883 = vmatpush.bf16.msrb.mxu3 %v14181_v5 }
 0x97c   : > { %7263 = vmatpush.bf16.msra.mxu1 %v7059_v18  ;;  %v14138_v18 = vld [vmem:[%s21097_s10 + $0x34] sm:$0xf0] }
 0x97d   : > { %v12544_v8 = vor.u32 %v14138_v18, %v12543_v57  ;;  %v12599_v57 = vld [vmem:[%s21097_s10 + $0xa0] sm:$0xf]  ;;  %v14152_v18 = vld [vmem:[%s21097_s10 + $0xa4] sm:$0xf0]  ;;  %7884 = vmatpush.bf16.msrb.mxu3 %v14180_v48 }
 0x980   : > { %7264 = vmatpush.bf16.msra.mxu1 %v7058_v42  ;;  %v12551_v42 = vld [vmem:[%s21097_s10 + $0x40] sm:$0xf] }
 0x981   : > { %v12552_v46 = vor.u32 %v14140_v36, %v12551_v42  ;;  %v14163_v42 = vld [vmem:[%s21098_s11 + $0x50] sm:$0xff]  ;;  %v14198_v36 = vld [vmem:[%s21098_s11 + $0x168] sm:$0xff]  ;;  %7885 = vmatpush.bf16.msrb.mxu3 %v14179_v20 }
 0x983   : > { %12605 = vmatmul.msk.bf16.vlgmr.msra.gmra.mxu1 %vm1955_vm1, %v12524_v50  ;;  %7217 = vmatmul.bf16.gmra.mxu3 %v12544_v8  ;;  %v14164_v50 = vld [vmem:[%s21098_s11 + $0x58] sm:$0xff]  ;;  %v12600_v8 = vor.u32 %v14152_v18, %v12599_v57 }
 0x984   : > { %8135 = vmatpush.bf16.msrb.mxu1 %v14200_v44  ;;  %7517 = vmatpush.bf16.msra.mxu2 %v14164_v50 }
 0x985   : > { %7886 = vmatpush.bf16.msrb.mxu3 %v14178_v23 }
 0x988   : > { %8136 = vmatpush.bf16.msrb.mxu1 %v14199_v52  ;;  %7518 = vmatpush.bf16.msra.mxu2 %v14163_v42 }
 0x989   : > { %7887 = vmatpush.bf16.msrb.mxu3 %v14177_v31 }
 0x98c   : > { %8137 = vmatpush.bf16.msrb.mxu1 %v14198_v36 }
 0x990   : > { %8138 = vmatpush.bf16.msrb.mxu1 %v14197_v53 }
 0x993   : > { %12606 = vmatmul.msk.bf16.gmra.mxu1 %vm1955_vm1, %v12532_v58  ;;  %7222 = vmatmul.bf16.gmra.mxu3 %v12552_v46  ;;  %v14147_v46 = vld [vmem:[%s21097_s10 + $0x84] sm:$0xf] }
 0x994   : > { %v12588_v47 = vor.u32 %v14147_v46, %v12585_v3  ;;  %8139 = vmatpush.bf16.msrb.mxu1 %v14196_v40 }
 0x998   : > { %8140 = vmatpush.bf16.msrb.mxu1 %v14195_v55  ;;  %v14192_v55 = vld [vmem:[%s21098_s11 + $0x138] sm:$0xff] }
 0x999   : > { %8015 = vmatpush.bf16.msra.mxu0 %v14192_v55 }
 0x9a3   : > { %12607 = vmatmul.msk.bf16.gmra.mxu1 %vm1955_vm1, %v12540_v19  ;;  %7227 = vmatmul.bf16.gmra.mxu3 %v12560_v56  ;;  %v14162_v19 = vld [vmem:[%s21098_s11 + $0x48] sm:$0xff] }
 0x9a4   : > { %7519 = vmatpush.bf16.msra.mxu2 %v14162_v19 }
 0x9b3   : > { %12608 = vmatmul.msk.bf16.gmra.mxu1 %vm1955_vm1, %v12548_v62  ;;  %7232 = vmatmul.bf16.gmra.mxu3 %v12568_v41  ;;  %v14161_v62 = vld [vmem:[%s21098_s11 + $0x40] sm:$0xff] }
 0x9b4   : > { %7520 = vmatpush.bf16.msra.mxu2 %v14161_v62 }
 0x9c3   : > { %12609 = vmatmul.msk.bf16.gmra.mxu1 %vm1955_vm1, %v12556_v29  ;;  %7237 = vmatmul.bf16.gmra.mxu3 %v12576_v4  ;;  %v14194_v4 = vld [vmem:[%s21098_s11 + $0x148] sm:$0xff] }
 0x9c4   : > { %8141 = vmatpush.bf16.msrb.mxu1 %v14194_v4 }
 0x9d3   : > { %12610 = vmatmul.msk.bf16.gmra.mxu1 %vm1955_vm1, %v12564_v13  ;;  %7242 = vmatmul.bf16.gmra.mxu3 %v12584_v7  ;;  %v14193_v7 = vld [vmem:[%s21098_s11 + $0x140] sm:$0xff] }
 0x9d4   : > { %8142 = vmatpush.bf16.msrb.mxu1 %v14193_v7  ;;  %v14190_v7 = vld [vmem:[%s21098_s11 + $0x128] sm:$0xff] }
 0x9d6   : > { %v19293_v27 = vpop.f32.mrf.mxu3 }
 0x9de   : > { %v19307_v51 = vpop.f32.mrf.mxu3 }
 0x9e3   : > { %12611 = vmatmul.msk.bf16.gmra.mxu1 %vm1955_vm1, %v12572_v60  ;;  %7247 = vmatmul.bf16.gmra.mxu3 %v12592_v0 }
 0x9e6   : > { %v19328_v14 = vpop.f32.mrf.mxu3 }
 0x9ee   : > { %v19351_v12 = vpop.f32.mrf.mxu3 }
 0x9f3   : > { %12612 = vmatmul.msk.bf16.gmra.mxu1 %vm1955_vm1, %v12580_v1  ;;  %7252 = vmatmul.bf16.gmra.mxu3 %v12600_v8 }
 0x9f6   : > { %v19378_v58 = vpop.f32.mrf.mxu3 }
 0x9fe   : > { %v19404_v32 = vpop.f32.mrf.mxu3 }
 0xa00   : > { %v7266_v56 = vpop.f32.mrf.mxu1 }
 0xa01   : > { %v7267_v41 = vadd.f32 %v7266_v56, %v19293_v27 }
 0xa03   : > { %12613 = vmatmul.msk.bf16.gmra.mxu1 %vm1955_vm1, %v12588_v47  ;;  %v7320_v29 = vpack.c.bf16 %v7267_v41, %v7267_v41 }
 0xa05   : > { %v7387_v13 = vunpack.c.l.b16 %v7320_v29 }
 0xa06   : > { %v19421_v63 = vpop.f32.mrf.mxu3 }
 0xa08   : > { %v7268_v45 = vpop.f32.mrf.mxu1 }
 0xa09   : > { %v7269_v22 = vadd.f32 %v7268_v45, %v19307_v51 }
 0xa0b   : > { %v7321_v15 = vpack.c.bf16 %v7269_v22, %v7269_v22 }
 0xa0d   : > { %v7388_v33 = vunpack.c.l.b16 %v7321_v15 }
 0xa0e   : > { %v19435_v27 = vpop.f32.mrf.mxu3 }
 0xa0f   : > { %v7400_v28 = vpack.c.b16 %v7388_v33, %v7387_v13  ;;  %v14191_v13 = vld [vmem:[%s21098_s11 + $0x130] sm:$0xff] }
 0xa10   : > { %v7271_v24 = vpop.f32.mrf.mxu1  ;;  %8016 = vmatpush.bf16.msra.mxu0 %v14191_v13 }
 0xa11   : > { %7614 = vmatmul.bf16.vlgmr.msrb.gmra.mxu0 %v7400_v28  ;;  %v7272_v17 = vadd.f32 %v7271_v24, %v19328_v14  ;;  %v7410_v49 = vshll.u32 %v7400_v28, 16  ;;  %v7408_v6 = vshrl.u32 %v7400_v28, 16  ;;  %v12604_v14 = vor.u32 %v14151_v37, %v12601_v2  ;;  %v14188_v2 = vld [vmem:[%s21098_s11 + $0x118] sm:$0xff] }
 0xa12   : > { %v7662_v26 = vrot.slane %v7400_v28, 1 }
 0xa13   : > { %12614 = vmatmul.msk.bf16.gmra.mxu1 %vm1955_vm1, %v12596_v35  ;;  %v7322_v9 = vpack.c.bf16 %v7272_v17, %v7272_v17  ;;  %v7412_v11 = vrot.slane %v7410_v49, 1  ;;  %v7797_v59 = vrot.slane %v7408_v6, 1  ;;  %v7798_v30 = vrot.slane %v7410_v49, 2 }
 0xa14   : > { %8017 = vmatpush.bf16.msra.mxu0 %v14190_v7  ;;  %v14212_v7 = vld [vmem:[%s21098_s11 + $0x1d8] sm:$0xff] }
 0xa15   : > { %v7389_v0 = vunpack.c.l.b16 %v7322_v9  ;;  %v7413_v5 = vor.u32 %v7412_v11, %v7408_v6  ;;  %v7799_v36 = vor.u32 %v7798_v30, %v7797_v59  ;;  %v14176_v30 = vld [vmem:[%s21098_s11 + $0xb8] sm:$0xff] }
 0xa16   : > { %v19440_v54 = vpop.f32.mrf.mxu3  ;;  %7729 = vmatpush.bf16.msrb.mxu2 %v14176_v30 }
 0xa18   : > { %v7273_v10 = vpop.f32.mrf.mxu1 }
 0xa19   : > { %v7274_v60 = vadd.f32 %v7273_v10, %v19351_v12  ;;  %v7948_v12 = vrot.slane %v7400_v28, 2 }
 0xa1b   : > { %v7323_v51 = vpack.c.bf16 %v7274_v60, %v7274_v60  ;;  %v14189_v60 = vld [vmem:[%s21098_s11 + $0x120] sm:$0xff] }
 0xa1c   : > { %8018 = vmatpush.bf16.msra.mxu0 %v14189_v60 }
 0xa1d   : > { %v7390_v21 = vunpack.c.l.b16 %v7323_v51 }
 0xa1e   : > { %v19453_v1 = vpop.f32.mrf.mxu3 }
 0xa1f   : > { %v19448_v38 = vpack.c.b16 %v7390_v21, %v7389_v0 }
 0xa20   : > { %v7276_v39 = vpop.f32.mrf.mxu1  ;;  %8019 = vmatpush.bf16.msra.mxu0 %v14188_v2 }
 0xa21   : > { %7619 = vmatmul.bf16.gmra.mxu0 %v19448_v38  ;;  %v7415_v25 = vshll.u32 %v19448_v38, 16  ;;  %v7419_v16 = vshrl.u32 %v19448_v38, 16  ;;  %v7949_v34 = vrot.slane %v19448_v38, 2  ;;  %v7663_v44 = vrot.slane %v19448_v38, 1 }
 0xa22   : > { %v7277_v48 = vadd.f32 %v7276_v39, %v19378_v58 }
 0xa23   : > { %12615 = vmatmul.msk.bf16.gmra.mxu1 %vm1955_vm1, %v12604_v14  ;;  %v7417_v50 = vrot.slane %v7415_v25, 1  ;;  %v7800_v57 = vrot.slane %v7419_v16, 1  ;;  %v7801_v18 = vrot.slane %v7415_v25, 2  ;;  %v19461_v8 = vsel %vm3397_vm2, %v7948_v12, %v7949_v34 }
 0xa24   : > { %v19466_v52 = vsel %vm2977_vm5, %v7662_v26, %v7663_v44  ;;  %v7324_v19 = vpack.c.bf16 %v7277_v48, %v7277_v48 }
 0xa25   : > { %v7418_v42 = vsel %vm2601_vm3, %v7413_v5, %v7417_v50  ;;  %v7802_v46 = vor.u32 %v7801_v18, %v7800_v57  ;;  %v14186_v57 = vld [vmem:[%s21098_s11 + $0x108] sm:$0xff]  ;;  %v14175_v18 = vld [vmem:[%s21098_s11 + $0xb0] sm:$0xff] }
 0xa26   : > { %7521 = vmatmul.bf16.vlgmr.msra.gmra.mxu2 %v7418_v42  ;;  %v19472_v53 = vpop.f32.mrf.mxu3  ;;  %v7391_v23 = vunpack.c.l.b16 %v7324_v19 }
 0xa27   : > { %v7803_v3 = vsel %vm3173_vm4, %v7799_v36, %v7802_v46  ;;  %7730 = vmatpush.bf16.msrb.mxu2 %v14175_v18  ;;  %v14215_v36 = vld [vmem:[%s21098_s11 + $0x1f0] sm:$0xff] }
 0xa28   : > { %v7278_v20 = vpop.f32.mrf.mxu1  ;;  %7888 = vmatmul.bf16.vlgmr.msrb.gmra.mxu3 %v7803_v3  ;;  %v14185_v3 = vld [vmem:[%s21098_s11 + $0x100] sm:$0xff] }
 0xa29   : > { %v7279_v47 = vadd.f32 %v7278_v20, %v19404_v32  ;;  %v7421_v32 = vor.u32 %v7419_v16, %v7417_v50  ;;  %v14187_v16 = vld [vmem:[%s21098_s11 + $0x110] sm:$0xff]  ;;  %v14174_v20 = vld [vmem:[%s21098_s11 + $0xa8] sm:$0xff] }
 0xa2a   : > { %8020 = vmatpush.bf16.msra.mxu0 %v14187_v16 }
 0xa2b   : > { %v7325_v56 = vpack.c.bf16 %v7279_v47, %v7279_v47  ;;  %7731 = vmatpush.bf16.msrb.mxu2 %v14174_v20 }
 0xa2d   : > { %v7392_v62 = vunpack.c.l.b16 %v7325_v56  ;;  %v14214_v56 = vld [vmem:[%s21098_s11 + $0x1e8] sm:$0xff] }
 0xa2e   : > { %v19483_v15 = vpop.f32.mrf.mxu3  ;;  %8021 = vmatpush.bf16.msra.mxu0 %v14186_v57 }
 0xa2f   : > { %v19474_v40 = vpack.c.b16 %v7392_v62, %v7391_v23 }
 0xa30   : > { %v7281_v58 = vpop.f32.mrf.mxu1 }
 0xa31   : > { %7624 = vmatmul.bf16.gmra.mxu0 %v19474_v40  ;;  %v7423_v31 = vshll.u32 %v19474_v40, 16  ;;  %v7427_v41 = vshrl.u32 %v19474_v40, 16  ;;  %v7282_v4 = vadd.f32 %v7281_v58, %v19421_v63  ;;  %v14173_v58 = vld [vmem:[%s21098_s11 + $0xa0] sm:$0xff] }
 0xa32   : > { %8022 = vmatpush.bf16.msra.mxu0 %v14185_v3  ;;  %7732 = vmatpush.bf16.msrb.mxu2 %v14173_v58 }
 0xa33   : > { %8143 = vmatmul.bf16.vlgmr.msrb.gmra.mxu1 %v19448_v38  ;;  %v7425_v45 = vrot.slane %v7423_v31, 1  ;;  %v7804_v29 = vrot.slane %v7427_v41, 1  ;;  %v7805_v22 = vrot.slane %v7423_v31, 2  ;;  %v7326_v35 = vpack.c.bf16 %v7282_v4, %v7282_v4 }
 0xa35   : > { %v19487_v43 = vsel %vm2601_vm3, %v7421_v32, %v7425_v45  ;;  %v7806_v61 = vor.u32 %v7805_v22, %v7804_v29  ;;  %v7393_v10 = vunpack.c.l.b16 %v7326_v35  ;;  %v7429_v6 = vor.u32 %v7427_v41, %v7425_v45  ;;  %v14232_v45 = vld [vmem:[%s21098_s11 + $0x278] sm:$0xff]  ;;  %v14213_v22 = vld [vmem:[%s21098_s11 + $0x1e0] sm:$0xff] }
 0xa36   : > { %7526 = vmatmul.bf16.gmra.mxu2 %v19487_v43  ;;  %v19501_v17 = vpop.f32.mrf.mxu3  ;;  %8641 = vmatpush.bf16.msra.mxu1 %v14232_v45  ;;  %v14225_v45 = vld [vmem:[%s21098_s11 + $0x240] sm:$0xff] }
 0xa37   : > { %v19494_v33 = vsel %vm3173_vm4, %v7802_v46, %v7806_v61 }
 0xa38   : > { %v7283_v28 = vpop.f32.mrf.mxu1  ;;  %7893 = vmatmul.bf16.gmra.mxu3 %v19494_v33 }
 0xa39   : > { %v7284_v63 = vadd.f32 %v7283_v28, %v19435_v27  ;;  %v14172_v28 = vld [vmem:[%s21098_s11 + $0x98] sm:$0xff] }
 0xa3a   : > { %7733 = vmatpush.bf16.msrb.mxu2 %v14172_v28 }
 0xa3b   : > { %v7327_v24 = vpack.c.bf16 %v7284_v63, %v7284_v63  ;;  %v14231_v63 = vld [vmem:[%s21098_s11 + $0x270] sm:$0xff] }
 0xa3c   : > { %8642 = vmatpush.bf16.msra.mxu1 %v14231_v63 }
 0xa3d   : > { %v7394_v9 = vunpack.c.l.b16 %v7327_v24 }
 0xa3e   : > { %v19515_v11 = vpop.f32.mrf.mxu3 }
 0xa3f   : > { %v19506_v51 = vpack.c.b16 %v7394_v9, %v7393_v10  ;;  %v14171_v9 = vld [vmem:[%s21098_s11 + $0x90] sm:$0xff] }
 0xa40   : > { %v7286_v49 = vpop.f32.mrf.mxu1  ;;  %7734 = vmatpush.bf16.msrb.mxu2 %v14171_v9 }
 0xa41   : > { %7629 = vmatmul.bf16.gmra.mxu0 %v19506_v51  ;;  %v7431_v27 = vshll.u32 %v19506_v51, 16  ;;  %v7435_v37 = vshrl.u32 %v19506_v51, 16  ;;  %v7287_v39 = vadd.f32 %v7286_v49, %v19440_v54  ;;  %v14216_v54 = vld [vmem:[%s21098_s11 + $0x1f8] sm:$0xff]  ;;  %v14230_v49 = vld [vmem:[%s21098_s11 + $0x268] sm:$0xff] }
 0xa42   : > { %8391 = vmatpush.bf16.msra.mxu3 %v14216_v54  ;;  %8643 = vmatpush.bf16.msra.mxu1 %v14230_v49  ;;  %v14169_v54 = vld [vmem:[%s21098_s11 + $0x80] sm:$0xff] }
 0xa43   : > { %8148 = vmatmul.bf16.gmra.mxu1 %v19474_v40  ;;  %v7433_v0 = vrot.slane %v7431_v27, 1  ;;  %v7808_v21 = vrot.slane %v7435_v37, 1  ;;  %v7809_v14 = vrot.slane %v7431_v27, 2  ;;  %v7328_v5 = vpack.c.bf16 %v7287_v39, %v7287_v39  ;;  %v14210_v39 = vld [vmem:[%s21098_s11 + $0x1c8] sm:$0xff] }
 0xa45   : > { %v19519_v59 = vsel %vm2601_vm3, %v7429_v6, %v7433_v0  ;;  %v7810_v25 = vor.u32 %v7809_v14, %v7808_v21  ;;  %v7395_v46 = vunpack.c.l.b16 %v7328_v5  ;;  %v7437_v31 = vor.u32 %v7435_v37, %v7433_v0  ;;  %v14211_v37 = vld [vmem:[%s21098_s11 + $0x1d0] sm:$0xff]  ;;  %v14170_v6 = vld [vmem:[%s21098_s11 + $0x88] sm:$0xff]  ;;  %v14229_v21 = vld [vmem:[%s21098_s11 + $0x260] sm:$0xff] }
 0xa46   : > { %7531 = vmatmul.bf16.gmra.mxu2 %v19519_v59  ;;  %v19542_v42 = vpop.f32.mrf.mxu3  ;;  %8392 = vmatpush.bf16.msra.mxu3 %v14215_v36  ;;  %v14209_v36 = vld [vmem:[%s21098_s11 + $0x1c0] sm:$0xff] }
 0xa47   : > { %v19529_v12 = vsel %vm3173_vm4, %v7806_v61, %v7810_v25  ;;  %7735 = vmatpush.bf16.msrb.mxu2 %v14170_v6  ;;  %8644 = vmatpush.bf16.msra.mxu1 %v14229_v21 }
 0xa48   : > { %v7288_v26 = vpop.f32.mrf.mxu1  ;;  %7898 = vmatmul.bf16.gmra.mxu3 %v19529_v12 }
 0xa49   : > { %v7289_v50 = vadd.f32 %v7288_v26, %v19453_v1 }
 0xa4a   : > { %8393 = vmatpush.bf16.msra.mxu3 %v14214_v56  ;;  %v14227_v56 = vld [vmem:[%s21098_s11 + $0x250] sm:$0xff] }
 0xa4b   : > { %v7329_v48 = vpack.c.bf16 %v7289_v50, %v7289_v50  ;;  %7736 = vmatpush.bf16.msrb.mxu2 %v14169_v54 }
 0xa4d   : > { %v7396_v1 = vunpack.c.l.b16 %v7329_v48 }
 0xa4e   : > { %v19568_v29 = vpop.f32.mrf.mxu3  ;;  %8394 = vmatpush.bf16.msra.mxu3 %v14213_v22 }
 0xa4f   : > { %v19553_v19 = vpack.c.b16 %v7396_v1, %v7395_v46 }
 0xa50   : > { %v7291_v47 = vpop.f32.mrf.mxu1 }
 0xa51   : > { %7634 = vmatmul.bf16.gmra.mxu0 %v19553_v19  ;;  %v7439_v23 = vshll.u32 %v19553_v19, 16  ;;  %v7443_v62 = vshrl.u32 %v19553_v19, 16  ;;  %v7292_v4 = vadd.f32 %v7291_v47, %v19472_v53 }
 0xa52   : > { %8395 = vmatpush.bf16.msra.mxu3 %v14212_v7 }
 0xa53   : > { %8153 = vmatmul.bf16.gmra.mxu1 %v19506_v51  ;;  %v7441_v41 = vrot.slane %v7439_v23, 1  ;;  %v7812_v55 = vrot.slane %v7443_v62, 1  ;;  %v7813_v32 = vrot.slane %v7439_v23, 2  ;;  %v7330_v24 = vpack.c.bf16 %v7292_v4, %v7292_v4 }
 0xa55   : > { %v19575_v61 = vsel %vm2601_vm3, %v7437_v31, %v7441_v41  ;;  %v7814_v13 = vor.u32 %v7813_v32, %v7812_v55  ;;  %v7397_v2 = vunpack.c.l.b16 %v7330_v24  ;;  %v7445_v26 = vor.u32 %v7443_v62, %v7441_v41  ;;  %v14226_v31 = vld [vmem:[%s21098_s11 + $0x248] sm:$0xff] }
 0xa56   : > { %22158 = vst [vmem:[#allocation133_spill] sm:$0xff] %v19575_v61  ;;  %7536 = vmatmul.bf16.gmra.mxu2 %v19575_v61  ;;  %v19598_v27 = vpop.f32.mrf.mxu3  ;;  %8396 = vmatpush.bf16.msra.mxu3 %v14211_v37  ;;  %v7951_v37 = vrot.slane %v19474_v40, 2 }
 0xa57   : > { %v19582_v35 = vsel %vm3173_vm4, %v7810_v25, %v7814_v13 }
 0xa58   : > { %22159 = vst [vmem:[#allocation55_spill] sm:$0xff] %v19582_v35  ;;  %v7293_v53 = vpop.f32.mrf.mxu1  ;;  %7903 = vmatmul.bf16.gmra.mxu3 %v19582_v35 }
 0xa59   : > { %v7294_v10 = vadd.f32 %v7293_v53, %v19483_v15 }
 0xa5a   : > { %8397 = vmatpush.bf16.msra.mxu3 %v14210_v39  ;;  %v7952_v39 = vsel %vm3397_vm2, %v7949_v34, %v7951_v37 }
 0xa5b   : > { %v7331_v60 = vpack.c.bf16 %v7294_v10, %v7294_v10 }
 0xa5d   : > { %v7398_v15 = vunpack.c.l.b16 %v7331_v60 }
 0xa5e   : > { %v7245_v48 = vpop.f32.mrf.mxu3  ;;  %8398 = vmatpush.bf16.msra.mxu3 %v14209_v36 }
 0xa5f   : > { %v19606_v0 = vpack.c.b16 %v7398_v15, %v7397_v2 }
 0xa60   : > { %v7296_v14 = vpop.f32.mrf.mxu1 }
 0xa61   : > { %v7297_v25 = vadd.f32 %v7296_v14, %v19501_v17  ;;  %7639 = vmatmul.bf16.gmra.mxu0 %v19606_v0  ;;  %v7447_v16 = vshll.u32 %v19606_v0, 16  ;;  %v7451_v30 = vshrl.u32 %v19606_v0, 16  ;;  %v14228_v17 = vld [vmem:[%s21098_s11 + $0x258] sm:$0xff] }
 0xa62   : > { %8645 = vmatpush.bf16.msra.mxu1 %v14228_v17 }
 0xa63   : > { %v7332_v5 = vpack.c.bf16 %v7297_v25, %v7297_v25  ;;  %8158 = vmatmul.bf16.gmra.mxu1 %v19553_v19  ;;  %v7449_v50 = vrot.slane %v7447_v16, 1  ;;  %v7816_v57 = vrot.slane %v7451_v30, 1  ;;  %v7817_v18 = vrot.slane %v7447_v16, 2 }
 0xa64   : > { %v7665_v16 = vrot.slane %v19474_v40, 1 }
 0xa65   : > { %v7399_v46 = vunpack.c.l.b16 %v7332_v5  ;;  %v19629_v1 = vsel %vm2601_vm3, %v7445_v26, %v7449_v50  ;;  %v19631_v3 = vor.u32 %v7817_v18, %v7816_v57  ;;  %v19655_v28 = vor.u32 %v7451_v30, %v7449_v50 }
 0xa66   : > { %22160 = vst [vmem:[#allocation42_spill] sm:$0xff] %v19629_v1  ;;  %7541 = vmatmul.bf16.gmra.mxu2 %v19629_v1  ;;  %8646 = vmatpush.bf16.msra.mxu1 %v14227_v56  ;;  %v7248_v41 = vpop.f32.mrf.mxu3  ;;  %v7666_v54 = vsel %vm2977_vm5, %v7663_v44, %v7665_v16  ;;  %v14224_v44 = vld [vmem:[%s21098_s11 + $0x238] sm:$0xff]  ;;  %v14223_v56 = vld [vmem:[%s21098_s11 + $0x230] sm:$0xff] }
 0xa67   : > { %v19634_v20 = vpack.c.b16 %v7399_v46, %v7399_v46  ;;  %v19638_v47 = vsel %vm3173_vm4, %v7814_v13, %v19631_v3  ;;  %8519 = vmatpush.bf16.msrb.mxu0 %v14224_v44 }
 0xa68   : > { %22161 = vst [vmem:[#allocation78_spill] sm:$0xff] %v19638_v47  ;;  %v7298_v23 = vpop.f32.mrf.mxu1  ;;  %7908 = vmatmul.bf16.gmra.mxu3 %v19638_v47 }
 0xa69   : > { %v7455_v62 = vshll.u32 %v19634_v20, 16  ;;  %v7820_v58 = vshrl.u32 %v19634_v20, 16  ;;  %v7299_v7 = vadd.f32 %v7298_v23, %v19515_v11 }
 0xa6a   : > { %8647 = vmatpush.bf16.msra.mxu1 %v14226_v31 }
 0xa6b   : > { %v7822_v55 = vrot.slane %v7820_v58, 1  ;;  %v7823_v32 = vrot.slane %v7455_v62, 2  ;;  %v7457_v13 = vrot.slane %v7455_v62, 1  ;;  %8520 = vmatpush.bf16.msrb.mxu0 %v14223_v56  ;;  %v14264_v56 = vld [vmem:[%s21098_s11 + $0x378] sm:$0xff] }
 0xa6d   : > { %v7824_v63 = vor.u32 %v7823_v32, %v7822_v55  ;;  %v7458_v24 = vsel %vm2601_vm3, %v19655_v28, %v7457_v13  ;;  %v14222_v55 = vld [vmem:[%s21098_s11 + $0x228] sm:$0xff]  ;;  %v14221_v13 = vld [vmem:[%s21098_s11 + $0x220] sm:$0xff] }
 0xa6e   : > { %8648 = vmatpush.bf16.msra.mxu1 %v14225_v45  ;;  %v7250_v53 = vpop.f32.mrf.mxu3 }
 0xa6f   : > { %v7825_v10 = vsel %vm3173_vm4, %v19631_v3, %v7824_v63  ;;  %8521 = vmatpush.bf16.msrb.mxu0 %v14222_v55  ;;  %v14204_v55 = vld [vmem:[%s21098_s11 + $0x198] sm:$0xff] }
 0xa70   : > { %v7301_v22 = vpop.f32.mrf.mxu1 }
 0xa71   : > { %v7302_v4 = vadd.f32 %v7301_v22, %v19542_v42  ;;  %8023 = vmatmul.bf16.vlgmr.msra.gmra.mxu0 %v19461_v8  ;;  %v7333_v8 = vpack.c.bf16 %v7299_v7, %v7299_v7  ;;  %v7955_v22 = vrot.slane %v19553_v19, 2 }
 0xa72   : > { %9145 = vmatpush.bf16.msrb.mxu1 %v14264_v56 }
 0xa73   : > { %8163 = vmatmul.bf16.gmra.mxu1 %v19606_v0  ;;  %v7334_v9 = vpack.c.bf16 %v7302_v4, %v7302_v4  ;;  %v8084_v15 = vunpack.c.l.b16 %v7333_v8  ;;  %8522 = vmatpush.bf16.msrb.mxu0 %v14221_v13  ;;  %v7669_v8 = vrot.slane %v19553_v19, 1  ;;  %v14263_v13 = vld [vmem:[%s21098_s11 + $0x370] sm:$0xff] }
 0xa75   : > { %v19664_v6 = vunpack.c.l.b16 %v7334_v9  ;;  %v19672_v25 = vpack.c.b16 %v8084_v15, %v7399_v46  ;;  %v14219_v9 = vld [vmem:[%s21098_s11 + $0x210] sm:$0xff]  ;;  %v14248_v15 = vld [vmem:[%s21098_s11 + $0x2f8] sm:$0xff] }
 0xa76   : > { %7546 = vmatmul.bf16.gmra.mxu2 %v7458_v24  ;;  %v7253_v2 = vpop.f32.mrf.mxu3  ;;  %8895 = vmatpush.bf16.msrb.mxu3 %v14248_v15 }
 0xa77   : > { %9146 = vmatpush.bf16.msrb.mxu1 %v14263_v13 }
 0xa78   : > { %v7303_v42 = vpop.f32.mrf.mxu1  ;;  %7913 = vmatmul.bf16.gmra.mxu3 %v7825_v10 }
 0xa79   : > { %v7304_v60 = vadd.f32 %v7303_v42, %v19568_v29  ;;  %v14220_v42 = vld [vmem:[%s21098_s11 + $0x218] sm:$0xff] }
 0xa7a   : > { %8523 = vmatpush.bf16.msrb.mxu0 %v14220_v42  ;;  %v14244_v42 = vld [vmem:[%s21098_s11 + $0x2d8] sm:$0xff] }
 0xa7b   : > { %v7335_v49 = vpack.c.bf16 %v7304_v60, %v7304_v60 }
 0xa7d   : > { %v8710_v11 = vunpack.c.l.b16 %v7335_v49  ;;  %v14208_v49 = vld [vmem:[%s21098_s11 + $0x1b8] sm:$0xff] }
 0xa7e   : > { %v7255_v30 = vpop.f32.mrf.mxu3  ;;  %8524 = vmatpush.bf16.msrb.mxu0 %v14219_v9  ;;  %8269 = vmatpush.bf16.msra.mxu2 %v14208_v49 }
 0xa7f   : > { %v19667_v21 = vpack.c.b16 %v8710_v11, %v19664_v6  ;;  %v14247_v30 = vld [vmem:[%s21098_s11 + $0x2f0] sm:$0xff] }
 0xa80   : > { %v7306_v14 = vpop.f32.mrf.mxu1  ;;  %8896 = vmatpush.bf16.msrb.mxu3 %v14247_v30  ;;  %v14262_v30 = vld [vmem:[%s21098_s11 + $0x368] sm:$0xff] }
 0xa81   : > { %v7307_v29 = vadd.f32 %v7306_v14, %v19598_v27  ;;  %8028 = vmatmul.bf16.gmra.mxu0 %v7952_v39  ;;  %v7953_v27 = vrot.slane %v19506_v51, 2  ;;  %v14218_v14 = vld [vmem:[%s21098_s11 + $0x208] sm:$0xff]  ;;  %9147 = vmatpush.bf16.msrb.mxu1 %v14262_v30 }
 0xa82   : > { %8525 = vmatpush.bf16.msrb.mxu0 %v14218_v14 }
 0xa83   : > { %8168 = vmatmul.bf16.gmra.mxu1 %v19672_v25  ;;  %v7336_v26 = vpack.c.bf16 %v7307_v29, %v7307_v29  ;;  %v19717_v24 = vsel %vm3397_vm2, %v7953_v27, %v7955_v22  ;;  %v14207_v29 = vld [vmem:[%s21098_s11 + $0x1b0] sm:$0xff] }
 0xa84   : > { %22164 = vst [vmem:[#allocation107_spill] sm:$0xff] %v19717_v24  ;;  %8270 = vmatpush.bf16.msra.mxu2 %v14207_v29 }
 0xa85   : > { %v19681_v50 = vunpack.c.l.b16 %v7336_v26  ;;  %v19757_v26 = vrot.slane %v19606_v0, 2 }
 0xa86   : > { %7737 = vmatmul.bf16.vlgmr.msrb.gmra.mxu2 %v19466_v52  ;;  %v19688_v52 = vsel %vm3397_vm2, %v7951_v37, %v7953_v27 }
 0xa87   : > { %22162 = vst [vmem:[#allocation153_spill] sm:$0xff] %v19688_v52  ;;  %v19771_v27 = vsel %vm3397_vm2, %v7955_v22, %v19757_v26 }
 0xa88   : > { %v7308_v5 = vpop.f32.mrf.mxu1  ;;  %8399 = vmatmul.bf16.vlgmr.msra.gmra.mxu3 %v7666_v54  ;;  %22165 = vst [vmem:[#allocation108_spill] sm:$0xff] %v19771_v27 }
 0xa89   : > { %v7309_v34 = vadd.f32 %v7308_v5, %v7245_v48  ;;  %v7667_v48 = vrot.slane %v19506_v51, 1 }
 0xa8b   : > { %v7337_v57 = vpack.c.bf16 %v7309_v34, %v7309_v34  ;;  %v19699_v58 = vsel %vm2977_vm5, %v7665_v16, %v7667_v48  ;;  %v19737_v37 = vsel %vm2977_vm5, %v7667_v48, %v7669_v8  ;;  %v14206_v34 = vld [vmem:[%s21098_s11 + $0x1a8] sm:$0xff]  ;;  %v19786_v48 = vrot.slane %v19606_v0, 1 }
 0xa8c   : > { %8271 = vmatpush.bf16.msra.mxu2 %v14206_v34 }
 0xa8d   : > { %v9336_v18 = vunpack.c.l.b16 %v7337_v57 }
 0xa8e   : > { %v7615_v17 = vpop.f32.mrf.mxu0 }
 0xa8f   : > { %v19685_v36 = vpack.c.b16 %v9336_v18, %v19681_v50  ;;  %v14246_v18 = vld [vmem:[%s21098_s11 + $0x2e8] sm:$0xff] }
 0xa90   : > { %v7311_v46 = vpop.f32.mrf.mxu1  ;;  %8897 = vmatpush.bf16.msrb.mxu3 %v14246_v18 }
 0xa91   : > { %v7312_v38 = vadd.f32 %v7311_v46, %v7248_v41  ;;  %8033 = vmatmul.bf16.gmra.mxu0 %v19688_v52  ;;  %v21227_v22 = vshrl.u32 %v19685_v36, 16 }
 0xa93   : > { %8649 = vmatmul.bf16.vlgmr.msra.gmra.mxu1 %v7952_v39  ;;  %v7338_v62 = vpack.c.bf16 %v7312_v38, %v7312_v38  ;;  %v14205_v38 = vld [vmem:[%s21098_s11 + $0x1a0] sm:$0xff] }
 0xa94   : > { %8272 = vmatpush.bf16.msra.mxu2 %v14205_v38  ;;  %v14202_v38 = vld [vmem:[%s21098_s11 + $0x188] sm:$0xff] }
 0xa95   : > { %v19705_v32 = vunpack.c.l.b16 %v7338_v62  ;;  %v21230_v62 = vshll.u32 %v19667_v21, 16 }
 0xa96   : > { %v7617_v23 = vpop.f32.mrf.mxu0  ;;  %7742 = vmatmul.bf16.gmra.mxu2 %v7666_v54  ;;  %v14217_v54 = vld [vmem:[%s21098_s11 + $0x200] sm:$0xff] }
 0xa97   : > { %8526 = vmatpush.bf16.msrb.mxu0 %v14217_v54  ;;  %v14243_v54 = vld [vmem:[%s21098_s11 + $0x2d0] sm:$0xff] }
 0xa98   : > { %v7313_v31 = vpop.f32.mrf.mxu1  ;;  %8404 = vmatmul.bf16.gmra.mxu3 %v19699_v58  ;;  %8273 = vmatpush.bf16.msra.mxu2 %v14204_v55 }
 0xa99   : > { %v7314_v41 = vadd.f32 %v7313_v31, %v7250_v53  ;;  %v21229_v31 = vshrl.u32 %v19667_v21, 16 }
 0xa9b   : > { %v7339_v45 = vpack.c.bf16 %v7314_v41, %v7314_v41  ;;  %v9085_v9 = vrot.slane %v21229_v31, 1 }
 0xa9d   : > { %v9962_v4 = vunpack.c.l.b16 %v7339_v45  ;;  %v21228_v45 = vshll.u32 %v19685_v36, 16 }
 0xa9e   : > { %v19711_v63 = vpop.f32.mrf.mxu0 }
 0xa9f   : > { %v19714_v7 = vpack.c.b16 %v9962_v4, %v19705_v32  ;;  %v19806_v4 = vsel %vm2977_vm5, %v7669_v8, %v19786_v48  ;;  %v9086_v8 = vrot.slane %v21230_v62, 2  ;;  %v9712_v14 = vrot.slane %v21228_v45, 2 }
 0xaa0   : > { %v7316_v53 = vpop.f32.mrf.mxu1  ;;  %22166 = vst [vmem:[#allocation29_spill] sm:$0xff] %v19806_v4 }
 0xaa1   : > { %22163 = vst [vmem:[#allocation105_spill] sm:$0xff] %v19714_v7  ;;  %v19719_v10 = vadd.f32 %v7316_v53, %v7253_v2  ;;  %8038 = vmatmul.bf16.gmra.mxu0 %v19717_v24  ;;  %v19840_v34 = vor.u32 %v9086_v8, %v9085_v9  ;;  %v19863_v9 = vpack.c.b16 %v19705_v32, %v19705_v32  ;;  %v14260_v32 = vld [vmem:[%s21098_s11 + $0x358] sm:$0xff] }
 0xaa3   : > { %8654 = vmatmul.bf16.gmra.mxu1 %v19688_v52  ;;  %22168 = vst [vmem:[#allocation127_spill] sm:$0xff] %v19863_v9  ;;  %v21236_v30 = vshll.u32 %v19863_v9, 16 }
 0xaa5   : > { %v9718_v31 = vrot.slane %v21236_v30, 2 }
 0xaa6   : > { %v19730_v60 = vpop.f32.mrf.mxu0  ;;  %7747 = vmatmul.bf16.gmra.mxu2 %v19699_v58 }
 0xaa8   : > { %v7318_v2 = vpop.f32.mrf.mxu1  ;;  %8409 = vmatmul.bf16.gmra.mxu3 %v19737_v37 }
 0xaa9   : > { %v7522_v11 = vpop.f32.mrf.mxu2  ;;  %v9711_v2 = vrot.slane %v21227_v22, 1  ;;  %v7340_v22 = vpack.c.bf16 %v19719_v10, %v19719_v10 }
 0xaaa   : > { %v19746_v39 = vadd.f32 %v7615_v17, %v7522_v11  ;;  %v14203_v11 = vld [vmem:[%s21098_s11 + $0x190] sm:$0xff] }
 0xaab   : > { %v19751_v16 = vpop.f32.mrf.mxu3  ;;  %8274 = vmatpush.bf16.msra.mxu2 %v14203_v11  ;;  %v9713_v18 = vor.u32 %v9712_v14, %v9711_v2  ;;  %v14201_v2 = vld [vmem:[%s21098_s11 + $0x180] sm:$0xff]  ;;  %v19875_v14 = vrot.slane %v19672_v25, 1  ;;  %v10082_v10 = vunpack.c.l.b16 %v7340_v22 }
 0xaad   : > { %v19849_v56 = vsel %vm3173_vm4, %v19840_v34, %v9713_v18 }
 0xaae   : > { %v19762_v5 = vpop.f32.mrf.mxu0  ;;  %22167 = vst [vmem:[#allocation126_spill] sm:$0xff] %v19849_v56 }
 0xaaf   : > { %8275 = vmatpush.bf16.msra.mxu2 %v14202_v38  ;;  %v21234_v38 = vshrl.u32 %v19714_v7, 16 }
 0xab0   : > { %v19767_v57 = vpop.f32.mrf.mxu1 }
 0xab1   : > { %v7524_v17 = vpop.f32.mrf.mxu2  ;;  %8043 = vmatmul.bf16.gmra.mxu0 %v19771_v27 }
 0xab2   : > { %v19777_v46 = vadd.f32 %v7617_v23, %v7524_v17  ;;  %v14245_v23 = vld [vmem:[%s21098_s11 + $0x2e0] sm:$0xff] }
 0xab3   : > { %v19782_v44 = vpop.f32.mrf.mxu3  ;;  %8659 = vmatmul.bf16.gmra.mxu1 %v19717_v24  ;;  %8898 = vmatpush.bf16.msrb.mxu3 %v14245_v23  ;;  %v14261_v23 = vld [vmem:[%s21098_s11 + $0x360] sm:$0xff] }
 0xab4   : > { %9148 = vmatpush.bf16.msrb.mxu1 %v14261_v23  ;;  %8276 = vmatpush.bf16.msra.mxu2 %v14201_v2  ;;  %v9715_v23 = vshrl.u32 %v19863_v9, 16  ;;  %v10337_v2 = vrot.slane %v21234_v38, 1  ;;  %v14258_v38 = vld [vmem:[%s21098_s11 + $0x348] sm:$0xff] }
 0xab6   : > { %v19796_v41 = vpop.f32.mrf.mxu0  ;;  %7752 = vmatmul.bf16.gmra.mxu2 %v19737_v37 }
 0xab7   : > { %8899 = vmatpush.bf16.msrb.mxu3 %v14244_v42  ;;  %v14242_v42 = vld [vmem:[%s21098_s11 + $0x2c8] sm:$0xff] }
 0xab8   : > { %v19811_v53 = vpop.f32.mrf.mxu1  ;;  %8414 = vmatmul.bf16.gmra.mxu3 %v19806_v4  ;;  %9149 = vmatpush.bf16.msrb.mxu1 %v14260_v32 }
 0xab9   : > { %v7527_v49 = vpop.f32.mrf.mxu2 }
 0xaba   : > { %v19824_v15 = vadd.f32 %v19711_v63, %v7527_v49  ;;  %v7959_v63 = vrot.slane %v19634_v20, 2 }
 0xabb   : > { %v19831_v29 = vpop.f32.mrf.mxu3  ;;  %8900 = vmatpush.bf16.msrb.mxu3 %v14243_v54  ;;  %v21235_v54 = vshll.u32 %v19714_v7, 16 }
 0xabc   : > { %v7960_v13 = vsel %vm3397_vm2, %v19757_v26, %v7959_v63 }
 0xabd   : > { %v10338_v32 = vrot.slane %v21235_v54, 2 }
 0xabe   : > { %v19842_v17 = vpop.f32.mrf.mxu0 }
 0xabf   : > { %8901 = vmatpush.bf16.msrb.mxu3 %v14242_v42  ;;  %v14259_v42 = vld [vmem:[%s21098_s11 + $0x350] sm:$0xff]  ;;  %v10339_v56 = vor.u32 %v10338_v32, %v10337_v2  ;;  %v19933_v32 = vpack.c.b16 %v10082_v10, %v10082_v10 }
 0xac0   : > { %v19854_v55 = vpop.f32.mrf.mxu1  ;;  %9150 = vmatpush.bf16.msrb.mxu1 %v14259_v42 }
 0xac1   : > { %v7529_v8 = vpop.f32.mrf.mxu2  ;;  %8048 = vmatmul.bf16.gmra.mxu0 %v7960_v13  ;;  %v19891_v13 = vsel %vm2977_vm5, %v19786_v48, %v19875_v14  ;;  %22173 = vst [vmem:[#allocation159_spill] sm:$0xff] %v19933_v32  ;;  %v10341_v10 = vshrl.u32 %v19933_v32, 16 }
 0xac2   : > { %v19866_v49 = vadd.f32 %v19730_v60, %v7529_v8  ;;  %v14241_v60 = vld [vmem:[%s21098_s11 + $0x2c0] sm:$0xff]  ;;  %22169 = vst [vmem:[#allocation89_spill] sm:$0xff] %v19891_v13 }
 0xac3   : > { %v19871_v11 = vpop.f32.mrf.mxu3  ;;  %8664 = vmatmul.bf16.gmra.mxu1 %v19771_v27  ;;  %8902 = vmatpush.bf16.msrb.mxu3 %v14241_v60  ;;  %v9717_v60 = vrot.slane %v9715_v23, 1  ;;  %v19916_v23 = vsel %vm3173_vm4, %v9713_v18, %v10339_v56 }
 0xac4   : > { %22170 = vst [vmem:[#allocation139_spill] sm:$0xff] %v19916_v23  ;;  %9151 = vmatpush.bf16.msrb.mxu1 %v14258_v38 }
 0xac5   : > { %v9719_v54 = vor.u32 %v9718_v31, %v9717_v60  ;;  %v14257_v31 = vld [vmem:[%s21098_s11 + $0x340] sm:$0xff] }
 0xac6   : > { %v7632_v63 = vpop.f32.mrf.mxu0  ;;  %7757 = vmatmul.bf16.gmra.mxu2 %v19806_v4 }
 0xac7   : > { %v19919_v42 = vsel %vm3173_vm4, %v9713_v18, %v9719_v54  ;;  %v7673_v18 = vrot.slane %v19634_v20, 1  ;;  %v21243_v20 = vshll.u32 %v19933_v32, 16 }
 0xac8   : > { %v19896_v8 = vpop.f32.mrf.mxu1  ;;  %8419 = vmatmul.bf16.gmra.mxu3 %v19891_v13  ;;  %22171 = vst [vmem:[#allocation147_spill] sm:$0xff] %v19919_v42  ;;  %9152 = vmatpush.bf16.msrb.mxu1 %v14257_v31 }
 0xac9   : > { %v7532_v45 = vpop.f32.mrf.mxu2 }
 0xaca   : > { %v19908_v62 = vadd.f32 %v19762_v5, %v7532_v45  ;;  %v19922_v5 = vrot.slane %v19672_v25, 2  ;;  %v19926_v45 = vpack.c.b16 %v19664_v6, %v19664_v6 }
 0xacb   : > { %v19910_v27 = vpop.f32.mrf.mxu3 }
 0xacc   : > { %22172 = vst [vmem:[#allocation83_spill] sm:$0xff] %v19922_v5  ;;  %v19943_v6 = vsel %vm3397_vm2, %v19757_v26, %v19922_v5  ;;  %v8339_v60 = vrot.slane %v19926_v45, 1  ;;  %v10343_v26 = vrot.slane %v10341_v10, 1 }
 0xacd   : > { %22174 = vst [vmem:[#allocation34_spill] sm:$0xff] %v19943_v6 }
 0xace   : > { %v7635_v30 = vpop.f32.mrf.mxu0  ;;  %v8340_v31 = vsel %vm2977_vm5, %v19875_v14, %v8339_v60  ;;  %v8589_v60 = vrot.slane %v19926_v45, 2 }
 0xad0   : > { %v19931_v2 = vpop.f32.mrf.mxu1 }
 0xad1   : > { %v7534_v22 = vpop.f32.mrf.mxu2  ;;  %8527 = vmatmul.bf16.vlgmr.msrb.gmra.mxu0 %v19494_v33  ;;  %v7674_v33 = vsel %vm2977_vm5, %v19786_v48, %v7673_v18 }
 0xad2   : > { %v19938_v54 = vadd.f32 %v19796_v41, %v7534_v22  ;;  %v10344_v22 = vrot.slane %v21243_v20, 2 }
 0xad3   : > { %v19945_v38 = vpop.f32.mrf.mxu3  ;;  %8669 = vmatmul.bf16.gmra.mxu1 %v19943_v6 }
 0xad4   : > { %v10345_v7 = vor.u32 %v10344_v22, %v10343_v26 }
 0xad6   : > { %v7637_v41 = vpop.f32.mrf.mxu0  ;;  %7762 = vmatmul.bf16.gmra.mxu2 %v7674_v33  ;;  %v19965_v6 = vsel %vm3173_vm4, %v10339_v56, %v10345_v7 }
 0xad7   : > { %22176 = vst [vmem:[#allocation112_spill] sm:$0xff] %v19965_v6 }
 0xad8   : > { %v19957_v42 = vpop.f32.mrf.mxu1  ;;  %8424 = vmatmul.bf16.gmra.mxu3 %v8340_v31  ;;  %v8590_v31 = vsel %vm3397_vm2, %v19922_v5, %v8589_v60  ;;  %v14256_v60 = vld [vmem:[%s21098_s11 + $0x338] sm:$0xff]  ;;  %v14253_v5 = vld [vmem:[%s21098_s11 + $0x320] sm:$0xff] }
 0xad9   : > { %22175 = vst [vmem:[#allocation103_spill] sm:$0xff] %v19957_v42  ;;  %v7537_v23 = vpop.f32.mrf.mxu2  ;;  %9017 = vmatpush.bf16.msra.mxu0 %v14256_v60  ;;  %v14279_v42 = vld [vmem:[%s21098_s11 + $0x3f0] sm:$0xff] }
 0xada   : > { %v19960_v48 = vadd.f32 %v19842_v17, %v7537_v23 }
 0xadb   : > { %v19962_v18 = vpop.f32.mrf.mxu3 }
 0xade   : > { %v7640_v33 = vpop.f32.mrf.mxu0 }
 0xae0   : > { %v19968_v10 = vpop.f32.mrf.mxu1 }
 0xae1   : > { %22177 = vst [vmem:[#allocation162_spill] sm:$0xff] %v19968_v10  ;;  %v7539_v32 = vpop.f32.mrf.mxu2  ;;  %8532 = vmatmul.bf16.gmra.mxu0 %v19529_v12  ;;  %v14250_v10 = vld [vmem:[%s21098_s11 + $0x308] sm:$0xff] }
 0xae2   : > { %v19971_v20 = vadd.f32 %v7632_v63, %v7539_v32 }
 0xae3   : > { %v19975_v17 = vpop.f32.mrf.mxu3  ;;  %8674 = vmatmul.bf16.gmra.mxu1 %v8590_v31 }
 0xae6   : > { %v7642_v23 = vpop.f32.mrf.mxu0  ;;  %8277 = vmatmul.bf16.vlgmr.msra.gmra.mxu2 %v19487_v43 }
 0xae8   : > { %8903 = vmatmul.bf16.vlgmr.msrb.gmra.mxu3 %v19519_v59  ;;  %v19979_v56 = vpop.f32.mrf.mxu1 }
 0xae9   : > { %v7542_v7 = vpop.f32.mrf.mxu2  ;;  %22178 = vst [vmem:[#allocation150_spill] sm:$0xff] %v19979_v56  ;;  %v14280_v56 = vld [vmem:[%s21098_s11 + $0x3f8] sm:$0xff] }
 0xaea   : > { %v19981_v26 = vadd.f32 %v7635_v30, %v7542_v7  ;;  %v14255_v30 = vld [vmem:[%s21098_s11 + $0x330] sm:$0xff]  ;;  %9387 = vmatpush.bf16.msra.mxu3 %v14280_v56 }
 0xaeb   : > { %v19983_v22 = vpop.f32.mrf.mxu3  ;;  %9018 = vmatpush.bf16.msra.mxu0 %v14255_v30 }
 0xaee   : > { %v8024_v63 = vpop.f32.mrf.mxu0  ;;  %9388 = vmatpush.bf16.msra.mxu3 %v14279_v42 }
 0xaf0   : > { %v19994_v6 = vpop.f32.mrf.mxu1 }
 0xaf1   : > { %v7544_v32 = vpop.f32.mrf.mxu2  ;;  %8537 = vmatmul.bf16.gmra.mxu0 %v19582_v35  ;;  %22179 = vst [vmem:[#allocation134_spill] sm:$0xff] %v19994_v6 }
 0xaf2   : > { %v19989_v31 = vadd.f32 %v7637_v41, %v7544_v32  ;;  %v14254_v32 = vld [vmem:[%s21098_s11 + $0x328] sm:$0xff] }
 0xaf3   : > { %v19991_v43 = vpop.f32.mrf.mxu3  ;;  %9153 = vmatmul.bf16.vlgmr.msrb.gmra.mxu1 %v19529_v12  ;;  %9019 = vmatpush.bf16.msra.mxu0 %v14254_v32  ;;  %v8207_v32 = vshll.u32 %v19672_v25, 16 }
 0xaf6   : > { %v19999_v7 = vpop.f32.mrf.mxu0  ;;  %8282 = vmatmul.bf16.gmra.mxu2 %v19519_v59 }
 0xaf7   : > { %9020 = vmatpush.bf16.msra.mxu0 %v14253_v5  ;;  %v14251_v5 = vld [vmem:[%s21098_s11 + $0x310] sm:$0xff] }
 0xaf8   : > { %8908 = vmatmul.bf16.gmra.mxu3 %v19575_v61  ;;  %v20013_v6 = vpop.f32.mrf.mxu1 }
 0xaf9   : > { %v7547_v41 = vpop.f32.mrf.mxu2  ;;  %22180 = vst [vmem:[#allocation69_spill] sm:$0xff] %v20013_v6  ;;  %v21252_v6 = vshrl.u32 %v19672_v25, 16 }
 0xafa   : > { %v20006_v12 = vadd.f32 %v7640_v33, %v7547_v41  ;;  %v14252_v33 = vld [vmem:[%s21098_s11 + $0x318] sm:$0xff] }
 0xafb   : > { %v20008_v60 = vpop.f32.mrf.mxu3  ;;  %9021 = vmatpush.bf16.msra.mxu0 %v14252_v33  ;;  %v8459_v33 = vrot.slane %v21252_v6, 1 }
 0xafe   : > { %v20015_v59 = vpop.f32.mrf.mxu0 }
 0xaff   : > { %9022 = vmatpush.bf16.msra.mxu0 %v14251_v5 }
 0xb01   : > { %v7549_v30 = vpop.f32.mrf.mxu2  ;;  %8542 = vmatmul.bf16.gmra.mxu0 %v19638_v47 }
 0xb02   : > { %v20021_v41 = vadd.f32 %v7642_v23, %v7549_v30  ;;  %v14240_v23 = vld [vmem:[%s21098_s11 + $0x2b8] sm:$0xff]  ;;  %v20037_v30 = vpop.f32.mrf.mxu1 }
 0xb03   : > { %v20023_v24 = vpop.f32.mrf.mxu3  ;;  %9158 = vmatmul.bf16.gmra.mxu1 %v19582_v35  ;;  %22181 = vst [vmem:[#allocation113_spill] sm:$0xff] %v20037_v30  ;;  %v8460_v35 = vrot.slane %v8207_v32, 2  ;;  %8761 = vmatpush.bf16.msrb.mxu2 %v14240_v23  ;;  %v14239_v30 = vld [vmem:[%s21098_s11 + $0x2b0] sm:$0xff] }
 0xb04   : > { %9023 = vmatpush.bf16.msra.mxu0 %v14250_v10  ;;  %v14238_v10 = vld [vmem:[%s21098_s11 + $0x2a8] sm:$0xff] }
 0xb05   : > { %v20055_v6 = vor.u32 %v8460_v35, %v8459_v33 }
 0xb06   : > { %v20031_v52 = vpop.f32.mrf.mxu0  ;;  %8287 = vmatmul.bf16.gmra.mxu2 %v19575_v61 }
 0xb07   : > { %8762 = vmatpush.bf16.msrb.mxu2 %v14239_v30  ;;  %v20073_v35 = vsel %vm3173_vm4, %v19631_v3, %v20055_v6  ;;  %v8209_v3 = vrot.slane %v8207_v32, 1  ;;  %v14236_v32 = vld [vmem:[%s21098_s11 + $0x298] sm:$0xff] }
 0xb08   : > { %8913 = vmatmul.bf16.gmra.mxu3 %v19629_v1  ;;  %22182 = vst [vmem:[#allocation101_spill] sm:$0xff] %v20073_v35 }
 0xb09   : > { %v7738_v9 = vpop.f32.mrf.mxu2 }
 0xb0a   : > { %v7768_v5 = vadd.f32 %v7738_v9, %v19746_v39  ;;  %v14249_v39 = vld [vmem:[%s21098_s11 + $0x300] sm:$0xff]  ;;  %v20079_v42 = vpop.f32.mrf.mxu1 }
 0xb0b   : > { %v20052_v61 = vpop.f32.mrf.mxu3  ;;  %9024 = vmatpush.bf16.msra.mxu0 %v14249_v39  ;;  %8763 = vmatpush.bf16.msrb.mxu2 %v14238_v10  ;;  %22183 = vst [vmem:[#allocation136_spill] sm:$0xff] %v20079_v42  ;;  %v21255_v10 = vshll.u32 %v19926_v45, 16 }
 0xb0c   : > { %v7919_v23 = vadd.f32 %v19751_v16, %v7768_v5  ;;  %v14278_v16 = vld [vmem:[%s21098_s11 + $0x3e8] sm:$0xff] }
 0xb0d   : > { %9389 = vmatpush.bf16.msra.mxu3 %v14278_v16  ;;  %v14277_v16 = vld [vmem:[%s21098_s11 + $0x3e0] sm:$0xff] }
 0xb0e   : > { %v20063_v9 = vpop.f32.mrf.mxu0  ;;  %v20068_v56 = vadd.f32 %v8024_v63, %v7919_v23  ;;  %v14237_v63 = vld [vmem:[%s21098_s11 + $0x2a0] sm:$0xff]  ;;  %v14296_v23 = vld [vmem:[%s21098_s11 + $0x478] sm:$0xff] }
 0xb0f   : > { %8764 = vmatpush.bf16.msrb.mxu2 %v14237_v63  ;;  %9643 = vmatpush.bf16.msra.mxu1 %v14296_v23  ;;  %v14295_v63 = vld [vmem:[%s21098_s11 + $0x470] sm:$0xff] }
 0xb11   : > { %v7740_v30 = vpop.f32.mrf.mxu2  ;;  %8547 = vmatmul.bf16.gmra.mxu0 %v20073_v35  ;;  %9390 = vmatpush.bf16.msra.mxu3 %v14277_v16  ;;  %v8466_v16 = vrot.slane %v21255_v10, 2 }
 0xb12   : > { %v7769_v33 = vadd.f32 %v7740_v30, %v19777_v46  ;;  %v8463_v46 = vshrl.u32 %v19926_v45, 16 }
 0xb13   : > { %v20085_v5 = vpop.f32.mrf.mxu3  ;;  %9163 = vmatmul.bf16.gmra.mxu1 %v19638_v47  ;;  %8765 = vmatpush.bf16.msrb.mxu2 %v14236_v32  ;;  %v14235_v47 = vld [vmem:[%s21098_s11 + $0x290] sm:$0xff]  ;;  %v20128_v32 = vpop.f32.mrf.mxu1 }
 0xb14   : > { %v7920_v39 = vadd.f32 %v19782_v44, %v7769_v33  ;;  %v20108_v33 = vsel %vm2601_vm3, %v19655_v28, %v8209_v3  ;;  %v8465_v23 = vrot.slane %v8463_v46, 1  ;;  %9644 = vmatpush.bf16.msra.mxu1 %v14295_v63  ;;  %v14294_v46 = vld [vmem:[%s21098_s11 + $0x468] sm:$0xff]  ;;  %22184 = vst [vmem:[#allocation118_spill] sm:$0xff] %v20128_v32 }
 0xb16   : > { %v20097_v30 = vpop.f32.mrf.mxu0  ;;  %8292 = vmatmul.bf16.gmra.mxu2 %v19629_v1  ;;  %v20104_v44 = vadd.f32 %v19999_v7, %v7920_v39  ;;  %v14276_v7 = vld [vmem:[%s21098_s11 + $0x3d8] sm:$0xff]  ;;  %v8467_v1 = vor.u32 %v8466_v16, %v8465_v23  ;;  %v14274_v23 = vld [vmem:[%s21098_s11 + $0x3c8] sm:$0xff] }
 0xb17   : > { %9391 = vmatpush.bf16.msra.mxu3 %v14276_v7  ;;  %8766 = vmatpush.bf16.msrb.mxu2 %v14235_v47  ;;  %v14234_v7 = vld [vmem:[%s21098_s11 + $0x288] sm:$0xff] }
 0xb18   : > { %8918 = vmatmul.bf16.gmra.mxu3 %v20108_v33  ;;  %9645 = vmatpush.bf16.msra.mxu1 %v14294_v46  ;;  %v8468_v47 = vsel %vm3173_vm4, %v20055_v6, %v8467_v1  ;;  %v22185_v1 = vshll.u32 %v19667_v21, 16 }
 0xb19   : > { %v7743_v39 = vpop.f32.mrf.mxu2 }
 0xb1a   : > { %v7770_v28 = vadd.f32 %v7743_v39, %v19824_v15  ;;  %v14275_v15 = vld [vmem:[%s21098_s11 + $0x3d0] sm:$0xff]  ;;  %v8835_v46 = vrot.slane %v22185_v1, 1 }
 0xb1b   : > { %v20123_v42 = vpop.f32.mrf.mxu3  ;;  %9392 = vmatpush.bf16.msra.mxu3 %v14275_v15  ;;  %8767 = vmatpush.bf16.msrb.mxu2 %v14234_v7  ;;  %v14292_v15 = vld [vmem:[%s21098_s11 + $0x458] sm:$0xff] }
 0xb1c   : > { %v7921_v10 = vadd.f32 %v19831_v29, %v7770_v28  ;;  %v14293_v29 = vld [vmem:[%s21098_s11 + $0x460] sm:$0xff] }
 0xb1d   : > { %9646 = vmatpush.bf16.msra.mxu1 %v14293_v29  ;;  %v22186_v29 = vshrl.u32 %v19672_v25, 16 }
 0xb1e   : > { %v20134_v63 = vpop.f32.mrf.mxu0  ;;  %v20140_v39 = vadd.f32 %v20015_v59, %v7921_v10  ;;  %v14233_v59 = vld [vmem:[%s21098_s11 + $0x280] sm:$0xff] }
 0xb1f   : > { %9393 = vmatpush.bf16.msra.mxu3 %v14274_v23  ;;  %8768 = vmatpush.bf16.msrb.mxu2 %v14233_v59  ;;  %v20168_v23 = vpop.f32.mrf.mxu1 }
 0xb20   : > { %22187 = vst [vmem:[#allocation74_spill] sm:$0xff] %v20168_v23  ;;  %v22189_v23 = vshll.u32 %v19926_v45, 16 }
 0xb21   : > { %v7745_v16 = vpop.f32.mrf.mxu2  ;;  %8552 = vmatmul.bf16.gmra.mxu0 %v8468_v47  ;;  %v8213_v47 = vor.u32 %v22186_v29, %v8209_v3  ;;  %9647 = vmatpush.bf16.msra.mxu1 %v14292_v15  ;;  %v20184_v15 = vpack.c.b16 %v19681_v50, %v19681_v50  ;;  %v14289_v50 = vld [vmem:[%s21098_s11 + $0x440] sm:$0xff] }
 0xb22   : > { %v7771_v28 = vadd.f32 %v7745_v16, %v19866_v49  ;;  %v14273_v49 = vld [vmem:[%s21098_s11 + $0x3c0] sm:$0xff]  ;;  %v8217_v32 = vrot.slane %v22189_v23, 1 }
 0xb23   : > { %v20154_v10 = vpop.f32.mrf.mxu3  ;;  %9168 = vmatmul.bf16.gmra.mxu1 %v20073_v35  ;;  %9394 = vmatpush.bf16.msra.mxu3 %v14273_v49 }
 0xb24   : > { %v7922_v7 = vadd.f32 %v19871_v11, %v7771_v28  ;;  %v20175_v11 = vsel %vm2601_vm3, %v8213_v47, %v8835_v46  ;;  %v14291_v28 = vld [vmem:[%s21098_s11 + $0x450] sm:$0xff]  ;;  %v8218_v23 = vsel %vm2601_vm3, %v8213_v47, %v8217_v32 }
 0xb25   : > { %9648 = vmatpush.bf16.msra.mxu1 %v14291_v28  ;;  %v8841_v28 = vshll.u32 %v20184_v15, 16 }
 0xb26   : > { %v8041_v16 = vpop.f32.mrf.mxu0  ;;  %8297 = vmatmul.bf16.gmra.mxu2 %v20108_v33  ;;  %v20172_v1 = vadd.f32 %v20031_v52, %v7922_v7  ;;  %v14290_v52 = vld [vmem:[%s21098_s11 + $0x448] sm:$0xff] }
 0xb28   : > { %8923 = vmatmul.bf16.gmra.mxu3 %v20175_v11 }
 0xb29   : > { %v7748_v3 = vpop.f32.mrf.mxu2  ;;  %9649 = vmatpush.bf16.msra.mxu1 %v14290_v52  ;;  %v22191_v52 = vshrl.u32 %v19667_v21, 16 }
 0xb2a   : > { %v7772_v59 = vadd.f32 %v7748_v3, %v19908_v62  ;;  %v20199_v62 = vpop.f32.mrf.mxu1 }
 0xb2b   : > { %v20186_v49 = vpop.f32.mrf.mxu3  ;;  %22188 = vst [vmem:[#allocation156_spill] sm:$0xff] %v20199_v62 }
 0xb2c   : > { %v7923_v7 = vadd.f32 %v19910_v27, %v7772_v59 }
 0xb2d   : > { %9650 = vmatpush.bf16.msra.mxu1 %v14289_v50 }
 0xb2e   : > { %v8044_v29 = vpop.f32.mrf.mxu0  ;;  %v20193_v35 = vadd.f32 %v20063_v9, %v7923_v7  ;;  %v20208_v9 = vsel %vm3173_vm4, %v20055_v6, %v19840_v34  ;;  %v20215_v7 = vor.u32 %v22191_v52, %v8835_v46 }
 0xb2f   : > { %22190 = vst [vmem:[#allocation140_spill] sm:$0xff] %v20208_v9 }
 0xb31   : > { %v7750_v3 = vpop.f32.mrf.mxu2  ;;  %9025 = vmatmul.bf16.vlgmr.msra.gmra.mxu0 %v19699_v58  ;;  %v8843_v58 = vrot.slane %v8841_v28, 1 }
 0xb32   : > { %v7773_v27 = vadd.f32 %v7750_v3, %v19938_v54  ;;  %v9089_v54 = vshrl.u32 %v20184_v15, 16  ;;  %v20225_v62 = vpop.f32.mrf.mxu1 }
 0xb33   : > { %v20210_v59 = vpop.f32.mrf.mxu3  ;;  %9173 = vmatmul.bf16.gmra.mxu1 %v20208_v9  ;;  %v8844_v3 = vsel %vm2601_vm3, %v20215_v7, %v8843_v58 }
 0xb34   : > { %v7924_v45 = vadd.f32 %v19945_v38, %v7773_v27  ;;  %v9091_v52 = vrot.slane %v9089_v54, 1  ;;  %v9092_v38 = vrot.slane %v8841_v28, 2 }
 0xb36   : > { %v8046_v50 = vpop.f32.mrf.mxu0  ;;  %8302 = vmatmul.bf16.gmra.mxu2 %v8218_v23  ;;  %v20221_v6 = vadd.f32 %v20097_v30, %v7924_v45  ;;  %v9093_v23 = vor.u32 %v9092_v38, %v9091_v52 }
 0xb38   : > { %8928 = vmatmul.bf16.gmra.mxu3 %v8844_v3  ;;  %v9094_v3 = vsel %vm3173_vm4, %v19840_v34, %v9093_v23 }
 0xb39   : > { %v7753_v9 = vpop.f32.mrf.mxu2 }
 0xb3a   : > { %v7774_v46 = vadd.f32 %v7753_v9, %v19960_v48  ;;  %v20240_v28 = vpop.f32.mrf.mxu1 }
 0xb3b   : > { %v20228_v27 = vpop.f32.mrf.mxu3 }
 0xb3c   : > { %v7925_v32 = vadd.f32 %v19962_v18, %v7774_v46 }
 0xb3e   : > { %v8049_v47 = vpop.f32.mrf.mxu0  ;;  %v20232_v30 = vadd.f32 %v20134_v63, %v7925_v32 }
 0xb41   : > { %v7755_v45 = vpop.f32.mrf.mxu2  ;;  %9030 = vmatmul.bf16.gmra.mxu0 %v19737_v37 }
 0xb42   : > { %v7775_v58 = vadd.f32 %v7755_v45, %v19971_v20  ;;  %v20251_v52 = vpop.f32.mrf.mxu1 }
 0xb43   : > { %v20238_v48 = vpop.f32.mrf.mxu3  ;;  %9178 = vmatmul.bf16.gmra.mxu1 %v9094_v3 }
 0xb44   : > { %v7926_v18 = vadd.f32 %v19975_v17, %v7775_v58 }
 0xb46   : > { %v8051_v9 = vpop.f32.mrf.mxu0  ;;  %8769 = vmatmul.bf16.vlgmr.msrb.gmra.mxu2 %v19474_v40  ;;  %v20244_v63 = vadd.f32 %v8041_v16, %v7926_v18  ;;  %v14288_v40 = vld [vmem:[%s21098_s11 + $0x438] sm:$0xff] }
 0xb47   : > { %9521 = vmatpush.bf16.msrb.mxu0 %v14288_v40  ;;  %v14283_v40 = vld [vmem:[%s21098_s11 + $0x410] sm:$0xff] }
 0xb48   : > { %9395 = vmatmul.bf16.vlgmr.msra.gmra.mxu3 %v19506_v51 }
 0xb49   : > { %v7758_v54 = vpop.f32.mrf.mxu2 }
 0xb4a   : > { %v7776_v20 = vadd.f32 %v7758_v54, %v19981_v26  ;;  %v20272_v58 = vpop.f32.mrf.mxu1 }
 0xb4b   : > { %v20248_v46 = vpop.f32.mrf.mxu3 }
 0xb4c   : > { %v7927_v34 = vadd.f32 %v19983_v22, %v7776_v20  ;;  %v14287_v22 = vld [vmem:[%s21098_s11 + $0x430] sm:$0xff] }
 0xb4d   : > { %9522 = vmatpush.bf16.msrb.mxu0 %v14287_v22  ;;  %v14312_v22 = vld [vmem:[%s21098_s11 + $0x4f8] sm:$0xff] }
 0xb4e   : > { %v8528_v38 = vpop.f32.mrf.mxu0  ;;  %v20253_v32 = vadd.f32 %v8044_v29, %v7927_v34  ;;  %9893 = vmatpush.bf16.msrb.mxu3 %v14312_v22 }
 0xb51   : > { %v7760_v17 = vpop.f32.mrf.mxu2  ;;  %9035 = vmatmul.bf16.gmra.mxu0 %v19806_v4 }
 0xb52   : > { %v7777_v16 = vadd.f32 %v7760_v17, %v19989_v31  ;;  %v20293_v34 = vpop.f32.mrf.mxu1 }
 0xb53   : > { %v20260_v23 = vpop.f32.mrf.mxu3  ;;  %9651 = vmatmul.bf16.vlgmr.msra.gmra.mxu1 %v19737_v37  ;;  %v14286_v37 = vld [vmem:[%s21098_s11 + $0x428] sm:$0xff] }
 0xb54   : > { %v7928_v26 = vadd.f32 %v19991_v43, %v7777_v16  ;;  %9523 = vmatpush.bf16.msrb.mxu0 %v14286_v37  ;;  %v14282_v37 = vld [vmem:[%s21098_s11 + $0x408] sm:$0xff] }
 0xb56   : > { %v20267_v29 = vpop.f32.mrf.mxu0  ;;  %8774 = vmatmul.bf16.gmra.mxu2 %v19506_v51  ;;  %v20270_v45 = vadd.f32 %v8046_v50, %v7928_v26  ;;  %v14285_v51 = vld [vmem:[%s21098_s11 + $0x420] sm:$0xff]  ;;  %v14272_v26 = vld [vmem:[%s21098_s11 + $0x3b8] sm:$0xff] }
 0xb57   : > { %9267 = vmatpush.bf16.msra.mxu2 %v14272_v26 }
 0xb58   : > { %9400 = vmatmul.bf16.gmra.mxu3 %v19553_v19  ;;  %9524 = vmatpush.bf16.msrb.mxu0 %v14285_v51  ;;  %v14311_v51 = vld [vmem:[%s21098_s11 + $0x4f0] sm:$0xff] }
 0xb59   : > { %v7763_v31 = vpop.f32.mrf.mxu2  ;;  %9894 = vmatpush.bf16.msrb.mxu3 %v14311_v51  ;;  %v14327_v51 = vld [vmem:[%s21098_s11 + $0x570] sm:$0xff] }
 0xb5a   : > { %v7778_v43 = vadd.f32 %v7763_v31, %v20006_v12  ;;  %v14284_v12 = vld [vmem:[%s21098_s11 + $0x418] sm:$0xff] }
 0xb5b   : > { %v20279_v3 = vpop.f32.mrf.mxu3 }
 0xb5c   : > { %v7929_v18 = vadd.f32 %v20008_v60, %v7778_v43  ;;  %9525 = vmatpush.bf16.msrb.mxu0 %v14284_v12  ;;  %v14281_v12 = vld [vmem:[%s21098_s11 + $0x400] sm:$0xff] }
 0xb5e   : > { %v20285_v50 = vpop.f32.mrf.mxu0  ;;  %v20287_v54 = vadd.f32 %v8049_v47, %v7929_v18  ;;  %v20323_v18 = vpop.f32.mrf.mxu1 }
 0xb60   : > { %9526 = vmatpush.bf16.msrb.mxu0 %v14283_v40  ;;  %v8175_v40 = vadd.f32 %v19811_v53, %v20104_v44  ;;  %v14328_v53 = vld [vmem:[%s21098_s11 + $0x578] sm:$0xff]  ;;  %v14309_v44 = vld [vmem:[%s21098_s11 + $0x4e0] sm:$0xff] }
 0xb61   : > { %v7765_v20 = vpop.f32.mrf.mxu2  ;;  %9040 = vmatmul.bf16.gmra.mxu0 %v19891_v13  ;;  %10147 = vmatpush.bf16.msrb.mxu1 %v14328_v53  ;;  %v14266_v53 = vld [vmem:[%s21098_s11 + $0x388] sm:$0xff] }
 0xb62   : > { %v7779_v60 = vadd.f32 %v7765_v20, %v20021_v41 }
 0xb63   : > { %v20296_v17 = vpop.f32.mrf.mxu3  ;;  %9656 = vmatmul.bf16.gmra.mxu1 %v19806_v4 }
 0xb64   : > { %v7930_v47 = vadd.f32 %v20023_v24, %v7779_v60  ;;  %v8174_v24 = vadd.f32 %v19767_v57, %v20068_v56  ;;  %9527 = vmatpush.bf16.msrb.mxu0 %v14282_v37  ;;  %v20327_v56 = vrot.slane %v19667_v21, 1 }
 0xb65   : > { %10148 = vmatpush.bf16.msrb.mxu1 %v14327_v51 }
 0xb66   : > { %v20303_v16 = vpop.f32.mrf.mxu0  ;;  %8779 = vmatmul.bf16.gmra.mxu2 %v19553_v19  ;;  %v20309_v41 = vadd.f32 %v8051_v9, %v7930_v47  ;;  %v14271_v9 = vld [vmem:[%s21098_s11 + $0x3b0] sm:$0xff]  ;;  %v20349_v26 = vsel %vm2977_vm5, %v19875_v14, %v20327_v56  ;;  %v20366_v37 = vpop.f32.mrf.mxu1 }
 0xb67   : > { %9268 = vmatpush.bf16.msra.mxu2 %v14271_v9  ;;  %22192 = vst [vmem:[#allocation23_spill] sm:$0xff] %v20349_v26  ;;  %v14268_v9 = vld [vmem:[%s21098_s11 + $0x398] sm:$0xff] }
 0xb68   : > { %9405 = vmatmul.bf16.gmra.mxu3 %v19606_v0  ;;  %9528 = vmatpush.bf16.msrb.mxu0 %v14281_v12  ;;  %v8176_v12 = vadd.f32 %v19854_v55, %v20140_v39  ;;  %v8965_v55 = vrot.slane %v20184_v15, 1  ;;  %v14307_v39 = vld [vmem:[%s21098_s11 + $0x4d0] sm:$0xff] }
 0xb69   : > { %v8278_v31 = vpop.f32.mrf.mxu2 }
 0xb6a   : > { %v8308_v43 = vadd.f32 %v8278_v31, %v8174_v24  ;;  %v14310_v24 = vld [vmem:[%s21098_s11 + $0x4e8] sm:$0xff]  ;;  %v8966_v51 = vsel %vm2977_vm5, %v20327_v56, %v8965_v55  ;;  %v14323_v55 = vld [vmem:[%s21098_s11 + $0x550] sm:$0xff] }
 0xb6b   : > { %v20332_v20 = vpop.f32.mrf.mxu3  ;;  %9895 = vmatpush.bf16.msrb.mxu3 %v14310_v24  ;;  %v14267_v24 = vld [vmem:[%s21098_s11 + $0x390] sm:$0xff] }
 0xb6c   : > { %v8430_v57 = vadd.f32 %v20052_v61, %v8308_v43  ;;  %v14270_v61 = vld [vmem:[%s21098_s11 + $0x3a8] sm:$0xff] }
 0xb6d   : > { %9269 = vmatpush.bf16.msra.mxu2 %v14270_v61  ;;  %v14308_v61 = vld [vmem:[%s21098_s11 + $0x4d8] sm:$0xff] }
 0xb6e   : > { %v20337_v60 = vpop.f32.mrf.mxu0  ;;  %v20342_v47 = vadd.f32 %v8528_v38, %v8430_v57  ;;  %v14269_v38 = vld [vmem:[%s21098_s11 + $0x3a0] sm:$0xff] }
 0xb6f   : > { %9896 = vmatpush.bf16.msrb.mxu3 %v14309_v44  ;;  %v20410_v44 = vpop.f32.mrf.mxu1 }
 0xb71   : > { %v8280_v22 = vpop.f32.mrf.mxu2  ;;  %9045 = vmatmul.bf16.gmra.mxu0 %v20349_v26  ;;  %9270 = vmatpush.bf16.msra.mxu2 %v14269_v38 }
 0xb72   : > { %v8309_v31 = vadd.f32 %v8280_v22, %v8175_v40  ;;  %v14326_v22 = vld [vmem:[%s21098_s11 + $0x568] sm:$0xff] }
 0xb73   : > { %9661 = vmatmul.bf16.gmra.mxu1 %v19891_v13  ;;  %9897 = vmatpush.bf16.msrb.mxu3 %v14308_v61 }
 0xb74   : > { %v8431_v14 = vadd.f32 %v20085_v5, %v8309_v31  ;;  %v20377_v5 = vpop.f32.mrf.mxu3  ;;  %10149 = vmatpush.bf16.msrb.mxu1 %v14326_v22 }
 0xb75   : > { %9271 = vmatpush.bf16.msra.mxu2 %v14268_v9  ;;  %v8177_v9 = vadd.f32 %v19896_v8, %v20172_v1  ;;  %v14324_v8 = vld [vmem:[%s21098_s11 + $0x558] sm:$0xff] }
 0xb76   : > { %v20368_v43 = vpop.f32.mrf.mxu0  ;;  %8784 = vmatmul.bf16.gmra.mxu2 %v19606_v0  ;;  %v20375_v57 = vadd.f32 %v20267_v29, %v8431_v14 }
 0xb77   : > { %9898 = vmatpush.bf16.msrb.mxu3 %v14307_v39 }
 0xb78   : > { %9410 = vmatmul.bf16.gmra.mxu3 %v19672_v25 }
 0xb79   : > { %v8283_v40 = vpop.f32.mrf.mxu2  ;;  %9272 = vmatpush.bf16.msra.mxu2 %v14267_v24  ;;  %v14305_v24 = vld [vmem:[%s21098_s11 + $0x4c0] sm:$0xff] }
 0xb7a   : > { %v8310_v29 = vadd.f32 %v8283_v40, %v8176_v12  ;;  %v14306_v12 = vld [vmem:[%s21098_s11 + $0x4c8] sm:$0xff] }
 0xb7b   : > { %9899 = vmatpush.bf16.msrb.mxu3 %v14306_v12 }
 0xb7c   : > { %v8432_v31 = vadd.f32 %v20123_v42, %v8310_v29  ;;  %v14325_v42 = vld [vmem:[%s21098_s11 + $0x560] sm:$0xff]  ;;  %v20419_v61 = vpop.f32.mrf.mxu3 }
 0xb7d   : > { %9273 = vmatpush.bf16.msra.mxu2 %v14266_v53  ;;  %10150 = vmatpush.bf16.msrb.mxu1 %v14325_v42  ;;  %v14265_v29 = vld [vmem:[%s21098_s11 + $0x380] sm:$0xff]  ;;  %v20442_v53 = vpop.f32.mrf.mxu1 }
 0xb7e   : > { %v20399_v38 = vpop.f32.mrf.mxu0  ;;  %v20405_v14 = vadd.f32 %v20285_v50, %v8432_v31 }
 0xb7f   : > { %9900 = vmatpush.bf16.msrb.mxu3 %v14305_v24 }
 0xb81   : > { %v8285_v50 = vpop.f32.mrf.mxu2  ;;  %9050 = vmatmul.bf16.gmra.mxu0 %v8966_v51  ;;  %9274 = vmatpush.bf16.msra.mxu2 %v14265_v29 }
 0xb82   : > { %v8311_v40 = vadd.f32 %v8285_v50, %v8177_v9  ;;  %10151 = vmatpush.bf16.msrb.mxu1 %v14324_v8  ;;  %v20451_v50 = vrot.slane %v19685_v36, 1 }
 0xb83   : > { %9666 = vmatmul.bf16.gmra.mxu1 %v20349_v26  ;;  %v22200_v26 = vld [vmem:[#allocation42_spill] sm:$0xff] }
 0xb84   : > { %v8433_v1 = vadd.f32 %v20154_v10, %v8311_v40  ;;  %v8178_v10 = vadd.f32 %v19931_v2, %v20193_v35  ;;  %v20444_v9 = vpop.f32.mrf.mxu3  ;;  %22193 = vst [vmem:[#allocation120_spill] sm:$0xff] %v20451_v50  ;;  %v14321_v35 = vld [vmem:[%s21098_s11 + $0x540] sm:$0xff]  ;;  %v22194_v40 = vld [vmem:[#allocation103_spill] sm:$0xff]  ;;  %v20465_v24 = vsel %vm2977_vm5, %v20327_v56, %v20451_v50 }
 0xb85   : > { %v8179_v29 = vadd.f32 %v22194_v40, %v20221_v6  ;;  %22196 = vst [vmem:[#allocation100_spill] sm:$0xff] %v20465_v24 }
 0xb86   : > { %v8545_v22 = vpop.f32.mrf.mxu0  ;;  %8789 = vmatmul.bf16.gmra.mxu2 %v19672_v25  ;;  %v20434_v31 = vadd.f32 %v20303_v16, %v8433_v1  ;;  %10152 = vmatpush.bf16.msrb.mxu1 %v14323_v55  ;;  %v14322_v16 = vld [vmem:[%s21098_s11 + $0x548] sm:$0xff] }
 0xb87   : > { %v22195_v1 = vld [vmem:[#allocation133_spill] sm:$0xff] }
 0xb88   : > { %9415 = vmatmul.bf16.gmra.mxu3 %v19667_v21 }
 0xb89   : > { %v8288_v39 = vpop.f32.mrf.mxu2 }
 0xb8a   : > { %v8312_v42 = vadd.f32 %v8288_v39, %v8178_v10  ;;  %10153 = vmatpush.bf16.msrb.mxu1 %v14322_v16 }
 0xb8c   : > { %v8434_v51 = vadd.f32 %v20186_v49, %v8312_v42  ;;  %v20471_v10 = vpop.f32.mrf.mxu3  ;;  %v22197_v42 = vld [vmem:[#allocation162_spill] sm:$0xff] }
 0xb8d   : > { %v8180_v56 = vadd.f32 %v22197_v42, %v20232_v30 }
 0xb8e   : > { %v8548_v12 = vpop.f32.mrf.mxu0  ;;  %v20454_v2 = vadd.f32 %v20337_v60, %v8434_v51  ;;  %10154 = vmatpush.bf16.msrb.mxu1 %v14321_v35  ;;  %v20468_v60 = vpop.f32.mrf.mxu1 }
 0xb91   : > { %v8290_v8 = vpop.f32.mrf.mxu2  ;;  %9529 = vmatmul.bf16.vlgmr.msrb.gmra.mxu0 %v22195_v1 }
 0xb92   : > { %v8313_v49 = vadd.f32 %v8290_v8, %v8179_v29  ;;  %v22198_v29 = vld [vmem:[#allocation127_spill] sm:$0xff] }
 0xb93   : > { %9671 = vmatmul.bf16.gmra.mxu1 %v20465_v24  ;;  %v9591_v8 = vrot.slane %v22198_v29, 1 }
 0xb94   : > { %v8435_v55 = vadd.f32 %v20210_v59, %v8313_v49  ;;  %v20487_v49 = vpop.f32.mrf.mxu3 }
 0xb96   : > { %v8550_v39 = vpop.f32.mrf.mxu0  ;;  %8794 = vmatmul.bf16.gmra.mxu2 %v19667_v21  ;;  %v20475_v6 = vadd.f32 %v20368_v43, %v8435_v55  ;;  %v20481_v40 = vpop.f32.mrf.mxu1  ;;  %v22199_v43 = vld [vmem:[#allocation150_spill] sm:$0xff] }
 0xb97   : > { %v8181_v55 = vadd.f32 %v22199_v43, %v20244_v63  ;;  %v22203_v63 = vld [vmem:[#allocation134_spill] sm:$0xff] }
 0xb98   : > { %9420 = vmatmul.bf16.gmra.mxu3 %v19685_v36  ;;  %v8182_v43 = vadd.f32 %v22203_v63, %v20253_v32  ;;  %v14320_v32 = vld [vmem:[%s21098_s11 + $0x538] sm:$0xff] }
 0xb99   : > { %v8293_v16 = vpop.f32.mrf.mxu2  ;;  %10013 = vmatpush.bf16.msra.mxu0 %v14320_v32 }
 0xb9a   : > { %v8314_v51 = vadd.f32 %v8293_v16, %v8180_v56  ;;  %v22201_v16 = vld [vmem:[#allocation153_spill] sm:$0xff] }
 0xb9c   : > { %v8436_v35 = vadd.f32 %v20228_v27, %v8314_v51  ;;  %v9592_v27 = vsel %vm2977_vm5, %v20451_v50, %v9591_v8  ;;  %v20503_v13 = vpop.f32.mrf.mxu3 }
 0xb9e   : > { %v8553_v59 = vpop.f32.mrf.mxu0  ;;  %v20485_v1 = vadd.f32 %v20399_v38, %v8436_v35  ;;  %v20498_v51 = vpop.f32.mrf.mxu1  ;;  %v22202_v35 = vld [vmem:[#allocation107_spill] sm:$0xff] }
 0xba1   : > { %v8295_v24 = vpop.f32.mrf.mxu2  ;;  %9534 = vmatmul.bf16.gmra.mxu0 %v22200_v26 }
 0xba2   : > { %v8315_v30 = vadd.f32 %v8295_v24, %v8181_v55 }
 0xba3   : > { %9676 = vmatmul.bf16.gmra.mxu1 %v9592_v27 }
 0xba4   : > { %v8437_v42 = vadd.f32 %v20238_v48, %v8315_v30 }
 0xba6   : > { %v8555_v56 = vpop.f32.mrf.mxu0  ;;  %9275 = vmatmul.bf16.vlgmr.msra.gmra.mxu2 %v22201_v16  ;;  %v20496_v38 = vadd.f32 %v8545_v22, %v8437_v42  ;;  %v22204_v22 = vld [vmem:[#allocation69_spill] sm:$0xff]  ;;  %v20516_v16 = vpop.f32.mrf.mxu1 }
 0xba7   : > { %v8183_v30 = vadd.f32 %v22204_v22, %v20270_v45  ;;  %v14319_v45 = vld [vmem:[%s21098_s11 + $0x530] sm:$0xff] }
 0xba8   : > { %9901 = vmatmul.bf16.vlgmr.msrb.gmra.mxu3 %v22202_v35  ;;  %10014 = vmatpush.bf16.msra.mxu0 %v14319_v45 }
 0xba9   : > { %v8298_v24 = vpop.f32.mrf.mxu2 }
 0xbaa   : > { %v8316_v55 = vadd.f32 %v8298_v24, %v8182_v43  ;;  %v20518_v43 = vpop.f32.mrf.mxu3 }
 0xbac   : > { %v8438_v8 = vadd.f32 %v20248_v46, %v8316_v55  ;;  %v22205_v55 = vld [vmem:[#allocation108_spill] sm:$0xff] }
 0xbae   : > { %v20506_v27 = vpop.f32.mrf.mxu0  ;;  %v20508_v48 = vadd.f32 %v8548_v12, %v8438_v8  ;;  %v22206_v8 = vld [vmem:[#allocation113_spill] sm:$0xff] }
 0xbaf   : > { %v8184_v22 = vadd.f32 %v22206_v8, %v20287_v54 }
 0xbb1   : > { %v8300_v42 = vpop.f32.mrf.mxu2  ;;  %9539 = vmatmul.bf16.gmra.mxu0 %v20108_v33 }
 0xbb2   : > { %v8317_v63 = vadd.f32 %v8300_v42, %v8183_v30  ;;  %v20536_v42 = vpop.f32.mrf.mxu1 }
 0xbb3   : > { %10155 = vmatmul.bf16.vlgmr.msrb.gmra.mxu1 %v22200_v26 }
 0xbb4   : > { %v8439_v46 = vadd.f32 %v20260_v23, %v8317_v63  ;;  %v14318_v23 = vld [vmem:[%s21098_s11 + $0x528] sm:$0xff] }
 0xbb5   : > { %10015 = vmatpush.bf16.msra.mxu0 %v14318_v23 }
 0xbb6   : > { %v20525_v12 = vpop.f32.mrf.mxu0  ;;  %9280 = vmatmul.bf16.gmra.mxu2 %v22202_v35  ;;  %v20528_v24 = vadd.f32 %v8550_v39, %v8439_v46  ;;  %v20539_v35 = vpop.f32.mrf.mxu3  ;;  %v14317_v39 = vld [vmem:[%s21098_s11 + $0x520] sm:$0xff] }
 0xbb7   : > { %v22207_v46 = vld [vmem:[#allocation136_spill] sm:$0xff] }
 0xbb8   : > { %9906 = vmatmul.bf16.gmra.mxu3 %v22205_v55  ;;  %v8185_v45 = vadd.f32 %v22207_v46, %v20309_v41 }
 0xbb9   : > { %v8303_v26 = vpop.f32.mrf.mxu2  ;;  %10016 = vmatpush.bf16.msra.mxu0 %v14317_v39  ;;  %v22209_v39 = vld [vmem:[#allocation118_spill] sm:$0xff] }
 0xbba   : > { %v8318_v30 = vadd.f32 %v8303_v26, %v8184_v22  ;;  %v20559_v23 = vpop.f32.mrf.mxu1  ;;  %v8680_v46 = vadd.f32 %v22209_v39, %v20342_v47  ;;  %v22210_v47 = vshll.u32 %v19685_v36, 16  ;;  %v14313_v39 = vld [vmem:[%s21098_s11 + $0x500] sm:$0xff] }
 0xbbc   : > { %v8440_v32 = vadd.f32 %v20279_v3, %v8318_v30  ;;  %v14316_v3 = vld [vmem:[%s21098_s11 + $0x518] sm:$0xff] }
 0xbbd   : > { %10017 = vmatpush.bf16.msra.mxu0 %v14316_v3  ;;  %v14304_v30 = vld [vmem:[%s21098_s11 + $0x4b8] sm:$0xff]  ;;  %v14314_v3 = vld [vmem:[%s21098_s11 + $0x508] sm:$0xff] }
 0xbbe   : > { %v20544_v63 = vpop.f32.mrf.mxu0  ;;  %v20546_v54 = vadd.f32 %v8553_v59, %v8440_v32  ;;  %v14315_v59 = vld [vmem:[%s21098_s11 + $0x510] sm:$0xff]  ;;  %9771 = vmatpush.bf16.msrb.mxu2 %v14304_v30 }
 0xbbf   : > { %v14343_v30 = vld [vmem:[%s21098_s11 + $0x5f0] sm:$0xff] }
 0xbc1   : > { %v8305_v8 = vpop.f32.mrf.mxu2  ;;  %9544 = vmatmul.bf16.gmra.mxu0 %v20175_v11 }
 0xbc2   : > { %v8319_v22 = vadd.f32 %v8305_v8, %v8185_v45  ;;  %10018 = vmatpush.bf16.msra.mxu0 %v14315_v59  ;;  %v14344_v45 = vld [vmem:[%s21098_s11 + $0x5f8] sm:$0xff]  ;;  %v9461_v59 = vrot.slane %v22210_v47, 1  ;;  %v14342_v47 = vld [vmem:[%s21098_s11 + $0x5e8] sm:$0xff] }
 0xbc3   : > { %10160 = vmatmul.bf16.gmra.mxu1 %v20108_v33  ;;  %v20569_v33 = vpop.f32.mrf.mxu3  ;;  %10397 = vmatpush.bf16.msra.mxu3 %v14344_v45  ;;  %v14302_v45 = vld [vmem:[%s21098_s11 + $0x4a8] sm:$0xff] }
 0xbc4   : > { %v8441_v26 = vadd.f32 %v20296_v17, %v8319_v22  ;;  %v22208_v17 = vld [vmem:[#allocation34_spill] sm:$0xff] }
 0xbc5   : > { %v14303_v22 = vld [vmem:[%s21098_s11 + $0x4b0] sm:$0xff] }
 0xbc6   : > { %v20561_v41 = vpop.f32.mrf.mxu0  ;;  %9285 = vmatmul.bf16.gmra.mxu2 %v22205_v55  ;;  %v20567_v32 = vadd.f32 %v8555_v56, %v8441_v26  ;;  %10019 = vmatpush.bf16.msra.mxu0 %v14314_v3  ;;  %v22211_v3 = vld [vmem:[#allocation74_spill] sm:$0xff] }
 0xbc7   : > { %9772 = vmatpush.bf16.msrb.mxu2 %v14303_v22  ;;  %10398 = vmatpush.bf16.msra.mxu3 %v14343_v30  ;;  %v9462_v22 = vsel %vm2601_vm3, %v20215_v7, %v9461_v59 }
 0xbc8   : > { %9911 = vmatmul.bf16.gmra.mxu3 %v22208_v17 }
 0xbc9   : > { %v8770_v8 = vpop.f32.mrf.mxu2 }
 0xbca   : > { %v8800_v56 = vadd.f32 %v8770_v8, %v8680_v46  ;;  %10020 = vmatpush.bf16.msra.mxu0 %v14313_v39  ;;  %v20600_v8 = vpop.f32.mrf.mxu1  ;;  %v14341_v39 = vld [vmem:[%s21098_s11 + $0x5e0] sm:$0xff] }
 0xbcb   : > { %9773 = vmatpush.bf16.msrb.mxu2 %v14302_v45  ;;  %v20609_v30 = vpop.f32.mrf.mxu3  ;;  %10399 = vmatpush.bf16.msra.mxu3 %v14342_v47 }
 0xbcc   : > { %v8934_v26 = vadd.f32 %v20332_v20, %v8800_v56  ;;  %v8681_v56 = vadd.f32 %v22211_v3, %v20375_v57  ;;  %v20616_v57 = vrot.slane %v19667_v21, 2  ;;  %v22212_v3 = vld [vmem:[#allocation83_spill] sm:$0xff] }
 0xbce   : > { %v20592_v46 = vpop.f32.mrf.mxu0  ;;  %v20598_v20 = vadd.f32 %v20506_v27, %v8934_v26  ;;  %v14301_v26 = vld [vmem:[%s21098_s11 + $0x4a0] sm:$0xff] }
 0xbcf   : > { %9774 = vmatpush.bf16.msrb.mxu2 %v14301_v26  ;;  %10400 = vmatpush.bf16.msra.mxu3 %v14341_v39 }
 0xbd1   : > { %v8772_v50 = vpop.f32.mrf.mxu2  ;;  %9549 = vmatmul.bf16.gmra.mxu0 %v9462_v22 }
 0xbd2   : > { %v8801_v27 = vadd.f32 %v8772_v50, %v8681_v56  ;;  %v14300_v50 = vld [vmem:[%s21098_s11 + $0x498] sm:$0xff]  ;;  %v22214_v56 = vld [vmem:[#allocation156_spill] sm:$0xff]  ;;  %v20642_v39 = vpop.f32.mrf.mxu1 }
 0xbd3   : > { %10165 = vmatmul.bf16.gmra.mxu1 %v20175_v11  ;;  %v8682_v47 = vadd.f32 %v22214_v56, %v20405_v14  ;;  %9775 = vmatpush.bf16.msrb.mxu2 %v14300_v50  ;;  %22215 = vst [vmem:[#allocation114_spill] sm:$0xff] %v20642_v39  ;;  %v22216_v14 = vshrl.u32 %v19685_v36, 16  ;;  %v22217_v56 = vshll.u32 %v22198_v29, 16 }
 0xbd4   : > { %v8935_v7 = vadd.f32 %v20377_v5, %v8801_v27  ;;  %v20634_v5 = vsel %vm3397_vm2, %v22212_v3, %v20616_v57  ;;  %v14340_v27 = vld [vmem:[%s21098_s11 + $0x5d8] sm:$0xff]  ;;  %v20647_v3 = vpop.f32.mrf.mxu3 }
 0xbd5   : > { %22213 = vst [vmem:[#allocation79_spill] sm:$0xff] %v20634_v5  ;;  %10401 = vmatpush.bf16.msra.mxu3 %v14340_v27  ;;  %v9465_v50 = vor.u32 %v22216_v14, %v9461_v59 }
 0xbd6   : > { %v20622_v45 = vpop.f32.mrf.mxu0  ;;  %9290 = vmatmul.bf16.gmra.mxu2 %v22208_v17  ;;  %v20629_v11 = vadd.f32 %v20525_v12, %v8935_v7  ;;  %v14299_v7 = vld [vmem:[%s21098_s11 + $0x490] sm:$0xff]  ;;  %v9469_v17 = vrot.slane %v22217_v56, 1  ;;  %v14297_v56 = vld [vmem:[%s21098_s11 + $0x480] sm:$0xff] }
 0xbd7   : > { %9776 = vmatpush.bf16.msrb.mxu2 %v14299_v7 }
 0xbd8   : > { %9916 = vmatmul.bf16.gmra.mxu3 %v20634_v5  ;;  %v9470_v59 = vsel %vm2601_vm3, %v9465_v50, %v9469_v17 }
 0xbd9   : > { %v8775_v26 = vpop.f32.mrf.mxu2 }
 0xbda   : > { %v8802_v12 = vadd.f32 %v8775_v26, %v8682_v47  ;;  %v14339_v47 = vld [vmem:[%s21098_s11 + $0x5d0] sm:$0xff]  ;;  %v14298_v26 = vld [vmem:[%s21098_s11 + $0x488] sm:$0xff] }
 0xbdb   : > { %10402 = vmatpush.bf16.msra.mxu3 %v14339_v47  ;;  %9777 = vmatpush.bf16.msrb.mxu2 %v14298_v26 }
 0xbdc   : > { %v8936_v4 = vadd.f32 %v20419_v61, %v8802_v12  ;;  %v8683_v61 = vadd.f32 %v20225_v62, %v20434_v31  ;;  %v14338_v12 = vld [vmem:[%s21098_s11 + $0x5c8] sm:$0xff]  ;;  %v20675_v62 = vpop.f32.mrf.mxu1  ;;  %v20681_v17 = vpop.f32.mrf.mxu3 }
 0xbdd   : > { %22218 = vst [vmem:[#allocation144_spill] sm:$0xff] %v20675_v62 }
 0xbde   : > { %v9041_v27 = vpop.f32.mrf.mxu0  ;;  %v20661_v39 = vadd.f32 %v20544_v63, %v8936_v4  ;;  %v20673_v4 = vrot.slane %v19685_v36, 2  ;;  %v14337_v63 = vld [vmem:[%s21098_s11 + $0x5c0] sm:$0xff] }
 0xbdf   : > { %10403 = vmatpush.bf16.msra.mxu3 %v14338_v12  ;;  %9778 = vmatpush.bf16.msrb.mxu2 %v14297_v56  ;;  %v22220_v56 = vld [vmem:[#allocation105_spill] sm:$0xff] }
 0xbe0   : > { %v20690_v26 = vsel %vm3397_vm2, %v20616_v57, %v20673_v4 }
 0xbe1   : > { %v8777_v7 = vpop.f32.mrf.mxu2  ;;  %9554 = vmatmul.bf16.gmra.mxu0 %v9470_v59  ;;  %22219 = vst [vmem:[#allocation117_spill] sm:$0xff] %v20690_v26 }
 0xbe2   : > { %v8803_v14 = vadd.f32 %v8777_v7, %v8683_v61 }
 0xbe3   : > { %10170 = vmatmul.bf16.gmra.mxu1 %v9462_v22  ;;  %10404 = vmatpush.bf16.msra.mxu3 %v14337_v63 }
 0xbe4   : > { %v8937_v31 = vadd.f32 %v20444_v9, %v8803_v14  ;;  %v8684_v9 = vadd.f32 %v20240_v28, %v20454_v2  ;;  %v20696_v7 = vpop.f32.mrf.mxu1  ;;  %v9215_v28 = vrot.slane %v20184_v15, 2 }
 0xbe6   : > { %v9043_v47 = vpop.f32.mrf.mxu0  ;;  %9295 = vmatmul.bf16.gmra.mxu2 %v20634_v5  ;;  %v20685_v22 = vadd.f32 %v20561_v41, %v8937_v31  ;;  %v22221_v41 = vshll.u32 %v22220_v56, 16  ;;  %v20703_v5 = vpop.f32.mrf.mxu3 }
 0xbe8   : > { %9921 = vmatmul.bf16.gmra.mxu3 %v20690_v26  ;;  %v10087_v31 = vrot.slane %v22221_v41, 1  ;;  %v8685_v26 = vadd.f32 %v20251_v52, %v20475_v6  ;;  %v8686_v6 = vadd.f32 %v20272_v58, %v20485_v1 }
 0xbe9   : > { %v8780_v61 = vpop.f32.mrf.mxu2 }
 0xbea   : > { %v8804_v59 = vadd.f32 %v8780_v61, %v8684_v9  ;;  %v9841_v9 = vrot.slane %v22198_v29, 2 }
 0xbec   : > { %v8938_v12 = vadd.f32 %v20471_v10, %v8804_v59  ;;  %v10088_v10 = vsel %vm2601_vm3, %v9465_v50, %v10087_v31  ;;  %v20719_v15 = vpop.f32.mrf.mxu1 }
 0xbee   : > { %v9046_v14 = vpop.f32.mrf.mxu0  ;;  %v20701_v63 = vadd.f32 %v20592_v46, %v8938_v12  ;;  %v9216_v46 = vsel %vm3397_vm2, %v20616_v57, %v9215_v28  ;;  %v20723_v29 = vpop.f32.mrf.mxu3  ;;  %v22223_v12 = vld [vmem:[#allocation159_spill] sm:$0xff] }
 0xbef   : > { %v22224_v41 = vshll.u32 %v22223_v12, 16 }
 0xbf1   : > { %v8782_v62 = vpop.f32.mrf.mxu2  ;;  %10021 = vmatmul.bf16.vlgmr.msra.gmra.mxu0 %v19553_v19  ;;  %v9842_v19 = vsel %vm3397_vm2, %v20673_v4, %v9841_v9  ;;  %v10095_v28 = vrot.slane %v22224_v41, 1 }
 0xbf2   : > { %v8805_v2 = vadd.f32 %v8782_v62, %v8685_v26  ;;  %v22222_v26 = vshrl.u32 %v22220_v56, 16 }
 0xbf3   : > { %10175 = vmatmul.bf16.gmra.mxu1 %v10088_v10  ;;  %v8687_v10 = vadd.f32 %v20293_v34, %v20496_v38 }
 0xbf4   : > { %v8939_v61 = vadd.f32 %v20487_v49, %v8805_v2 }
 0xbf6   : > { %v9048_v59 = vpop.f32.mrf.mxu0  ;;  %9300 = vmatmul.bf16.gmra.mxu2 %v9216_v46  ;;  %v20715_v52 = vadd.f32 %v20622_v45, %v8939_v61  ;;  %v10091_v45 = vor.u32 %v22222_v26, %v10087_v31  ;;  %v20736_v61 = vpop.f32.mrf.mxu1 }
 0xbf8   : > { %9926 = vmatmul.bf16.gmra.mxu3 %v9842_v19  ;;  %v10096_v1 = vsel %vm2601_vm3, %v10091_v45, %v10095_v28  ;;  %v22225_v19 = vld [vmem:[#allocation55_spill] sm:$0xff] }
 0xbf9   : > { %v8785_v49 = vpop.f32.mrf.mxu2 }
 0xbfa   : > { %v8806_v50 = vadd.f32 %v8785_v49, %v8686_v6  ;;  %v22226_v6 = vld [vmem:[#allocation78_spill] sm:$0xff] }
 0xbfc   : > { %v8940_v57 = vadd.f32 %v20503_v13, %v8806_v50  ;;  %v20738_v13 = vpop.f32.mrf.mxu3 }
 0xbfe   : > { %v9051_v62 = vpop.f32.mrf.mxu0  ;;  %v20730_v2 = vadd.f32 %v9041_v27, %v8940_v57 }
 0xc01   : > { %v8787_v9 = vpop.f32.mrf.mxu2  ;;  %10026 = vmatmul.bf16.gmra.mxu0 %v19606_v0  ;;  %v8688_v0 = vadd.f32 %v20323_v18, %v20508_v48  ;;  %v14352_v18 = vld [vmem:[%s21098_s11 + $0x638] sm:$0xff] }
 0xc02   : > { %v8807_v58 = vadd.f32 %v8787_v9, %v8687_v10  ;;  %10519 = vmatpush.bf16.msrb.mxu0 %v14352_v18  ;;  %v14350_v9 = vld [vmem:[%s21098_s11 + $0x628] sm:$0xff] }
 0xc03   : > { %10180 = vmatmul.bf16.gmra.mxu1 %v10096_v1  ;;  %v14349_v1 = vld [vmem:[%s21098_s11 + $0x620] sm:$0xff] }
 0xc04   : > { %v8941_v31 = vadd.f32 %v20518_v43, %v8807_v58  ;;  %v20748_v50 = vpop.f32.mrf.mxu3  ;;  %v20752_v43 = vpop.f32.mrf.mxu1 }
 0xc06   : > { %v9053_v46 = vpop.f32.mrf.mxu0  ;;  %9779 = vmatmul.bf16.vlgmr.msrb.gmra.mxu2 %v22225_v19  ;;  %v20742_v27 = vadd.f32 %v9043_v47, %v8941_v31  ;;  %v8689_v47 = vadd.f32 %v20366_v37, %v20528_v24  ;;  %v8690_v24 = vadd.f32 %v20410_v44, %v20546_v54  ;;  %v8691_v44 = vadd.f32 %v20442_v53, %v20567_v32 }
 0xc08   : > { %10405 = vmatmul.bf16.vlgmr.msra.gmra.mxu3 %v22226_v6 }
 0xc09   : > { %v8790_v34 = vpop.f32.mrf.mxu2 }
 0xc0a   : > { %v8808_v38 = vadd.f32 %v8790_v34, %v8688_v0 }
 0xc0c   : > { %v8942_v49 = vadd.f32 %v20539_v35, %v8808_v38  ;;  %v20767_v37 = vpop.f32.mrf.mxu3  ;;  %v20772_v10 = vpop.f32.mrf.mxu1  ;;  %v14347_v38 = vld [vmem:[%s21098_s11 + $0x610] sm:$0xff] }
 0xc0e   : > { %v9530_v57 = vpop.f32.mrf.mxu0  ;;  %v20750_v26 = vadd.f32 %v9046_v14, %v8942_v49  ;;  %v14351_v14 = vld [vmem:[%s21098_s11 + $0x630] sm:$0xff]  ;;  %v22228_v49 = vld [vmem:[#allocation140_spill] sm:$0xff] }
 0xc0f   : > { %10520 = vmatpush.bf16.msrb.mxu0 %v14351_v14 }
 0xc11   : > { %v8792_v45 = vpop.f32.mrf.mxu2  ;;  %10031 = vmatmul.bf16.gmra.mxu0 %v19672_v25  ;;  %v22227_v25 = vld [vmem:[#allocation101_spill] sm:$0xff] }
 0xc12   : > { %v8809_v48 = vadd.f32 %v8792_v45, %v8689_v47  ;;  %v9184_v47 = vadd.f32 %v20468_v60, %v20598_v20  ;;  %v14346_v45 = vld [vmem:[%s21098_s11 + $0x608] sm:$0xff]  ;;  %v14345_v60 = vld [vmem:[%s21098_s11 + $0x600] sm:$0xff] }
 0xc13   : > { %10521 = vmatpush.bf16.msrb.mxu0 %v14350_v9 }
 0xc14   : > { %v8943_v35 = vadd.f32 %v20569_v33, %v8809_v48  ;;  %v20785_v54 = vpop.f32.mrf.mxu3  ;;  %v20791_v34 = vpop.f32.mrf.mxu1  ;;  %v14335_v48 = vld [vmem:[%s21098_s11 + $0x5b0] sm:$0xff] }
 0xc16   : > { %v9532_v41 = vpop.f32.mrf.mxu0  ;;  %9784 = vmatmul.bf16.gmra.mxu2 %v22226_v6  ;;  %v20765_v28 = vadd.f32 %v9048_v59, %v8943_v35 }
 0xc17   : > { %10522 = vmatpush.bf16.msrb.mxu0 %v14349_v1 }
 0xc18   : > { %10410 = vmatmul.bf16.gmra.mxu3 %v22227_v25 }
 0xc19   : > { %v8795_v33 = vpop.f32.mrf.mxu2 }
 0xc1a   : > { %v8810_v58 = vadd.f32 %v8795_v33, %v8690_v24  ;;  %v9185_v33 = vadd.f32 %v20481_v40, %v20629_v11  ;;  %v14332_v40 = vld [vmem:[%s21098_s11 + $0x598] sm:$0xff] }
 0xc1c   : > { %v8944_v59 = vadd.f32 %v20609_v30, %v8810_v58  ;;  %v14348_v30 = vld [vmem:[%s21098_s11 + $0x618] sm:$0xff]  ;;  %v20812_v35 = vpop.f32.mrf.mxu3  ;;  %v20815_v14 = vpop.f32.mrf.mxu1  ;;  %v14333_v58 = vld [vmem:[%s21098_s11 + $0x5a0] sm:$0xff] }
 0xc1d   : > { %10523 = vmatpush.bf16.msrb.mxu0 %v14348_v30 }
 0xc1e   : > { %v9535_v31 = vpop.f32.mrf.mxu0  ;;  %v20781_v19 = vadd.f32 %v9051_v62, %v8944_v59 }
 0xc21   : > { %v8797_v6 = vpop.f32.mrf.mxu2  ;;  %10036 = vmatmul.bf16.gmra.mxu0 %v19667_v21  ;;  %v14336_v21 = vld [vmem:[%s21098_s11 + $0x5b8] sm:$0xff] }
 0xc22   : > { %v8811_v0 = vadd.f32 %v8797_v6, %v8691_v44  ;;  %10524 = vmatpush.bf16.msrb.mxu0 %v14347_v38  ;;  %10269 = vmatpush.bf16.msra.mxu2 %v14336_v21  ;;  %v22229_v44 = vld [vmem:[#allocation126_spill] sm:$0xff]  ;;  %v9186_v6 = vadd.f32 %v20498_v51, %v20661_v39  ;;  %v9187_v51 = vadd.f32 %v20516_v16, %v20685_v22  ;;  %v22230_v16 = vld [vmem:[#allocation139_spill] sm:$0xff] }
 0xc23   : > { %v9188_v22 = vadd.f32 %v20536_v42, %v20701_v63 }
 0xc24   : > { %v8945_v62 = vadd.f32 %v20647_v3, %v8811_v0  ;;  %v20832_v1 = vpop.f32.mrf.mxu3  ;;  %v14331_v0 = vld [vmem:[%s21098_s11 + $0x590] sm:$0xff] }
 0xc26   : > { %v9537_v53 = vpop.f32.mrf.mxu0  ;;  %9789 = vmatmul.bf16.gmra.mxu2 %v22227_v25  ;;  %v20801_v32 = vadd.f32 %v9053_v46, %v8945_v62  ;;  %10525 = vmatpush.bf16.msrb.mxu0 %v14346_v45  ;;  %v14334_v25 = vld [vmem:[%s21098_s11 + $0x5a8] sm:$0xff] }
 0xc27   : > { %10270 = vmatpush.bf16.msra.mxu2 %v14335_v48 }
 0xc28   : > { %10415 = vmatmul.bf16.gmra.mxu3 %v22228_v49 }
 0xc29   : > { %v9276_v3 = vpop.f32.mrf.mxu2 }
 0xc2a   : > { %v9306_v18 = vadd.f32 %v9276_v3, %v9184_v47  ;;  %10526 = vmatpush.bf16.msrb.mxu0 %v14345_v60  ;;  %v14329_v3 = vld [vmem:[%s21098_s11 + $0x580] sm:$0xff] }
 0xc2b   : > { %10271 = vmatpush.bf16.msra.mxu2 %v14334_v25 }
 0xc2c   : > { %v9426_v46 = vadd.f32 %v20681_v17, %v9306_v18 }
 0xc2e   : > { %v9540_v20 = vpop.f32.mrf.mxu0  ;;  %v20823_v24 = vadd.f32 %v9530_v57, %v9426_v46 }
 0xc2f   : > { %10272 = vmatpush.bf16.msra.mxu2 %v14333_v58 }
 0xc31   : > { %v9278_v17 = vpop.f32.mrf.mxu2  ;;  %10041 = vmatmul.bf16.gmra.mxu0 %v19685_v36  ;;  %v20840_v36 = vpop.f32.mrf.mxu1 }
 0xc32   : > { %v9307_v9 = vadd.f32 %v9278_v17, %v9185_v33 }
 0xc33   : > { %10273 = vmatpush.bf16.msra.mxu2 %v14332_v40 }
 0xc34   : > { %v9427_v59 = vadd.f32 %v20703_v5, %v9307_v9  ;;  %v9189_v9 = vadd.f32 %v20559_v23, %v20715_v52 }
 0xc36   : > { %v9542_v57 = vpop.f32.mrf.mxu0  ;;  %9794 = vmatmul.bf16.gmra.mxu2 %v22228_v49  ;;  %v20838_v11 = vadd.f32 %v9532_v41, %v9427_v59  ;;  %v14330_v41 = vld [vmem:[%s21098_s11 + $0x588] sm:$0xff]  ;;  %v20854_v49 = vpop.f32.mrf.mxu3 }
 0xc37   : > { %10274 = vmatpush.bf16.msra.mxu2 %v14331_v0 }
 0xc38   : > { %10420 = vmatmul.bf16.gmra.mxu3 %v22229_v44 }
 0xc39   : > { %v9281_v5 = vpop.f32.mrf.mxu2  ;;  %v20858_v39 = vpop.f32.mrf.mxu1 }
 0xc3a   : > { %v9308_v30 = vadd.f32 %v9281_v5, %v9186_v6 }
 0xc3b   : > { %10275 = vmatpush.bf16.msra.mxu2 %v14330_v41 }
 0xc3c   : > { %v9428_v62 = vadd.f32 %v20723_v29, %v9308_v30 }
 0xc3e   : > { %v9545_v38 = vpop.f32.mrf.mxu0  ;;  %v20852_v21 = vadd.f32 %v9535_v31, %v9428_v62  ;;  %v9421_v48 = vpop.f32.mrf.mxu3  ;;  %v22233_v62 = vld [vmem:[#allocation114_spill] sm:$0xff] }
 0xc3f   : > { %10276 = vmatpush.bf16.msra.mxu2 %v14329_v3  ;;  %v9191_v41 = vadd.f32 %v22233_v62, %v20742_v27 }
 0xc41   : > { %v9283_v47 = vpop.f32.mrf.mxu2  ;;  %10046 = vmatmul.bf16.gmra.mxu0 %v22220_v56  ;;  %v20871_v25 = vpop.f32.mrf.mxu1 }
 0xc42   : > { %v9309_v29 = vadd.f32 %v9283_v47, %v9187_v51  ;;  %v22234_v51 = vld [vmem:[#allocation34_spill] sm:$0xff] }
 0xc44   : > { %v9429_v45 = vadd.f32 %v20738_v13, %v9309_v29 }
 0xc46   : > { %v9547_v31 = vpop.f32.mrf.mxu0  ;;  %9799 = vmatmul.bf16.gmra.mxu2 %v22229_v44  ;;  %v20866_v18 = vadd.f32 %v9537_v53, %v9429_v45  ;;  %v9423_v59 = vpop.f32.mrf.mxu3  ;;  %v22231_v44 = vld [vmem:[#allocation147_spill] sm:$0xff] }
 0xc48   : > { %10425 = vmatmul.bf16.gmra.mxu3 %v22230_v16 }
 0xc49   : > { %v9286_v46 = vpop.f32.mrf.mxu2  ;;  %v20880_v63 = vpop.f32.mrf.mxu1 }
 0xc4a   : > { %v9310_v60 = vadd.f32 %v9286_v46, %v9188_v22 }
 0xc4c   : > { %v9430_v33 = vadd.f32 %v20748_v50, %v9310_v60  ;;  %v22232_v50 = vld [vmem:[#allocation112_spill] sm:$0xff] }
 0xc4e   : > { %v9550_v17 = vpop.f32.mrf.mxu0  ;;  %v20874_v13 = vadd.f32 %v9540_v20, %v9430_v33  ;;  %v9190_v20 = vadd.f32 %v20600_v8, %v20730_v2  ;;  %v9902_v5 = vpop.f32.mrf.mxu3  ;;  %v22235_v2 = vld [vmem:[#allocation29_spill] sm:$0xff] }
 0xc51   : > { %v9288_v53 = vpop.f32.mrf.mxu2  ;;  %10527 = vmatmul.bf16.vlgmr.msrb.gmra.mxu0 %v22205_v55 }
 0xc52   : > { %v9311_v58 = vadd.f32 %v9288_v53, %v9189_v9 }
 0xc54   : > { %v9431_v42 = vadd.f32 %v20767_v37, %v9311_v58  ;;  %v20891_v37 = vpop.f32.mrf.mxu1 }
 0xc56   : > { %v9552_v40 = vpop.f32.mrf.mxu0  ;;  %9804 = vmatmul.bf16.gmra.mxu2 %v22231_v44  ;;  %v20883_v6 = vadd.f32 %v9542_v57, %v9431_v42 }
 0xc58   : > { %10430 = vmatmul.bf16.gmra.mxu3 %v22232_v50  ;;  %v22238_v50 = vld [vmem:[#allocation89_spill] sm:$0xff] }
 0xc59   : > { %v9291_v23 = vpop.f32.mrf.mxu2 }
 0xc5a   : > { %v9312_v52 = vadd.f32 %v9291_v23, %v9190_v20 }
 0xc5c   : > { %v9432_v55 = vadd.f32 %v20785_v54, %v9312_v52  ;;  %v9904_v54 = vpop.f32.mrf.mxu3  ;;  %v20902_v16 = vpop.f32.mrf.mxu1 }
 0xc5e   : > { %v9555_v30 = vpop.f32.mrf.mxu0  ;;  %v20889_v0 = vadd.f32 %v9545_v38, %v9432_v55  ;;  %v22236_v38 = vld [vmem:[#allocation144_spill] sm:$0xff] }
 0xc5f   : > { %v9192_v45 = vadd.f32 %v22236_v38, %v20750_v26 }
 0xc61   : > { %v9293_v57 = vpop.f32.mrf.mxu2  ;;  %10532 = vmatmul.bf16.gmra.mxu0 %v22234_v51 }
 0xc62   : > { %v9313_v47 = vadd.f32 %v9293_v57, %v9191_v41  ;;  %v22239_v57 = vld [vmem:[#allocation117_spill] sm:$0xff] }
 0xc64   : > { %v9433_v29 = vadd.f32 %v20812_v35, %v9313_v47  ;;  %v9193_v35 = vadd.f32 %v20696_v7, %v20765_v28  ;;  %v9907_v9 = vpop.f32.mrf.mxu3  ;;  %v20910_v42 = vpop.f32.mrf.mxu1 }
 0xc66   : > { %v9557_v8 = vpop.f32.mrf.mxu0  ;;  %10277 = vmatmul.bf16.vlgmr.msra.gmra.mxu2 %v22235_v2  ;;  %v20898_v3 = vadd.f32 %v9547_v31, %v9433_v29  ;;  %v22237_v31 = vld [vmem:[#allocation79_spill] sm:$0xff] }
 0xc69   : > { %v9296_v22 = vpop.f32.mrf.mxu2 }
 0xc6a   : > { %v9314_v46 = vadd.f32 %v9296_v22, %v9192_v45 }
 0xc6c   : > { %v9434_v27 = vadd.f32 %v20832_v1, %v9314_v46  ;;  %v9194_v1 = vadd.f32 %v20719_v15, %v20781_v19  ;;  %v9909_v7 = vpop.f32.mrf.mxu3  ;;  %v20918_v52 = vpop.f32.mrf.mxu1  ;;  %v22240_v15 = vld [vmem:[#allocation23_spill] sm:$0xff]  ;;  %v9683_v46 = vadd.f32 %v20772_v10, %v20838_v11 }
 0xc6e   : > { %v10022_v60 = vpop.f32.mrf.mxu0  ;;  %v20905_v33 = vadd.f32 %v9550_v17, %v9434_v27 }
 0xc71   : > { %v9298_v53 = vpop.f32.mrf.mxu2  ;;  %10537 = vmatmul.bf16.gmra.mxu0 %v22237_v31 }
 0xc72   : > { %v9315_v58 = vadd.f32 %v9298_v53, %v9193_v35 }
 0xc74   : > { %v9435_v26 = vadd.f32 %v20854_v49, %v9315_v58  ;;  %v9195_v49 = vadd.f32 %v20736_v61, %v20801_v32  ;;  %v9912_v47 = vpop.f32.mrf.mxu3  ;;  %v10465_v61 = vrot.slane %v22220_v56, 2 }
 0xc76   : > { %v10024_v44 = vpop.f32.mrf.mxu0  ;;  %10282 = vmatmul.bf16.gmra.mxu2 %v22238_v50  ;;  %v20914_v20 = vadd.f32 %v9552_v40, %v9435_v26  ;;  %v10467_v50 = vrot.slane %v22223_v12, 2 }
 0xc79   : > { %v9301_v17 = vpop.f32.mrf.mxu2 }
 0xc7a   : > { %v9316_v23 = vadd.f32 %v9301_v17, %v9194_v1 }
 0xc7c   : > { %v9436_v28 = vadd.f32 %v9421_v48, %v9316_v23  ;;  %v20928_v48 = vpop.f32.mrf.mxu1 }
 0xc7e   : > { %v10027_v55 = vpop.f32.mrf.mxu0  ;;  %v20920_v62 = vadd.f32 %v9555_v30, %v9436_v28  ;;  %v9682_v30 = vadd.f32 %v20752_v43, %v20823_v24 }
 0xc81   : > { %v9303_v41 = vpop.f32.mrf.mxu2  ;;  %10542 = vmatmul.bf16.gmra.mxu0 %v22239_v57 }
 0xc82   : > { %v9317_v40 = vadd.f32 %v9303_v41, %v9195_v49 }
 0xc84   : > { %v9437_v51 = vadd.f32 %v9423_v59, %v9317_v40  ;;  %v9914_v59 = vpop.f32.mrf.mxu3  ;;  %v20939_v27 = vpop.f32.mrf.mxu1 }
 0xc86   : > { %v10029_v29 = vpop.f32.mrf.mxu0  ;;  %10287 = vmatmul.bf16.gmra.mxu2 %v22240_v15  ;;  %v20926_v19 = vadd.f32 %v9557_v8, %v9437_v51  ;;  %v10466_v8 = vsel %vm3397_vm2, %v20673_v4, %v10465_v61 }
 0xc89   : > { %v9780_v2 = vpop.f32.mrf.mxu2 }
 0xc8a   : > { %v9810_v38 = vadd.f32 %v9780_v2, %v9682_v30 }
 0xc8c   : > { %v9932_v45 = vadd.f32 %v9902_v5, %v9810_v38  ;;  %v22241_v5 = vld [vmem:[#allocation100_spill] sm:$0xff]  ;;  %v9917_v58 = vpop.f32.mrf.mxu3  ;;  %v20946_v11 = vpop.f32.mrf.mxu1 }
 0xc8e   : > { %v10032_v32 = vpop.f32.mrf.mxu0  ;;  %v20933_v22 = vadd.f32 %v10022_v60, %v9932_v45  ;;  %v9684_v60 = vadd.f32 %v20791_v34, %v20852_v21  ;;  %v10215_v34 = vrot.slane %v22220_v56, 1 }
 0xc91   : > { %v9782_v35 = vpop.f32.mrf.mxu2  ;;  %10547 = vmatmul.bf16.gmra.mxu0 %v10466_v8 }
 0xc92   : > { %v9811_v43 = vadd.f32 %v9782_v35, %v9683_v46  ;;  %v10217_v46 = vrot.slane %v22223_v12, 1  ;;  %v9689_v12 = vadd.f32 %v20880_v63, %v20898_v3  ;;  %v9691_v63 = vadd.f32 %v20902_v16, %v20914_v20 }
 0xc94   : > { %v9933_v24 = vadd.f32 %v9904_v54, %v9811_v43  ;;  %v9685_v54 = vadd.f32 %v20815_v14, %v20866_v18  ;;  %v9919_v28 = vpop.f32.mrf.mxu3  ;;  %v20955_v41 = vpop.f32.mrf.mxu1  ;;  %v9686_v14 = vadd.f32 %v20840_v36, %v20874_v13  ;;  %v10218_v35 = vsel %vm2977_vm5, %v10215_v34, %v10217_v46 }
 0xc96   : > { %v10034_v53 = vpop.f32.mrf.mxu0  ;;  %10292 = vmatmul.bf16.gmra.mxu2 %v22241_v5  ;;  %v20942_v31 = vadd.f32 %v10024_v44, %v9933_v24  ;;  %v10468_v44 = vsel %vm3397_vm2, %v10465_v61, %v10467_v50 }
 0xc99   : > { %v9785_v26 = vpop.f32.mrf.mxu2 }
 0xc9a   : > { %v9812_v10 = vadd.f32 %v9785_v26, %v9684_v60 }
 0xc9c   : > { %v9934_v4 = vadd.f32 %v9907_v9, %v9812_v10  ;;  %v22242_v9 = vld [vmem:[#allocation120_spill] sm:$0xff]  ;;  %v9922_v30 = vpop.f32.mrf.mxu3  ;;  %v10166_v2 = vpop.f32.mrf.mxu1 }
 0xc9d   : > { %v10216_v57 = vsel %vm2977_vm5, %v22242_v9, %v10215_v34 }
 0xc9e   : > { %v10037_v1 = vpop.f32.mrf.mxu0  ;;  %v20949_v17 = vadd.f32 %v10027_v55, %v9934_v4  ;;  %v9690_v4 = vadd.f32 %v20891_v37, %v20905_v33  ;;  %v9692_v37 = vadd.f32 %v20910_v42, %v20920_v62 }
 0xca1   : > { %v9787_v23 = vpop.f32.mrf.mxu2  ;;  %10552 = vmatmul.bf16.gmra.mxu0 %v10468_v44 }
 0xca2   : > { %v9813_v21 = vadd.f32 %v9787_v23, %v9685_v54 }
 0xca4   : > { %v9935_v49 = vadd.f32 %v9909_v7, %v9813_v21  ;;  %v9687_v7 = vadd.f32 %v20858_v39, %v20883_v6  ;;  %v9924_v13 = vpop.f32.mrf.mxu3 }
 0xca6   : > { %v10039_v40 = vpop.f32.mrf.mxu0  ;;  %10297 = vmatmul.bf16.gmra.mxu2 %v10216_v57  ;;  %v20959_v55 = vadd.f32 %v10029_v29, %v9935_v49 }
 0xca9   : > { %v9790_v18 = vpop.f32.mrf.mxu2 }
 0xcaa   : > { %v9814_v51 = vadd.f32 %v9790_v18, %v9686_v14  ;;  %v9693_v14 = vadd.f32 %v20918_v52, %v20926_v19  ;;  %v10187_v52 = vadd.f32 %v20939_v27, %v20942_v31  ;;  %v21007_v27 = vld [vmem:[#allocation7] ss:$0 sm:$0xff] }
 0xcac   : > { %v9936_v15 = vadd.f32 %v9912_v47, %v9814_v51  ;;  %v9688_v47 = vadd.f32 %v20871_v25, %v20889_v0  ;;  %v9927_v5 = vpop.f32.mrf.mxu3 }
 0xcae   : > { %v10056_v56 = vadd.f32 %v10032_v32, %v9936_v15  ;;  %v10042_v38 = vpop.f32.mrf.mxu0 }
 0xcb0   : > { %v20965_v45 = vadd.f32 %v10166_v2, %v10056_v56 }
 0xcb1   : > { %v9792_v61 = vpop.f32.mrf.mxu2 }
 0xcb2   : > { %v9815_v29 = vadd.f32 %v9792_v61, %v9687_v7  ;;  %v20997_v61 = vld [vmem:[#allocation4] ss:$0 sm:$0xff] }
 0xcb4   : > { %v9937_v8 = vadd.f32 %v9914_v59, %v9815_v29  ;;  %v9929_v50 = vpop.f32.mrf.mxu3 }
 0xcb6   : > { %10302 = vmatmul.bf16.gmra.mxu2 %v10218_v35  ;;  %v20969_v36 = vadd.f32 %v10034_v53, %v9937_v8  ;;  %v10044_v32 = vpop.f32.mrf.mxu0 }
 0xcb9   : > { %v9795_v43 = vpop.f32.mrf.mxu2 }
 0xcba   : > { %v9816_v24 = vadd.f32 %v9795_v43, %v9688_v47  ;;  %v10188_v43 = vadd.f32 %v20946_v11, %v20949_v17  ;;  %v10189_v11 = vadd.f32 %v20955_v41, %v20959_v55 }
 0xcbc   : > { %v9938_v39 = vadd.f32 %v9917_v58, %v9816_v24  ;;  %v10406_v34 = vpop.f32.mrf.mxu3 }
 0xcbe   : > { %v20973_v6 = vadd.f32 %v10037_v1, %v9938_v39  ;;  %v10047_v26 = vpop.f32.mrf.mxu0 }
 0xcc1   : > { %v9797_v59 = vpop.f32.mrf.mxu2 }
 0xcc2   : > { %v9817_v60 = vadd.f32 %v9797_v59, %v9689_v12 }
 0xcc4   : > { %v9939_v10 = vadd.f32 %v9919_v28, %v9817_v60 }
 0xcc6   : > { %v20977_v53 = vadd.f32 %v10039_v40, %v9939_v10  ;;  %v10049_v58 = vpop.f32.mrf.mxu0  ;;  %v10408_v40 = vpop.f32.mrf.mxu3 }
 0xcc9   : > { %v9800_v25 = vpop.f32.mrf.mxu2 }
 0xcca   : > { %v9818_v0 = vadd.f32 %v9800_v25, %v9690_v4 }
 0xccc   : > { %v9940_v54 = vadd.f32 %v9922_v30, %v9818_v0  ;;  %v10186_v30 = vadd.f32 %v20928_v48, %v20933_v22  ;;  %v21002_v22 = vld [vmem:[#allocation6] ss:$0 sm:$0xff] }
 0xcce   : > { %v20981_v1 = vadd.f32 %v10042_v38, %v9940_v54  ;;  %v10528_v28 = vpop.f32.mrf.mxu0  ;;  %v10411_v56 = vpop.f32.mrf.mxu3 }
 0xcd1   : > { %v9802_v3 = vpop.f32.mrf.mxu2 }
 0xcd2   : > { %v9819_v44 = vadd.f32 %v9802_v3, %v9691_v63 }
 0xcd4   : > { %v9941_v23 = vadd.f32 %v9924_v13, %v9819_v44 }
 0xcd6   : > { %v20985_v21 = vadd.f32 %v10044_v32, %v9941_v23  ;;  %v10530_v16 = vpop.f32.mrf.mxu0  ;;  %v10413_v8 = vpop.f32.mrf.mxu3 }
 0xcd9   : > { %v9805_v33 = vpop.f32.mrf.mxu2 }
 0xcda   : > { %v9820_v49 = vadd.f32 %v9805_v33, %v9692_v37 }
 0xcdc   : > { %v9942_v9 = vadd.f32 %v9927_v5, %v9820_v49 }
 0xcde   : > { %v20989_v57 = vadd.f32 %v10047_v26, %v9942_v9  ;;  %v10533_v2 = vpop.f32.mrf.mxu0  ;;  %v10416_v60 = vpop.f32.mrf.mxu3 }
 0xce1   : > { %v9807_v20 = vpop.f32.mrf.mxu2 }
 0xce2   : > { %v9821_v18 = vadd.f32 %v9807_v20, %v9693_v14 }
 0xce4   : > { %v9943_v51 = vadd.f32 %v9929_v50, %v9821_v18 }
 0xce6   : > { %v20993_v15 = vadd.f32 %v10049_v58, %v9943_v51  ;;  %v10535_v13 = vpop.f32.mrf.mxu0  ;;  %v10168_v58 = vpop.f32.mrf.mxu1 }
 0xce7   : > { %v10418_v23 = vpop.f32.mrf.mxu3  ;;  %v10191_v18 = vadd.f32 %v10168_v58, %v20969_v36 }
 0xce9   : > { %v10278_v42 = vpop.f32.mrf.mxu2 }
 0xcea   : > { %v10308_v62 = vadd.f32 %v10278_v42, %v10186_v30 }
 0xcec   : > { %v10436_v38 = vadd.f32 %v10406_v34, %v10308_v62 }
 0xcee   : > { %v10558_v7 = vadd.f32 %v10528_v28, %v10436_v38  ;;  %v10538_v25 = vpop.f32.mrf.mxu0 }
 0xcef   : > { %v10421_v30 = vpop.f32.mrf.mxu3 }
 0xcf0   : > { %v10574_v46 = vadd.f32 %v20997_v61, %v10558_v7 }
 0xcf1   : > { %v10280_v19 = vpop.f32.mrf.mxu2 }
 0xcf2   : > { %v10309_v29 = vadd.f32 %v10280_v19, %v10187_v52  ;;  %v10586_v47 = vmax.f32 %v10574_v46, 0.0 }
 0xcf4   : > { %v10437_v35 = vadd.f32 %v10408_v40, %v10309_v29  ;;  %v10602_v31 = vmul.f32 %v21002_v22, %v10586_v47  ;;  %v10171_v40 = vpop.f32.mrf.mxu1 }
 0xcf5   : > { %v10192_v46 = vadd.f32 %v10171_v40, %v20973_v6 }
 0xcf6   : > { %v10559_v48 = vadd.f32 %v10530_v16, %v10437_v35  ;;  %v21012_v10 = vadd.f32 %v21007_v27, %v10602_v31  ;;  %v10540_v28 = vpop.f32.mrf.mxu0 }
 0xcf8   : > { %v10575_v32 = vadd.f32 %v20997_v61, %v10559_v48 }
 0xcf9   : > { %v10283_v24 = vpop.f32.mrf.mxu2 }
 0xcfa   : > { %v10587_v39 = vmax.f32 %v10575_v32, 0.0  ;;  %v10310_v12 = vadd.f32 %v10283_v24, %v10188_v43 }
 0xcfc   : > { %v10438_v5 = vadd.f32 %v10411_v56, %v10310_v12  ;;  %v10603_v59 = vmul.f32 %v21002_v22, %v10587_v39  ;;  %v10173_v52 = vpop.f32.mrf.mxu1 }
 0xcfd   : > { %v10193_v12 = vadd.f32 %v10173_v52, %v20977_v53 }
 0xcfe   : > { %v10560_v26 = vadd.f32 %v10533_v2, %v10438_v5  ;;  %v21015_v4 = vadd.f32 %v21007_v27, %v10603_v59  ;;  %v10543_v62 = vpop.f32.mrf.mxu0 }
 0xd00   : > { %v10632_v17 = vpack.c.bf16 %v21015_v4, %v21012_v10  ;;  %v10576_v50 = vadd.f32 %v20997_v61, %v10560_v26 }
 0xd01   : > { %v10285_v0 = vpop.f32.mrf.mxu2 }
 0xd02   : > { %v10311_v54 = vadd.f32 %v10285_v0, %v10189_v11  ;;  %v10588_v3 = vmax.f32 %v10576_v50, 0.0 }
 0xd04   : > { %v10439_v63 = vadd.f32 %v10413_v8, %v10311_v54  ;;  %v10604_v41 = vmul.f32 %v21002_v22, %v10588_v3  ;;  %v10176_v31 = vpop.f32.mrf.mxu1 }
 0xd05   : > { %v10194_v58 = vadd.f32 %v10176_v31, %v20981_v1 }
 0xd06   : > { %v10561_v44 = vadd.f32 %v10535_v13, %v10439_v63  ;;  %v21027_v16 = vadd.f32 %v21007_v27, %v10604_v41  ;;  %v10423_v13 = vpop.f32.mrf.mxu3  ;;  %v10545_v32 = vpop.f32.mrf.mxu0 }
 0xd08   : > { %v10577_v34 = vadd.f32 %v20997_v61, %v10561_v44 }
 0xd09   : > { %v10288_v37 = vpop.f32.mrf.mxu2 }
 0xd0a   : > { %v10589_v33 = vmax.f32 %v10577_v34, 0.0  ;;  %v10312_v49 = vadd.f32 %v10288_v37, %v20965_v45 }
 0xd0c   : > { %v10440_v55 = vadd.f32 %v10416_v60, %v10312_v49  ;;  %v10605_v9 = vmul.f32 %v21002_v22, %v10589_v33 }
 0xd0e   : > { %v10562_v14 = vadd.f32 %v10538_v25, %v10440_v55  ;;  %v21030_v20 = vadd.f32 %v21007_v27, %v10605_v9  ;;  %v10426_v25 = vpop.f32.mrf.mxu3  ;;  %v10548_v50 = vpop.f32.mrf.mxu0 }
 0xd10   : > { %v10633_v51 = vpack.c.bf16 %v21030_v20, %v21027_v16  ;;  %v10578_v56 = vadd.f32 %v20997_v61, %v10562_v14 }
 0xd11   : > { %v10290_v45 = vpop.f32.mrf.mxu2 }
 0xd12   : > { %v10313_v42 = vadd.f32 %v10290_v45, %v10191_v18  ;;  %v10590_v38 = vmax.f32 %v10578_v56, 0.0 }
 0xd14   : > { %v10441_v2 = vadd.f32 %v10418_v23, %v10313_v42  ;;  %v10606_v35 = vmul.f32 %v21002_v22, %v10590_v38  ;;  %v10178_v23 = vpop.f32.mrf.mxu1 }
 0xd15   : > { %v10195_v55 = vadd.f32 %v10178_v23, %v20985_v21 }
 0xd16   : > { %v10563_v7 = vadd.f32 %v10540_v28, %v10441_v2  ;;  %v21041_v24 = vadd.f32 %v21007_v27, %v10606_v35  ;;  %v10428_v41 = vpop.f32.mrf.mxu3  ;;  %v10550_v40 = vpop.f32.mrf.mxu0 }
 0xd18   : > { %v10579_v19 = vadd.f32 %v20997_v61, %v10563_v7 }
 0xd19   : > { %v10293_v29 = vpop.f32.mrf.mxu2 }
 0xd1a   : > { %v10591_v8 = vmax.f32 %v10579_v19, 0.0  ;;  %v10314_v36 = vadd.f32 %v10293_v29, %v10192_v46 }
 0xd1c   : > { %v10442_v47 = vadd.f32 %v10421_v30, %v10314_v36  ;;  %v10607_v48 = vmul.f32 %v21002_v22, %v10591_v8  ;;  %v10181_v45 = vpop.f32.mrf.mxu1 }
 0xd1d   : > { %v10196_v2 = vadd.f32 %v10181_v45, %v20989_v57 }
 0xd1e   : > { %v10564_v43 = vadd.f32 %v10543_v62, %v10442_v47  ;;  %v21044_v39 = vadd.f32 %v21007_v27, %v10607_v48  ;;  %v10431_v38 = vpop.f32.mrf.mxu3  ;;  %v10553_v46 = vpop.f32.mrf.mxu0 }
 0xd20   : > { %v10634_v6 = vpack.c.bf16 %v21044_v39, %v21041_v24  ;;  %v10580_v59 = vadd.f32 %v20997_v61, %v10564_v43 }
 0xd21   : > { %v10295_v5 = vpop.f32.mrf.mxu2 }
 0xd22   : > { %v10315_v60 = vadd.f32 %v10295_v5, %v10193_v12  ;;  %v10592_v11 = vmax.f32 %v10580_v59, 0.0 }
 0xd24   : > { %v10443_v26 = vadd.f32 %v10423_v13, %v10315_v60  ;;  %v10608_v44 = vmul.f32 %v21002_v22, %v10592_v11  ;;  %v10183_v47 = vpop.f32.mrf.mxu1 }
 0xd25   : > { %v10197_v48 = vadd.f32 %v10183_v47, %v20993_v15 }
 0xd26   : > { %v10565_v0 = vadd.f32 %v10545_v32, %v10443_v26  ;;  %v10624_v33 = vadd.f32 %v21007_v27, %v10608_v44  ;;  %v10433_v31 = vpop.f32.mrf.mxu3  ;;  %v10555_v59 = vpop.f32.mrf.mxu0 }
 0xd28   : > { %v10581_v54 = vadd.f32 %v20997_v61, %v10565_v0 }
 0xd29   : > { %v10298_v63 = vpop.f32.mrf.mxu2 }
 0xd2a   : > { %v10593_v3 = vmax.f32 %v10581_v54, 0.0  ;;  %v10316_v53 = vadd.f32 %v10298_v63, %v10194_v58 }
 0xd2c   : > { %v10444_v34 = vadd.f32 %v10426_v25, %v10316_v53  ;;  %v10609_v28 = vmul.f32 %v21002_v22, %v10593_v3 }
 0xd2e   : > { %v10566_v37 = vadd.f32 %v10548_v50, %v10444_v34  ;;  %v10625_v49 = vadd.f32 %v21007_v27, %v10609_v28 }
 0xd30   : > { %v10635_v9 = vpack.c.bf16 %v10625_v49, %v10624_v33  ;;  %v10582_v14 = vadd.f32 %v20997_v61, %v10566_v37 }
 0xd31   : > { %v10300_v1 = vpop.f32.mrf.mxu2 }
 0xd32   : > { %v10317_v18 = vadd.f32 %v10300_v1, %v10195_v55  ;;  %v10594_v56 = vmax.f32 %v10582_v14, 0.0 }
 0xd34   : > { %v10445_v30 = vadd.f32 %v10428_v41, %v10317_v18  ;;  %v10610_v21 = vmul.f32 %v21002_v22, %v10594_v56 }
 0xd36   : > { %v10567_v42 = vadd.f32 %v10550_v40, %v10445_v30  ;;  %v10626_v35 = vadd.f32 %v21007_v27, %v10610_v21 }
 0xd38   : > { %v10583_v62 = vadd.f32 %v20997_v61, %v10567_v42 }
 0xd39   : > { %v10303_v7 = vpop.f32.mrf.mxu2 }
 0xd3a   : > { %v10595_v52 = vmax.f32 %v10583_v62, 0.0  ;;  %v10318_v19 = vadd.f32 %v10303_v7, %v10196_v2 }
 0xd3c   : > { %v10446_v29 = vadd.f32 %v10431_v38, %v10318_v19  ;;  %v10611_v8 = vmul.f32 %v21002_v22, %v10595_v52 }
 0xd3e   : > { %v10568_v36 = vadd.f32 %v10553_v46, %v10446_v29  ;;  %v10627_v13 = vadd.f32 %v21007_v27, %v10611_v8 }
 0xd40   : > { %v10636_v32 = vpack.c.bf16 %v10627_v13, %v10626_v35  ;;  %v10584_v43 = vadd.f32 %v20997_v61, %v10568_v36 }
 0xd41   : > { %v10305_v57 = vpop.f32.mrf.mxu2 }
 0xd42   : > { %v10319_v12 = vadd.f32 %v10305_v57, %v10197_v48  ;;  %v10596_v60 = vmax.f32 %v10584_v43, 0.0 }
 0xd44   : > { %v10447_v5 = vadd.f32 %v10433_v31, %v10319_v12  ;;  %v10612_v11 = vmul.f32 %v21002_v22, %v10596_v60 }
 0xd46   : > { %v10569_v26 = vadd.f32 %v10555_v59, %v10447_v5  ;;  %v10628_v15 = vadd.f32 %v21007_v27, %v10612_v11 }
 0xd48   : > { %v10585_v25 = vadd.f32 %v20997_v61, %v10569_v26  ;;  %v14353_v61 = vld [vmem:[#allocation9] sm:$0xff] }
 0xd4a   : > { %v10597_v0 = vmax.f32 %v10585_v25, 0.0 }
 0xd4c   : > { %v10613_v50 = vmul.f32 %v21002_v22, %v10597_v0 }
 0xd4e   : > { %v10629_v54 = vadd.f32 %v21007_v27, %v10613_v50 }
 0xd50   : > { %v10637_v58 = vpack.c.bf16 %v10629_v54, %v10628_v15 }
 0xd52   : > { %10649 = vmatpush.bf16.msra.mxu1 %v10637_v58 }
 0xd56   : > { %10650 = vmatpush.bf16.msra.mxu1 %v10636_v32 }
 0xd5a   : > { %10651 = vmatpush.bf16.msra.mxu1 %v10635_v9 }
 0xd5e   : > { %10652 = vmatpush.bf16.msra.mxu1 %v10634_v6 }
 0xd62   : > { %10653 = vmatpush.bf16.msra.mxu1 %v10633_v51 }
 0xd66   : > { %10654 = vmatpush.bf16.msra.mxu1 %v10632_v17 }
 0xd69   : > { %13804 = vmatmul.msk.bf16.vlgmr.msra.gmra.mxu1 %vm10643_vm6, %v14353_v61 }
 0xde6   : > { %v10656_v22 = vpop.f32.mrf.mxu1 }
 0xdee   : > { %v10658_v27 = vpop.f32.mrf.mxu1 }
 0xdef   : > { %v14357_v24 = vpack.c.bf16 %v10658_v27, %v10656_v22 }
 0xdf1   : > { %14358 = vst [vmem:[%s596_s21] sm:$0xff] %v14357_v24  }
 0xdf2 PF: > { %s22243_s26 = sld [smem:[#allocation13_spill]] }
 0xdf8   : > { %s29_s21 = sadd.s32 1, %s22243_s26  }
 0xdf9   : > { %p26_p7 = scmp.ge.s32.totalorder %s29_s21, 4  }
 0xdfb   :  { %28 = sbr.rel (!%p26_p7) target bundleno = 8 (0x8), region = 183 }
 0xe00   :  { %10686 = vsyncpa [#allocation3], 1 }
 0xe01   :  { %10688 = vsyncpa [#allocation3 + $0x1], 1 }
 0xe02   :  { %10689 = vsyncpa [#allocation5], 1 }
 0xe03   :  { %10690 = vsyncpa [#allocation8], 1 }

</bundles_post_ra>
